<compile_context>
chip_gen: v6e
topology: v6e:2x2x1
jax: 0.10.0
libtpu: 0.0.40
codegen_flags: <defaults>
</compile_context>

<pallas_src>
import functools

import jax
import jax.numpy as jnp
from jax import lax
from jax.experimental import pallas as pl
from jax.experimental.pallas import tpu as pltpu


def _order_attention_kernel(qi_tbl, ki_tbl,                       # scalar prefetch (SMEM)
                            q_ref, kT_ref, v_ref, wout_ref, bout_ref,   # inputs
                            o_ref,                                       # output
                            m_scr, l_scr, acc_scr,                       # scratch
                            *, p_dtype):
    ti = pl.program_id(1)
    qi = qi_tbl[ti]          # q-tile index for this triangular step
    ki = ki_tbl[ti]          # kv-tile index for this triangular step

    heads, tq, _ = q_ref.shape
    tk = kT_ref.shape[-1]

    # ---- first kv tile of a q-tile group: reset online-softmax state ----
    @pl.when(ki == 0)
    def _init():
        m_scr[...] = jnp.full(m_scr.shape, -jnp.inf, dtype=m_scr.dtype)
        l_scr[...] = jnp.zeros(l_scr.shape, dtype=l_scr.dtype)
        acc_scr[...] = jnp.zeros(acc_scr.shape, dtype=acc_scr.dtype)

    def update(diagonal):
        # Scores: batched-over-heads (tq, Dh) @ (Dh, tk).  Q is pre-scaled and K is
        # pre-transposed in the wrapper, so both operands are lane-dense and no
        # per-step projection / head split / transpose is needed.
        s = jnp.einsum('hqd,hdk->hqk', q_ref[...], kT_ref[...],
                       preferred_element_type=jnp.float32)           # (H, tq, tk) f32

        if diagonal:
            # The order (lower-triangular) mask only exists on the diagonal tile.
            row = lax.broadcasted_iota(jnp.int32, (tq, tk), 0)
            col = lax.broadcasted_iota(jnp.int32, (tq, tk), 1)
            s = jnp.where((row >= col)[None, :, :], s, jnp.float32(-1e9))

        # Online softmax update (statistics in f32; exp in p_dtype).
        m_prev = m_scr[...]
        m_new = jnp.maximum(m_prev, jnp.max(s, axis=-1, keepdims=True))
        alpha = jnp.exp(m_prev - m_new)
        p = jnp.exp((s - m_new).astype(p_dtype))
        l_new = alpha * l_scr[...] + jnp.sum(p, axis=-1, keepdims=True,
                                             dtype=jnp.float32)
        acc_new = alpha * acc_scr[...] + jnp.einsum(
            'hqk,hkd->hqd', p, v_ref[...], preferred_element_type=jnp.float32)

        if diagonal:
            # The diagonal tile is the last kv tile of this q tile -> finalize here:
            # exact divide (runs once per q tile), per-head output projection
            # (absorbs the head merge into the matmul), + bias.
            out3 = (acc_new / l_new).astype(wout_ref.dtype)           # (H, tq, Dh)
            y = jnp.dot(out3[0], wout_ref[0], preferred_element_type=jnp.float32)
            for h in range(1, heads):
                y = y + jnp.dot(out3[h], wout_ref[h],
                                preferred_element_type=jnp.float32)
            y = y + bout_ref[...].astype(jnp.float32)                 # (tq, dim)
            o_ref[...] = y.astype(o_ref.dtype)
        else:
            m_scr[...] = m_new
            l_scr[...] = l_new
            acc_scr[...] = acc_new

    @pl.when(ki < qi)
    def _off_diagonal():        # fully-visible tile: no mask construction / select
        update(diagonal=False)

    @pl.when(ki == qi)
    def _diagonal():            # masked tile + fused finalize
        update(diagonal=True)


def order_attention(x, w_qkv, w_out, b_out, *, heads, dim_head, block=256):
    """Forward pass of OrderAttention.  x: (B, N, dim); weights in right-multiply
    form: w_qkv (dim, 3*inner), w_out (inner, dim), b_out (dim,)."""
    b, n, dim = x.shape
    inner = heads * dim_head
    assert w_qkv.shape == (dim, 3 * inner)
    assert w_out.shape == (inner, dim)
    assert b_out.shape == (dim,)

    t = min(block, n)
    assert n % t == 0, "sequence length must be a multiple of the tile size"
    nt = n // t
    n_tri = nt * (nt + 1) // 2

    # Triangular (q-tile, kv-tile) schedule: no dead above-diagonal grid steps.
    qi_list, ki_list = [], []
    for qidx in range(nt):
        for kidx in range(qidx + 1):
            qi_list.append(qidx)
            ki_list.append(kidx)
    qi_tbl = jnp.asarray(qi_list, jnp.int32)
    ki_tbl = jnp.asarray(ki_list, jnp.int32)

    # Hoisted QKV projection: single fused matmul, softmax scale folded into W_q
    # (weight-only op), done exactly once instead of O(nt^2/2) times in the kernel.
    scale = jnp.asarray(float(dim_head) ** -0.5, w_qkv.dtype)
    w_qkv_s = jnp.concatenate([w_qkv[:, :inner] * scale, w_qkv[:, inner:]], axis=-1)
    qkv = x @ w_qkv_s                                    # (B, N, 3*inner)
    q, k, v = jnp.split(qkv, 3, axis=-1)

    def head_major(u):                                   # (B, N, inner) -> (B, H, N, Dh)
        return u.reshape(b, n, heads, dim_head).transpose(0, 2, 1, 3)

    q_hm = head_major(q)                                 # (B, H, N, Dh)  pre-scaled Q
    v_hm = head_major(v)                                 # (B, H, N, Dh)
    kT_hm = head_major(k).transpose(0, 1, 3, 2)          # (B, H, Dh, N)  lane-dense K^T
    w_out_hm = w_out.reshape(heads, dim_head, dim)       # per-head output projection
    b_out2 = b_out.reshape(1, dim)

    # bf16 exp only when the model already runs in bf16 (v6e/v7x have bf16 EUP);
    # v5e / f32 inputs keep the softmax math in f32.
    p_dtype = jnp.bfloat16 if x.dtype == jnp.bfloat16 else jnp.float32
    kernel = functools.partial(_order_attention_kernel, p_dtype=p_dtype)

    grid_spec = pltpu.PrefetchScalarGridSpec(
        num_scalar_prefetch=2,
        grid=(b, n_tri),
        in_specs=[
            # Q tile: block index depends only on qi -> resident in VMEM across the
            # whole kv sweep of that q tile (no per-step re-DMA, no Q scratch).
            pl.BlockSpec((None, heads, t, dim_head),
                         lambda bi, ti, qi_t, ki_t: (bi, 0, qi_t[ti], 0)),
            # K^T tile (Dh, tk): lane-dense along the kv axis.
            pl.BlockSpec((None, heads, dim_head, t),
                         lambda bi, ti, qi_t, ki_t: (bi, 0, 0, ki_t[ti])),
            # V tile (tk, Dh).
            pl.BlockSpec((None, heads, t, dim_head),
                         lambda bi, ti, qi_t, ki_t: (bi, 0, ki_t[ti], 0)),
            # Output-projection weights / bias: constant block index -> VMEM-resident.
            pl.BlockSpec((heads, dim_head, dim),
                         lambda bi, ti, qi_t, ki_t: (0, 0, 0)),
            pl.BlockSpec((1, dim),
                         lambda bi, ti, qi_t, ki_t: (0, 0)),
        ],
        out_specs=pl.BlockSpec((None, t, dim),
                               lambda bi, ti, qi_t, ki_t: (bi, qi_t[ti], 0)),
        scratch_shapes=[
            pltpu.VMEM((heads, t, 1), jnp.float32),          # m: running max
            pltpu.VMEM((heads, t, 1), jnp.float32),          # l: running denominator
            pltpu.VMEM((heads, t, dim_head), jnp.float32),   # acc: running numerator
        ],
    )

    return pl.pallas_call(
        kernel,
        out_shape=jax.ShapeDtypeStruct((b, n, dim), x.dtype),
        grid_spec=grid_spec,
        compiler_params=pltpu.CompilerParams(
            dimension_semantics=("parallel", "arbitrary")),
    )(qi_tbl, ki_tbl, q_hm, kT_hm, v_hm, w_out_hm, b_out2)


def order_attention_ref(x, w_qkv, w_out, b_out, *, heads, dim_head):
    """Pure-JAX reference matching the PyTorch forward (Dropout p=0 is identity)."""
    b, n, dim = x.shape
    scale = float(dim_head) ** -0.5

    qkv = x.astype(jnp.float32) @ w_qkv.astype(jnp.float32)      # (B, N, 3*inner)
    q, k, v = jnp.split(qkv, 3, axis=-1)

    def split_heads(u):  # (B, N, inner) -> (B, H, N, Dh)
        return u.reshape(b, n, heads, dim_head).transpose(0, 2, 1, 3)

    q, k, v = map(split_heads, (q, k, v))
    dots = jnp.einsum('bhid,bhjd->bhij', q, k) * scale
    mask = jnp.tril(jnp.ones((n, n), jnp.float32))
    dots = jnp.where(mask[None, None] == 0, jnp.float32(-1e9), dots)
    attn = jax.nn.softmax(dots, axis=-1)
    out = jnp.einsum('bhij,bhjd->bhid', attn, v)
    out = out.transpose(0, 2, 1, 3).reshape(b, n, heads * dim_head)
    y = out @ w_out.astype(jnp.float32) + b_out.astype(jnp.float32)
    return y.astype(x.dtype)


if __name__ == "__main__":
    # Small shapes consistent with the module's forward: x is (b, n, dim).
    B, N, DIM = 2, 384, 32
    HEADS, DIM_HEAD = 4, 8
    INNER = HEADS * DIM_HEAD
    BLOCK = 128   # N/BLOCK = 3 tiles -> exercises the triangular schedule's init,
                  # unmasked off-diagonal, masked diagonal and fused-finalize paths.

    key = jax.random.PRNGKey(0)
    kx, kq, ko, kb = jax.random.split(key, 4)

    x = jax.random.normal(kx, (B, N, DIM), dtype=jnp.float32)
    # nn.Linear-style uniform init; to_qkv has bias=False, to_out Linear has a bias.
    w_qkv = jax.random.uniform(kq, (DIM, 3 * INNER), jnp.float32,
                               minval=-(DIM ** -0.5), maxval=DIM ** -0.5)
    w_out = jax.random.uniform(ko, (INNER, DIM), jnp.float32,
                               minval=-(INNER ** -0.5), maxval=INNER ** -0.5)
    b_out = jax.random.uniform(kb, (DIM,), jnp.float32,
                               minval=-(INNER ** -0.5), maxval=INNER ** -0.5)

    y = order_attention(x, w_qkv, w_out, b_out,
                        heads=HEADS, dim_head=DIM_HEAD, block=BLOCK)
    y = jax.block_until_ready(y)

    y_ref = order_attention_ref(x, w_qkv, w_out, b_out,
                                heads=HEADS, dim_head=DIM_HEAD)
    assert y.shape == (B, N, DIM)
    assert jnp.allclose(y, y_ref, atol=1e-3, rtol=1e-3), "mismatch vs reference"

    print("KERNEL_OK")
</pallas_src>

<mosaic_0001>
module attributes {stable_mosaic.version = 11 : i64} {
  func.func @_order_attention_kernel(%arg0: i32, %arg1: i32, %arg2: memref<6xi32, #tpu.memory_space<smem>>, %arg3: memref<6xi32, #tpu.memory_space<smem>>, %arg4: memref<1x4x128x8xf32, #tpu.memory_space<vmem>>, %arg5: memref<1x4x8x128xf32, #tpu.memory_space<vmem>>, %arg6: memref<1x4x128x8xf32, #tpu.memory_space<vmem>>, %arg7: memref<4x8x32xf32, #tpu.memory_space<vmem>>, %arg8: memref<1x32xf32, #tpu.memory_space<vmem>>, %arg9: memref<1x128x32xf32, #tpu.memory_space<vmem>>, %arg10: memref<4x128x1xf32, #tpu.memory_space<vmem>>, %arg11: memref<4x128x1xf32, #tpu.memory_space<vmem>>, %arg12: memref<4x128x8xf32, #tpu.memory_space<vmem>>) attributes {dimension_semantics = [#tpu.dimension_semantics<parallel>, #tpu.dimension_semantics<arbitrary>], iteration_bounds = array<i64: 2, 6>, scalar_prefetch = 2 : i64, scratch_operands = 3 : i64, tpu.core_type = #tpu.core_type<tc>, window_params = [{transform_indices = @transform_0, window_bounds = array<i64: 1, 4, 128, 8>}, {transform_indices = @transform_1, window_bounds = array<i64: 1, 4, 8, 128>}, {transform_indices = @transform_2, window_bounds = array<i64: 1, 4, 128, 8>}, {pipeline_mode = #tpu.pipeline_mode<synchronous>, transform_indices = @transform_3, window_bounds = array<i64: 4, 8, 32>}, {pipeline_mode = #tpu.pipeline_mode<synchronous>, transform_indices = @transform_4, window_bounds = array<i64: 1, 32>}, {transform_indices = @transform_5, window_bounds = array<i64: 1, 128, 32>}]} {
    %0 = arith.index_cast %arg1 : i32 to index
    %1 = memref.load %arg2[%0] : memref<6xi32, #tpu.memory_space<smem>>
    %2 = arith.index_cast %arg1 : i32 to index
    %3 = memref.load %arg3[%2] : memref<6xi32, #tpu.memory_space<smem>>
    %c0_i32 = arith.constant 0 : i32
    %4 = arith.cmpi eq, %3, %c0_i32 : i32
    %5 = arith.extui %4 : i1 to i32
    %c0_i32_0 = arith.constant 0 : i32
    %6 = arith.cmpi ne, %5, %c0_i32_0 : i32
    scf.if %6 {
      %cst = arith.constant 0xFF800000 : f32
      %13 = vector.broadcast %cst : f32 to vector<4x128x1xf32>
      %c0 = arith.constant 0 : index
      %c0_3 = arith.constant 0 : index
      %c0_4 = arith.constant 0 : index
      %14 = vector.load %arg10[%c0, %c0_3, %c0_4] : memref<4x128x1xf32, #tpu.memory_space<vmem>>, vector<4x128x1xf32>
      tpu.vector_store %arg10[%c0, %c0_3, %c0_4], %13 {strides = array<i32>} : memref<4x128x1xf32, #tpu.memory_space<vmem>>, vector<4x128x1xf32>,
      %cst_5 = arith.constant 0.000000e+00 : f32
      %15 = vector.broadcast %cst_5 : f32 to vector<4x128x1xf32>
      %c0_6 = arith.constant 0 : index
      %c0_7 = arith.constant 0 : index
      %c0_8 = arith.constant 0 : index
      %16 = vector.load %arg11[%c0_6, %c0_7, %c0_8] : memref<4x128x1xf32, #tpu.memory_space<vmem>>, vector<4x128x1xf32>
      tpu.vector_store %arg11[%c0_6, %c0_7, %c0_8], %15 {strides = array<i32>} : memref<4x128x1xf32, #tpu.memory_space<vmem>>, vector<4x128x1xf32>,
      %cst_9 = arith.constant 0.000000e+00 : f32
      %17 = vector.broadcast %cst_9 : f32 to vector<4x128x8xf32>
      %c0_10 = arith.constant 0 : index
      %c0_11 = arith.constant 0 : index
      %c0_12 = arith.constant 0 : index
      %18 = vector.load %arg12[%c0_10, %c0_11, %c0_12] : memref<4x128x8xf32, #tpu.memory_space<vmem>>, vector<4x128x8xf32>
      tpu.vector_store %arg12[%c0_10, %c0_11, %c0_12], %17 {strides = array<i32>} : memref<4x128x8xf32, #tpu.memory_space<vmem>>, vector<4x128x8xf32>,
    } else {
    }
    %7 = arith.cmpi slt, %3, %1 : i32
    %8 = arith.extui %7 : i1 to i32
    %c0_i32_1 = arith.constant 0 : i32
    %9 = arith.cmpi ne, %8, %c0_i32_1 : i32
    scf.if %9 {
      %c0 = arith.constant 0 : index
      %c0_3 = arith.constant 0 : index
      %c0_4 = arith.constant 0 : index
      %c0_5 = arith.constant 0 : index
      %13 = vector.load %arg4[%c0, %c0_3, %c0_4, %c0_5] : memref<1x4x128x8xf32, #tpu.memory_space<vmem>>, vector<1x4x128x8xf32>
      %14 = vector.shape_cast %13 : vector<1x4x128x8xf32> to vector<4x128x8xf32>
      %c0_6 = arith.constant 0 : index
      %c0_7 = arith.constant 0 : index
      %c0_8 = arith.constant 0 : index
      %c0_9 = arith.constant 0 : index
      %15 = vector.load %arg5[%c0_6, %c0_7, %c0_8, %c0_9] : memref<1x4x8x128xf32, #tpu.memory_space<vmem>>, vector<1x4x8x128xf32>
      %16 = vector.shape_cast %15 : vector<1x4x8x128xf32> to vector<4x8x128xf32>
      "tpu.trace_start"() <{level = 10 : i32, message = "hqd,hdk->hqk"}> : () -> ()
      %cst = arith.constant dense<0.000000e+00> : vector<4x128x128xf32>
      %17 = tpu.matmul %14, %16, %cst {dimension_numbers = #tpu.dot_dimension_numbers<[2], [1], [1], [2], [0, 0, 0, 1, 1, 2], [0], [0]>} : vector<4x128x8xf32>, vector<4x8x128xf32>, vector<4x128x128xf32> -> vector<4x128x128xf32>
      "tpu.trace_stop"() : () -> ()
      %c0_10 = arith.constant 0 : index
      %c0_11 = arith.constant 0 : index
      %c0_12 = arith.constant 0 : index
      %18 = vector.load %arg10[%c0_10, %c0_11, %c0_12] : memref<4x128x1xf32, #tpu.memory_space<vmem>>, vector<4x128x1xf32>
      %cst_13 = arith.constant dense<0xFF800000> : vector<4x128xf32>
      %19 = vector.multi_reduction <maximumf>, %17, %cst_13 [2] : vector<4x128x128xf32> to vector<4x128xf32>
      %20 = vector.shape_cast %19 : vector<4x128xf32> to vector<4x128x1xf32>
      %21 = arith.maximumf %18, %20 : vector<4x128x1xf32>
      %22 = arith.subf %18, %21 : vector<4x128x1xf32>
      %23 = math.exp %22 : vector<4x128x1xf32>
      %24 = vector.broadcast %21 : vector<4x128x1xf32> to vector<4x128x128xf32>
      %25 = arith.subf %17, %24 : vector<4x128x128xf32>
      %26 = math.exp %25 : vector<4x128x128xf32>
      %c0_14 = arith.constant 0 : index
      %c0_15 = arith.constant 0 : index
      %c0_16 = arith.constant 0 : index
      %27 = vector.load %arg11[%c0_14, %c0_15, %c0_16] : memref<4x128x1xf32, #tpu.memory_space<vmem>>, vector<4x128x1xf32>
      %28 = arith.mulf %23, %27 : vector<4x128x1xf32>
      %cst_17 = arith.constant dense<0.000000e+00> : vector<4x128xf32>
      %29 = vector.multi_reduction <add>, %26, %cst_17 [2] : vector<4x128x128xf32> to vector<4x128xf32>
      %30 = vector.shape_cast %29 : vector<4x128xf32> to vector<4x128x1xf32>
      %31 = arith.addf %28, %30 : vector<4x128x1xf32>
      %c0_18 = arith.constant 0 : index
      %c0_19 = arith.constant 0 : index
      %c0_20 = arith.constant 0 : index
      %32 = vector.load %arg12[%c0_18, %c0_19, %c0_20] : memref<4x128x8xf32, #tpu.memory_space<vmem>>, vector<4x128x8xf32>
      %33 = vector.broadcast %23 : vector<4x128x1xf32> to vector<4x128x8xf32>
      %34 = arith.mulf %33, %32 : vector<4x128x8xf32>
      %c0_21 = arith.constant 0 : index
      %c0_22 = arith.constant 0 : index
      %c0_23 = arith.constant 0 : index
      %c0_24 = arith.constant 0 : index
      %35 = vector.load %arg6[%c0_21, %c0_22, %c0_23, %c0_24] : memref<1x4x128x8xf32, #tpu.memory_space<vmem>>, vector<1x4x128x8xf32>
      %36 = vector.shape_cast %35 : vector<1x4x128x8xf32> to vector<4x128x8xf32>
      "tpu.trace_start"() <{level = 10 : i32, message = "hqk,hkd->hqd"}> : () -> ()
      %cst_25 = arith.constant dense<0.000000e+00> : vector<4x128x8xf32>
      %37 = tpu.matmul %26, %36, %cst_25 {dimension_numbers = #tpu.dot_dimension_numbers<[2], [1], [1], [2], [0, 0, 0, 1, 1, 2], [0], [0]>} : vector<4x128x128xf32>, vector<4x128x8xf32>, vector<4x128x8xf32> -> vector<4x128x8xf32>
      "tpu.trace_stop"() : () -> ()
      %38 = arith.addf %34, %37 : vector<4x128x8xf32>
      %c0_26 = arith.constant 0 : index
      %c0_27 = arith.constant 0 : index
      %c0_28 = arith.constant 0 : index
      %39 = vector.load %arg10[%c0_26, %c0_27, %c0_28] : memref<4x128x1xf32, #tpu.memory_space<vmem>>, vector<4x128x1xf32>
      tpu.vector_store %arg10[%c0_26, %c0_27, %c0_28], %21 {strides = array<i32>} : memref<4x128x1xf32, #tpu.memory_space<vmem>>, vector<4x128x1xf32>,
      %c0_29 = arith.constant 0 : index
      %c0_30 = arith.constant 0 : index
      %c0_31 = arith.constant 0 : index
      %40 = vector.load %arg11[%c0_29, %c0_30, %c0_31] : memref<4x128x1xf32, #tpu.memory_space<vmem>>, vector<4x128x1xf32>
      tpu.vector_store %arg11[%c0_29, %c0_30, %c0_31], %31 {strides = array<i32>} : memref<4x128x1xf32, #tpu.memory_space<vmem>>, vector<4x128x1xf32>,
      %c0_32 = arith.constant 0 : index
      %c0_33 = arith.constant 0 : index
      %c0_34 = arith.constant 0 : index
      %41 = vector.load %arg12[%c0_32, %c0_33, %c0_34] : memref<4x128x8xf32, #tpu.memory_space<vmem>>, vector<4x128x8xf32>
      tpu.vector_store %arg12[%c0_32, %c0_33, %c0_34], %38 {strides = array<i32>} : memref<4x128x8xf32, #tpu.memory_space<vmem>>, vector<4x128x8xf32>,
    } else {
    }
    %10 = arith.cmpi eq, %3, %1 : i32
    %11 = arith.extui %10 : i1 to i32
    %c0_i32_2 = arith.constant 0 : i32
    %12 = arith.cmpi ne, %11, %c0_i32_2 : i32
    scf.if %12 {
      %c0 = arith.constant 0 : index
      %c0_3 = arith.constant 0 : index
      %c0_4 = arith.constant 0 : index
      %c0_5 = arith.constant 0 : index
      %13 = vector.load %arg4[%c0, %c0_3, %c0_4, %c0_5] : memref<1x4x128x8xf32, #tpu.memory_space<vmem>>, vector<1x4x128x8xf32>
      %14 = vector.shape_cast %13 : vector<1x4x128x8xf32> to vector<4x128x8xf32>
      %c0_6 = arith.constant 0 : index
      %c0_7 = arith.constant 0 : index
      %c0_8 = arith.constant 0 : index
      %c0_9 = arith.constant 0 : index
      %15 = vector.load %arg5[%c0_6, %c0_7, %c0_8, %c0_9] : memref<1x4x8x128xf32, #tpu.memory_space<vmem>>, vector<1x4x8x128xf32>
      %16 = vector.shape_cast %15 : vector<1x4x8x128xf32> to vector<4x8x128xf32>
      "tpu.trace_start"() <{level = 10 : i32, message = "hqd,hdk->hqk"}> : () -> ()
      %cst = arith.constant dense<0.000000e+00> : vector<4x128x128xf32>
      %17 = tpu.matmul %14, %16, %cst {dimension_numbers = #tpu.dot_dimension_numbers<[2], [1], [1], [2], [0, 0, 0, 1, 1, 2], [0], [0]>} : vector<4x128x8xf32>, vector<4x8x128xf32>, vector<4x128x128xf32> -> vector<4x128x128xf32>
      "tpu.trace_stop"() : () -> ()
      %18 = tpu.iota {dimensions = array<i32: 0>} : vector<128x128xi32>
      %19 = tpu.iota {dimensions = array<i32: 1>} : vector<128x128xi32>
      %20 = arith.cmpi sge, %18, %19 : vector<128x128xi32>
      %21 = vector.shape_cast %20 : vector<128x128xi1> to vector<1x128x128xi1>
      %cst_10 = arith.constant -1.000000e+09 : f32
      %22 = vector.shape_cast %21 : vector<1x128x128xi1> to vector<1x128x128xi1>
      %23 = vector.broadcast %22 : vector<1x128x128xi1> to vector<4x128x128xi1>
      %24 = vector.broadcast %cst_10 : f32 to vector<4x128x128xf32>
      %25 = arith.select %23, %17, %24 : vector<4x128x128xi1>, vector<4x128x128xf32>
      %c0_11 = arith.constant 0 : index
      %c0_12 = arith.constant 0 : index
      %c0_13 = arith.constant 0 : index
      %26 = vector.load %arg10[%c0_11, %c0_12, %c0_13] : memref<4x128x1xf32, #tpu.memory_space<vmem>>, vector<4x128x1xf32>
      %cst_14 = arith.constant dense<0xFF800000> : vector<4x128xf32>
      %27 = vector.multi_reduction <maximumf>, %25, %cst_14 [2] : vector<4x128x128xf32> to vector<4x128xf32>
      %28 = vector.shape_cast %27 : vector<4x128xf32> to vector<4x128x1xf32>
      %29 = arith.maximumf %26, %28 : vector<4x128x1xf32>
      %30 = arith.subf %26, %29 : vector<4x128x1xf32>
      %31 = math.exp %30 : vector<4x128x1xf32>
      %32 = vector.broadcast %29 : vector<4x128x1xf32> to vector<4x128x128xf32>
      %33 = arith.subf %25, %32 : vector<4x128x128xf32>
      %34 = math.exp %33 : vector<4x128x128xf32>
      %c0_15 = arith.constant 0 : index
      %c0_16 = arith.constant 0 : index
      %c0_17 = arith.constant 0 : index
      %35 = vector.load %arg11[%c0_15, %c0_16, %c0_17] : memref<4x128x1xf32, #tpu.memory_space<vmem>>, vector<4x128x1xf32>
      %36 = arith.mulf %31, %35 : vector<4x128x1xf32>
      %cst_18 = arith.constant dense<0.000000e+00> : vector<4x128xf32>
      %37 = vector.multi_reduction <add>, %34, %cst_18 [2] : vector<4x128x128xf32> to vector<4x128xf32>
      %38 = vector.shape_cast %37 : vector<4x128xf32> to vector<4x128x1xf32>
      %39 = arith.addf %36, %38 : vector<4x128x1xf32>
      %c0_19 = arith.constant 0 : index
      %c0_20 = arith.constant 0 : index
      %c0_21 = arith.constant 0 : index
      %40 = vector.load %arg12[%c0_19, %c0_20, %c0_21] : memref<4x128x8xf32, #tpu.memory_space<vmem>>, vector<4x128x8xf32>
      %41 = vector.broadcast %31 : vector<4x128x1xf32> to vector<4x128x8xf32>
      %42 = arith.mulf %41, %40 : vector<4x128x8xf32>
      %c0_22 = arith.constant 0 : index
      %c0_23 = arith.constant 0 : index
      %c0_24 = arith.constant 0 : index
      %c0_25 = arith.constant 0 : index
      %43 = vector.load %arg6[%c0_22, %c0_23, %c0_24, %c0_25] : memref<1x4x128x8xf32, #tpu.memory_space<vmem>>, vector<1x4x128x8xf32>
      %44 = vector.shape_cast %43 : vector<1x4x128x8xf32> to vector<4x128x8xf32>
      "tpu.trace_start"() <{level = 10 : i32, message = "hqk,hkd->hqd"}> : () -> ()
      %cst_26 = arith.constant dense<0.000000e+00> : vector<4x128x8xf32>
      %45 = tpu.matmul %34, %44, %cst_26 {dimension_numbers = #tpu.dot_dimension_numbers<[2], [1], [1], [2], [0, 0, 0, 1, 1, 2], [0], [0]>} : vector<4x128x128xf32>, vector<4x128x8xf32>, vector<4x128x8xf32> -> vector<4x128x8xf32>
      "tpu.trace_stop"() : () -> ()
      %46 = arith.addf %42, %45 : vector<4x128x8xf32>
      %47 = vector.broadcast %39 : vector<4x128x1xf32> to vector<4x128x8xf32>
      %48 = arith.divf %46, %47 : vector<4x128x8xf32>
      %49 = vector.extract_strided_slice %48 {offsets = [0, 0, 0], sizes = [1, 128, 8], strides = [1, 1, 1]} : vector<4x128x8xf32> to vector<1x128x8xf32>
      %50 = vector.shape_cast %49 : vector<1x128x8xf32> to vector<128x8xf32>
      %c0_27 = arith.constant 0 : index
      %c0_28 = arith.constant 0 : index
      %c0_29 = arith.constant 0 : index
      %51 = vector.load %arg7[%c0_27, %c0_28, %c0_29] : memref<4x8x32xf32, #tpu.memory_space<vmem>>, vector<1x8x32xf32>
      %52 = vector.shape_cast %51 : vector<1x8x32xf32> to vector<8x32xf32>
      %cst_30 = arith.constant dense<0.000000e+00> : vector<128x32xf32>
      %53 = tpu.matmul %50, %52, %cst_30 {dimension_numbers = #tpu.dot_dimension_numbers<[1], [0], [0], [1], [0, 0, 1, 1], [], []>} : vector<128x8xf32>, vector<8x32xf32>, vector<128x32xf32> -> vector<128x32xf32>
      %54 = vector.extract_strided_slice %48 {offsets = [1, 0, 0], sizes = [1, 128, 8], strides = [1, 1, 1]} : vector<4x128x8xf32> to vector<1x128x8xf32>
      %55 = vector.shape_cast %54 : vector<1x128x8xf32> to vector<128x8xf32>
      %c1 = arith.constant 1 : index
      %c0_31 = arith.constant 0 : index
      %c0_32 = arith.constant 0 : index
      %56 = vector.load %arg7[%c1, %c0_31, %c0_32] : memref<4x8x32xf32, #tpu.memory_space<vmem>>, vector<1x8x32xf32>
      %57 = vector.shape_cast %56 : vector<1x8x32xf32> to vector<8x32xf32>
      %cst_33 = arith.constant dense<0.000000e+00> : vector<128x32xf32>
      %58 = tpu.matmul %55, %57, %cst_33 {dimension_numbers = #tpu.dot_dimension_numbers<[1], [0], [0], [1], [0, 0, 1, 1], [], []>} : vector<128x8xf32>, vector<8x32xf32>, vector<128x32xf32> -> vector<128x32xf32>
      %59 = arith.addf %53, %58 : vector<128x32xf32>
      %60 = vector.extract_strided_slice %48 {offsets = [2, 0, 0], sizes = [1, 128, 8], strides = [1, 1, 1]} : vector<4x128x8xf32> to vector<1x128x8xf32>
      %61 = vector.shape_cast %60 : vector<1x128x8xf32> to vector<128x8xf32>
      %c2 = arith.constant 2 : index
      %c0_34 = arith.constant 0 : index
      %c0_35 = arith.constant 0 : index
      %62 = vector.load %arg7[%c2, %c0_34, %c0_35] : memref<4x8x32xf32, #tpu.memory_space<vmem>>, vector<1x8x32xf32>
      %63 = vector.shape_cast %62 : vector<1x8x32xf32> to vector<8x32xf32>
      %cst_36 = arith.constant dense<0.000000e+00> : vector<128x32xf32>
      %64 = tpu.matmul %61, %63, %cst_36 {dimension_numbers = #tpu.dot_dimension_numbers<[1], [0], [0], [1], [0, 0, 1, 1], [], []>} : vector<128x8xf32>, vector<8x32xf32>, vector<128x32xf32> -> vector<128x32xf32>
      %65 = arith.addf %59, %64 : vector<128x32xf32>
      %66 = vector.extract_strided_slice %48 {offsets = [3, 0, 0], sizes = [1, 128, 8], strides = [1, 1, 1]} : vector<4x128x8xf32> to vector<1x128x8xf32>
      %67 = vector.shape_cast %66 : vector<1x128x8xf32> to vector<128x8xf32>
      %c3 = arith.constant 3 : index
      %c0_37 = arith.constant 0 : index
      %c0_38 = arith.constant 0 : index
      %68 = vector.load %arg7[%c3, %c0_37, %c0_38] : memref<4x8x32xf32, #tpu.memory_space<vmem>>, vector<1x8x32xf32>
      %69 = vector.shape_cast %68 : vector<1x8x32xf32> to vector<8x32xf32>
      %cst_39 = arith.constant dense<0.000000e+00> : vector<128x32xf32>
      %70 = tpu.matmul %67, %69, %cst_39 {dimension_numbers = #tpu.dot_dimension_numbers<[1], [0], [0], [1], [0, 0, 1, 1], [], []>} : vector<128x8xf32>, vector<8x32xf32>, vector<128x32xf32> -> vector<128x32xf32>
      %71 = arith.addf %65, %70 : vector<128x32xf32>
      %c0_40 = arith.constant 0 : index
      %c0_41 = arith.constant 0 : index
      %72 = vector.load %arg8[%c0_40, %c0_41] : memref<1x32xf32, #tpu.memory_space<vmem>>, vector<1x32xf32>
      %73 = vector.broadcast %72 : vector<1x32xf32> to vector<128x32xf32>
      %74 = arith.addf %71, %73 : vector<128x32xf32>
      %c0_42 = arith.constant 0 : index
      %c0_43 = arith.constant 0 : index
      %c0_44 = arith.constant 0 : index
      %75 = vector.load %arg9[%c0_42, %c0_43, %c0_44] : memref<1x128x32xf32, #tpu.memory_space<vmem>>, vector<1x128x32xf32>
      %76 = vector.shape_cast %75 : vector<1x128x32xf32> to vector<128x32xf32>
      %77 = vector.shape_cast %74 : vector<128x32xf32> to vector<1x128x32xf32>
      tpu.vector_store %arg9[%c0_42, %c0_43, %c0_44], %77 {strides = array<i32>} : memref<1x128x32xf32, #tpu.memory_space<vmem>>, vector<1x128x32xf32>,
    } else {
    }
    return
  }
  func.func @transform_0(%arg0: i32, %arg1: i32, %arg2: memref<6xi32, #tpu.memory_space<smem>>, %arg3: memref<6xi32, #tpu.memory_space<smem>>) -> (i32, i32, i32, i32) {
    %0 = arith.index_cast %arg1 : i32 to index
    %1 = memref.load %arg2[%0] : memref<6xi32, #tpu.memory_space<smem>>
    %c0_i32 = arith.constant 0 : i32
    %c0_i32_0 = arith.constant 0 : i32
    %c0_i32_1 = arith.constant 0 : i32
    return %arg0, %c0_i32, %1, %c0_i32_0 : i32, i32, i32, i32
  }
  func.func @transform_1(%arg0: i32, %arg1: i32, %arg2: memref<6xi32, #tpu.memory_space<smem>>, %arg3: memref<6xi32, #tpu.memory_space<smem>>) -> (i32, i32, i32, i32) {
    %0 = arith.index_cast %arg1 : i32 to index
    %1 = memref.load %arg3[%0] : memref<6xi32, #tpu.memory_space<smem>>
    %c0_i32 = arith.constant 0 : i32
    %c0_i32_0 = arith.constant 0 : i32
    %c0_i32_1 = arith.constant 0 : i32
    return %arg0, %c0_i32, %c0_i32_0, %1 : i32, i32, i32, i32
  }
  func.func @transform_2(%arg0: i32, %arg1: i32, %arg2: memref<6xi32, #tpu.memory_space<smem>>, %arg3: memref<6xi32, #tpu.memory_space<smem>>) -> (i32, i32, i32, i32) {
    %0 = arith.index_cast %arg1 : i32 to index
    %1 = memref.load %arg3[%0] : memref<6xi32, #tpu.memory_space<smem>>
    %c0_i32 = arith.constant 0 : i32
    %c0_i32_0 = arith.constant 0 : i32
    %c0_i32_1 = arith.constant 0 : i32
    return %arg0, %c0_i32, %1, %c0_i32_0 : i32, i32, i32, i32
  }
  func.func @transform_3(%arg0: i32, %arg1: i32, %arg2: memref<6xi32, #tpu.memory_space<smem>>, %arg3: memref<6xi32, #tpu.memory_space<smem>>) -> (i32, i32, i32) {
    %c0_i32 = arith.constant 0 : i32
    %c0_i32_0 = arith.constant 0 : i32
    %c0_i32_1 = arith.constant 0 : i32
    %c0_i32_2 = arith.constant 0 : i32
    return %c0_i32, %c0_i32_0, %c0_i32_1 : i32, i32, i32
  }
  func.func @transform_4(%arg0: i32, %arg1: i32, %arg2: memref<6xi32, #tpu.memory_space<smem>>, %arg3: memref<6xi32, #tpu.memory_space<smem>>) -> (i32, i32) {
    %c0_i32 = arith.constant 0 : i32
    %c0_i32_0 = arith.constant 0 : i32
    %c0_i32_1 = arith.constant 0 : i32
    return %c0_i32, %c0_i32_0 : i32, i32
  }
  func.func @transform_5(%arg0: i32, %arg1: i32, %arg2: memref<6xi32, #tpu.memory_space<smem>>, %arg3: memref<6xi32, #tpu.memory_space<smem>>) -> (i32, i32, i32) {
    %0 = arith.index_cast %arg1 : i32 to index
    %1 = memref.load %arg2[%0] : memref<6xi32, #tpu.memory_space<smem>>
    %c0_i32 = arith.constant 0 : i32
    %c0_i32_0 = arith.constant 0 : i32
    return %arg0, %1, %c0_i32 : i32, i32, i32
  }
}

</mosaic_0001>

<bundles_post_ra>
// kernel: tpu_custom_call.1
= control target key start
LH: loop header
LB: loop body
LE: loop exit
PB: predicated region body
PF: predicated region fallthrough
CT: control target
= control target key end

     0   :  { %s16846_s0 = inlined_call_operand.vmem [shape: s32[6], index: 0, kind: input, shape index: {}]   ;;  %s16847_s2 = inlined_call_operand.vmem [shape: f32[2,4,384,8], index: 2, kind: input, shape index: {}]   ;;  %s16848_s3 = inlined_call_operand.vmem [shape: f32[2,4,8,384], index: 3, kind: input, shape index: {}]   ;;  %s16849_s4 = inlined_call_operand.vmem [shape: f32[2,4,384,8], index: 4, kind: input, shape index: {}]   ;;  %s16850_s5 = inlined_call_operand.vmem [shape: f32[4,8,32], index: 5, kind: input, shape index: {}]   ;;  %s16851_s6 = inlined_call_operand.vmem [shape: f32[1,32], index: 6, kind: input, shape index: {}]   ;;  %s16852_s7 = inlined_call_operand.vmem [shape: f32[2,384,32], index: 7, kind: output, shape index: {}]   ;;  %s16853_s1 = inlined_call_operand.vmem [shape: s32[6], index: 1, kind: input, shape index: {}]  }
   0x1   :  { %17119 = sst [smem:[#allocation254_spill]] %s16847_s2  ;;  %s12_s26 = sshll.u32 %s16846_s0, 4  ;;  %s13_s26 = int_to_ptr.vmem [resolvable:$true] %s12_s26 }
   0x2   :  { %17120 = sst [smem:[#allocation255_spill]] %s16850_s5  ;;  %s16_s29 = sshll.u32 %s16853_s1, 4  ;;  %s17_s29 = int_to_ptr.vmem [resolvable:$true] %s16_s29 }
   0x3   :  { %17121 = sst [smem:[#allocation256_spill]] %s16851_s6  ;;  %s11670_s30 = scalar_lea.vmem %s13_s26, 16 }
   0x4   :  { %17122 = sst [smem:[#allocation257_spill]] %s16852_s7  ;;  %p11671_p0 = scmp.ne.s32.totalorder %s13_s26, %s11670_s30 }
   0x5   :  { %p11675_p1 = scmp.lt.s32.totalorder %s13_s26, %s13_s26  ;;  %p11676_p2 = scmp.lt.s32.totalorder %s11670_s30, %s11670_s30 }
   0x7   :  { %p11677_p3 = por %p11676_p2, %p11675_p1 }
   0x9   :  { %p11678_p4 = pnand %p11677_p3, %p11671_p0 }
   0xb   :  { %11681 = shalt.err (!%p11678_p4)  }
   0xc   :  { %s11784_s8 = smov [#allocation6]   ;;  %s11682_s9 = scalar_lea.vmem %s17_s29, 16 }
   0xd   :  { %15 = dma.vmem_to_smem %s13_s26, 16, %s11784_s8, [#allocation5] }
   0xe   :  { %p11683_p5 = scmp.ne.s32.totalorder %s17_s29, %s11682_s9  ;;  %p11687_p6 = scmp.lt.s32.totalorder %s17_s29, %s17_s29 }
   0xf   :  { %p11688_p7 = scmp.lt.s32.totalorder %s11682_s9, %s11682_s9 }
  0x11   :  { %p11689_p8 = por %p11688_p7, %p11687_p6 }
  0x13   :  { %p11690_p9 = pnand %p11689_p8, %p11683_p5 }
  0x15   :  { %11693 = shalt.err (!%p11690_p9)  }
  0x16   :  { %s11785_s0 = smov [#allocation7]  }
  0x17   :  { %19 = dma.vmem_to_smem %s17_s29, 16, %s11785_s0, [#allocation5] }
  0x18   :  { %11738 = dma.done.wait [#allocation5], 32 }
  0x19   :  { %11739 = vsyncadd [#allocation5], 4294967264 }
  0x1a   :  { %21 = sfence }
  0x1b   :  { %s11836_s1 = smov 0   ;;  %s11838_s10 = smov 0  }
  0x1c   :  { %s11840_s11 = smov 0   ;;  %s11842_s12 = smov 0  }
  0x1d   :  { %s11844_s13 = smov 0   ;;  %s11846_s14 = smov 0  }
  0x1e   :  { %s11848_s15 = smov 0   ;;  %s11850_s16 = smov 0  }
  0x1f   :  { %s11852_s17 = smov 0   ;;  %s11854_s18 = smov 0  }
  0x20   :  { %s11856_s19 = smov 0  }
  0x21 LB: > { %17123 = sst [smem:[#allocation12_spill]] %s11750_s11  ;;  %s36_s20 = sadd.s32 1, %s11774_s17  ;;  %s11782_s19 = sphi %s11856_s19, %s27_s19   ;;  %s11778_s18 = sphi %s11854_s18, %s17854_s18   ;;  %s11774_s17 = sphi %s11852_s17, %s17853_s17   ;;  %s11770_s16 = sphi %s11850_s16, %s17852_s16   ;;  %s11766_s15 = sphi %s11848_s15, %s17851_s15   ;;  %s11762_s14 = sphi %s11846_s14, %s17850_s14   ;;  %s11758_s13 = sphi %s11844_s13, %s17849_s13   ;;  %s11754_s12 = sphi %s11842_s12, %s17848_s12   ;;  %s11750_s11 = sphi %s11840_s11, %s17847_s11   ;;  %s11746_s10 = sphi %s11838_s10, %s17846_s10   ;;  %s11742_s1 = sphi %s11836_s1, %s17845_s1  }
  0x22   : > { %17124 = sst [smem:[#allocation13_spill]] %s11766_s15  ;;  %p37_p10 = scmp.ge.s32.totalorder %s36_s20, 6 }
  0x23   : > { %17125 = sst [smem:[#allocation14_spill]] %s11770_s16  ;;  %s39_s21 = sadd.s32 1, %s11778_s18 }
  0x24   : > { %s43_s22 = sld [smem:[#allocation6 + %s11774_s17]]  ;;  %p57_p11 = scmp.ne.s32.totalorder %s11762_s14, %s11758_s13 }
  0x25   : > { %s17856_s20 = smov (%p37_p10, %s36_s20), 0  ;;  %s17858_s21 = smov (!%p37_p10, %s39_s21), %s11778_s18 }
  0x26   : > { %s44_s23 = sld [smem:[#allocation6 + %s17856_s20]]  ;;  %p58_p12 = scmp.eq.s32.totalorder %s11782_s19, 0 }
  0x27   : > { %p41_p13 = scmp.ge.s32.totalorder %s17858_s21, 2  ;;  %s73_s24 = sld [smem:[#allocation7 + %s11774_s17]] }
  0x28   : > { %p11904_p0 = por %p58_p12, %p57_p11  ;;  %s74_s26 = sld [smem:[#allocation7 + %s17856_s20]] }
  0x29   : > { %s17860_s21 = smov (%p41_p13, %s17858_s21), 0  ;;  %s50_s27 = sadd.s32 1, %s11762_s14 }
  0x2a   : > { %17127 = sst [smem:[#allocation15_spill]] %s17860_s21  ;;  %p87_p1 = scmp.ne.s32.totalorder %s11754_s12, %s11750_s11 }
  0x2b   : > { %s45_s28 = ssub.s32 %s11778_s18, %s17860_s21  ;;  %s103_s29 = sld [smem:[#allocation7 + %s11774_s17]] }
  0x2c   : > { %s46_s30 = ssub.s32 %s43_s22, %s44_s23  ;;  %p11919_p2 = por %p87_p1, %p58_p12 }
  0x2d   : > { %s47_s9 = sor.u32 %s46_s30, %s45_s28  ;;  %s104_s0 = sld [smem:[#allocation7 + %s17856_s20]] }
  0x2e   : > { %p48_p3 = scmp.eq.s32.totalorder %s47_s9, 0  ;;  %s76_s6 = ssub.s32 %s73_s24, %s74_s26 }
  0x2f   : > { %s77_s5 = sor.u32 %s76_s6, %s45_s28  ;;  %s80_s7 = sadd.s32 1, %s11754_s12 }
  0x30   : > { %s11926_s16 = scalar_select %p48_p3, %s11762_s14, %s50_s27  }
  0x31   : > { %p78_p4 = scmp.eq.s32.totalorder %s77_s5, 0  ;;  %p117_p5 = scmp.ne.s32.totalorder %s11746_s10, %s11742_s1 }
  0x32   : > { %s110_s11 = sadd.s32 1, %s11746_s10  ;;  %p9479_p8 = scmp.ge.s32.totalorder %s11782_s19, 12 }
  0x33   : > { %s11931_s21 = scalar_select %p78_p4, %s11754_s12, %s80_s7  }
  0x34   : > { %s106_s15 = ssub.s32 %s103_s29, %s104_s0  ;;  %p11935_p6 = por %p117_p5, %p58_p12 }
  0x35   : > { %s107_s23 = sor.u32 %s106_s15, %s45_s28  ;;  %221 = sbr.rel (%p9479_p8) target bundleno = 156 (0x9c), region = 24 }
  0x36   : > { %p108_p7 = scmp.eq.s32.totalorder %s107_s23, 0 }
  0x38   : > { %s11941_s30 = scalar_select %p108_p7, %s11746_s10, %s110_s11  }
  0x3a   : > { %224 = sbr.rel (!%p11904_p0) target bundleno = 101 (0x65), region = 28  ;;  %s229_s5 = sld [smem:[#allocation6 + %s11774_s17]] (%p11904_p0) }
  0x3b   : > { %s226_s6 = sand.u32 (%p11904_p0), 1, %s11762_s14   ;;  %s10915_s7 = smul.u32 (%p11904_p0), 192, %s11778_s18 }
  0x3c   : > { %s9480_s24 = sshll.u32 (%p11904_p0), %s226_s6, 9  ;;  %s17130_s2 = sld [smem:[#allocation254_spill]] (%p11904_p0) }
  0x3d   : > { %s11957_s25 = scalar_lea.vmem (%p11904_p0), [#allocation8], %s9480_s24 }
  0x40   : > { %s9481_s26 = sshll.u32 %s229_s5, 4 }
  0x41   : > { %s232_s27 = sadd.s32 %s10915_s7, %s9481_s26 }
  0x42   : > { %s9482_s15 = sshll.u32 %s232_s27, 3 }
  0x43   : > { %s11952_s11 = scalar_lea.vmem %s17130_s2, %s9482_s15 }
  0x44   : > { %v389_v0 = vld [vmem:[%s11952_s11] sm:$0xff]  ;;  %v391_v1 = vld [vmem:[%s11952_s11 + $0x8] sm:$0xff]  ;;  %v393_v2 = vld [vmem:[%s11952_s11 + $0x10] sm:$0xff] }
  0x45   : > { %390 = vst [vmem:[%s11957_s25] sm:$0xff] %v389_v0  ;;  %392 = vst [vmem:[%s11957_s25 + $0x8] sm:$0xff] %v391_v1  ;;  %v395_v3 = vld [vmem:[%s11952_s11 + $0x18] sm:$0xff]  ;;  %v397_v4 = vld [vmem:[%s11952_s11 + $0x20] sm:$0xff] }
  0x46   : > { %394 = vst [vmem:[%s11957_s25 + $0x10] sm:$0xff] %v393_v2  ;;  %v399_v5 = vld [vmem:[%s11952_s11 + $0x28] sm:$0xff]  ;;  %396 = vst [vmem:[%s11957_s25 + $0x18] sm:$0xff] %v395_v3  ;;  %v401_v6 = vld [vmem:[%s11952_s11 + $0x30] sm:$0xff] }
  0x47   : > { %398 = vst [vmem:[%s11957_s25 + $0x20] sm:$0xff] %v397_v4  ;;  %400 = vst [vmem:[%s11957_s25 + $0x28] sm:$0xff] %v399_v5  ;;  %v403_v7 = vld [vmem:[%s11952_s11 + $0x38] sm:$0xff]  ;;  %v405_v8 = vld [vmem:[%s11952_s11 + $0x40] sm:$0xff] }
  0x48   : > { %402 = vst [vmem:[%s11957_s25 + $0x30] sm:$0xff] %v401_v6  ;;  %404 = vst [vmem:[%s11957_s25 + $0x38] sm:$0xff] %v403_v7  ;;  %v407_v9 = vld [vmem:[%s11952_s11 + $0x48] sm:$0xff]  ;;  %v409_v10 = vld [vmem:[%s11952_s11 + $0x50] sm:$0xff] }
  0x49   : > { %406 = vst [vmem:[%s11957_s25 + $0x40] sm:$0xff] %v405_v8  ;;  %v411_v11 = vld [vmem:[%s11952_s11 + $0x58] sm:$0xff]  ;;  %408 = vst [vmem:[%s11957_s25 + $0x48] sm:$0xff] %v407_v9  ;;  %v413_v12 = vld [vmem:[%s11952_s11 + $0x60] sm:$0xff] }
  0x4a   : > { %410 = vst [vmem:[%s11957_s25 + $0x50] sm:$0xff] %v409_v10  ;;  %412 = vst [vmem:[%s11957_s25 + $0x58] sm:$0xff] %v411_v11  ;;  %v415_v13 = vld [vmem:[%s11952_s11 + $0x68] sm:$0xff]  ;;  %v417_v14 = vld [vmem:[%s11952_s11 + $0x70] sm:$0xff] }
  0x4b   : > { %414 = vst [vmem:[%s11957_s25 + $0x60] sm:$0xff] %v413_v12  ;;  %416 = vst [vmem:[%s11957_s25 + $0x68] sm:$0xff] %v415_v13  ;;  %v419_v15 = vld [vmem:[%s11952_s11 + $0x78] sm:$0xff]  ;;  %v421_v16 = vld [vmem:[%s11952_s11 + $0x180] sm:$0xff] }
  0x4c   : > { %418 = vst [vmem:[%s11957_s25 + $0x70] sm:$0xff] %v417_v14  ;;  %v423_v17 = vld [vmem:[%s11952_s11 + $0x188] sm:$0xff]  ;;  %420 = vst [vmem:[%s11957_s25 + $0x78] sm:$0xff] %v419_v15  ;;  %v425_v18 = vld [vmem:[%s11952_s11 + $0x190] sm:$0xff] }
  0x4d   : > { %422 = vst [vmem:[%s11957_s25 + $0x80] sm:$0xff] %v421_v16  ;;  %424 = vst [vmem:[%s11957_s25 + $0x88] sm:$0xff] %v423_v17  ;;  %v427_v19 = vld [vmem:[%s11952_s11 + $0x198] sm:$0xff]  ;;  %v429_v20 = vld [vmem:[%s11952_s11 + $0x1a0] sm:$0xff] }
  0x4e   : > { %426 = vst [vmem:[%s11957_s25 + $0x90] sm:$0xff] %v425_v18  ;;  %428 = vst [vmem:[%s11957_s25 + $0x98] sm:$0xff] %v427_v19  ;;  %v431_v21 = vld [vmem:[%s11952_s11 + $0x1a8] sm:$0xff]  ;;  %v433_v22 = vld [vmem:[%s11952_s11 + $0x1b0] sm:$0xff] }
  0x4f   : > { %430 = vst [vmem:[%s11957_s25 + $0xa0] sm:$0xff] %v429_v20  ;;  %v435_v23 = vld [vmem:[%s11952_s11 + $0x1b8] sm:$0xff]  ;;  %432 = vst [vmem:[%s11957_s25 + $0xa8] sm:$0xff] %v431_v21  ;;  %v437_v24 = vld [vmem:[%s11952_s11 + $0x1c0] sm:$0xff] }
  0x50   : > { %434 = vst [vmem:[%s11957_s25 + $0xb0] sm:$0xff] %v433_v22  ;;  %436 = vst [vmem:[%s11957_s25 + $0xb8] sm:$0xff] %v435_v23  ;;  %v439_v25 = vld [vmem:[%s11952_s11 + $0x1c8] sm:$0xff]  ;;  %v441_v26 = vld [vmem:[%s11952_s11 + $0x1d0] sm:$0xff] }
  0x51   : > { %438 = vst [vmem:[%s11957_s25 + $0xc0] sm:$0xff] %v437_v24  ;;  %440 = vst [vmem:[%s11957_s25 + $0xc8] sm:$0xff] %v439_v25  ;;  %v443_v27 = vld [vmem:[%s11952_s11 + $0x1d8] sm:$0xff]  ;;  %v445_v28 = vld [vmem:[%s11952_s11 + $0x1e0] sm:$0xff] }
  0x52   : > { %442 = vst [vmem:[%s11957_s25 + $0xd0] sm:$0xff] %v441_v26  ;;  %v447_v29 = vld [vmem:[%s11952_s11 + $0x1e8] sm:$0xff]  ;;  %444 = vst [vmem:[%s11957_s25 + $0xd8] sm:$0xff] %v443_v27  ;;  %v449_v30 = vld [vmem:[%s11952_s11 + $0x1f0] sm:$0xff] }
  0x53   : > { %446 = vst [vmem:[%s11957_s25 + $0xe0] sm:$0xff] %v445_v28  ;;  %448 = vst [vmem:[%s11957_s25 + $0xe8] sm:$0xff] %v447_v29  ;;  %v451_v31 = vld [vmem:[%s11952_s11 + $0x1f8] sm:$0xff]  ;;  %v453_v32 = vld [vmem:[%s11952_s11 + $0x300] sm:$0xff] }
  0x54   : > { %450 = vst [vmem:[%s11957_s25 + $0xf0] sm:$0xff] %v449_v30  ;;  %452 = vst [vmem:[%s11957_s25 + $0xf8] sm:$0xff] %v451_v31  ;;  %v455_v33 = vld [vmem:[%s11952_s11 + $0x308] sm:$0xff]  ;;  %v457_v34 = vld [vmem:[%s11952_s11 + $0x310] sm:$0xff] }
  0x55   : > { %454 = vst [vmem:[%s11957_s25 + $0x100] sm:$0xff] %v453_v32  ;;  %v459_v35 = vld [vmem:[%s11952_s11 + $0x318] sm:$0xff]  ;;  %456 = vst [vmem:[%s11957_s25 + $0x108] sm:$0xff] %v455_v33  ;;  %v461_v36 = vld [vmem:[%s11952_s11 + $0x320] sm:$0xff] }
  0x56   : > { %458 = vst [vmem:[%s11957_s25 + $0x110] sm:$0xff] %v457_v34  ;;  %460 = vst [vmem:[%s11957_s25 + $0x118] sm:$0xff] %v459_v35  ;;  %v463_v37 = vld [vmem:[%s11952_s11 + $0x328] sm:$0xff]  ;;  %v465_v38 = vld [vmem:[%s11952_s11 + $0x330] sm:$0xff] }
  0x57   : > { %462 = vst [vmem:[%s11957_s25 + $0x120] sm:$0xff] %v461_v36  ;;  %464 = vst [vmem:[%s11957_s25 + $0x128] sm:$0xff] %v463_v37  ;;  %v467_v39 = vld [vmem:[%s11952_s11 + $0x338] sm:$0xff]  ;;  %v469_v40 = vld [vmem:[%s11952_s11 + $0x340] sm:$0xff] }
  0x58   : > { %466 = vst [vmem:[%s11957_s25 + $0x130] sm:$0xff] %v465_v38  ;;  %v471_v41 = vld [vmem:[%s11952_s11 + $0x348] sm:$0xff]  ;;  %468 = vst [vmem:[%s11957_s25 + $0x138] sm:$0xff] %v467_v39  ;;  %v473_v42 = vld [vmem:[%s11952_s11 + $0x350] sm:$0xff] }
  0x59   : > { %470 = vst [vmem:[%s11957_s25 + $0x140] sm:$0xff] %v469_v40  ;;  %472 = vst [vmem:[%s11957_s25 + $0x148] sm:$0xff] %v471_v41  ;;  %v475_v43 = vld [vmem:[%s11952_s11 + $0x358] sm:$0xff]  ;;  %v477_v44 = vld [vmem:[%s11952_s11 + $0x360] sm:$0xff] }
  0x5a   : > { %474 = vst [vmem:[%s11957_s25 + $0x150] sm:$0xff] %v473_v42  ;;  %476 = vst [vmem:[%s11957_s25 + $0x158] sm:$0xff] %v475_v43  ;;  %v479_v45 = vld [vmem:[%s11952_s11 + $0x368] sm:$0xff]  ;;  %v481_v46 = vld [vmem:[%s11952_s11 + $0x370] sm:$0xff] }
  0x5b   : > { %478 = vst [vmem:[%s11957_s25 + $0x160] sm:$0xff] %v477_v44  ;;  %v483_v47 = vld [vmem:[%s11952_s11 + $0x378] sm:$0xff]  ;;  %480 = vst [vmem:[%s11957_s25 + $0x168] sm:$0xff] %v479_v45  ;;  %v485_v48 = vld [vmem:[%s11952_s11 + $0x480] sm:$0xff] }
  0x5c   : > { %482 = vst [vmem:[%s11957_s25 + $0x170] sm:$0xff] %v481_v46  ;;  %484 = vst [vmem:[%s11957_s25 + $0x178] sm:$0xff] %v483_v47  ;;  %v487_v49 = vld [vmem:[%s11952_s11 + $0x488] sm:$0xff]  ;;  %v489_v50 = vld [vmem:[%s11952_s11 + $0x490] sm:$0xff] }
  0x5d   : > { %486 = vst [vmem:[%s11957_s25 + $0x180] sm:$0xff] %v485_v48  ;;  %488 = vst [vmem:[%s11957_s25 + $0x188] sm:$0xff] %v487_v49  ;;  %v491_v51 = vld [vmem:[%s11952_s11 + $0x498] sm:$0xff]  ;;  %v493_v52 = vld [vmem:[%s11952_s11 + $0x4a0] sm:$0xff] }
  0x5e   : > { %490 = vst [vmem:[%s11957_s25 + $0x190] sm:$0xff] %v489_v50  ;;  %v495_v53 = vld [vmem:[%s11952_s11 + $0x4a8] sm:$0xff]  ;;  %492 = vst [vmem:[%s11957_s25 + $0x198] sm:$0xff] %v491_v51  ;;  %v497_v54 = vld [vmem:[%s11952_s11 + $0x4b0] sm:$0xff] }
  0x5f   : > { %494 = vst [vmem:[%s11957_s25 + $0x1a0] sm:$0xff] %v493_v52  ;;  %496 = vst [vmem:[%s11957_s25 + $0x1a8] sm:$0xff] %v495_v53  ;;  %v499_v55 = vld [vmem:[%s11952_s11 + $0x4b8] sm:$0xff]  ;;  %v501_v56 = vld [vmem:[%s11952_s11 + $0x4c0] sm:$0xff] }
  0x60   : > { %498 = vst [vmem:[%s11957_s25 + $0x1b0] sm:$0xff] %v497_v54  ;;  %500 = vst [vmem:[%s11957_s25 + $0x1b8] sm:$0xff] %v499_v55  ;;  %v503_v57 = vld [vmem:[%s11952_s11 + $0x4c8] sm:$0xff]  ;;  %v505_v58 = vld [vmem:[%s11952_s11 + $0x4d0] sm:$0xff] }
  0x61   : > { %502 = vst [vmem:[%s11957_s25 + $0x1c0] sm:$0xff] %v501_v56  ;;  %v507_v59 = vld [vmem:[%s11952_s11 + $0x4d8] sm:$0xff]  ;;  %504 = vst [vmem:[%s11957_s25 + $0x1c8] sm:$0xff] %v503_v57  ;;  %v509_v60 = vld [vmem:[%s11952_s11 + $0x4e0] sm:$0xff] }
  0x62   : > { %506 = vst [vmem:[%s11957_s25 + $0x1d0] sm:$0xff] %v505_v58  ;;  %508 = vst [vmem:[%s11957_s25 + $0x1d8] sm:$0xff] %v507_v59  ;;  %v511_v61 = vld [vmem:[%s11952_s11 + $0x4e8] sm:$0xff]  ;;  %v513_v62 = vld [vmem:[%s11952_s11 + $0x4f0] sm:$0xff] }
  0x63   : > { %510 = vst [vmem:[%s11957_s25 + $0x1e0] sm:$0xff] %v509_v60  ;;  %512 = vst [vmem:[%s11957_s25 + $0x1e8] sm:$0xff] %v511_v61  ;;  %v515_v63 = vld [vmem:[%s11952_s11 + $0x4f8] sm:$0xff] }
  0x64   : > { %514 = vst [vmem:[%s11957_s25 + $0x1f0] sm:$0xff] %v513_v62  ;;  %516 = vst [vmem:[%s11957_s25 + $0x1f8] sm:$0xff] %v515_v63 }
  0x65 PF: > { %522 = sbr.rel (!%p11919_p2) target bundleno = 113 (0x71), region = 66  ;;  %s527_s9 = sld [smem:[#allocation7 + %s11774_s17]] (%p11919_p2) }
  0x66   : > { %s524_s0 = sand.u32 (%p11919_p2), 1, %s11754_s12   ;;  %s10916_s23 = smul.u32 (%p11919_p2), 12, %s11778_s18 }
  0x67   : > { %s9483_s5 = sshll.u32 (%p11919_p2), %s524_s0, 5 }
  0x68   : > { %s526_s15 = scalar_lea.vmem (%p11919_p2), [#allocation9], %s9483_s5 }
  0x6b   : > { %s529_s6 = sadd.s32 %s10916_s23, %s527_s9 }
  0x6c   : > { %s9484_s7 = sshll.u32 %s529_s6, 3 }
  0x6d   : > { %s531_s27 = scalar_lea.vmem %s16848_s3, %s9484_s7 }
  0x6e   : > { %v566_v0 = vld [vmem:[%s531_s27] sm:$0xff]  ;;  %v568_v1 = vld [vmem:[%s531_s27 + $0x18] sm:$0xff]  ;;  %v570_v2 = vld [vmem:[%s531_s27 + $0x30] sm:$0xff] }
  0x6f   : > { %567 = vst [vmem:[%s526_s15] sm:$0xff] %v566_v0  ;;  %569 = vst [vmem:[%s526_s15 + $0x8] sm:$0xff] %v568_v1  ;;  %v572_v3 = vld [vmem:[%s531_s27 + $0x48] sm:$0xff] }
  0x70   : > { %571 = vst [vmem:[%s526_s15 + $0x10] sm:$0xff] %v570_v2  ;;  %573 = vst [vmem:[%s526_s15 + $0x18] sm:$0xff] %v572_v3 }
  0x71 PF: > { %579 = sbr.rel (!%p11935_p6) target bundleno = 156 (0x9c), region = 104  ;;  %s584_s8 = sld [smem:[#allocation7 + %s11774_s17]] (%p11935_p6) }
  0x72   : > { %s581_s28 = sand.u32 (%p11935_p6), 1, %s11746_s10   ;;  %s10917_s29 = smul.u32 (%p11935_p6), 192, %s11778_s18 }
  0x73   : > { %s9485_s11 = sshll.u32 (%p11935_p6), %s581_s28, 9 }
  0x74   : > { %s12105_s22 = scalar_lea.vmem (%p11935_p6), [#allocation10], %s9485_s11 }
  0x77   : > { %s9486_s25 = sshll.u32 %s584_s8, 4 }
  0x78   : > { %s587_s9 = sadd.s32 %s10917_s29, %s9486_s25 }
  0x79   : > { %s9487_s0 = sshll.u32 %s587_s9, 3 }
  0x7a   : > { %s12100_s6 = scalar_lea.vmem %s16849_s4, %s9487_s0 }
  0x7b   : > { %v744_v4 = vld [vmem:[%s12100_s6] sm:$0xff]  ;;  %v746_v5 = vld [vmem:[%s12100_s6 + $0x8] sm:$0xff]  ;;  %v748_v6 = vld [vmem:[%s12100_s6 + $0x10] sm:$0xff] }
  0x7c   : > { %745 = vst [vmem:[%s12105_s22] sm:$0xff] %v744_v4  ;;  %747 = vst [vmem:[%s12105_s22 + $0x8] sm:$0xff] %v746_v5  ;;  %v750_v7 = vld [vmem:[%s12100_s6 + $0x18] sm:$0xff]  ;;  %v752_v8 = vld [vmem:[%s12100_s6 + $0x20] sm:$0xff] }
  0x7d   : > { %749 = vst [vmem:[%s12105_s22 + $0x10] sm:$0xff] %v748_v6  ;;  %v754_v9 = vld [vmem:[%s12100_s6 + $0x28] sm:$0xff]  ;;  %751 = vst [vmem:[%s12105_s22 + $0x18] sm:$0xff] %v750_v7  ;;  %v756_v10 = vld [vmem:[%s12100_s6 + $0x30] sm:$0xff] }
  0x7e   : > { %753 = vst [vmem:[%s12105_s22 + $0x20] sm:$0xff] %v752_v8  ;;  %755 = vst [vmem:[%s12105_s22 + $0x28] sm:$0xff] %v754_v9  ;;  %v758_v11 = vld [vmem:[%s12100_s6 + $0x38] sm:$0xff]  ;;  %v760_v12 = vld [vmem:[%s12100_s6 + $0x40] sm:$0xff] }
  0x7f   : > { %757 = vst [vmem:[%s12105_s22 + $0x30] sm:$0xff] %v756_v10  ;;  %759 = vst [vmem:[%s12105_s22 + $0x38] sm:$0xff] %v758_v11  ;;  %v762_v13 = vld [vmem:[%s12100_s6 + $0x48] sm:$0xff]  ;;  %v764_v14 = vld [vmem:[%s12100_s6 + $0x50] sm:$0xff] }
  0x80   : > { %761 = vst [vmem:[%s12105_s22 + $0x40] sm:$0xff] %v760_v12  ;;  %v766_v15 = vld [vmem:[%s12100_s6 + $0x58] sm:$0xff]  ;;  %763 = vst [vmem:[%s12105_s22 + $0x48] sm:$0xff] %v762_v13  ;;  %v768_v16 = vld [vmem:[%s12100_s6 + $0x60] sm:$0xff] }
  0x81   : > { %765 = vst [vmem:[%s12105_s22 + $0x50] sm:$0xff] %v764_v14  ;;  %767 = vst [vmem:[%s12105_s22 + $0x58] sm:$0xff] %v766_v15  ;;  %v770_v17 = vld [vmem:[%s12100_s6 + $0x68] sm:$0xff]  ;;  %v772_v18 = vld [vmem:[%s12100_s6 + $0x70] sm:$0xff] }
  0x82   : > { %769 = vst [vmem:[%s12105_s22 + $0x60] sm:$0xff] %v768_v16  ;;  %771 = vst [vmem:[%s12105_s22 + $0x68] sm:$0xff] %v770_v17  ;;  %v774_v19 = vld [vmem:[%s12100_s6 + $0x78] sm:$0xff]  ;;  %v776_v20 = vld [vmem:[%s12100_s6 + $0x180] sm:$0xff] }
  0x83   : > { %773 = vst [vmem:[%s12105_s22 + $0x70] sm:$0xff] %v772_v18  ;;  %v778_v21 = vld [vmem:[%s12100_s6 + $0x188] sm:$0xff]  ;;  %775 = vst [vmem:[%s12105_s22 + $0x78] sm:$0xff] %v774_v19  ;;  %v780_v22 = vld [vmem:[%s12100_s6 + $0x190] sm:$0xff] }
  0x84   : > { %777 = vst [vmem:[%s12105_s22 + $0x80] sm:$0xff] %v776_v20  ;;  %779 = vst [vmem:[%s12105_s22 + $0x88] sm:$0xff] %v778_v21  ;;  %v782_v23 = vld [vmem:[%s12100_s6 + $0x198] sm:$0xff]  ;;  %v784_v24 = vld [vmem:[%s12100_s6 + $0x1a0] sm:$0xff] }
  0x85   : > { %781 = vst [vmem:[%s12105_s22 + $0x90] sm:$0xff] %v780_v22  ;;  %783 = vst [vmem:[%s12105_s22 + $0x98] sm:$0xff] %v782_v23  ;;  %v786_v25 = vld [vmem:[%s12100_s6 + $0x1a8] sm:$0xff]  ;;  %v788_v26 = vld [vmem:[%s12100_s6 + $0x1b0] sm:$0xff] }
  0x86   : > { %785 = vst [vmem:[%s12105_s22 + $0xa0] sm:$0xff] %v784_v24  ;;  %v790_v27 = vld [vmem:[%s12100_s6 + $0x1b8] sm:$0xff]  ;;  %787 = vst [vmem:[%s12105_s22 + $0xa8] sm:$0xff] %v786_v25  ;;  %v792_v28 = vld [vmem:[%s12100_s6 + $0x1c0] sm:$0xff] }
  0x87   : > { %789 = vst [vmem:[%s12105_s22 + $0xb0] sm:$0xff] %v788_v26  ;;  %791 = vst [vmem:[%s12105_s22 + $0xb8] sm:$0xff] %v790_v27  ;;  %v794_v29 = vld [vmem:[%s12100_s6 + $0x1c8] sm:$0xff]  ;;  %v796_v30 = vld [vmem:[%s12100_s6 + $0x1d0] sm:$0xff] }
  0x88   : > { %793 = vst [vmem:[%s12105_s22 + $0xc0] sm:$0xff] %v792_v28  ;;  %795 = vst [vmem:[%s12105_s22 + $0xc8] sm:$0xff] %v794_v29  ;;  %v798_v31 = vld [vmem:[%s12100_s6 + $0x1d8] sm:$0xff]  ;;  %v800_v32 = vld [vmem:[%s12100_s6 + $0x1e0] sm:$0xff] }
  0x89   : > { %797 = vst [vmem:[%s12105_s22 + $0xd0] sm:$0xff] %v796_v30  ;;  %v802_v33 = vld [vmem:[%s12100_s6 + $0x1e8] sm:$0xff]  ;;  %799 = vst [vmem:[%s12105_s22 + $0xd8] sm:$0xff] %v798_v31  ;;  %v804_v34 = vld [vmem:[%s12100_s6 + $0x1f0] sm:$0xff] }
  0x8a   : > { %801 = vst [vmem:[%s12105_s22 + $0xe0] sm:$0xff] %v800_v32  ;;  %803 = vst [vmem:[%s12105_s22 + $0xe8] sm:$0xff] %v802_v33  ;;  %v806_v35 = vld [vmem:[%s12100_s6 + $0x1f8] sm:$0xff]  ;;  %v808_v36 = vld [vmem:[%s12100_s6 + $0x300] sm:$0xff] }
  0x8b   : > { %805 = vst [vmem:[%s12105_s22 + $0xf0] sm:$0xff] %v804_v34  ;;  %807 = vst [vmem:[%s12105_s22 + $0xf8] sm:$0xff] %v806_v35  ;;  %v810_v37 = vld [vmem:[%s12100_s6 + $0x308] sm:$0xff]  ;;  %v812_v38 = vld [vmem:[%s12100_s6 + $0x310] sm:$0xff] }
  0x8c   : > { %809 = vst [vmem:[%s12105_s22 + $0x100] sm:$0xff] %v808_v36  ;;  %v814_v39 = vld [vmem:[%s12100_s6 + $0x318] sm:$0xff]  ;;  %811 = vst [vmem:[%s12105_s22 + $0x108] sm:$0xff] %v810_v37  ;;  %v816_v40 = vld [vmem:[%s12100_s6 + $0x320] sm:$0xff] }
  0x8d   : > { %813 = vst [vmem:[%s12105_s22 + $0x110] sm:$0xff] %v812_v38  ;;  %815 = vst [vmem:[%s12105_s22 + $0x118] sm:$0xff] %v814_v39  ;;  %v818_v41 = vld [vmem:[%s12100_s6 + $0x328] sm:$0xff]  ;;  %v820_v42 = vld [vmem:[%s12100_s6 + $0x330] sm:$0xff] }
  0x8e   : > { %817 = vst [vmem:[%s12105_s22 + $0x120] sm:$0xff] %v816_v40  ;;  %819 = vst [vmem:[%s12105_s22 + $0x128] sm:$0xff] %v818_v41  ;;  %v822_v43 = vld [vmem:[%s12100_s6 + $0x338] sm:$0xff]  ;;  %v824_v44 = vld [vmem:[%s12100_s6 + $0x340] sm:$0xff] }
  0x8f   : > { %821 = vst [vmem:[%s12105_s22 + $0x130] sm:$0xff] %v820_v42  ;;  %v826_v45 = vld [vmem:[%s12100_s6 + $0x348] sm:$0xff]  ;;  %823 = vst [vmem:[%s12105_s22 + $0x138] sm:$0xff] %v822_v43  ;;  %v828_v46 = vld [vmem:[%s12100_s6 + $0x350] sm:$0xff] }
  0x90   : > { %825 = vst [vmem:[%s12105_s22 + $0x140] sm:$0xff] %v824_v44  ;;  %827 = vst [vmem:[%s12105_s22 + $0x148] sm:$0xff] %v826_v45  ;;  %v830_v47 = vld [vmem:[%s12100_s6 + $0x358] sm:$0xff]  ;;  %v832_v48 = vld [vmem:[%s12100_s6 + $0x360] sm:$0xff] }
  0x91   : > { %829 = vst [vmem:[%s12105_s22 + $0x150] sm:$0xff] %v828_v46  ;;  %831 = vst [vmem:[%s12105_s22 + $0x158] sm:$0xff] %v830_v47  ;;  %v834_v49 = vld [vmem:[%s12100_s6 + $0x368] sm:$0xff]  ;;  %v836_v50 = vld [vmem:[%s12100_s6 + $0x370] sm:$0xff] }
  0x92   : > { %833 = vst [vmem:[%s12105_s22 + $0x160] sm:$0xff] %v832_v48  ;;  %v838_v51 = vld [vmem:[%s12100_s6 + $0x378] sm:$0xff]  ;;  %835 = vst [vmem:[%s12105_s22 + $0x168] sm:$0xff] %v834_v49  ;;  %v840_v52 = vld [vmem:[%s12100_s6 + $0x480] sm:$0xff] }
  0x93   : > { %837 = vst [vmem:[%s12105_s22 + $0x170] sm:$0xff] %v836_v50  ;;  %839 = vst [vmem:[%s12105_s22 + $0x178] sm:$0xff] %v838_v51  ;;  %v842_v53 = vld [vmem:[%s12100_s6 + $0x488] sm:$0xff]  ;;  %v844_v54 = vld [vmem:[%s12100_s6 + $0x490] sm:$0xff] }
  0x94   : > { %841 = vst [vmem:[%s12105_s22 + $0x180] sm:$0xff] %v840_v52  ;;  %843 = vst [vmem:[%s12105_s22 + $0x188] sm:$0xff] %v842_v53  ;;  %v846_v55 = vld [vmem:[%s12100_s6 + $0x498] sm:$0xff]  ;;  %v848_v56 = vld [vmem:[%s12100_s6 + $0x4a0] sm:$0xff] }
  0x95   : > { %845 = vst [vmem:[%s12105_s22 + $0x190] sm:$0xff] %v844_v54  ;;  %v850_v57 = vld [vmem:[%s12100_s6 + $0x4a8] sm:$0xff]  ;;  %847 = vst [vmem:[%s12105_s22 + $0x198] sm:$0xff] %v846_v55  ;;  %v852_v58 = vld [vmem:[%s12100_s6 + $0x4b0] sm:$0xff] }
  0x96   : > { %849 = vst [vmem:[%s12105_s22 + $0x1a0] sm:$0xff] %v848_v56  ;;  %851 = vst [vmem:[%s12105_s22 + $0x1a8] sm:$0xff] %v850_v57  ;;  %v854_v59 = vld [vmem:[%s12100_s6 + $0x4b8] sm:$0xff]  ;;  %v856_v60 = vld [vmem:[%s12100_s6 + $0x4c0] sm:$0xff] }
  0x97   : > { %853 = vst [vmem:[%s12105_s22 + $0x1b0] sm:$0xff] %v852_v58  ;;  %855 = vst [vmem:[%s12105_s22 + $0x1b8] sm:$0xff] %v854_v59  ;;  %v858_v61 = vld [vmem:[%s12100_s6 + $0x4c8] sm:$0xff]  ;;  %v860_v62 = vld [vmem:[%s12100_s6 + $0x4d0] sm:$0xff] }
  0x98   : > { %857 = vst [vmem:[%s12105_s22 + $0x1c0] sm:$0xff] %v856_v60  ;;  %v862_v63 = vld [vmem:[%s12100_s6 + $0x4d8] sm:$0xff]  ;;  %859 = vst [vmem:[%s12105_s22 + $0x1c8] sm:$0xff] %v858_v61  ;;  %v864_v0 = vld [vmem:[%s12100_s6 + $0x4e0] sm:$0xff] }
  0x99   : > { %861 = vst [vmem:[%s12105_s22 + $0x1d0] sm:$0xff] %v860_v62  ;;  %863 = vst [vmem:[%s12105_s22 + $0x1d8] sm:$0xff] %v862_v63  ;;  %v866_v1 = vld [vmem:[%s12100_s6 + $0x4e8] sm:$0xff]  ;;  %v868_v2 = vld [vmem:[%s12100_s6 + $0x4f0] sm:$0xff] }
  0x9a   : > { %865 = vst [vmem:[%s12105_s22 + $0x1e0] sm:$0xff] %v864_v0  ;;  %867 = vst [vmem:[%s12105_s22 + $0x1e8] sm:$0xff] %v866_v1  ;;  %v870_v3 = vld [vmem:[%s12100_s6 + $0x4f8] sm:$0xff] }
  0x9b   : > { %869 = vst [vmem:[%s12105_s22 + $0x1f0] sm:$0xff] %v868_v2  ;;  %871 = vst [vmem:[%s12105_s22 + $0x1f8] sm:$0xff] %v870_v3 }
  0x9c PF: > { %p9488_p9 = scmp.ge.s32.totalorder %s11782_s19, 1  ;;  %p876_p10 = scmp.lt.s32.totalorder %s11782_s19, 13 }
  0x9e   : > { %p877_p11 = pnand %p9488_p9, %p876_p10 }
  0x9f   : > { %s17131_s7 = sld [smem:[#allocation12_spill]] (!%p877_p11)  ;;  %s883_s27 = sand.u32 (!%p877_p11), 1, %s11758_s13  }
  0xa0   : > { %880 = sbr.rel (%p877_p11) target bundleno = 2441 (0x989), region = 142  ;;  %s17132_s24 = sld [smem:[#allocation13_spill]] (!%p877_p11) }
  0xa1   : > { %s17133_s26 = sld [smem:[#allocation14_spill]] (!%p877_p11)  ;;  %s9489_s8 = sshll.u32 (!%p877_p11), %s883_s27, 9 }
  0xa2   : > { %s897_s29 = sand.u32 (!%p877_p11), 1, %s11742_s1   ;;  %s12251_s1 = scalar_lea.vmem (!%p877_p11), [#allocation8], %s9489_s8 }
  0xa3   : > { %s9491_s25 = sshll.u32 (!%p877_p11), %s897_s29, 9 }
  0xa4   : > { %s12255_s29 = scalar_lea.vmem (!%p877_p11), [#allocation10], %s9491_s25 }
  0xa5   : > { %s890_s15 = sand.u32 1, %s17131_s7   ;;  %s17134_s7 = sld [smem:[#allocation257_spill]] }
  0xa6   : > { %s9490_s28 = sshll.u32 %s890_s15, 5  ;;  %s942_s11 = sld [smem:[#allocation6 + %s17132_s24]] }
  0xa7   : > { %p944_p12 = scmp.lt.s32.totalorder %s17133_s26, 1  ;;  %s12240_s9 = sld [smem:[#allocation6 + %s17132_s24]] }
  0xa8   : > { %s12244_s0 = sld [smem:[#allocation7 + %s17132_s24]]  ;;  %s12253_s15 = scalar_lea.vmem [#allocation9], %s9490_s28 }
  0xa9   : > { %s17862_s26 = smov (!%p944_p12, %s17133_s26), 1 }
  0xaa   : > { %s10918_s5 = smul.u32 48, %s17862_s26 }
  0xac   : > { %s9492_s23 = sshll.u32 %s942_s11, 4 }
  0xad   : > { %p946_p13 = scmp.lt.s32.totalorder %s9492_s23, 47 }
  0xae   : > { %p9494_p0 = scmp.ne.s32.totalorder %s12244_s0, 0 }
  0xaf   : > { %s17864_s23 = smov (!%p946_p13, %s9492_s23), 47 }
  0xb0   : > { %s949_s6 = sadd.s32 %s10918_s5, %s17864_s23  ;;  %959 = sbr.rel (%p9494_p0) target bundleno = 278 (0x116), region = 158 }
  0xb1   : > { %s9493_s22 = sshll.u32 %s949_s6, 3 }
  0xb2   : > { %s12249_s27 = scalar_lea.vmem %s17134_s7, %s9493_s22 }
  0xb5   : > { %vm960_vm0 = vcmask 7168   ;;  %vm1089_vm1 = vcmask 64512   ;;  %v11786_v4 = vmov -inf   ;;  %v11787_v5 = vmov 0.0  }
  0xb6   : > { %961 = vst.msk [vmem:[#allocation2] sm:$0xff] %vm960_vm0, %v11786_v4  ;;  %962 = vst.msk [vmem:[#allocation2 + $0x8] sm:$0xff] %vm960_vm0, %v11786_v4 }
  0xb7   : > { %963 = vst.msk [vmem:[#allocation2 + $0x10] sm:$0xff] %vm960_vm0, %v11786_v4  ;;  %964 = vst.msk [vmem:[#allocation2 + $0x18] sm:$0xff] %vm960_vm0, %v11786_v4 }
  0xb8   : > { %965 = vst.msk [vmem:[#allocation2 + $0x20] sm:$0xff] %vm960_vm0, %v11786_v4  ;;  %966 = vst.msk [vmem:[#allocation2 + $0x28] sm:$0xff] %vm960_vm0, %v11786_v4 }
  0xb9   : > { %967 = vst.msk [vmem:[#allocation2 + $0x30] sm:$0xff] %vm960_vm0, %v11786_v4  ;;  %968 = vst.msk [vmem:[#allocation2 + $0x38] sm:$0xff] %vm960_vm0, %v11786_v4 }
  0xba   : > { %969 = vst.msk [vmem:[#allocation2 + $0x40] sm:$0xff] %vm960_vm0, %v11786_v4  ;;  %970 = vst.msk [vmem:[#allocation2 + $0x48] sm:$0xff] %vm960_vm0, %v11786_v4 }
  0xbb   : > { %971 = vst.msk [vmem:[#allocation2 + $0x50] sm:$0xff] %vm960_vm0, %v11786_v4  ;;  %972 = vst.msk [vmem:[#allocation2 + $0x58] sm:$0xff] %vm960_vm0, %v11786_v4 }
  0xbc   : > { %973 = vst.msk [vmem:[#allocation2 + $0x60] sm:$0xff] %vm960_vm0, %v11786_v4  ;;  %974 = vst.msk [vmem:[#allocation2 + $0x68] sm:$0xff] %vm960_vm0, %v11786_v4 }
  0xbd   : > { %975 = vst.msk [vmem:[#allocation2 + $0x70] sm:$0xff] %vm960_vm0, %v11786_v4  ;;  %976 = vst.msk [vmem:[#allocation2 + $0x78] sm:$0xff] %vm960_vm0, %v11786_v4 }
  0xbe   : > { %977 = vst.msk [vmem:[#allocation2 + $0x80] sm:$0xff] %vm960_vm0, %v11786_v4  ;;  %978 = vst.msk [vmem:[#allocation2 + $0x88] sm:$0xff] %vm960_vm0, %v11786_v4 }
  0xbf   : > { %979 = vst.msk [vmem:[#allocation2 + $0x90] sm:$0xff] %vm960_vm0, %v11786_v4  ;;  %980 = vst.msk [vmem:[#allocation2 + $0x98] sm:$0xff] %vm960_vm0, %v11786_v4 }
  0xc0   : > { %981 = vst.msk [vmem:[#allocation2 + $0xa0] sm:$0xff] %vm960_vm0, %v11786_v4  ;;  %982 = vst.msk [vmem:[#allocation2 + $0xa8] sm:$0xff] %vm960_vm0, %v11786_v4 }
  0xc1   : > { %983 = vst.msk [vmem:[#allocation2 + $0xb0] sm:$0xff] %vm960_vm0, %v11786_v4  ;;  %984 = vst.msk [vmem:[#allocation2 + $0xb8] sm:$0xff] %vm960_vm0, %v11786_v4 }
  0xc2   : > { %985 = vst.msk [vmem:[#allocation2 + $0xc0] sm:$0xff] %vm960_vm0, %v11786_v4  ;;  %986 = vst.msk [vmem:[#allocation2 + $0xc8] sm:$0xff] %vm960_vm0, %v11786_v4 }
  0xc3   : > { %987 = vst.msk [vmem:[#allocation2 + $0xd0] sm:$0xff] %vm960_vm0, %v11786_v4  ;;  %988 = vst.msk [vmem:[#allocation2 + $0xd8] sm:$0xff] %vm960_vm0, %v11786_v4 }
  0xc4   : > { %989 = vst.msk [vmem:[#allocation2 + $0xe0] sm:$0xff] %vm960_vm0, %v11786_v4  ;;  %990 = vst.msk [vmem:[#allocation2 + $0xe8] sm:$0xff] %vm960_vm0, %v11786_v4 }
  0xc5   : > { %991 = vst.msk [vmem:[#allocation2 + $0xf0] sm:$0xff] %vm960_vm0, %v11786_v4  ;;  %992 = vst.msk [vmem:[#allocation2 + $0xf8] sm:$0xff] %vm960_vm0, %v11786_v4 }
  0xc6   : > { %993 = vst.msk [vmem:[#allocation2 + $0x100] sm:$0xff] %vm960_vm0, %v11786_v4  ;;  %994 = vst.msk [vmem:[#allocation2 + $0x108] sm:$0xff] %vm960_vm0, %v11786_v4 }
  0xc7   : > { %995 = vst.msk [vmem:[#allocation2 + $0x110] sm:$0xff] %vm960_vm0, %v11786_v4  ;;  %996 = vst.msk [vmem:[#allocation2 + $0x118] sm:$0xff] %vm960_vm0, %v11786_v4 }
  0xc8   : > { %997 = vst.msk [vmem:[#allocation2 + $0x120] sm:$0xff] %vm960_vm0, %v11786_v4  ;;  %998 = vst.msk [vmem:[#allocation2 + $0x128] sm:$0xff] %vm960_vm0, %v11786_v4 }
  0xc9   : > { %999 = vst.msk [vmem:[#allocation2 + $0x130] sm:$0xff] %vm960_vm0, %v11786_v4  ;;  %1000 = vst.msk [vmem:[#allocation2 + $0x138] sm:$0xff] %vm960_vm0, %v11786_v4 }
  0xca   : > { %1001 = vst.msk [vmem:[#allocation2 + $0x140] sm:$0xff] %vm960_vm0, %v11786_v4  ;;  %1002 = vst.msk [vmem:[#allocation2 + $0x148] sm:$0xff] %vm960_vm0, %v11786_v4 }
  0xcb   : > { %1003 = vst.msk [vmem:[#allocation2 + $0x150] sm:$0xff] %vm960_vm0, %v11786_v4  ;;  %1004 = vst.msk [vmem:[#allocation2 + $0x158] sm:$0xff] %vm960_vm0, %v11786_v4 }
  0xcc   : > { %1005 = vst.msk [vmem:[#allocation2 + $0x160] sm:$0xff] %vm960_vm0, %v11786_v4  ;;  %1006 = vst.msk [vmem:[#allocation2 + $0x168] sm:$0xff] %vm960_vm0, %v11786_v4 }
  0xcd   : > { %1007 = vst.msk [vmem:[#allocation2 + $0x170] sm:$0xff] %vm960_vm0, %v11786_v4  ;;  %1008 = vst.msk [vmem:[#allocation2 + $0x178] sm:$0xff] %vm960_vm0, %v11786_v4 }
  0xce   : > { %1009 = vst.msk [vmem:[#allocation2 + $0x180] sm:$0xff] %vm960_vm0, %v11786_v4  ;;  %1010 = vst.msk [vmem:[#allocation2 + $0x188] sm:$0xff] %vm960_vm0, %v11786_v4 }
  0xcf   : > { %1011 = vst.msk [vmem:[#allocation2 + $0x190] sm:$0xff] %vm960_vm0, %v11786_v4  ;;  %1012 = vst.msk [vmem:[#allocation2 + $0x198] sm:$0xff] %vm960_vm0, %v11786_v4 }
  0xd0   : > { %1013 = vst.msk [vmem:[#allocation2 + $0x1a0] sm:$0xff] %vm960_vm0, %v11786_v4  ;;  %1014 = vst.msk [vmem:[#allocation2 + $0x1a8] sm:$0xff] %vm960_vm0, %v11786_v4 }
  0xd1   : > { %1015 = vst.msk [vmem:[#allocation2 + $0x1b0] sm:$0xff] %vm960_vm0, %v11786_v4  ;;  %1016 = vst.msk [vmem:[#allocation2 + $0x1b8] sm:$0xff] %vm960_vm0, %v11786_v4 }
  0xd2   : > { %1017 = vst.msk [vmem:[#allocation2 + $0x1c0] sm:$0xff] %vm960_vm0, %v11786_v4  ;;  %1018 = vst.msk [vmem:[#allocation2 + $0x1c8] sm:$0xff] %vm960_vm0, %v11786_v4 }
  0xd3   : > { %1019 = vst.msk [vmem:[#allocation2 + $0x1d0] sm:$0xff] %vm960_vm0, %v11786_v4  ;;  %1020 = vst.msk [vmem:[#allocation2 + $0x1d8] sm:$0xff] %vm960_vm0, %v11786_v4 }
  0xd4   : > { %1021 = vst.msk [vmem:[#allocation2 + $0x1e0] sm:$0xff] %vm960_vm0, %v11786_v4  ;;  %1022 = vst.msk [vmem:[#allocation2 + $0x1e8] sm:$0xff] %vm960_vm0, %v11786_v4 }
  0xd5   : > { %1023 = vst.msk [vmem:[#allocation2 + $0x1f0] sm:$0xff] %vm960_vm0, %v11786_v4  ;;  %1024 = vst.msk [vmem:[#allocation2 + $0x1f8] sm:$0xff] %vm960_vm0, %v11786_v4 }
  0xd6   : > { %1025 = vst.msk [vmem:[#allocation3] sm:$0xff] %vm960_vm0, %v11787_v5  ;;  %1026 = vst.msk [vmem:[#allocation3 + $0x8] sm:$0xff] %vm960_vm0, %v11787_v5 }
  0xd7   : > { %1027 = vst.msk [vmem:[#allocation3 + $0x10] sm:$0xff] %vm960_vm0, %v11787_v5  ;;  %1028 = vst.msk [vmem:[#allocation3 + $0x18] sm:$0xff] %vm960_vm0, %v11787_v5 }
  0xd8   : > { %1029 = vst.msk [vmem:[#allocation3 + $0x20] sm:$0xff] %vm960_vm0, %v11787_v5  ;;  %1030 = vst.msk [vmem:[#allocation3 + $0x28] sm:$0xff] %vm960_vm0, %v11787_v5 }
  0xd9   : > { %1031 = vst.msk [vmem:[#allocation3 + $0x30] sm:$0xff] %vm960_vm0, %v11787_v5  ;;  %1032 = vst.msk [vmem:[#allocation3 + $0x38] sm:$0xff] %vm960_vm0, %v11787_v5 }
  0xda   : > { %1033 = vst.msk [vmem:[#allocation3 + $0x40] sm:$0xff] %vm960_vm0, %v11787_v5  ;;  %1034 = vst.msk [vmem:[#allocation3 + $0x48] sm:$0xff] %vm960_vm0, %v11787_v5 }
  0xdb   : > { %1035 = vst.msk [vmem:[#allocation3 + $0x50] sm:$0xff] %vm960_vm0, %v11787_v5  ;;  %1036 = vst.msk [vmem:[#allocation3 + $0x58] sm:$0xff] %vm960_vm0, %v11787_v5 }
  0xdc   : > { %1037 = vst.msk [vmem:[#allocation3 + $0x60] sm:$0xff] %vm960_vm0, %v11787_v5  ;;  %1038 = vst.msk [vmem:[#allocation3 + $0x68] sm:$0xff] %vm960_vm0, %v11787_v5 }
  0xdd   : > { %1039 = vst.msk [vmem:[#allocation3 + $0x70] sm:$0xff] %vm960_vm0, %v11787_v5  ;;  %1040 = vst.msk [vmem:[#allocation3 + $0x78] sm:$0xff] %vm960_vm0, %v11787_v5 }
  0xde   : > { %1041 = vst.msk [vmem:[#allocation3 + $0x80] sm:$0xff] %vm960_vm0, %v11787_v5  ;;  %1042 = vst.msk [vmem:[#allocation3 + $0x88] sm:$0xff] %vm960_vm0, %v11787_v5 }
  0xdf   : > { %1043 = vst.msk [vmem:[#allocation3 + $0x90] sm:$0xff] %vm960_vm0, %v11787_v5  ;;  %1044 = vst.msk [vmem:[#allocation3 + $0x98] sm:$0xff] %vm960_vm0, %v11787_v5 }
  0xe0   : > { %1045 = vst.msk [vmem:[#allocation3 + $0xa0] sm:$0xff] %vm960_vm0, %v11787_v5  ;;  %1046 = vst.msk [vmem:[#allocation3 + $0xa8] sm:$0xff] %vm960_vm0, %v11787_v5 }
  0xe1   : > { %1047 = vst.msk [vmem:[#allocation3 + $0xb0] sm:$0xff] %vm960_vm0, %v11787_v5  ;;  %1048 = vst.msk [vmem:[#allocation3 + $0xb8] sm:$0xff] %vm960_vm0, %v11787_v5 }
  0xe2   : > { %1049 = vst.msk [vmem:[#allocation3 + $0xc0] sm:$0xff] %vm960_vm0, %v11787_v5  ;;  %1050 = vst.msk [vmem:[#allocation3 + $0xc8] sm:$0xff] %vm960_vm0, %v11787_v5 }
  0xe3   : > { %1051 = vst.msk [vmem:[#allocation3 + $0xd0] sm:$0xff] %vm960_vm0, %v11787_v5  ;;  %1052 = vst.msk [vmem:[#allocation3 + $0xd8] sm:$0xff] %vm960_vm0, %v11787_v5 }
  0xe4   : > { %1053 = vst.msk [vmem:[#allocation3 + $0xe0] sm:$0xff] %vm960_vm0, %v11787_v5  ;;  %1054 = vst.msk [vmem:[#allocation3 + $0xe8] sm:$0xff] %vm960_vm0, %v11787_v5 }
  0xe5   : > { %1055 = vst.msk [vmem:[#allocation3 + $0xf0] sm:$0xff] %vm960_vm0, %v11787_v5  ;;  %1056 = vst.msk [vmem:[#allocation3 + $0xf8] sm:$0xff] %vm960_vm0, %v11787_v5 }
  0xe6   : > { %1057 = vst.msk [vmem:[#allocation3 + $0x100] sm:$0xff] %vm960_vm0, %v11787_v5  ;;  %1058 = vst.msk [vmem:[#allocation3 + $0x108] sm:$0xff] %vm960_vm0, %v11787_v5 }
  0xe7   : > { %1059 = vst.msk [vmem:[#allocation3 + $0x110] sm:$0xff] %vm960_vm0, %v11787_v5  ;;  %1060 = vst.msk [vmem:[#allocation3 + $0x118] sm:$0xff] %vm960_vm0, %v11787_v5 }
  0xe8   : > { %1061 = vst.msk [vmem:[#allocation3 + $0x120] sm:$0xff] %vm960_vm0, %v11787_v5  ;;  %1062 = vst.msk [vmem:[#allocation3 + $0x128] sm:$0xff] %vm960_vm0, %v11787_v5 }
  0xe9   : > { %1063 = vst.msk [vmem:[#allocation3 + $0x130] sm:$0xff] %vm960_vm0, %v11787_v5  ;;  %1064 = vst.msk [vmem:[#allocation3 + $0x138] sm:$0xff] %vm960_vm0, %v11787_v5 }
  0xea   : > { %1065 = vst.msk [vmem:[#allocation3 + $0x140] sm:$0xff] %vm960_vm0, %v11787_v5  ;;  %1066 = vst.msk [vmem:[#allocation3 + $0x148] sm:$0xff] %vm960_vm0, %v11787_v5 }
  0xeb   : > { %1067 = vst.msk [vmem:[#allocation3 + $0x150] sm:$0xff] %vm960_vm0, %v11787_v5  ;;  %1068 = vst.msk [vmem:[#allocation3 + $0x158] sm:$0xff] %vm960_vm0, %v11787_v5 }
  0xec   : > { %1069 = vst.msk [vmem:[#allocation3 + $0x160] sm:$0xff] %vm960_vm0, %v11787_v5  ;;  %1070 = vst.msk [vmem:[#allocation3 + $0x168] sm:$0xff] %vm960_vm0, %v11787_v5 }
  0xed   : > { %1071 = vst.msk [vmem:[#allocation3 + $0x170] sm:$0xff] %vm960_vm0, %v11787_v5  ;;  %1072 = vst.msk [vmem:[#allocation3 + $0x178] sm:$0xff] %vm960_vm0, %v11787_v5 }
  0xee   : > { %1073 = vst.msk [vmem:[#allocation3 + $0x180] sm:$0xff] %vm960_vm0, %v11787_v5  ;;  %1074 = vst.msk [vmem:[#allocation3 + $0x188] sm:$0xff] %vm960_vm0, %v11787_v5 }
  0xef   : > { %1075 = vst.msk [vmem:[#allocation3 + $0x190] sm:$0xff] %vm960_vm0, %v11787_v5  ;;  %1076 = vst.msk [vmem:[#allocation3 + $0x198] sm:$0xff] %vm960_vm0, %v11787_v5 }
  0xf0   : > { %1077 = vst.msk [vmem:[#allocation3 + $0x1a0] sm:$0xff] %vm960_vm0, %v11787_v5  ;;  %1078 = vst.msk [vmem:[#allocation3 + $0x1a8] sm:$0xff] %vm960_vm0, %v11787_v5 }
  0xf1   : > { %1079 = vst.msk [vmem:[#allocation3 + $0x1b0] sm:$0xff] %vm960_vm0, %v11787_v5  ;;  %1080 = vst.msk [vmem:[#allocation3 + $0x1b8] sm:$0xff] %vm960_vm0, %v11787_v5 }
  0xf2   : > { %1081 = vst.msk [vmem:[#allocation3 + $0x1c0] sm:$0xff] %vm960_vm0, %v11787_v5  ;;  %1082 = vst.msk [vmem:[#allocation3 + $0x1c8] sm:$0xff] %vm960_vm0, %v11787_v5 }
  0xf3   : > { %1083 = vst.msk [vmem:[#allocation3 + $0x1d0] sm:$0xff] %vm960_vm0, %v11787_v5  ;;  %1084 = vst.msk [vmem:[#allocation3 + $0x1d8] sm:$0xff] %vm960_vm0, %v11787_v5 }
  0xf4   : > { %1085 = vst.msk [vmem:[#allocation3 + $0x1e0] sm:$0xff] %vm960_vm0, %v11787_v5  ;;  %1086 = vst.msk [vmem:[#allocation3 + $0x1e8] sm:$0xff] %vm960_vm0, %v11787_v5 }
  0xf5   : > { %1087 = vst.msk [vmem:[#allocation3 + $0x1f0] sm:$0xff] %vm960_vm0, %v11787_v5  ;;  %1088 = vst.msk [vmem:[#allocation3 + $0x1f8] sm:$0xff] %vm960_vm0, %v11787_v5 }
  0xf6   : > { %1090 = vst.msk [vmem:[#allocation4] sm:$0xff] %vm1089_vm1, %v11787_v5  ;;  %1091 = vst.msk [vmem:[#allocation4 + $0x8] sm:$0xff] %vm1089_vm1, %v11787_v5 }
  0xf7   : > { %1092 = vst.msk [vmem:[#allocation4 + $0x10] sm:$0xff] %vm1089_vm1, %v11787_v5  ;;  %1093 = vst.msk [vmem:[#allocation4 + $0x18] sm:$0xff] %vm1089_vm1, %v11787_v5 }
  0xf8   : > { %1094 = vst.msk [vmem:[#allocation4 + $0x20] sm:$0xff] %vm1089_vm1, %v11787_v5  ;;  %1095 = vst.msk [vmem:[#allocation4 + $0x28] sm:$0xff] %vm1089_vm1, %v11787_v5 }
  0xf9   : > { %1096 = vst.msk [vmem:[#allocation4 + $0x30] sm:$0xff] %vm1089_vm1, %v11787_v5  ;;  %1097 = vst.msk [vmem:[#allocation4 + $0x38] sm:$0xff] %vm1089_vm1, %v11787_v5 }
  0xfa   : > { %1098 = vst.msk [vmem:[#allocation4 + $0x40] sm:$0xff] %vm1089_vm1, %v11787_v5  ;;  %1099 = vst.msk [vmem:[#allocation4 + $0x48] sm:$0xff] %vm1089_vm1, %v11787_v5 }
  0xfb   : > { %1100 = vst.msk [vmem:[#allocation4 + $0x50] sm:$0xff] %vm1089_vm1, %v11787_v5  ;;  %1101 = vst.msk [vmem:[#allocation4 + $0x58] sm:$0xff] %vm1089_vm1, %v11787_v5 }
  0xfc   : > { %1102 = vst.msk [vmem:[#allocation4 + $0x60] sm:$0xff] %vm1089_vm1, %v11787_v5  ;;  %1103 = vst.msk [vmem:[#allocation4 + $0x68] sm:$0xff] %vm1089_vm1, %v11787_v5 }
  0xfd   : > { %1104 = vst.msk [vmem:[#allocation4 + $0x70] sm:$0xff] %vm1089_vm1, %v11787_v5  ;;  %1105 = vst.msk [vmem:[#allocation4 + $0x78] sm:$0xff] %vm1089_vm1, %v11787_v5 }
  0xfe   : > { %1106 = vst.msk [vmem:[#allocation4 + $0x80] sm:$0xff] %vm1089_vm1, %v11787_v5  ;;  %1107 = vst.msk [vmem:[#allocation4 + $0x88] sm:$0xff] %vm1089_vm1, %v11787_v5 }
  0xff   : > { %1108 = vst.msk [vmem:[#allocation4 + $0x90] sm:$0xff] %vm1089_vm1, %v11787_v5  ;;  %1109 = vst.msk [vmem:[#allocation4 + $0x98] sm:$0xff] %vm1089_vm1, %v11787_v5 }
 0x100   : > { %1110 = vst.msk [vmem:[#allocation4 + $0xa0] sm:$0xff] %vm1089_vm1, %v11787_v5  ;;  %1111 = vst.msk [vmem:[#allocation4 + $0xa8] sm:$0xff] %vm1089_vm1, %v11787_v5 }
 0x101   : > { %1112 = vst.msk [vmem:[#allocation4 + $0xb0] sm:$0xff] %vm1089_vm1, %v11787_v5  ;;  %1113 = vst.msk [vmem:[#allocation4 + $0xb8] sm:$0xff] %vm1089_vm1, %v11787_v5 }
 0x102   : > { %1114 = vst.msk [vmem:[#allocation4 + $0xc0] sm:$0xff] %vm1089_vm1, %v11787_v5  ;;  %1115 = vst.msk [vmem:[#allocation4 + $0xc8] sm:$0xff] %vm1089_vm1, %v11787_v5 }
 0x103   : > { %1116 = vst.msk [vmem:[#allocation4 + $0xd0] sm:$0xff] %vm1089_vm1, %v11787_v5  ;;  %1117 = vst.msk [vmem:[#allocation4 + $0xd8] sm:$0xff] %vm1089_vm1, %v11787_v5 }
 0x104   : > { %1118 = vst.msk [vmem:[#allocation4 + $0xe0] sm:$0xff] %vm1089_vm1, %v11787_v5  ;;  %1119 = vst.msk [vmem:[#allocation4 + $0xe8] sm:$0xff] %vm1089_vm1, %v11787_v5 }
 0x105   : > { %1120 = vst.msk [vmem:[#allocation4 + $0xf0] sm:$0xff] %vm1089_vm1, %v11787_v5  ;;  %1121 = vst.msk [vmem:[#allocation4 + $0xf8] sm:$0xff] %vm1089_vm1, %v11787_v5 }
 0x106   : > { %1122 = vst.msk [vmem:[#allocation4 + $0x100] sm:$0xff] %vm1089_vm1, %v11787_v5  ;;  %1123 = vst.msk [vmem:[#allocation4 + $0x108] sm:$0xff] %vm1089_vm1, %v11787_v5 }
 0x107   : > { %1124 = vst.msk [vmem:[#allocation4 + $0x110] sm:$0xff] %vm1089_vm1, %v11787_v5  ;;  %1125 = vst.msk [vmem:[#allocation4 + $0x118] sm:$0xff] %vm1089_vm1, %v11787_v5 }
 0x108   : > { %1126 = vst.msk [vmem:[#allocation4 + $0x120] sm:$0xff] %vm1089_vm1, %v11787_v5  ;;  %1127 = vst.msk [vmem:[#allocation4 + $0x128] sm:$0xff] %vm1089_vm1, %v11787_v5 }
 0x109   : > { %1128 = vst.msk [vmem:[#allocation4 + $0x130] sm:$0xff] %vm1089_vm1, %v11787_v5  ;;  %1129 = vst.msk [vmem:[#allocation4 + $0x138] sm:$0xff] %vm1089_vm1, %v11787_v5 }
 0x10a   : > { %1130 = vst.msk [vmem:[#allocation4 + $0x140] sm:$0xff] %vm1089_vm1, %v11787_v5  ;;  %1131 = vst.msk [vmem:[#allocation4 + $0x148] sm:$0xff] %vm1089_vm1, %v11787_v5 }
 0x10b   : > { %1132 = vst.msk [vmem:[#allocation4 + $0x150] sm:$0xff] %vm1089_vm1, %v11787_v5  ;;  %1133 = vst.msk [vmem:[#allocation4 + $0x158] sm:$0xff] %vm1089_vm1, %v11787_v5 }
 0x10c   : > { %1134 = vst.msk [vmem:[#allocation4 + $0x160] sm:$0xff] %vm1089_vm1, %v11787_v5  ;;  %1135 = vst.msk [vmem:[#allocation4 + $0x168] sm:$0xff] %vm1089_vm1, %v11787_v5 }
 0x10d   : > { %1136 = vst.msk [vmem:[#allocation4 + $0x170] sm:$0xff] %vm1089_vm1, %v11787_v5  ;;  %1137 = vst.msk [vmem:[#allocation4 + $0x178] sm:$0xff] %vm1089_vm1, %v11787_v5 }
 0x10e   : > { %1138 = vst.msk [vmem:[#allocation4 + $0x180] sm:$0xff] %vm1089_vm1, %v11787_v5  ;;  %1139 = vst.msk [vmem:[#allocation4 + $0x188] sm:$0xff] %vm1089_vm1, %v11787_v5 }
 0x10f   : > { %1140 = vst.msk [vmem:[#allocation4 + $0x190] sm:$0xff] %vm1089_vm1, %v11787_v5  ;;  %1141 = vst.msk [vmem:[#allocation4 + $0x198] sm:$0xff] %vm1089_vm1, %v11787_v5 }
 0x110   : > { %1142 = vst.msk [vmem:[#allocation4 + $0x1a0] sm:$0xff] %vm1089_vm1, %v11787_v5  ;;  %1143 = vst.msk [vmem:[#allocation4 + $0x1a8] sm:$0xff] %vm1089_vm1, %v11787_v5 }
 0x111   : > { %1144 = vst.msk [vmem:[#allocation4 + $0x1b0] sm:$0xff] %vm1089_vm1, %v11787_v5  ;;  %1145 = vst.msk [vmem:[#allocation4 + $0x1b8] sm:$0xff] %vm1089_vm1, %v11787_v5 }
 0x112   : > { %1146 = vst.msk [vmem:[#allocation4 + $0x1c0] sm:$0xff] %vm1089_vm1, %v11787_v5  ;;  %1147 = vst.msk [vmem:[#allocation4 + $0x1c8] sm:$0xff] %vm1089_vm1, %v11787_v5 }
 0x113   : > { %1148 = vst.msk [vmem:[#allocation4 + $0x1d0] sm:$0xff] %vm1089_vm1, %v11787_v5  ;;  %1149 = vst.msk [vmem:[#allocation4 + $0x1d8] sm:$0xff] %vm1089_vm1, %v11787_v5 }
 0x114   : > { %1150 = vst.msk [vmem:[#allocation4 + $0x1e0] sm:$0xff] %vm1089_vm1, %v11787_v5  ;;  %1151 = vst.msk [vmem:[#allocation4 + $0x1e8] sm:$0xff] %vm1089_vm1, %v11787_v5 }
 0x115   : > { %1152 = vst.msk [vmem:[#allocation4 + $0x1f0] sm:$0xff] %vm1089_vm1, %v11787_v5  ;;  %1153 = vst.msk [vmem:[#allocation4 + $0x1f8] sm:$0xff] %vm1089_vm1, %v11787_v5 }
 0x116 PF: > { %p9495_p1 = scmp.ge.s32.totalorder %s12244_s0, %s12240_s9 }
 0x118   : > { %1157 = sbr.rel (%p9495_p1) target bundleno = 1193 (0x4a9), region = 162 }
 0x11d   : > { %v1222_v6 = vld [vmem:[%s12253_s15] sm:$0xff]  ;;  %v1223_v7 = vld [vmem:[%s12253_s15 + $0x8] sm:$0xff]  ;;  %vm1226_vm2 = vcmask 64512   ;;  %v1160_v12 = vld [vmem:[%s12251_s1 + $0x10] sm:$0xff]  ;;  %vm4435_vm3 = vcmask 7168  }
 0x11e   : > { %v1158_v8 = vld [vmem:[%s12251_s1] sm:$0xff]  ;;  %10155 = vmatprep.subr.mxu0 %v1222_v6  ;;  %10181 = vmatprep.subr.mxu1 %v1223_v7  ;;  %v1159_v10 = vld [vmem:[%s12251_s1 + $0x8] sm:$0xff]  ;;  %v1176_v13 = vld [vmem:[%s12251_s1 + $0x90] sm:$0xff] }
 0x11f   : > { %v1174_v9 = vld [vmem:[%s12251_s1 + $0x80] sm:$0xff]  ;;  %v1175_v11 = vld [vmem:[%s12251_s1 + $0x88] sm:$0xff]  ;;  %10156 = vmatpush3.msra.mxu0 %v1222_v6  ;;  %10157 = vmatprep.mubr.msk.f32.mxu0 %vm1226_vm2, %v1158_v8  ;;  %v1161_v14 = vld [vmem:[%s12251_s1 + $0x18] sm:$0xff] }
 0x120   : > { %10182 = vmatpush3.msra.mxu1 %v1223_v7  ;;  %10183 = vmatprep.mubr.msk.f32.mxu1 %vm1226_vm2, %v1174_v9  ;;  %v1177_v15 = vld [vmem:[%s12251_s1 + $0x98] sm:$0xff]  ;;  %v1162_v16 = vld [vmem:[%s12251_s1 + $0x20] sm:$0xff]  ;;  %v1224_v18 = vld [vmem:[%s12253_s15 + $0x10] sm:$0xff] }
 0x121   : > { %10158 = vmatmul.mubr.msk.f32.vlgmr.msra.gmra.mxu0 %vm1226_vm2, %v1159_v10  ;;  %10184 = vmatmul.mubr.msk.f32.vlgmr.msra.gmra.mxu1 %vm1226_vm2, %v1175_v11  ;;  %v1178_v17 = vld [vmem:[%s12251_s1 + $0xa0] sm:$0xff]  ;;  %v1225_v19 = vld [vmem:[%s12253_s15 + $0x18] sm:$0xff]  ;;  %v1163_v20 = vld [vmem:[%s12251_s1 + $0x28] sm:$0xff] }
 0x122   : > { %10160 = vmatprep.mubr.msk.f32.mxu0 %vm1226_vm2, %v1160_v12  ;;  %10186 = vmatprep.mubr.msk.f32.mxu1 %vm1226_vm2, %v1176_v13  ;;  %v1179_v21 = vld [vmem:[%s12251_s1 + $0xa8] sm:$0xff]  ;;  %v1164_v22 = vld [vmem:[%s12251_s1 + $0x30] sm:$0xff]  ;;  %v1165_v24 = vld [vmem:[%s12251_s1 + $0x38] sm:$0xff] }
 0x123   : > { %v1180_v23 = vld [vmem:[%s12251_s1 + $0xb0] sm:$0xff]  ;;  %10207 = vmatprep.subr.mxu0 %v1224_v18  ;;  %10233 = vmatprep.subr.mxu1 %v1225_v19  ;;  %v1181_v25 = vld [vmem:[%s12251_s1 + $0xb8] sm:$0xff]  ;;  %v1166_v26 = vld [vmem:[%s12251_s1 + $0x40] sm:$0xff] }
 0x124   : > { %10208 = vmatpush3.msra.mxu0 %v1224_v18  ;;  %10234 = vmatpush3.msra.mxu1 %v1225_v19  ;;  %v1182_v27 = vld [vmem:[%s12251_s1 + $0xc0] sm:$0xff]  ;;  %v1167_v28 = vld [vmem:[%s12251_s1 + $0x48] sm:$0xff]  ;;  %v1168_v30 = vld [vmem:[%s12251_s1 + $0x50] sm:$0xff] }
 0x125   : > { %10161 = vmatmul.mubr.msk.f32.gmra.mxu0 %vm1226_vm2, %v1161_v14  ;;  %10187 = vmatmul.mubr.msk.f32.gmra.mxu1 %vm1226_vm2, %v1177_v15  ;;  %v1183_v29 = vld [vmem:[%s12251_s1 + $0xc8] sm:$0xff]  ;;  %v1184_v31 = vld [vmem:[%s12251_s1 + $0xd0] sm:$0xff]  ;;  %v1169_v32 = vld [vmem:[%s12251_s1 + $0x58] sm:$0xff] }
 0x126   : > { %10163 = vmatprep.mubr.msk.f32.mxu0 %vm1226_vm2, %v1162_v16  ;;  %10189 = vmatprep.mubr.msk.f32.mxu1 %vm1226_vm2, %v1178_v17  ;;  %v1185_v33 = vld [vmem:[%s12251_s1 + $0xd8] sm:$0xff]  ;;  %v1170_v34 = vld [vmem:[%s12251_s1 + $0x60] sm:$0xff]  ;;  %v1171_v36 = vld [vmem:[%s12251_s1 + $0x68] sm:$0xff] }
 0x127   : > { %v1186_v35 = vld [vmem:[%s12251_s1 + $0xe0] sm:$0xff]  ;;  %v1187_v37 = vld [vmem:[%s12251_s1 + $0xe8] sm:$0xff]  ;;  %v1172_v38 = vld [vmem:[%s12251_s1 + $0x70] sm:$0xff] }
 0x128   : > { %v1188_v39 = vld [vmem:[%s12251_s1 + $0xf0] sm:$0xff]  ;;  %v1173_v40 = vld [vmem:[%s12251_s1 + $0x78] sm:$0xff]  ;;  %v1190_v42 = vld [vmem:[%s12251_s1 + $0x100] sm:$0xff] }
 0x129   : > { %10164 = vmatmul.mubr.msk.f32.gmra.mxu0 %vm1226_vm2, %v1163_v20  ;;  %10190 = vmatmul.mubr.msk.f32.gmra.mxu1 %vm1226_vm2, %v1179_v21  ;;  %v1189_v41 = vld [vmem:[%s12251_s1 + $0xf8] sm:$0xff]  ;;  %v1206_v43 = vld [vmem:[%s12251_s1 + $0x180] sm:$0xff]  ;;  %v1191_v44 = vld [vmem:[%s12251_s1 + $0x108] sm:$0xff]  ;;  %v11788_v21 = vmov 0  }
 0x12a   : > { %10166 = vmatprep.mubr.msk.f32.mxu0 %vm1226_vm2, %v1164_v22  ;;  %10192 = vmatprep.mubr.msk.f32.mxu1 %vm1226_vm2, %v1180_v23  ;;  %v1207_v45 = vld [vmem:[%s12251_s1 + $0x188] sm:$0xff]  ;;  %v1192_v46 = vld [vmem:[%s12251_s1 + $0x110] sm:$0xff]  ;;  %v1193_v48 = vld [vmem:[%s12251_s1 + $0x118] sm:$0xff] }
 0x12b   : > { %v1208_v47 = vld [vmem:[%s12251_s1 + $0x190] sm:$0xff]  ;;  %v1209_v49 = vld [vmem:[%s12251_s1 + $0x198] sm:$0xff]  ;;  %v1194_v50 = vld [vmem:[%s12251_s1 + $0x120] sm:$0xff]  ;;  %11013 = vset.pattern.permute.xlu1 %v11788_v21  ;;  %11014 = vset.pattern.permute.xlu0 %v11788_v21 }
 0x12c   : > { %v1210_v51 = vld [vmem:[%s12251_s1 + $0x1a0] sm:$0xff]  ;;  %v1195_v52 = vld [vmem:[%s12251_s1 + $0x128] sm:$0xff]  ;;  %v1196_v54 = vld [vmem:[%s12251_s1 + $0x130] sm:$0xff] }
 0x12d   : > { %10167 = vmatmul.mubr.msk.f32.gmra.mxu0 %vm1226_vm2, %v1165_v24  ;;  %10193 = vmatmul.mubr.msk.f32.gmra.mxu1 %vm1226_vm2, %v1181_v25  ;;  %v1211_v53 = vld [vmem:[%s12251_s1 + $0x1a8] sm:$0xff]  ;;  %v1212_v55 = vld [vmem:[%s12251_s1 + $0x1b0] sm:$0xff]  ;;  %v1197_v56 = vld [vmem:[%s12251_s1 + $0x138] sm:$0xff] }
 0x12e   : > { %10169 = vmatprep.mubr.msk.f32.mxu0 %vm1226_vm2, %v1166_v26  ;;  %10195 = vmatprep.mubr.msk.f32.mxu1 %vm1226_vm2, %v1182_v27  ;;  %v1213_v57 = vld [vmem:[%s12251_s1 + $0x1b8] sm:$0xff]  ;;  %v1198_v58 = vld [vmem:[%s12251_s1 + $0x140] sm:$0xff]  ;;  %v1199_v60 = vld [vmem:[%s12251_s1 + $0x148] sm:$0xff] }
 0x12f   : > { %v1214_v59 = vld [vmem:[%s12251_s1 + $0x1c0] sm:$0xff]  ;;  %v1215_v61 = vld [vmem:[%s12251_s1 + $0x1c8] sm:$0xff]  ;;  %v1200_v62 = vld [vmem:[%s12251_s1 + $0x150] sm:$0xff] }
 0x130   : > { %v1216_v63 = vld [vmem:[%s12251_s1 + $0x1d0] sm:$0xff]  ;;  %v1201_v0 = vld [vmem:[%s12251_s1 + $0x158] sm:$0xff]  ;;  %v1202_v2 = vld [vmem:[%s12251_s1 + $0x160] sm:$0xff] }
 0x131   : > { %10170 = vmatmul.mubr.msk.f32.gmra.mxu0 %vm1226_vm2, %v1167_v28  ;;  %10196 = vmatmul.mubr.msk.f32.gmra.mxu1 %vm1226_vm2, %v1183_v29  ;;  %v1217_v1 = vld [vmem:[%s12251_s1 + $0x1d8] sm:$0xff]  ;;  %v1218_v3 = vld [vmem:[%s12251_s1 + $0x1e0] sm:$0xff]  ;;  %v1203_v4 = vld [vmem:[%s12251_s1 + $0x168] sm:$0xff] }
 0x132   : > { %10172 = vmatprep.mubr.msk.f32.mxu0 %vm1226_vm2, %v1168_v30  ;;  %10198 = vmatprep.mubr.msk.f32.mxu1 %vm1226_vm2, %v1184_v31  ;;  %v1219_v5 = vld [vmem:[%s12251_s1 + $0x1e8] sm:$0xff]  ;;  %v1204_v6 = vld [vmem:[%s12251_s1 + $0x170] sm:$0xff]  ;;  %v1205_v8 = vld [vmem:[%s12251_s1 + $0x178] sm:$0xff] }
 0x133   : > { %v1220_v7 = vld [vmem:[%s12251_s1 + $0x1f0] sm:$0xff]  ;;  %v1221_v9 = vld [vmem:[%s12251_s1 + $0x1f8] sm:$0xff] }
 0x135   : > { %10173 = vmatmul.mubr.msk.f32.gmra.mxu0 %vm1226_vm2, %v1169_v32  ;;  %10199 = vmatmul.mubr.msk.f32.gmra.mxu1 %vm1226_vm2, %v1185_v33 }
 0x136   : > { %10175 = vmatprep.mubr.msk.f32.mxu0 %vm1226_vm2, %v1170_v34  ;;  %10201 = vmatprep.mubr.msk.f32.mxu1 %vm1226_vm2, %v1186_v35 }
 0x139   : > { %10176 = vmatmul.mubr.msk.f32.gmra.mxu0 %vm1226_vm2, %v1171_v36  ;;  %10202 = vmatmul.mubr.msk.f32.gmra.mxu1 %vm1226_vm2, %v1187_v37 }
 0x13a   : > { %10178 = vmatprep.mubr.msk.f32.mxu0 %vm1226_vm2, %v1172_v38  ;;  %10204 = vmatprep.mubr.msk.f32.mxu1 %vm1226_vm2, %v1188_v39 }
 0x13d   : > { %10179 = vmatmul.mubr.msk.f32.gmra.mxu0 %vm1226_vm2, %v1173_v40  ;;  %10205 = vmatmul.mubr.msk.f32.gmra.mxu1 %vm1226_vm2, %v1189_v41 }
 0x13e   : > { %10209 = vmatprep.mubr.msk.f32.mxu0 %vm1226_vm2, %v1190_v42  ;;  %10235 = vmatprep.mubr.msk.f32.mxu1 %vm1226_vm2, %v1206_v43 }
 0x141   : > { %10210 = vmatmul.mubr.msk.f32.vlgmr.msra.gmra.mxu0 %vm1226_vm2, %v1191_v44  ;;  %10236 = vmatmul.mubr.msk.f32.vlgmr.msra.gmra.mxu1 %vm1226_vm2, %v1207_v45 }
 0x142   : > { %10212 = vmatprep.mubr.msk.f32.mxu0 %vm1226_vm2, %v1192_v46  ;;  %10238 = vmatprep.mubr.msk.f32.mxu1 %vm1226_vm2, %v1208_v47 }
 0x145   : > { %10213 = vmatmul.mubr.msk.f32.gmra.mxu0 %vm1226_vm2, %v1193_v48  ;;  %10239 = vmatmul.mubr.msk.f32.gmra.mxu1 %vm1226_vm2, %v1209_v49 }
 0x146   : > { %10215 = vmatprep.mubr.msk.f32.mxu0 %vm1226_vm2, %v1194_v50  ;;  %10241 = vmatprep.mubr.msk.f32.mxu1 %vm1226_vm2, %v1210_v51 }
 0x149   : > { %10216 = vmatmul.mubr.msk.f32.gmra.mxu0 %vm1226_vm2, %v1195_v52  ;;  %10242 = vmatmul.mubr.msk.f32.gmra.mxu1 %vm1226_vm2, %v1211_v53 }
 0x14a   : > { %10218 = vmatprep.mubr.msk.f32.mxu0 %vm1226_vm2, %v1196_v54  ;;  %10244 = vmatprep.mubr.msk.f32.mxu1 %vm1226_vm2, %v1212_v55 }
 0x14d   : > { %10219 = vmatmul.mubr.msk.f32.gmra.mxu0 %vm1226_vm2, %v1197_v56  ;;  %10245 = vmatmul.mubr.msk.f32.gmra.mxu1 %vm1226_vm2, %v1213_v57 }
 0x14e   : > { %10221 = vmatprep.mubr.msk.f32.mxu0 %vm1226_vm2, %v1198_v58  ;;  %10247 = vmatprep.mubr.msk.f32.mxu1 %vm1226_vm2, %v1214_v59 }
 0x151   : > { %10222 = vmatmul.mubr.msk.f32.gmra.mxu0 %vm1226_vm2, %v1199_v60  ;;  %10248 = vmatmul.mubr.msk.f32.gmra.mxu1 %vm1226_vm2, %v1215_v61 }
 0x152   : > { %10224 = vmatprep.mubr.msk.f32.mxu0 %vm1226_vm2, %v1200_v62  ;;  %10250 = vmatprep.mubr.msk.f32.mxu1 %vm1226_vm2, %v1216_v63 }
 0x155   : > { %10225 = vmatmul.mubr.msk.f32.gmra.mxu0 %vm1226_vm2, %v1201_v0  ;;  %10251 = vmatmul.mubr.msk.f32.gmra.mxu1 %vm1226_vm2, %v1217_v1 }
 0x156   : > { %10227 = vmatprep.mubr.msk.f32.mxu0 %vm1226_vm2, %v1202_v2  ;;  %10253 = vmatprep.mubr.msk.f32.mxu1 %vm1226_vm2, %v1218_v3 }
 0x159   : > { %10228 = vmatmul.mubr.msk.f32.gmra.mxu0 %vm1226_vm2, %v1203_v4  ;;  %10254 = vmatmul.mubr.msk.f32.gmra.mxu1 %vm1226_vm2, %v1219_v5 }
 0x15a   : > { %10230 = vmatprep.mubr.msk.f32.mxu0 %vm1226_vm2, %v1204_v6  ;;  %10256 = vmatprep.mubr.msk.f32.mxu1 %vm1226_vm2, %v1220_v7 }
 0x15d   : > { %10231 = vmatmul.mubr.msk.f32.gmra.mxu0 %vm1226_vm2, %v1205_v8  ;;  %10257 = vmatmul.mubr.msk.f32.gmra.mxu1 %vm1226_vm2, %v1221_v9 }
 0x1e1   : > { %v12776_v10 = vpop.f32.mrf.mxu0  ;;  %v12778_v11 = vpop.f32.mrf.mxu1 }
 0x1e2   : > { %2097 = vmax.xlane.f32.xlu1 %v12778_v11  ;;  %2065 = vmax.xlane.f32.xlu0 %v12776_v10 }
 0x1e3   : > { %v12782_v12 = vpop.f32.mrf.mxu0  ;;  %v12784_v13 = vpop.f32.mrf.mxu1 }
 0x1e5   : > { %v12786_v14 = vpop.f32.mrf.mxu0  ;;  %v12790_v15 = vpop.f32.mrf.mxu1 }
 0x1e6   : > { %2063 = vmax.xlane.f32.xlu0 %v12782_v12  ;;  %2069 = vmax.xlane.f32.xlu1 %v12786_v14 }
 0x1e7   : > { %v12792_v16 = vpop.f32.mrf.mxu0  ;;  %v12796_v17 = vpop.f32.mrf.mxu1 }
 0x1e8   : > { %17135 = vst [vmem:[#allocation16_spill] sm:$0xff] %v12796_v17 }
 0x1e9   : > { %v12798_v18 = vpop.f32.mrf.mxu0  ;;  %v12804_v20 = vpop.f32.mrf.mxu1 }
 0x1ea   : > { %2095 = vmax.xlane.f32.xlu0 %v12784_v13  ;;  %2101 = vmax.xlane.f32.xlu1 %v12790_v15  ;;  %17136 = vst [vmem:[#allocation17_spill] sm:$0xff] %v12798_v18  ;;  %17138 = vst [vmem:[#allocation19_spill] sm:$0xff] %v12804_v20 }
 0x1eb   : > { %v12802_v19 = vpop.f32.mrf.mxu0  ;;  %v12808_v22 = vpop.f32.mrf.mxu1 }
 0x1ec   : > { %17137 = vst [vmem:[#allocation18_spill] sm:$0xff] %v12802_v19  ;;  %17139 = vst [vmem:[#allocation20_spill] sm:$0xff] %v12808_v22 }
 0x1ed   : > { %v12810_v23 = vpop.f32.mrf.mxu0  ;;  %v12816_v25 = vpop.f32.mrf.mxu1 }
 0x1ee   : > { %2099 = vmax.xlane.f32.xlu0 %v12796_v17  ;;  %2067 = vmax.xlane.f32.xlu1 %v12792_v16  ;;  %17140 = vst [vmem:[#allocation21_spill] sm:$0xff] %v12810_v23  ;;  %17142 = vst [vmem:[#allocation23_spill] sm:$0xff] %v12816_v25  ;;  %v13372_v17 = vld [vmem:[#allocation2 + $0x190] sm:$0xff] }
 0x1ef   : > { %v12814_v24 = vpop.f32.mrf.mxu0  ;;  %v12820_v26 = vpop.f32.mrf.mxu1  ;;  %17211 = vst [vmem:[#allocation92_spill] sm:$0xff] %v13372_v17 }
 0x1f0   : > { %17141 = vst [vmem:[#allocation22_spill] sm:$0xff] %v12814_v24  ;;  %17143 = vst [vmem:[#allocation24_spill] sm:$0xff] %v12820_v26 }
 0x1f1   : > { %v12822_v27 = vpop.f32.mrf.mxu0  ;;  %v12828_v29 = vpop.f32.mrf.mxu1 }
 0x1f2   : > { %2073 = vmax.xlane.f32.xlu1 %v12798_v18  ;;  %2071 = vmax.xlane.f32.xlu0 %v12802_v19  ;;  %17144 = vst [vmem:[#allocation25_spill] sm:$0xff] %v12822_v27  ;;  %17146 = vst [vmem:[#allocation27_spill] sm:$0xff] %v12828_v29 }
 0x1f3   : > { %v12826_v28 = vpop.f32.mrf.mxu0  ;;  %v12832_v30 = vpop.f32.mrf.mxu1 }
 0x1f4   : > { %17145 = vst [vmem:[#allocation26_spill] sm:$0xff] %v12826_v28  ;;  %17147 = vst [vmem:[#allocation28_spill] sm:$0xff] %v12832_v30 }
 0x1f5   : > { %v12834_v31 = vpop.f32.mrf.mxu0  ;;  %v12840_v33 = vpop.f32.mrf.mxu1 }
 0x1f6   : > { %2105 = vmax.xlane.f32.xlu1 %v12804_v20  ;;  %2103 = vmax.xlane.f32.xlu0 %v12808_v22  ;;  %17148 = vst [vmem:[#allocation29_spill] sm:$0xff] %v12834_v31  ;;  %17150 = vst [vmem:[#allocation31_spill] sm:$0xff] %v12840_v33 }
 0x1f7   : > { %v12838_v32 = vpop.f32.mrf.mxu0  ;;  %v12844_v34 = vpop.f32.mrf.mxu1 }
 0x1f8   : > { %17149 = vst [vmem:[#allocation30_spill] sm:$0xff] %v12838_v32  ;;  %17151 = vst [vmem:[#allocation32_spill] sm:$0xff] %v12844_v34 }
 0x1f9   : > { %v12846_v35 = vpop.f32.mrf.mxu0  ;;  %v12852_v37 = vpop.f32.mrf.mxu1 }
 0x1fa   : > { %2077 = vmax.xlane.f32.xlu1 %v12810_v23  ;;  %2075 = vmax.xlane.f32.xlu0 %v12814_v24  ;;  %17152 = vst [vmem:[#allocation33_spill] sm:$0xff] %v12846_v35  ;;  %17154 = vst [vmem:[#allocation35_spill] sm:$0xff] %v12852_v37  ;;  %v13248_v24 = vld [vmem:[#allocation2 + $0x70] sm:$0xff] }
 0x1fb   : > { %v12850_v36 = vpop.f32.mrf.mxu0  ;;  %v12856_v38 = vpop.f32.mrf.mxu1  ;;  %17194 = vst [vmem:[#allocation75_spill] sm:$0xff] %v13248_v24 }
 0x1fc   : > { %17153 = vst [vmem:[#allocation34_spill] sm:$0xff] %v12850_v36  ;;  %17155 = vst [vmem:[#allocation36_spill] sm:$0xff] %v12856_v38 }
 0x1fd   : > { %v12858_v39 = vpop.f32.mrf.mxu0  ;;  %v12864_v41 = vpop.f32.mrf.mxu1 }
 0x1fe   : > { %2109 = vmax.xlane.f32.xlu1 %v12816_v25  ;;  %2107 = vmax.xlane.f32.xlu0 %v12820_v26  ;;  %17156 = vst [vmem:[#allocation37_spill] sm:$0xff] %v12858_v39  ;;  %17158 = vst [vmem:[#allocation39_spill] sm:$0xff] %v12864_v41  ;;  %v13246_v25 = vld [vmem:[#allocation2 + $0x78] sm:$0xff] }
 0x1ff   : > { %v12862_v40 = vpop.f32.mrf.mxu0  ;;  %v12868_v42 = vpop.f32.mrf.mxu1 }
 0x200   : > { %17157 = vst [vmem:[#allocation38_spill] sm:$0xff] %v12862_v40  ;;  %17159 = vst [vmem:[#allocation40_spill] sm:$0xff] %v12868_v42 }
 0x201   : > { %v12870_v43 = vpop.f32.mrf.mxu0  ;;  %v12876_v45 = vpop.f32.mrf.mxu1 }
 0x202   : > { %2081 = vmax.xlane.f32.xlu1 %v12822_v27  ;;  %2079 = vmax.xlane.f32.xlu0 %v12826_v28  ;;  %17160 = vst [vmem:[#allocation41_spill] sm:$0xff] %v12870_v43  ;;  %17162 = vst [vmem:[#allocation43_spill] sm:$0xff] %v12876_v45  ;;  %v13184_v28 = vld [vmem:[#allocation2 + $0xd8] sm:$0xff] }
 0x203   : > { %v12874_v44 = vpop.f32.mrf.mxu0  ;;  %v12880_v46 = vpop.f32.mrf.mxu1 }
 0x204   : > { %17161 = vst [vmem:[#allocation42_spill] sm:$0xff] %v12874_v44  ;;  %17163 = vst [vmem:[#allocation44_spill] sm:$0xff] %v12880_v46 }
 0x205   : > { %v12882_v47 = vpop.f32.mrf.mxu0  ;;  %v12888_v49 = vpop.f32.mrf.mxu1 }
 0x206   : > { %2113 = vmax.xlane.f32.xlu1 %v12828_v29  ;;  %2111 = vmax.xlane.f32.xlu0 %v12832_v30  ;;  %17164 = vst [vmem:[#allocation45_spill] sm:$0xff] %v12882_v47  ;;  %17166 = vst [vmem:[#allocation47_spill] sm:$0xff] %v12888_v49 }
 0x207   : > { %v12886_v48 = vpop.f32.mrf.mxu0  ;;  %v12892_v50 = vpop.f32.mrf.mxu1 }
 0x208   : > { %17165 = vst [vmem:[#allocation46_spill] sm:$0xff] %v12886_v48  ;;  %17167 = vst [vmem:[#allocation48_spill] sm:$0xff] %v12892_v50 }
 0x209   : > { %v12894_v51 = vpop.f32.mrf.mxu0  ;;  %v12900_v53 = vpop.f32.mrf.mxu1 }
 0x20a   : > { %2085 = vmax.xlane.f32.xlu1 %v12834_v31  ;;  %2083 = vmax.xlane.f32.xlu0 %v12838_v32  ;;  %17168 = vst [vmem:[#allocation49_spill] sm:$0xff] %v12894_v51  ;;  %17170 = vst [vmem:[#allocation51_spill] sm:$0xff] %v12900_v53  ;;  %v13160_v32 = vld [vmem:[#allocation2 + $0x58] sm:$0xff]  ;;  %v13162_v31 = vld [vmem:[#allocation2 + $0x50] sm:$0xff] }
 0x20b   : > { %v12898_v52 = vpop.f32.mrf.mxu0  ;;  %v12904_v54 = vpop.f32.mrf.mxu1 }
 0x20c   : > { %17169 = vst [vmem:[#allocation50_spill] sm:$0xff] %v12898_v52  ;;  %17171 = vst [vmem:[#allocation52_spill] sm:$0xff] %v12904_v54 }
 0x20d   : > { %v12906_v55 = vpop.f32.mrf.mxu0  ;;  %v12912_v57 = vpop.f32.mrf.mxu1 }
 0x20e   : > { %2117 = vmax.xlane.f32.xlu1 %v12840_v33  ;;  %2115 = vmax.xlane.f32.xlu0 %v12844_v34  ;;  %17172 = vst [vmem:[#allocation53_spill] sm:$0xff] %v12906_v55  ;;  %17174 = vst [vmem:[#allocation55_spill] sm:$0xff] %v12912_v57  ;;  %v13121_v34 = vld [vmem:[#allocation2 + $0x40] sm:$0xff] }
 0x20f   : > { %v12910_v56 = vpop.f32.mrf.mxu0  ;;  %v12916_v58 = vpop.f32.mrf.mxu1  ;;  %v13140_v33 = vld [vmem:[#allocation2 + $0xc0] sm:$0xff] }
 0x210   : > { %17173 = vst [vmem:[#allocation54_spill] sm:$0xff] %v12910_v56  ;;  %17175 = vst [vmem:[#allocation56_spill] sm:$0xff] %v12916_v58 }
 0x211   : > { %v12918_v59 = vpop.f32.mrf.mxu0  ;;  %v12924_v61 = vpop.f32.mrf.mxu1 }
 0x212   : > { %2089 = vmax.xlane.f32.xlu1 %v12846_v35  ;;  %2087 = vmax.xlane.f32.xlu0 %v12850_v36  ;;  %17176 = vst [vmem:[#allocation57_spill] sm:$0xff] %v12918_v59  ;;  %17178 = vst [vmem:[#allocation59_spill] sm:$0xff] %v12924_v61  ;;  %v3743_v36 = vld [vmem:[%s12255_s29 + $0x80] sm:$0xff]  ;;  %v13119_v35 = vld [vmem:[#allocation2 + $0x48] sm:$0xff] }
 0x213   : > { %v12922_v60 = vpop.f32.mrf.mxu0  ;;  %v12928_v62 = vpop.f32.mrf.mxu1 }
 0x214   : > { %17177 = vst [vmem:[#allocation58_spill] sm:$0xff] %v12922_v60  ;;  %17179 = vst [vmem:[#allocation60_spill] sm:$0xff] %v12928_v62 }
 0x215   : > { %v12930_v63 = vpop.f32.mrf.mxu0  ;;  %v12936_v1 = vpop.f32.mrf.mxu1 }
 0x216   : > { %2121 = vmax.xlane.f32.xlu1 %v12852_v37  ;;  %2119 = vmax.xlane.f32.xlu0 %v12856_v38  ;;  %17180 = vst [vmem:[#allocation61_spill] sm:$0xff] %v12930_v63  ;;  %17182 = vst [vmem:[#allocation63_spill] sm:$0xff] %v12936_v1  ;;  %v13103_v38 = vld [vmem:[#allocation2 + $0xb0] sm:$0xff]  ;;  %v3744_v37 = vld [vmem:[%s12255_s29 + $0x88] sm:$0xff] }
 0x217   : > { %v12934_v0 = vpop.f32.mrf.mxu0  ;;  %v12940_v2 = vpop.f32.mrf.mxu1 }
 0x218   : > { %17181 = vst [vmem:[#allocation62_spill] sm:$0xff] %v12934_v0  ;;  %17183 = vst [vmem:[#allocation64_spill] sm:$0xff] %v12940_v2 }
 0x219   : > { %v12942_v3 = vpop.f32.mrf.mxu0  ;;  %v12948_v5 = vpop.f32.mrf.mxu1 }
 0x21a   : > { %2093 = vmax.xlane.f32.xlu1 %v12858_v39  ;;  %2091 = vmax.xlane.f32.xlu0 %v12862_v40  ;;  %17184 = vst [vmem:[#allocation65_spill] sm:$0xff] %v12942_v3  ;;  %17186 = vst [vmem:[#allocation67_spill] sm:$0xff] %v12948_v5  ;;  %v13084_v40 = vld [vmem:[#allocation2 + $0x30] sm:$0xff]  ;;  %v13101_v39 = vld [vmem:[#allocation2 + $0xb8] sm:$0xff] }
 0x21b   : > { %v12946_v4 = vpop.f32.mrf.mxu0  ;;  %v12952_v6 = vpop.f32.mrf.mxu1 }
 0x21c   : > { %17185 = vst [vmem:[#allocation66_spill] sm:$0xff] %v12946_v4  ;;  %17187 = vst [vmem:[#allocation68_spill] sm:$0xff] %v12952_v6 }
 0x21d   : > { %v12954_v7 = vpop.f32.mrf.mxu0  ;;  %v12960_v9 = vpop.f32.mrf.mxu1 }
 0x21e   : > { %2125 = vmax.xlane.f32.xlu1 %v12864_v41  ;;  %2123 = vmax.xlane.f32.xlu0 %v12868_v42  ;;  %17188 = vst [vmem:[#allocation69_spill] sm:$0xff] %v12954_v7  ;;  %17190 = vst [vmem:[#allocation71_spill] sm:$0xff] %v12960_v9  ;;  %v3746_v42 = vld [vmem:[%s12255_s29 + $0x98] sm:$0xff] }
 0x21f   : > { %v12958_v8 = vpop.f32.mrf.mxu0  ;;  %v12964_v21 = vpop.f32.mrf.mxu1  ;;  %v13082_v41 = vld [vmem:[#allocation2 + $0x38] sm:$0xff] }
 0x220   : > { %17189 = vst [vmem:[#allocation70_spill] sm:$0xff] %v12958_v8  ;;  %17191 = vst [vmem:[#allocation72_spill] sm:$0xff] %v12964_v21 }
 0x222   : > { %2129 = vmax.xlane.f32.xlu1 %v12870_v43  ;;  %2127 = vmax.xlane.f32.xlu0 %v12874_v44  ;;  %v3731_v43 = vld [vmem:[%s12255_s29 + $0x20] sm:$0xff] }
 0x226   : > { %2161 = vmax.xlane.f32.xlu1 %v12876_v45  ;;  %2159 = vmax.xlane.f32.xlu0 %v12880_v46  ;;  %v13063_v46 = vld [vmem:[#allocation2 + $0xa0] sm:$0xff] }
 0x227   : > { %v3747_v45 = vld [vmem:[%s12255_s29 + $0xa0] sm:$0xff] }
 0x22a   : > { %2133 = vmax.xlane.f32.xlu1 %v12882_v47  ;;  %2131 = vmax.xlane.f32.xlu0 %v12886_v48  ;;  %v13061_v47 = vld [vmem:[#allocation2 + $0xa8] sm:$0xff] }
 0x22e   : > { %2165 = vmax.xlane.f32.xlu1 %v12888_v49  ;;  %2163 = vmax.xlane.f32.xlu0 %v12892_v50  ;;  %v13043_v50 = vld [vmem:[#allocation2 + $0x28] sm:$0xff]  ;;  %v13045_v49 = vld [vmem:[#allocation2 + $0x20] sm:$0xff] }
 0x232   : > { %2137 = vmax.xlane.f32.xlu1 %v12894_v51  ;;  %2135 = vmax.xlane.f32.xlu0 %v12898_v52  ;;  %v3734_v52 = vld [vmem:[%s12255_s29 + $0x38] sm:$0xff]  ;;  %v3749_v51 = vld [vmem:[%s12255_s29 + $0xb0] sm:$0xff] }
 0x236   : > { %2169 = vmax.xlane.f32.xlu1 %v12900_v53  ;;  %2167 = vmax.xlane.f32.xlu0 %v12904_v54  ;;  %v13023_v54 = vld [vmem:[#allocation2 + $0x90] sm:$0xff] }
 0x23a   : > { %2141 = vmax.xlane.f32.xlu1 %v12906_v55  ;;  %2139 = vmax.xlane.f32.xlu0 %v12910_v56 }
 0x23e   : > { %2173 = vmax.xlane.f32.xlu1 %v12912_v57  ;;  %2171 = vmax.xlane.f32.xlu0 %v12916_v58  ;;  %v3737_v58 = vld [vmem:[%s12255_s29 + $0x50] sm:$0xff]  ;;  %v3752_v57 = vld [vmem:[%s12255_s29 + $0xc8] sm:$0xff] }
 0x242   : > { %2145 = vmax.xlane.f32.xlu1 %v12918_v59  ;;  %2143 = vmax.xlane.f32.xlu0 %v12922_v60  ;;  %v13004_v59 = vld [vmem:[#allocation2 + $0x80] sm:$0xff] }
 0x246   : > { %2177 = vmax.xlane.f32.xlu1 %v12924_v61  ;;  %2175 = vmax.xlane.f32.xlu0 %v12928_v62  ;;  %v3739_v62 = vld [vmem:[%s12255_s29 + $0x60] sm:$0xff]  ;;  %v3753_v61 = vld [vmem:[%s12255_s29 + $0xd0] sm:$0xff] }
 0x24a   : > { %2149 = vmax.xlane.f32.xlu1 %v12930_v63  ;;  %2147 = vmax.xlane.f32.xlu0 %v12934_v0  ;;  %v12987_v63 = vld [vmem:[#allocation2 + $0x18] sm:$0xff] }
 0x24e   : > { %2181 = vmax.xlane.f32.xlu1 %v12936_v1  ;;  %2179 = vmax.xlane.f32.xlu0 %v12940_v2  ;;  %v12973_v2 = vld [vmem:[#allocation2 + $0x8] sm:$0xff] }
 0x252   : > { %2153 = vmax.xlane.f32.xlu1 %v12942_v3  ;;  %2151 = vmax.xlane.f32.xlu0 %v12946_v4  ;;  %v3758_v4 = vld [vmem:[%s12255_s29 + $0xf8] sm:$0xff]  ;;  %v3757_v3 = vld [vmem:[%s12255_s29 + $0xf0] sm:$0xff] }
 0x253   : > { %10315 = vmatprep.subr.mxu1 %v3758_v4 }
 0x254   : > { %10316 = vmatpush3.msra.mxu1 %v3758_v4 }
 0x255   : > { %10317 = vmatprep.subr.mxu1 %v3757_v3 }
 0x256   : > { %2185 = vmax.xlane.f32.xlu1 %v12948_v5  ;;  %2183 = vmax.xlane.f32.xlu0 %v12952_v6  ;;  %v3742_v6 = vld [vmem:[%s12255_s29 + $0x78] sm:$0xff]  ;;  %v12970_v5 = vld [vmem:[#allocation2 + $0x88] sm:$0xff] }
 0x257   : > { %10259 = vmatprep.subr.mxu0 %v3742_v6  ;;  %10318 = vmatpush3.msra.mxu1 %v3757_v3  ;;  %v3755_v3 = vld [vmem:[%s12255_s29 + $0xe0] sm:$0xff] }
 0x258   : > { %10260 = vmatpush3.msra.mxu0 %v3742_v6  ;;  %v12984_v6 = vld [vmem:[#allocation2] sm:$0xff] }
 0x25a   : > { %2157 = vmax.xlane.f32.xlu1 %v12954_v7  ;;  %2155 = vmax.xlane.f32.xlu0 %v12958_v8  ;;  %v3741_v8 = vld [vmem:[%s12255_s29 + $0x70] sm:$0xff]  ;;  %v3756_v7 = vld [vmem:[%s12255_s29 + $0xe8] sm:$0xff] }
 0x25b   : > { %10261 = vmatprep.subr.mxu0 %v3741_v8  ;;  %10319 = vmatprep.subr.mxu1 %v3756_v7 }
 0x25c   : > { %10262 = vmatpush3.msra.mxu0 %v3741_v8  ;;  %10320 = vmatpush3.msra.mxu1 %v3756_v7  ;;  %v3754_v8 = vld [vmem:[%s12255_s29 + $0xd8] sm:$0xff] }
 0x25d   : > { %10321 = vmatprep.subr.mxu1 %v3755_v3 }
 0x25e   : > { %2189 = vmax.xlane.f32.xlu1 %v12960_v9  ;;  %2187 = vmax.xlane.f32.xlu0 %v12964_v21  ;;  %v3740_v9 = vld [vmem:[%s12255_s29 + $0x68] sm:$0xff] }
 0x25f   : > { %10263 = vmatprep.subr.mxu0 %v3740_v9  ;;  %10322 = vmatpush3.msra.mxu1 %v3755_v3  ;;  %v13006_v3 = vld [vmem:[#allocation2 + $0x98] sm:$0xff] }
 0x260   : > { %10264 = vmatpush3.msra.mxu0 %v3740_v9  ;;  %10323 = vmatprep.subr.mxu1 %v3754_v8 }
 0x261   : > { %10265 = vmatprep.subr.mxu0 %v3739_v62  ;;  %10324 = vmatpush3.msra.mxu1 %v3754_v8  ;;  %v3751_v8 = vld [vmem:[%s12255_s29 + $0xc0] sm:$0xff] }
 0x262   : > { %10266 = vmatpush3.msra.mxu0 %v3739_v62  ;;  %10325 = vmatprep.subr.mxu1 %v3753_v61  ;;  %v3736_v62 = vld [vmem:[%s12255_s29 + $0x48] sm:$0xff] }
 0x263   : > { %10326 = vmatpush3.msra.mxu1 %v3753_v61  ;;  %v3735_v61 = vld [vmem:[%s12255_s29 + $0x40] sm:$0xff] }
 0x264   : > { %10327 = vmatprep.subr.mxu1 %v3752_v57 }
 0x265   : > { %10328 = vmatpush3.msra.mxu1 %v3752_v57 }
 0x266   : > { %10329 = vmatprep.subr.mxu1 %v3751_v8 }
 0x267   : > { %10330 = vmatpush3.msra.mxu1 %v3751_v8 }
 0x26b   : > { %v2098_v21 = vpop.xlane.xlu1 %2097  ;;  %v2066_v4 = vpop.xlane.xlu0 %2065 }
 0x26c   : > { %v12979_v1 = vmax.f32 %v12970_v5, %v2098_v21  ;;  %v12982_v0 = vmax.f32 %v12973_v2, %v2066_v4  ;;  %v3738_v4 = vld [vmem:[%s12255_s29 + $0x58] sm:$0xff] }
 0x26d   : > { %10267 = vmatprep.subr.mxu0 %v3738_v4 }
 0x26e   : > { %4453 = vst.msk [vmem:[#allocation2 + $0x88] sm:$0xff] %vm4435_vm3, %v12979_v1  ;;  %4437 = vst.msk [vmem:[#allocation2 + $0x8] sm:$0xff] %vm4435_vm3, %v12982_v0  ;;  %10268 = vmatpush3.msra.mxu0 %v3738_v4  ;;  %v13025_v4 = vld [vmem:[#allocation2 + $0x10] sm:$0xff] }
 0x26f   : > { %v2064_v7 = vpop.xlane.xlu0 %2063  ;;  %v2070_v21 = vpop.xlane.xlu1 %2069  ;;  %2454 = vperm.xlu1 %11013, %v12982_v0   ;;  %10269 = vmatprep.subr.mxu0 %v3737_v58 }
 0x270   : > { %v12999_v9 = vmax.f32 %v12984_v6, %v2064_v7  ;;  %v13002_v60 = vmax.f32 %v12987_v63, %v2070_v21  ;;  %10270 = vmatpush3.msra.mxu0 %v3737_v58 }
 0x271   : > { %10271 = vmatprep.subr.mxu0 %v3736_v62 }
 0x272   : > { %4436 = vst.msk [vmem:[#allocation2] sm:$0xff] %vm4435_vm3, %v12999_v9  ;;  %4439 = vst.msk [vmem:[#allocation2 + $0x18] sm:$0xff] %vm4435_vm3, %v13002_v60  ;;  %10272 = vmatpush3.msra.mxu0 %v3736_v62  ;;  %v3733_v62 = vld [vmem:[%s12255_s29 + $0x30] sm:$0xff] }
 0x273   : > { %v2096_v7 = vpop.xlane.xlu0 %2095  ;;  %v2102_v21 = vpop.xlane.xlu1 %2101  ;;  %10273 = vmatprep.subr.mxu0 %v3735_v61 }
 0x274   : > { %v13017_v56 = vmax.f32 %v13004_v59, %v2096_v7  ;;  %v13020_v55 = vmax.f32 %v13006_v3, %v2102_v21  ;;  %2534 = vperm.xlu0 %11014, %v12979_v1   ;;  %v3750_v7 = vld [vmem:[%s12255_s29 + $0xb8] sm:$0xff]  ;;  %10274 = vmatpush3.msra.mxu0 %v3735_v61 }
 0x275   : > { %10331 = vmatprep.subr.mxu1 %v3750_v7  ;;  %10275 = vmatprep.subr.mxu0 %v3734_v52 }
 0x276   : > { %4452 = vst.msk [vmem:[#allocation2 + $0x80] sm:$0xff] %vm4435_vm3, %v13017_v56  ;;  %4455 = vst.msk [vmem:[#allocation2 + $0x98] sm:$0xff] %vm4435_vm3, %v13020_v55  ;;  %2529 = vperm.xlu1 %11013, %v13017_v56   ;;  %10332 = vmatpush3.msra.mxu1 %v3750_v7  ;;  %v3732_v7 = vld [vmem:[%s12255_s29 + $0x28] sm:$0xff] }
 0x277   : > { %v2100_v58 = vpop.xlane.xlu0 %2099  ;;  %v2068_v21 = vpop.xlane.xlu1 %2067  ;;  %10333 = vmatprep.subr.mxu1 %v3749_v51  ;;  %10276 = vmatpush3.msra.mxu0 %v3734_v52 }
 0x278   : > { %v13035_v57 = vmax.f32 %v13023_v54, %v2100_v58  ;;  %v13038_v53 = vmax.f32 %v13025_v4, %v2068_v21  ;;  %2449 = vperm.xlu0 %11014, %v12999_v9   ;;  %v3748_v21 = vld [vmem:[%s12255_s29 + $0xa8] sm:$0xff]  ;;  %10334 = vmatpush3.msra.mxu1 %v3749_v51  ;;  %v2272_v51 = vsub.f32 %v12970_v5, %v12979_v1  ;;  %v3730_v1 = vld [vmem:[%s12255_s29 + $0x18] sm:$0xff]  ;;  %v3745_v5 = vld [vmem:[%s12255_s29 + $0x90] sm:$0xff] }
 0x279   : > { %10277 = vmatprep.subr.mxu0 %v3733_v62  ;;  %10335 = vmatprep.subr.mxu1 %v3748_v21 }
 0x27a   : > { %4454 = vst.msk [vmem:[#allocation2 + $0x90] sm:$0xff] %vm4435_vm3, %v13035_v57  ;;  %4438 = vst.msk [vmem:[#allocation2 + $0x10] sm:$0xff] %vm4435_vm3, %v13038_v53  ;;  %2464 = vperm.xlu1 %11013, %v13002_v60   ;;  %10278 = vmatpush3.msra.mxu0 %v3733_v62 }
 0x27b   : > { %v2074_v8 = vpop.xlane.xlu1 %2073  ;;  %v2072_v58 = vpop.xlane.xlu0 %2071  ;;  %10336 = vmatpush3.msra.mxu1 %v3748_v21  ;;  %10279 = vmatprep.subr.mxu0 %v3732_v7 }
 0x27c   : > { %v13055_v48 = vmax.f32 %v13043_v50, %v2074_v8  ;;  %2544 = vperm.xlu0 %11014, %v13020_v55   ;;  %v13059_v61 = vmax.f32 %v13045_v49, %v2072_v58  ;;  %10337 = vmatprep.subr.mxu1 %v3747_v45 }
 0x27d   : > { %10280 = vmatpush3.msra.mxu0 %v3732_v7  ;;  %10338 = vmatpush3.msra.mxu1 %v3747_v45  ;;  %v2353_v45 = vmul.f32 1.442695, %v2272_v51 }
 0x27e   : > { %4441 = vst.msk [vmem:[#allocation2 + $0x28] sm:$0xff] %vm4435_vm3, %v13055_v48  ;;  %4440 = vst.msk [vmem:[#allocation2 + $0x20] sm:$0xff] %vm4435_vm3, %v13059_v61  ;;  %2459 = vperm.xlu1 %11013, %v13038_v53   ;;  %10281 = vmatprep.subr.mxu0 %v3731_v43 }
 0x27f   : > { %v2106_v8 = vpop.xlane.xlu1 %2105  ;;  %v2104_v58 = vpop.xlane.xlu0 %2103  ;;  %10339 = vmatprep.subr.mxu1 %v3746_v42  ;;  %10282 = vmatpush3.msra.mxu0 %v3731_v43  ;;  %11015 = vpow2.f32 %v2353_v45 }
 0x280   : > { %v13075_v52 = vmax.f32 %v13061_v47, %v2106_v8  ;;  %v13078_v44 = vmax.f32 %v13063_v46, %v2104_v58  ;;  %10340 = vmatpush3.msra.mxu1 %v3746_v42  ;;  %v3729_v58 = vld [vmem:[%s12255_s29 + $0x10] sm:$0xff]  ;;  %10283 = vmatprep.subr.mxu0 %v3730_v1  ;;  %v3728_v42 = vld [vmem:[%s12255_s29 + $0x8] sm:$0xff] }
 0x281   : > { %10341 = vmatprep.subr.mxu1 %v3745_v5  ;;  %10284 = vmatpush3.msra.mxu0 %v3730_v1  ;;  %v3727_v1 = vld [vmem:[%s12255_s29] sm:$0xff] }
 0x282   : > { %4457 = vst.msk [vmem:[#allocation2 + $0xa8] sm:$0xff] %vm4435_vm3, %v13075_v52  ;;  %4456 = vst.msk [vmem:[#allocation2 + $0xa0] sm:$0xff] %vm4435_vm3, %v13078_v44  ;;  %2539 = vperm.xlu1 %11013, %v13035_v57   ;;  %2554 = vperm.xlu0 %11014, %v13075_v52   ;;  %v2276_v22 = vsub.f32 %v13061_v47, %v13075_v52 }
 0x283   : > { %v2078_v62 = vpop.xlane.xlu1 %2077  ;;  %v2076_v21 = vpop.xlane.xlu0 %2075  ;;  %10342 = vmatpush3.msra.mxu1 %v3745_v5  ;;  %10285 = vmatprep.subr.mxu0 %v3729_v58 }
 0x284   : > { %v13095_v7 = vmax.f32 %v13082_v41, %v2078_v62  ;;  %v13098_v8 = vmax.f32 %v13084_v40, %v2076_v21  ;;  %10343 = vmatprep.subr.mxu1 %v3744_v37  ;;  %10286 = vmatpush3.msra.mxu0 %v3729_v58  ;;  %v2255_v58 = vsub.f32 %v12984_v6, %v12999_v9 }
 0x285   : > { %10344 = vmatpush3.msra.mxu1 %v3744_v37  ;;  %10287 = vmatprep.subr.mxu0 %v3728_v42  ;;  %v2258_v6 = vsub.f32 %v12987_v63, %v13002_v60 }
 0x286   : > { %4443 = vst.msk [vmem:[#allocation2 + $0x38] sm:$0xff] %vm4435_vm3, %v13095_v7  ;;  %4442 = vst.msk [vmem:[#allocation2 + $0x30] sm:$0xff] %vm4435_vm3, %v13098_v8  ;;  %2474 = vperm.xlu1 %11013, %v13055_v48   ;;  %10345 = vmatprep.subr.mxu1 %v3743_v36 }
 0x287   : > { %v2110_v43 = vpop.xlane.xlu1 %2109  ;;  %v2108_v51 = vpop.xlane.xlu0 %2107  ;;  %10288 = vmatpush3.msra.mxu0 %v3728_v42  ;;  %10346 = vmatpush3.msra.mxu1 %v3743_v36  ;;  %v2256_v36 = vsub.f32 %v12973_v2, %v12982_v0  ;;  %v2325_v63 = vmul.f32 1.442695, %v2258_v6  ;;  %v2271_v2 = vsub.f32 %v13004_v59, %v13017_v56  ;;  %v13204_v56 = vld [vmem:[#allocation2 + $0x60] sm:$0xff] }
 0x288   : > { %v13113_v62 = vmax.f32 %v13101_v39, %v2110_v43  ;;  %v13116_v21 = vmax.f32 %v13103_v38, %v2108_v51  ;;  %10289 = vmatprep.subr.mxu0 %v3727_v1  ;;  %v13138_v51 = vld [vmem:[#allocation2 + $0xc8] sm:$0xff] }
 0x289   : > { %10290 = vmatpush3.msra.mxu0 %v3727_v1  ;;  %v2321_v60 = vmul.f32 1.442695, %v2256_v36  ;;  %v13186_v36 = vld [vmem:[#allocation2 + $0xd0] sm:$0xff] }
 0x28a   : > { %4459 = vst.msk [vmem:[#allocation2 + $0xb8] sm:$0xff] %vm4435_vm3, %v13113_v62  ;;  %4458 = vst.msk [vmem:[#allocation2 + $0xb0] sm:$0xff] %vm4435_vm3, %v13116_v21  ;;  %2469 = vperm.xlu1 %11013, %v13059_v61   ;;  %2564 = vperm.xlu0 %11014, %v13113_v62  }
 0x28b   : > { %v2082_v5 = vpop.xlane.xlu1 %2081  ;;  %v2080_v45 = vpop.xlane.xlu0 %2079 }
 0x28c   : > { %v13133_v37 = vmax.f32 %v13119_v35, %v2082_v5  ;;  %v13136_v43 = vmax.f32 %v13121_v34, %v2080_v45  ;;  %v2319_v5 = vmul.f32 1.442695, %v2255_v58  ;;  %v13182_v29 = vpop.eup %11015 }
 0x28d   : > { %17192 = vst [vmem:[#allocation73_spill] sm:$0xff] %v13182_v29 }
 0x28e   : > { %4445 = vst.msk [vmem:[#allocation2 + $0x48] sm:$0xff] %vm4435_vm3, %v13133_v37  ;;  %4444 = vst.msk [vmem:[#allocation2 + $0x40] sm:$0xff] %vm4435_vm3, %v13136_v43  ;;  %2549 = vperm.xlu1 %11013, %v13078_v44   ;;  %2494 = vperm.xlu0 %11014, %v13133_v37   ;;  %11017 = vpow2.f32 %v2319_v5 }
 0x28f   : > { %v2114_v9 = vpop.xlane.xlu1 %2113  ;;  %v2112_v1 = vpop.xlane.xlu0 %2111  ;;  %11019 = vpow2.f32 %v2321_v60  ;;  %v13222_v60 = vld [vmem:[#allocation2 + $0xe0] sm:$0xff] }
 0x290   : > { %v13155_v45 = vmax.f32 %v13138_v51, %v2114_v9  ;;  %v13158_v42 = vmax.f32 %v13140_v33, %v2112_v1  ;;  %v2274_v1 = vsub.f32 %v13006_v3, %v13020_v55  ;;  %v2351_v55 = vmul.f32 1.442695, %v2271_v2 }
 0x291   : > { %11021 = vpow2.f32 %v2325_v63 }
 0x292   : > { %4461 = vst.msk [vmem:[#allocation2 + $0xc8] sm:$0xff] %vm4435_vm3, %v13155_v45  ;;  %4460 = vst.msk [vmem:[#allocation2 + $0xc0] sm:$0xff] %vm4435_vm3, %v13158_v42  ;;  %2484 = vperm.xlu1 %11013, %v13095_v7   ;;  %2574 = vperm.xlu0 %11014, %v13155_v45   ;;  %v2357_v6 = vmul.f32 1.442695, %v2274_v1  ;;  %11023 = vpow2.f32 %v2351_v55 }
 0x293   : > { %v2086_v58 = vpop.xlane.xlu1 %2085  ;;  %v2084_v9 = vpop.xlane.xlu0 %2083 }
 0x294   : > { %v13177_v0 = vmax.f32 %v13160_v32, %v2086_v58  ;;  %v13180_v30 = vmax.f32 %v13162_v31, %v2084_v9  ;;  %v13202_v9 = vld [vmem:[#allocation2 + $0x68] sm:$0xff]  ;;  %11025 = vpow2.f32 %v2357_v6  ;;  %v2257_v6 = vsub.f32 %v13025_v4, %v13038_v53 }
 0x296   : > { %4447 = vst.msk [vmem:[#allocation2 + $0x58] sm:$0xff] %vm4435_vm3, %v13177_v0  ;;  %4446 = vst.msk [vmem:[#allocation2 + $0x50] sm:$0xff] %vm4435_vm3, %v13180_v30  ;;  %2479 = vperm.xlu1 %11013, %v13098_v8   ;;  %3430 = vperm.xlu0 %11014, %v13182_v29   ;;  %v2260_v29 = vsub.f32 %v13043_v50, %v13055_v48  ;;  %v2273_v50 = vsub.f32 %v13023_v54, %v13035_v57  ;;  %v2323_v4 = vmul.f32 1.442695, %v2257_v6  ;;  %v13276_v54 = vld [vmem:[#allocation2 + $0xf0] sm:$0xff] }
 0x297   : > { %v2118_v59 = vpop.xlane.xlu1 %2117  ;;  %v2116_v3 = vpop.xlane.xlu0 %2115  ;;  %17197 = vst [vmem:[#allocation78_spill] sm:$0xff] %v13276_v54 }
 0x298   : > { %v13197_v5 = vmax.f32 %v13184_v28, %v2118_v59  ;;  %v13200_v58 = vmax.f32 %v13186_v36, %v2116_v3  ;;  %v13220_v3 = vld [vmem:[#allocation2 + $0xe8] sm:$0xff]  ;;  %v2329_v23 = vmul.f32 1.442695, %v2260_v29  ;;  %v2355_v47 = vmul.f32 1.442695, %v2273_v50 }
 0x299   : > { %11027 = vpow2.f32 %v2323_v4  ;;  %v13318_v50 = vld [vmem:[#allocation2 + $0x188] sm:$0xff] }
 0x29a   : > { %4463 = vst.msk [vmem:[#allocation2 + $0xd8] sm:$0xff] %vm4435_vm3, %v13197_v5  ;;  %4462 = vst.msk [vmem:[#allocation2 + $0xd0] sm:$0xff] %vm4435_vm3, %v13200_v58  ;;  %2559 = vperm.xlu1 %11013, %v13116_v21   ;;  %2504 = vperm.xlu0 %11014, %v13177_v0   ;;  %11029 = vpow2.f32 %v2329_v23 }
 0x29b   : > { %v2090_v63 = vpop.xlane.xlu1 %2089  ;;  %v2088_v2 = vpop.xlane.xlu0 %2087  ;;  %11031 = vpow2.f32 %v2355_v47  ;;  %17202 = vst [vmem:[#allocation83_spill] sm:$0xff] %v13318_v50 }
 0x29c   : > { %v13215_v1 = vmax.f32 %v13202_v9, %v2090_v63  ;;  %v13218_v59 = vmax.f32 %v13204_v56, %v2088_v2  ;;  %v13244_v26 = vpop.eup %11017 }
 0x29d   : > { %17193 = vst [vmem:[#allocation74_spill] sm:$0xff] %v13244_v26  ;;  %v13262_v53 = vpop.eup %11019 }
 0x29e   : > { %4449 = vst.msk [vmem:[#allocation2 + $0x68] sm:$0xff] %vm4435_vm3, %v13215_v1  ;;  %4448 = vst.msk [vmem:[#allocation2 + $0x60] sm:$0xff] %vm4435_vm3, %v13218_v59  ;;  %2489 = vperm.xlu1 %11013, %v13136_v43   ;;  %2584 = vperm.xlu0 %11014, %v13197_v5   ;;  %v13272_v19 = vpop.eup %11021 }
 0x29f   : > { %v2122_v63 = vpop.xlane.xlu1 %2121  ;;  %v2120_v2 = vpop.xlane.xlu0 %2119  ;;  %17195 = vst [vmem:[#allocation76_spill] sm:$0xff] %v13262_v53  ;;  %17196 = vst [vmem:[#allocation77_spill] sm:$0xff] %v13272_v19 }
 0x2a0   : > { %v13239_v27 = vmax.f32 %v13220_v3, %v2122_v63  ;;  %v13242_v55 = vmax.f32 %v13222_v60, %v2120_v2 }
 0x2a2   : > { %4465 = vst.msk [vmem:[#allocation2 + $0xe8] sm:$0xff] %vm4435_vm3, %v13239_v27  ;;  %4464 = vst.msk [vmem:[#allocation2 + $0xe0] sm:$0xff] %vm4435_vm3, %v13242_v55  ;;  %2569 = vperm.xlu1 %11013, %v13158_v42   ;;  %3345 = vperm.xlu0 %11014, %v13244_v26   ;;  %v13274_v26 = vld [vmem:[#allocation2 + $0xf8] sm:$0xff] }
 0x2a3   : > { %v2094_v63 = vpop.xlane.xlu1 %2093  ;;  %v2092_v2 = vpop.xlane.xlu0 %2091 }
 0x2a4   : > { %v13267_v48 = vmax.f32 %v13246_v25, %v2094_v63  ;;  %v13270_v20 = vmax.f32 %v13248_v24, %v2092_v2  ;;  %v13288_v63 = vpop.eup %11023  ;;  %v2361_v2 = vmul.f32 1.442695, %v2276_v22  ;;  %v13298_v24 = vld [vmem:[#allocation2 + $0x108] sm:$0xff]  ;;  %v13320_v22 = vld [vmem:[#allocation2 + $0x180] sm:$0xff] }
 0x2a5   : > { %17198 = vst [vmem:[#allocation79_spill] sm:$0xff] %v13288_v63  ;;  %v13296_v18 = vpop.eup %11025  ;;  %17200 = vst [vmem:[#allocation81_spill] sm:$0xff] %v13298_v24 }
 0x2a6   : > { %4451 = vst.msk [vmem:[#allocation2 + $0x78] sm:$0xff] %vm4435_vm3, %v13267_v48  ;;  %4450 = vst.msk [vmem:[#allocation2 + $0x70] sm:$0xff] %vm4435_vm3, %v13270_v20  ;;  %3350 = vperm.xlu1 %11013, %v13262_v53   ;;  %3360 = vperm.xlu0 %11014, %v13272_v19   ;;  %v13300_v53 = vld [vmem:[#allocation2 + $0x100] sm:$0xff]  ;;  %11033 = vpow2.f32 %v2361_v2  ;;  %v2259_v2 = vsub.f32 %v13045_v49, %v13059_v61  ;;  %v2262_v19 = vsub.f32 %v13082_v41, %v13095_v7 }
 0x2a7   : > { %v2126_v52 = vpop.xlane.xlu1 %2125  ;;  %v2124_v6 = vpop.xlane.xlu0 %2123  ;;  %17199 = vst [vmem:[#allocation80_spill] sm:$0xff] %v13296_v18  ;;  %17201 = vst [vmem:[#allocation82_spill] sm:$0xff] %v13300_v53  ;;  %v2275_v61 = vsub.f32 %v13063_v46, %v13078_v44 }
 0x2a8   : > { %v13291_v57 = vmax.f32 %v13274_v26, %v2126_v52  ;;  %v13294_v29 = vmax.f32 %v13276_v54, %v2124_v6  ;;  %17203 = vst [vmem:[#allocation84_spill] sm:$0xff] %v13320_v22  ;;  %v2327_v41 = vmul.f32 1.442695, %v2259_v2  ;;  %v2333_v54 = vmul.f32 1.442695, %v2262_v19  ;;  %v13370_v2 = vld [vmem:[#allocation2 + $0x198] sm:$0xff] }
 0x2a9   : > { %17210 = vst [vmem:[#allocation91_spill] sm:$0xff] %v13370_v2 }
 0x2aa   : > { %4467 = vst.msk [vmem:[#allocation2 + $0xf8] sm:$0xff] %vm4435_vm3, %v13291_v57  ;;  %4466 = vst.msk [vmem:[#allocation2 + $0xf0] sm:$0xff] %vm4435_vm3, %v13294_v29  ;;  %3425 = vperm.xlu1 %11013, %v13288_v63   ;;  %3440 = vperm.xlu0 %11014, %v13296_v18   ;;  %v13342_v63 = vld [vmem:[#allocation2 + $0x118] sm:$0xff]  ;;  %11035 = vpow2.f32 %v2327_v41  ;;  %v13414_v41 = vld [vmem:[#allocation2 + $0x1a8] sm:$0xff] }
 0x2ab   : > { %v2130_v23 = vpop.xlane.xlu1 %2129  ;;  %v2128_v4 = vpop.xlane.xlu0 %2127  ;;  %17206 = vst [vmem:[#allocation87_spill] sm:$0xff] %v13342_v63  ;;  %11037 = vpow2.f32 %v2333_v54  ;;  %17218 = vst [vmem:[#allocation99_spill] sm:$0xff] %v13414_v41  ;;  %v13416_v54 = vld [vmem:[#allocation2 + $0x1a0] sm:$0xff] }
 0x2ac   : > { %v13313_v52 = vmax.f32 %v13298_v24, %v2130_v23  ;;  %v13316_v6 = vmax.f32 %v13300_v53, %v2128_v4  ;;  %v13344_v53 = vld [vmem:[#allocation2 + $0x110] sm:$0xff]  ;;  %17219 = vst [vmem:[#allocation100_spill] sm:$0xff] %v13416_v54 }
 0x2ad   : > { %17207 = vst [vmem:[#allocation88_spill] sm:$0xff] %v13344_v53 }
 0x2ae   : > { %4469 = vst.msk [vmem:[#allocation2 + $0x108] sm:$0xff] %vm4435_vm3, %v13313_v52  ;;  %4468 = vst.msk [vmem:[#allocation2 + $0x100] sm:$0xff] %vm4435_vm3, %v13316_v6  ;;  %2499 = vperm.xlu1 %11013, %v13180_v30   ;;  %2514 = vperm.xlu0 %11014, %v13215_v1  }
 0x2af   : > { %v2162_v23 = vpop.xlane.xlu1 %2161  ;;  %v2160_v4 = vpop.xlane.xlu0 %2159 }
 0x2b0   : > { %v13337_v18 = vmax.f32 %v13318_v50, %v2162_v23  ;;  %v13340_v47 = vmax.f32 %v13320_v22, %v2160_v4  ;;  %v13358_v4 = vpop.eup %11027  ;;  %v2278_v50 = vsub.f32 %v13101_v39, %v13113_v62  ;;  %v2359_v39 = vmul.f32 1.442695, %v2275_v61 }
 0x2b1   : > { %17208 = vst [vmem:[#allocation89_spill] sm:$0xff] %v13358_v4  ;;  %v13368_v24 = vpop.eup %11029 }
 0x2b2   : > { %17204 = vst [vmem:[#allocation85_spill] sm:$0xff] %v13337_v18  ;;  %17205 = vst [vmem:[#allocation86_spill] sm:$0xff] %v13340_v47  ;;  %2579 = vperm.xlu1 %11013, %v13200_v58   ;;  %2594 = vperm.xlu0 %11014, %v13239_v27   ;;  %11039 = vpow2.f32 %v2359_v39 }
 0x2b3   : > { %4485 = vst.msk [vmem:[#allocation2 + $0x188] sm:$0xff] %vm4435_vm3, %v13337_v18  ;;  %4484 = vst.msk [vmem:[#allocation2 + $0x180] sm:$0xff] %vm4435_vm3, %v13340_v47  ;;  %v2134_v7 = vpop.xlane.xlu1 %2133  ;;  %v2132_v23 = vpop.xlane.xlu0 %2131 }
 0x2b4   : > { %v13363_v49 = vmax.f32 %v13342_v63, %v2134_v7  ;;  %v13366_v22 = vmax.f32 %v13344_v53, %v2132_v23  ;;  %17209 = vst [vmem:[#allocation90_spill] sm:$0xff] %v13368_v24  ;;  %v13384_v7 = vpop.eup %11031  ;;  %v2365_v23 = vmul.f32 1.442695, %v2278_v50  ;;  %v13394_v63 = vld [vmem:[#allocation2 + $0x128] sm:$0xff] }
 0x2b5   : > { %17212 = vst [vmem:[#allocation93_spill] sm:$0xff] %v13384_v7  ;;  %v13392_v53 = vpop.eup %11033  ;;  %17216 = vst [vmem:[#allocation97_spill] sm:$0xff] %v13394_v63 }
 0x2b6   : > { %4471 = vst.msk [vmem:[#allocation2 + $0x118] sm:$0xff] %vm4435_vm3, %v13363_v49  ;;  %4470 = vst.msk [vmem:[#allocation2 + $0x110] sm:$0xff] %vm4435_vm3, %v13366_v22  ;;  %3355 = vperm.xlu1 %11013, %v13358_v4   ;;  %3370 = vperm.xlu0 %11014, %v13368_v24   ;;  %v13396_v4 = vld [vmem:[#allocation2 + $0x120] sm:$0xff]  ;;  %11041 = vpow2.f32 %v2365_v23  ;;  %v2261_v23 = vsub.f32 %v13084_v40, %v13098_v8  ;;  %v2264_v24 = vsub.f32 %v13119_v35, %v13133_v37 }
 0x2b7   : > { %v2166_v46 = vpop.xlane.xlu1 %2165  ;;  %v2164_v62 = vpop.xlane.xlu0 %2163  ;;  %17215 = vst [vmem:[#allocation96_spill] sm:$0xff] %v13392_v53  ;;  %17217 = vst [vmem:[#allocation98_spill] sm:$0xff] %v13396_v4  ;;  %v2277_v8 = vsub.f32 %v13103_v38, %v13116_v21 }
 0x2b8   : > { %v13387_v44 = vmax.f32 %v13370_v2, %v2166_v46  ;;  %v13390_v19 = vmax.f32 %v13372_v17, %v2164_v62  ;;  %v13438_v17 = vld [vmem:[#allocation2 + $0x138] sm:$0xff]  ;;  %v2331_v35 = vmul.f32 1.442695, %v2261_v23  ;;  %v2337_v2 = vmul.f32 1.442695, %v2264_v24 }
 0x2b9   : > { %17222 = vst [vmem:[#allocation103_spill] sm:$0xff] %v13438_v17  ;;  %v13466_v23 = vld [vmem:[#allocation2 + $0x1b8] sm:$0xff]  ;;  %v2363_v24 = vmul.f32 1.442695, %v2277_v8 }
 0x2ba   : > { %17213 = vst [vmem:[#allocation94_spill] sm:$0xff] %v13387_v44  ;;  %17214 = vst [vmem:[#allocation95_spill] sm:$0xff] %v13390_v19  ;;  %3435 = vperm.xlu1 %11013, %v13384_v7   ;;  %3450 = vperm.xlu0 %11014, %v13392_v53   ;;  %v13440_v7 = vld [vmem:[#allocation2 + $0x130] sm:$0xff]  ;;  %11043 = vpow2.f32 %v2331_v35  ;;  %v13508_v35 = vld [vmem:[#allocation2 + $0x1c0] sm:$0xff] }
 0x2bb   : > { %4487 = vst.msk [vmem:[#allocation2 + $0x198] sm:$0xff] %vm4435_vm3, %v13387_v44  ;;  %4486 = vst.msk [vmem:[#allocation2 + $0x190] sm:$0xff] %vm4435_vm3, %v13390_v19  ;;  %v2138_v50 = vpop.xlane.xlu1 %2137  ;;  %v2136_v61 = vpop.xlane.xlu0 %2135  ;;  %11045 = vpow2.f32 %v2337_v2 }
 0x2bc   : > { %v13409_v46 = vmax.f32 %v13394_v63, %v2138_v50  ;;  %v13412_v62 = vmax.f32 %v13396_v4, %v2136_v61  ;;  %17223 = vst [vmem:[#allocation104_spill] sm:$0xff] %v13440_v7  ;;  %17226 = vst [vmem:[#allocation107_spill] sm:$0xff] %v13466_v23  ;;  %v13468_v63 = vld [vmem:[#allocation2 + $0x1b0] sm:$0xff]  ;;  %11047 = vpow2.f32 %v2363_v24 }
 0x2bd   : > { %17227 = vst [vmem:[#allocation108_spill] sm:$0xff] %v13468_v63  ;;  %17235 = vst [vmem:[#allocation116_spill] sm:$0xff] %v13508_v35 }
 0x2be   : > { %4473 = vst.msk [vmem:[#allocation2 + $0x128] sm:$0xff] %vm4435_vm3, %v13409_v46  ;;  %4472 = vst.msk [vmem:[#allocation2 + $0x120] sm:$0xff] %vm4435_vm3, %v13412_v62  ;;  %2509 = vperm.xlu1 %11013, %v13218_v59   ;;  %2524 = vperm.xlu0 %11014, %v13267_v48  }
 0x2bf   : > { %v2170_v50 = vpop.xlane.xlu1 %2169  ;;  %v2168_v61 = vpop.xlane.xlu0 %2167 }
 0x2c0   : > { %v13433_v53 = vmax.f32 %v13414_v41, %v2170_v50  ;;  %v13436_v39 = vmax.f32 %v13416_v54, %v2168_v61  ;;  %v13454_v61 = vpop.eup %11035  ;;  %v2280_v41 = vsub.f32 %v13138_v51, %v13155_v45 }
 0x2c1   : > { %17224 = vst [vmem:[#allocation105_spill] sm:$0xff] %v13454_v61  ;;  %v13464_v4 = vpop.eup %11037 }
 0x2c2   : > { %17220 = vst [vmem:[#allocation101_spill] sm:$0xff] %v13433_v53  ;;  %17221 = vst [vmem:[#allocation102_spill] sm:$0xff] %v13436_v39  ;;  %2589 = vperm.xlu1 %11013, %v13242_v55   ;;  %2604 = vperm.xlu0 %11014, %v13291_v57   ;;  %v13478_v45 = vpop.eup %11039 }
 0x2c3   : > { %4489 = vst.msk [vmem:[#allocation2 + $0x1a8] sm:$0xff] %vm4435_vm3, %v13433_v53  ;;  %4488 = vst.msk [vmem:[#allocation2 + $0x1a0] sm:$0xff] %vm4435_vm3, %v13436_v39  ;;  %v2142_v37 = vpop.xlane.xlu1 %2141  ;;  %v2140_v50 = vpop.xlane.xlu0 %2139 }
 0x2c4   : > { %v13459_v40 = vmax.f32 %v13438_v17, %v2142_v37  ;;  %v13462_v54 = vmax.f32 %v13440_v7, %v2140_v50  ;;  %17225 = vst [vmem:[#allocation106_spill] sm:$0xff] %v13464_v4  ;;  %17228 = vst [vmem:[#allocation109_spill] sm:$0xff] %v13478_v45  ;;  %v2369_v37 = vmul.f32 1.442695, %v2280_v41  ;;  %v13486_v7 = vpop.eup %11041 }
 0x2c5   : > { %17231 = vst [vmem:[#allocation112_spill] sm:$0xff] %v13486_v7 }
 0x2c6   : > { %4475 = vst.msk [vmem:[#allocation2 + $0x138] sm:$0xff] %vm4435_vm3, %v13459_v40  ;;  %4474 = vst.msk [vmem:[#allocation2 + $0x130] sm:$0xff] %vm4435_vm3, %v13462_v54  ;;  %3365 = vperm.xlu1 %11013, %v13454_v61   ;;  %3380 = vperm.xlu0 %11014, %v13464_v4   ;;  %v13488_v61 = vld [vmem:[#allocation2 + $0x148] sm:$0xff]  ;;  %v13490_v4 = vld [vmem:[#allocation2 + $0x140] sm:$0xff]  ;;  %11049 = vpow2.f32 %v2369_v37 }
 0x2c7   : > { %v2174_v21 = vpop.xlane.xlu1 %2173  ;;  %v2172_v51 = vpop.xlane.xlu0 %2171  ;;  %17232 = vst [vmem:[#allocation113_spill] sm:$0xff] %v13488_v61  ;;  %17233 = vst [vmem:[#allocation114_spill] sm:$0xff] %v13490_v4 }
 0x2c8   : > { %v13481_v50 = vmax.f32 %v13466_v23, %v2174_v21  ;;  %v13484_v38 = vmax.f32 %v13468_v63, %v2172_v51  ;;  %v13506_v51 = vld [vmem:[#allocation2 + $0x1c8] sm:$0xff]  ;;  %v13511_v63 = vld [vmem:[%s12255_s29 + $0x178] sm:$0xff]  ;;  %v13532_v23 = vld [vmem:[#allocation2 + $0x150] sm:$0xff] }
 0x2c9   : > { %17234 = vst [vmem:[#allocation115_spill] sm:$0xff] %v13506_v51  ;;  %10371 = vmatprep.subr.mxu0 %v13511_v63  ;;  %17239 = vst [vmem:[#allocation120_spill] sm:$0xff] %v13532_v23 }
 0x2ca   : > { %17229 = vst [vmem:[#allocation110_spill] sm:$0xff] %v13481_v50  ;;  %17230 = vst [vmem:[#allocation111_spill] sm:$0xff] %v13484_v38  ;;  %3445 = vperm.xlu1 %11013, %v13478_v45   ;;  %3460 = vperm.xlu0 %11014, %v13486_v7   ;;  %v13530_v45 = vld [vmem:[#allocation2 + $0x158] sm:$0xff] }
 0x2cb   : > { %4491 = vst.msk [vmem:[#allocation2 + $0x1b8] sm:$0xff] %vm4435_vm3, %v13481_v50  ;;  %4490 = vst.msk [vmem:[#allocation2 + $0x1b0] sm:$0xff] %vm4435_vm3, %v13484_v38  ;;  %v2146_v2 = vpop.xlane.xlu1 %2145  ;;  %v2144_v41 = vpop.xlane.xlu0 %2143 }
 0x2cc   : > { %v13501_v8 = vmax.f32 %v13488_v61, %v2146_v2  ;;  %v13504_v21 = vmax.f32 %v13490_v4, %v2144_v41  ;;  %v2266_v2 = vsub.f32 %v13160_v32, %v13177_v0  ;;  %17238 = vst [vmem:[#allocation119_spill] sm:$0xff] %v13530_v45  ;;  %v13535_v4 = vld [vmem:[%s12255_s29 + $0x1f8] sm:$0xff]  ;;  %v17240_v32 = vsub.f32 %v13121_v34, %v13136_v43  ;;  %v13563_v43 = vld [vmem:[#allocation2 + $0x1d0] sm:$0xff] }
 0x2cd   : > { %10427 = vmatprep.subr.mxu1 %v13535_v4  ;;  %v13561_v34 = vld [vmem:[#allocation2 + $0x1d8] sm:$0xff]  ;;  %17244 = vst [vmem:[#allocation124_spill] sm:$0xff] %v13563_v43 }
 0x2ce   : > { %4477 = vst.msk [vmem:[#allocation2 + $0x148] sm:$0xff] %vm4435_vm3, %v13501_v8  ;;  %4476 = vst.msk [vmem:[#allocation2 + $0x140] sm:$0xff] %vm4435_vm3, %v13504_v21  ;;  %2519 = vperm.xlu1 %11013, %v13270_v20   ;;  %2614 = vperm.xlu0 %11014, %v13313_v52   ;;  %v2335_v0 = vmul.f32 1.442695, %v17240_v32  ;;  %v2341_v61 = vmul.f32 1.442695, %v2266_v2 }
 0x2cf   : > { %v2178_v24 = vpop.xlane.xlu1 %2177  ;;  %v2176_v37 = vpop.xlane.xlu0 %2175  ;;  %17243 = vst [vmem:[#allocation123_spill] sm:$0xff] %v13561_v34 }
 0x2d0   : > { %v13525_v41 = vmax.f32 %v13506_v51, %v2178_v24  ;;  %v13528_v7 = vmax.f32 %v13508_v35, %v2176_v37  ;;  %v13549_v35 = vpop.eup %11043  ;;  %v2282_v51 = vsub.f32 %v13184_v28, %v13197_v5  ;;  %11051 = vpow2.f32 %v2335_v0  ;;  %v13586_v0 = vld [vmem:[#allocation2 + $0x160] sm:$0xff] }
 0x2d1   : > { %17241 = vst [vmem:[#allocation121_spill] sm:$0xff] %v13549_v35  ;;  %v17245_v28 = vsub.f32 %v13140_v33, %v13158_v42  ;;  %11053 = vpow2.f32 %v2341_v61  ;;  %17251 = vst [vmem:[#allocation130_spill] sm:$0xff] %v13586_v0 }
 0x2d2   : > { %17236 = vst [vmem:[#allocation117_spill] sm:$0xff] %v13525_v41  ;;  %17237 = vst [vmem:[#allocation118_spill] sm:$0xff] %v13528_v7  ;;  %2599 = vperm.xlu1 %11013, %v13294_v29   ;;  %2694 = vperm.xlu0 %11014, %v13337_v18   ;;  %v13559_v18 = vpop.eup %11045 }
 0x2d3   : > { %4493 = vst.msk [vmem:[#allocation2 + $0x1c8] sm:$0xff] %vm4435_vm3, %v13525_v41  ;;  %4492 = vst.msk [vmem:[#allocation2 + $0x1c0] sm:$0xff] %vm4435_vm3, %v13528_v7  ;;  %v2150_v24 = vpop.xlane.xlu1 %2149  ;;  %v2148_v37 = vpop.xlane.xlu0 %2147  ;;  %v2367_v5 = vmul.f32 1.442695, %v17245_v28  ;;  %v13600_v28 = vld [vmem:[#allocation2 + $0x1e8] sm:$0xff] }
 0x2d4   : > { %v13554_v17 = vmax.f32 %v13530_v45, %v2150_v24  ;;  %v13557_v7 = vmax.f32 %v13532_v23, %v2148_v37  ;;  %17242 = vst [vmem:[#allocation122_spill] sm:$0xff] %v13559_v18  ;;  %v13574_v24 = vpop.eup %11047  ;;  %v2373_v37 = vmul.f32 1.442695, %v2282_v51  ;;  %17253 = vst [vmem:[#allocation132_spill] sm:$0xff] %v13600_v28 }
 0x2d5   : > { %17246 = vst [vmem:[#allocation125_spill] sm:$0xff] %v13574_v24  ;;  %11055 = vpow2.f32 %v2367_v5 }
 0x2d6   : > { %4479 = vst.msk [vmem:[#allocation2 + $0x158] sm:$0xff] %vm4435_vm3, %v13554_v17  ;;  %4478 = vst.msk [vmem:[#allocation2 + $0x150] sm:$0xff] %vm4435_vm3, %v13557_v7  ;;  %3375 = vperm.xlu1 %11013, %v13549_v35   ;;  %3390 = vperm.xlu0 %11014, %v13559_v18   ;;  %v13582_v35 = vpop.eup %11049  ;;  %v13584_v18 = vld [vmem:[#allocation2 + $0x168] sm:$0xff]  ;;  %11057 = vpow2.f32 %v2373_v37 }
 0x2d7   : > { %v2182_v2 = vpop.xlane.xlu1 %2181  ;;  %v2180_v32 = vpop.xlane.xlu0 %2179  ;;  %17249 = vst [vmem:[#allocation128_spill] sm:$0xff] %v13582_v35  ;;  %17250 = vst [vmem:[#allocation129_spill] sm:$0xff] %v13584_v18 }
 0x2d8   : > { %v13577_v45 = vmax.f32 %v13561_v34, %v2182_v2  ;;  %v13580_v23 = vmax.f32 %v13563_v43, %v2180_v32  ;;  %v13602_v2 = vld [vmem:[#allocation2 + $0x1e0] sm:$0xff] }
 0x2d9   : > { %17254 = vst [vmem:[#allocation133_spill] sm:$0xff] %v13602_v2 }
 0x2da   : > { %17247 = vst [vmem:[#allocation126_spill] sm:$0xff] %v13577_v45  ;;  %17248 = vst [vmem:[#allocation127_spill] sm:$0xff] %v13580_v23  ;;  %3455 = vperm.xlu1 %11013, %v13574_v24   ;;  %3470 = vperm.xlu0 %11014, %v13582_v35   ;;  %v13618_v35 = vld [vmem:[#allocation2 + $0x170] sm:$0xff] }
 0x2db   : > { %4495 = vst.msk [vmem:[#allocation2 + $0x1d8] sm:$0xff] %vm4435_vm3, %v13577_v45  ;;  %4494 = vst.msk [vmem:[#allocation2 + $0x1d0] sm:$0xff] %vm4435_vm3, %v13580_v23  ;;  %v2154_v33 = vpop.xlane.xlu1 %2153  ;;  %v2152_v42 = vpop.xlane.xlu0 %2151 }
 0x2dc   : > { %v13595_v61 = vmax.f32 %v13584_v18, %v2154_v33  ;;  %v13598_v51 = vmax.f32 %v13586_v0, %v2152_v42  ;;  %v13616_v42 = vld [vmem:[#allocation2 + $0x178] sm:$0xff]  ;;  %17257 = vst [vmem:[#allocation136_spill] sm:$0xff] %v13618_v35 }
 0x2dd   : > { %v13629_v24 = vpop.eup %11051 }
 0x2de   : > { %17252 = vst [vmem:[#allocation131_spill] sm:$0xff] %v13598_v51  ;;  %4481 = vst.msk [vmem:[#allocation2 + $0x168] sm:$0xff] %vm4435_vm3, %v13595_v61  ;;  %2609 = vperm.xlu1 %11013, %v13316_v6   ;;  %2624 = vperm.xlu0 %11014, %v13363_v49  }
 0x2df   : > { %4480 = vst.msk [vmem:[#allocation2 + $0x160] sm:$0xff] %vm4435_vm3, %v13598_v51  ;;  %v2186_v5 = vpop.xlane.xlu1 %2185  ;;  %v2184_v32 = vpop.xlane.xlu0 %2183  ;;  %17259 = vst [vmem:[#allocation137_spill] sm:$0xff] %v13629_v24 }
 0x2e0   : > { %v13611_v37 = vmax.f32 %v13600_v28, %v2186_v5  ;;  %v13614_v33 = vmax.f32 %v13602_v2, %v2184_v32  ;;  %v17258_v5 = vsub.f32 %v13162_v31, %v13180_v30  ;;  %v17260_v28 = vsub.f32 %v13202_v9, %v13215_v1  ;;  %v13644_v30 = vld [vmem:[#allocation2 + $0x1f0] sm:$0xff] }
 0x2e1   : > { %17264 = vst [vmem:[#allocation141_spill] sm:$0xff] %v13644_v30  ;;  %v17265_v31 = vsub.f32 %v13186_v36, %v13200_v58  ;;  %v17271_v58 = vsub.f32 %v13204_v56, %v13218_v59 }
 0x2e2   : > { %17255 = vst [vmem:[#allocation134_spill] sm:$0xff] %v13611_v37  ;;  %17256 = vst [vmem:[#allocation135_spill] sm:$0xff] %v13614_v33  ;;  %2689 = vperm.xlu1 %11013, %v13340_v47   ;;  %2704 = vperm.xlu0 %11014, %v13387_v44   ;;  %v2339_v43 = vmul.f32 1.442695, %v17258_v5  ;;  %v2345_v34 = vmul.f32 1.442695, %v17260_v28  ;;  %v13640_v47 = vpop.eup %11053  ;;  %v17267_v5 = vsub.f32 %v13220_v3, %v13239_v27 }
 0x2e3   : > { %4497 = vst.msk [vmem:[#allocation2 + $0x1e8] sm:$0xff] %vm4435_vm3, %v13611_v37  ;;  %4496 = vst.msk [vmem:[#allocation2 + $0x1e0] sm:$0xff] %vm4435_vm3, %v13614_v33  ;;  %v2158_v32 = vpop.xlane.xlu1 %2157  ;;  %v2156_v2 = vpop.xlane.xlu0 %2155  ;;  %v13642_v44 = vld [vmem:[#allocation2 + $0x1f8] sm:$0xff]  ;;  %v2371_v9 = vmul.f32 1.442695, %v17265_v31  ;;  %v17272_v31 = vsub.f32 %v13246_v25, %v13267_v48 }
 0x2e4   : > { %v13635_v0 = vmax.f32 %v13616_v42, %v2158_v32  ;;  %v13638_v18 = vmax.f32 %v13618_v35, %v2156_v2  ;;  %17262 = vst [vmem:[#allocation139_spill] sm:$0xff] %v13640_v47  ;;  %17263 = vst [vmem:[#allocation140_spill] sm:$0xff] %v13642_v44  ;;  %11059 = vpow2.f32 %v2339_v43  ;;  %v13655_v2 = vpop.eup %11055  ;;  %v2377_v32 = vmul.f32 1.442695, %v17267_v5 }
 0x2e5   : > { %17266 = vst [vmem:[#allocation142_spill] sm:$0xff] %v13655_v2  ;;  %11061 = vpow2.f32 %v2345_v34  ;;  %v13666_v43 = vpop.eup %11057  ;;  %v2343_v3 = vmul.f32 1.442695, %v17271_v58 }
 0x2e6   : > { %17261 = vst [vmem:[#allocation138_spill] sm:$0xff] %v13638_v18  ;;  %4483 = vst.msk [vmem:[#allocation2 + $0x178] sm:$0xff] %vm4435_vm3, %v13635_v0  ;;  %3385 = vperm.xlu1 %11013, %v13629_v24   ;;  %3400 = vperm.xlu0 %11014, %v13640_v47   ;;  %11063 = vpow2.f32 %v2371_v9 }
 0x2e7   : > { %4482 = vst.msk [vmem:[#allocation2 + $0x170] sm:$0xff] %vm4435_vm3, %v13638_v18  ;;  %v2190_v1 = vpop.xlane.xlu1 %2189  ;;  %v2188_v28 = vpop.xlane.xlu0 %2187  ;;  %17270 = vst [vmem:[#allocation145_spill] sm:$0xff] %v13666_v43  ;;  %11065 = vpow2.f32 %v2377_v32 }
 0x2e8   : > { %v13661_v24 = vmax.f32 %v13642_v44, %v2190_v1  ;;  %v13664_v47 = vmax.f32 %v13644_v30, %v2188_v28  ;;  %v2349_v1 = vmul.f32 1.442695, %v17272_v31  ;;  %11067 = vpow2.f32 %v2343_v3 }
 0x2ea   : > { %17268 = vst [vmem:[#allocation143_spill] sm:$0xff] %v13661_v24  ;;  %17269 = vst [vmem:[#allocation144_spill] sm:$0xff] %v13664_v47  ;;  %3465 = vperm.xlu1 %11013, %v13655_v2   ;;  %3480 = vperm.xlu0 %11014, %v13666_v43   ;;  %11069 = vpow2.f32 %v2349_v1 }
 0x2eb   : > { %4499 = vst.msk [vmem:[#allocation2 + $0x1f8] sm:$0xff] %vm4435_vm3, %v13661_v24  ;;  %4498 = vst.msk [vmem:[#allocation2 + $0x1f0] sm:$0xff] %vm4435_vm3, %v13664_v47  ;;  %v2455_v27 = vpop.permute.xlu1 %2454 }
 0x2ec   : > { %v2768_v9 = vsub.f32 %v12776_v10, %v2455_v27 }
 0x2ee   : > { %2619 = vperm.xlu1 %11013, %v13366_v22   ;;  %2634 = vperm.xlu0 %11014, %v13409_v46   ;;  %v2833_v48 = vmul.f32 1.442695, %v2768_v9 }
 0x2ef   : > { %v2535_v36 = vpop.permute.xlu0 %2534 }
 0x2f0   : > { %v2784_v34 = vsub.f32 %v12778_v11, %v2535_v36 }
 0x2f1   : > { %v2530_v28 = vpop.permute.xlu1 %2529  ;;  %v13687_v30 = vpop.eup %11059 }
 0x2f2   : > { %v2783_v5 = vsub.f32 %v12784_v13, %v2530_v28  ;;  %2699 = vperm.xlu1 %11013, %v13390_v19   ;;  %2714 = vperm.xlu0 %11014, %v13433_v53   ;;  %v2865_v32 = vmul.f32 1.442695, %v2784_v34  ;;  %17273 = vst [vmem:[#allocation146_spill] sm:$0xff] %v13687_v30  ;;  %v13690_v59 = vpop.eup %11061  ;;  %v17275_v13 = vsub.f32 %v13222_v60, %v13242_v55 }
 0x2f3   : > { %v2450_v43 = vpop.permute.xlu0 %2449  ;;  %17274 = vst [vmem:[#allocation147_spill] sm:$0xff] %v13690_v59  ;;  %v13698_v58 = vpop.eup %11063 }
 0x2f4   : > { %v2863_v56 = vmul.f32 1.442695, %v2783_v5  ;;  %v2767_v11 = vsub.f32 %v12782_v12, %v2450_v43  ;;  %v2375_v27 = vmul.f32 1.442695, %v17275_v13  ;;  %17276 = vst [vmem:[#allocation148_spill] sm:$0xff] %v13698_v58  ;;  %v17277_v12 = vsub.f32 %v13274_v26, %v13291_v57  ;;  %v13703_v34 = vpop.eup %11065  ;;  %v17279_v57 = vld [vmem:[#allocation16_spill] sm:$0xff] }
 0x2f5   : > { %v2465_v25 = vpop.permute.xlu1 %2464  ;;  %17278 = vst [vmem:[#allocation149_spill] sm:$0xff] %v13703_v34  ;;  %v13712_v5 = vpop.eup %11067  ;;  %v17284_v13 = vld [vmem:[#allocation17_spill] sm:$0xff] }
 0x2f6   : > { %11071 = vpow2.f32 %v2863_v56  ;;  %v2831_v10 = vmul.f32 1.442695, %v2767_v11  ;;  %3395 = vperm.xlu1 %11013, %v13687_v30   ;;  %3410 = vperm.xlu0 %11014, %v13690_v59   ;;  %v2770_v36 = vsub.f32 %v12786_v14, %v2465_v25  ;;  %v2381_v43 = vmul.f32 1.442695, %v17277_v12  ;;  %17280 = vst [vmem:[#allocation16_spill] sm:$0xff] %v13712_v5  ;;  %v17282_v25 = vld [vmem:[#allocation75_spill] sm:$0xff] }
 0x2f7   : > { %11073 = vpow2.f32 %v2865_v32  ;;  %v2545_v3 = vpop.permute.xlu0 %2544  ;;  %v13714_v11 = vpop.eup %11069  ;;  %v17285_v12 = vld [vmem:[#allocation81_spill] sm:$0xff] }
 0x2f8   : > { %11075 = vpow2.f32 %v2831_v10  ;;  %v2837_v14 = vmul.f32 1.442695, %v2770_v36  ;;  %v2786_v60 = vsub.f32 %v12790_v15, %v2545_v3  ;;  %17281 = vst [vmem:[#allocation150_spill] sm:$0xff] %v13714_v11 }
 0x2f9   : > { %v2460_v31 = vpop.permute.xlu1 %2459  ;;  %11077 = vpow2.f32 %v2833_v48  ;;  %v17283_v48 = vsub.f32 %v17282_v25, %v13270_v20  ;;  %v3789_v20 = vld [vmem:[%s12255_s29 + $0x1f0] sm:$0xff] }
 0x2fa   : > { %v2769_v1 = vsub.f32 %v12792_v16, %v2460_v31  ;;  %3475 = vperm.xlu1 %11013, %v13698_v58   ;;  %3490 = vperm.xlu0 %11014, %v13703_v34   ;;  %11079 = vpow2.f32 %v2375_v27  ;;  %v2869_v16 = vmul.f32 1.442695, %v2786_v60  ;;  %v17287_v60 = vld [vmem:[#allocation18_spill] sm:$0xff] }
 0x2fb   : > { %11081 = vpow2.f32 %v2381_v43  ;;  %v2347_v10 = vmul.f32 1.442695, %v17283_v48  ;;  %v17286_v43 = vsub.f32 %v17285_v12, %v13313_v52 }
 0x2fc   : > { %v2835_v55 = vmul.f32 1.442695, %v2769_v1 }
 0x2fd   : > { %v2540_v26 = vpop.permute.xlu1 %2539  ;;  %v2555_v32 = vpop.permute.xlu0 %2554  ;;  %v2385_v3 = vmul.f32 1.442695, %v17286_v43  ;;  %v3772_v43 = vld [vmem:[%s12255_s29 + $0x168] sm:$0xff] }
 0x2fe   : > { %11083 = vpow2.f32 %v2835_v55  ;;  %v2785_v28 = vsub.f32 %v17279_v57, %v2540_v26  ;;  %2629 = vperm.xlu1 %11013, %v13412_v62   ;;  %2644 = vperm.xlu0 %11014, %v13459_v40   ;;  %v17288_v26 = vld [vmem:[#allocation19_spill] sm:$0xff] }
 0x2ff   : > { %11085 = vpow2.f32 %v2837_v14  ;;  %v2788_v57 = vsub.f32 %v17288_v26, %v2555_v32  ;;  %v3771_v26 = vld [vmem:[%s12255_s29 + $0x160] sm:$0xff] }
 0x300   : > { %v2867_v9 = vmul.f32 1.442695, %v2785_v28 }
 0x301   : > { %v2475_v56 = vpop.permute.xlu1 %2474 }
 0x302   : > { %11087 = vpow2.f32 %v2867_v9  ;;  %2709 = vperm.xlu1 %11013, %v13436_v39   ;;  %2724 = vperm.xlu0 %11014, %v13481_v50   ;;  %v2772_v27 = vsub.f32 %v17284_v13, %v2475_v56  ;;  %v17290_v9 = vld [vmem:[#allocation78_spill] sm:$0xff] }
 0x303   : > { %v13718_v15 = vpop.eup %11071  ;;  %11089 = vpow2.f32 %v2869_v16  ;;  %v17291_v56 = vsub.f32 %v17290_v9, %v13294_v29  ;;  %v3773_v13 = vld [vmem:[%s12255_s29 + $0x170] sm:$0xff] }
 0x304   : > { %v13724_v36 = vpop.eup %11073  ;;  %10347 = vmatprep.mubr.f32.mxu1 %v13718_v15  ;;  %11091 = vpow2.f32 %v2347_v10  ;;  %v2841_v28 = vmul.f32 1.442695, %v2772_v27  ;;  %v3788_v10 = vld [vmem:[%s12255_s29 + $0x1e8] sm:$0xff]  ;;  %v17349_v50 = vld [vmem:[#allocation42_spill] sm:$0xff] }
 0x305   : > { %v13730_v31 = vpop.eup %11075  ;;  %v2470_v1 = vpop.permute.xlu1 %2469  ;;  %10348 = vmatmul.mubr.f32.vlgmr.msra.gmra.mxu1 %v13724_v36  ;;  %v2379_v25 = vmul.f32 1.442695, %v17291_v56  ;;  %11093 = vpow2.f32 %v2385_v3 }
 0x306   : > { %v13733_v14 = vpop.permute.xlu0 %2564  ;;  %v2771_v55 = vsub.f32 %v17287_v60, %v2470_v1  ;;  %3405 = vperm.xlu1 %11013, %v13712_v5   ;;  %3420 = vperm.xlu0 %11014, %v13714_v11   ;;  %v13739_v52 = vpop.eup %11077  ;;  %v2873_v1 = vmul.f32 1.442695, %v2788_v57 }
 0x307   : > { %10291 = vmatprep.mubr.f32.mxu0 %v13730_v31  ;;  %10428 = vmatpush3.msra.mxu1 %v13535_v4  ;;  %v13744_v16 = vpop.eup %11079  ;;  %v17293_v4 = vld [vmem:[#allocation20_spill] sm:$0xff] }
 0x308   : > { %17289 = vst [vmem:[#allocation75_spill] sm:$0xff] %v13744_v16  ;;  %v2839_v48 = vmul.f32 1.442695, %v2771_v55  ;;  %10292 = vmatmul.mubr.f32.vlgmr.msra.gmra.mxu0 %v13739_v52  ;;  %10429 = vmatprep.subr.mxu1 %v3789_v20  ;;  %v13752_v32 = vpop.eup %11081 }
 0x309   : > { %17292 = vst [vmem:[#allocation17_spill] sm:$0xff] %v13752_v32  ;;  %v2550_v27 = vpop.permute.xlu1 %2549  ;;  %10372 = vmatpush3.msra.mxu0 %v13511_v63  ;;  %10430 = vmatpush3.msra.mxu1 %v3789_v20 }
 0x30a   : > { %v13754_v12 = vpop.permute.xlu0 %2494  ;;  %11095 = vpow2.f32 %v2839_v48  ;;  %v2787_v29 = vsub.f32 %v17293_v4, %v2550_v27  ;;  %3485 = vperm.xlu1 %11013, %v13744_v16   ;;  %3500 = vperm.xlu0 %11014, %v13752_v32   ;;  %v3770_v27 = vld [vmem:[%s12255_s29 + $0x158] sm:$0xff]  ;;  %v3787_v4 = vld [vmem:[%s12255_s29 + $0x1e0] sm:$0xff]  ;;  %v17300_v32 = vld [vmem:[#allocation82_spill] sm:$0xff] }
 0x30b   : > { %v13761_v3 = vpop.eup %11083  ;;  %11097 = vpow2.f32 %v2841_v28  ;;  %10373 = vmatprep.subr.mxu0 %v3773_v13  ;;  %10431 = vmatprep.subr.mxu1 %v3788_v10  ;;  %v17294_v28 = vld [vmem:[#allocation21_spill] sm:$0xff] }
 0x30c   : > { %v13763_v60 = vpop.eup %11085  ;;  %11099 = vpow2.f32 %v2379_v25  ;;  %v2871_v63 = vmul.f32 1.442695, %v2787_v29  ;;  %10294 = vmatprep.mubr.f32.mxu0 %v13761_v3  ;;  %10374 = vmatpush3.msra.mxu0 %v3773_v13  ;;  %v17295_v25 = vld [vmem:[#allocation87_spill] sm:$0xff] }
 0x30d   : > { %v2485_v20 = vpop.permute.xlu1 %2484  ;;  %10295 = vmatmul.mubr.f32.gmra.mxu0 %v13763_v60  ;;  %10375 = vmatprep.subr.mxu0 %v3772_v43  ;;  %v17296_v48 = vsub.f32 %v17295_v25, %v13363_v49  ;;  %v3786_v49 = vld [vmem:[%s12255_s29 + $0x1d8] sm:$0xff] }
 0x30e   : > { %v13767_v55 = vpop.permute.xlu0 %2574  ;;  %11101 = vpow2.f32 %v2871_v63  ;;  %2639 = vperm.xlu1 %11013, %v13462_v54   ;;  %2654 = vperm.xlu0 %11014, %v13501_v8   ;;  %v2774_v9 = vsub.f32 %v17294_v28, %v2485_v20  ;;  %v17298_v20 = vld [vmem:[#allocation23_spill] sm:$0xff] }
 0x30f   : > { %v13772_v57 = vpop.eup %11087  ;;  %11103 = vpow2.f32 %v2873_v1  ;;  %10376 = vmatpush3.msra.mxu0 %v3772_v43  ;;  %10432 = vmatpush3.msra.mxu1 %v3788_v10  ;;  %v2389_v13 = vmul.f32 1.442695, %v17296_v48  ;;  %v17297_v43 = vld [vmem:[#allocation22_spill] sm:$0xff]  ;;  %v2790_v28 = vsub.f32 %v17298_v20, %v13733_v14  ;;  %v3768_v14 = vld [vmem:[%s12255_s29 + $0x148] sm:$0xff] }
 0x310   : > { %v13775_v56 = vpop.eup %11089  ;;  %10350 = vmatprep.mubr.f32.mxu1 %v13772_v57  ;;  %10377 = vmatprep.subr.mxu0 %v3771_v26  ;;  %v3769_v10 = vld [vmem:[%s12255_s29 + $0x150] sm:$0xff]  ;;  %v2845_v25 = vmul.f32 1.442695, %v2774_v9  ;;  %v17303_v9 = vld [vmem:[#allocation24_spill] sm:$0xff] }
 0x311   : > { %v2480_v29 = vpop.permute.xlu1 %2479  ;;  %10351 = vmatmul.mubr.f32.gmra.mxu1 %v13775_v56  ;;  %10378 = vmatpush3.msra.mxu0 %v3771_v26  ;;  %v13793_v48 = vpop.eup %11091  ;;  %v17301_v26 = vsub.f32 %v17300_v32, %v13316_v6  ;;  %11105 = vpow2.f32 %v2389_v13  ;;  %v3785_v6 = vld [vmem:[%s12255_s29 + $0x1d0] sm:$0xff]  ;;  %v2877_v13 = vmul.f32 1.442695, %v2790_v28  ;;  %v3767_v28 = vld [vmem:[%s12255_s29 + $0x140] sm:$0xff] }
 0x312   : > { %v13784_v1 = vpop.permute.xlu0 %3430  ;;  %v2773_v63 = vsub.f32 %v17297_v43, %v2480_v29  ;;  %2719 = vperm.xlu1 %11013, %v13484_v38   ;;  %2734 = vperm.xlu0 %11014, %v13525_v41   ;;  %17299 = vst [vmem:[#allocation81_spill] sm:$0xff] %v13793_v48  ;;  %v13798_v11 = vpop.eup %11093 }
 0x313   : > { %10379 = vmatprep.subr.mxu0 %v3770_v27  ;;  %10433 = vmatprep.subr.mxu1 %v3787_v4  ;;  %v2383_v29 = vmul.f32 1.442695, %v17301_v26  ;;  %17302 = vst [vmem:[#allocation18_spill] sm:$0xff] %v13798_v11 }
 0x314   : > { %v2843_v43 = vmul.f32 1.442695, %v2773_v63  ;;  %10380 = vmatpush3.msra.mxu0 %v3770_v27  ;;  %10434 = vmatpush3.msra.mxu1 %v3787_v4  ;;  %v17304_v27 = vld [vmem:[#allocation25_spill] sm:$0xff] }
 0x315   : > { %v2560_v34 = vpop.permute.xlu1 %2559  ;;  %10381 = vmatprep.subr.mxu0 %v3769_v10  ;;  %10435 = vmatprep.subr.mxu1 %v3786_v49  ;;  %v2776_v4 = vsub.f32 %v17304_v27, %v13754_v12  ;;  %v17306_v12 = vld [vmem:[#allocation26_spill] sm:$0xff] }
 0x316   : > { %v13800_v59 = vpop.permute.xlu0 %2504  ;;  %11107 = vpow2.f32 %v2843_v43  ;;  %v2789_v20 = vsub.f32 %v17303_v9, %v2560_v34  ;;  %3415 = vperm.xlu1 %11013, %v13793_v48   ;;  %3510 = vperm.xlu0 %11014, %v13798_v11  }
 0x317   : > { %v13807_v32 = vpop.eup %11095  ;;  %11109 = vpow2.f32 %v2845_v25  ;;  %10382 = vmatpush3.msra.mxu0 %v3769_v10  ;;  %10436 = vmatpush3.msra.mxu1 %v3786_v49  ;;  %v2849_v25 = vmul.f32 1.442695, %v2776_v4 }
 0x318   : > { %v13811_v63 = vpop.eup %11097  ;;  %11111 = vpow2.f32 %v2383_v29  ;;  %v2875_v26 = vmul.f32 1.442695, %v2789_v20  ;;  %10297 = vmatprep.mubr.f32.mxu0 %v13807_v32  ;;  %10383 = vmatprep.subr.mxu0 %v3768_v14  ;;  %v17307_v29 = vld [vmem:[#allocation27_spill] sm:$0xff] }
 0x319   : > { %v13814_v34 = vpop.eup %11099  ;;  %v2490_v43 = vpop.permute.xlu1 %2489  ;;  %10298 = vmatmul.mubr.f32.gmra.mxu0 %v13811_v63  ;;  %10437 = vmatprep.subr.mxu1 %v3785_v6  ;;  %v2792_v20 = vsub.f32 %v17307_v29, %v13767_v55  ;;  %v17311_v29 = vld [vmem:[#allocation88_spill] sm:$0xff] }
 0x31a   : > { %17305 = vst [vmem:[#allocation19_spill] sm:$0xff] %v13814_v34  ;;  %v13817_v9 = vpop.permute.xlu0 %2584  ;;  %11113 = vpow2.f32 %v2875_v26  ;;  %v2775_v10 = vsub.f32 %v17306_v12, %v2490_v43  ;;  %3495 = vperm.xlu1 %11013, %v13814_v34   ;;  %2664 = vperm.xlu0 %11014, %v13554_v17   ;;  %v17308_v26 = vld [vmem:[#allocation97_spill] sm:$0xff]  ;;  %v3766_v34 = vld [vmem:[%s12255_s29 + $0x138] sm:$0xff] }
 0x31b   : > { %v13823_v49 = vpop.eup %11101  ;;  %11115 = vpow2.f32 %v2877_v13  ;;  %10384 = vmatpush3.msra.mxu0 %v3768_v14  ;;  %10438 = vmatpush3.msra.mxu1 %v3785_v6  ;;  %v17309_v11 = vsub.f32 %v17308_v26, %v13409_v46  ;;  %v3784_v13 = vld [vmem:[%s12255_s29 + $0x1c8] sm:$0xff]  ;;  %v17310_v14 = vld [vmem:[#allocation28_spill] sm:$0xff]  ;;  %v3765_v46 = vld [vmem:[%s12255_s29 + $0x130] sm:$0xff]  ;;  %v17312_v26 = vsub.f32 %v17311_v29, %v13366_v22 }
 0x31c   : > { %v13827_v27 = vpop.eup %11103  ;;  %v2847_v12 = vmul.f32 1.442695, %v2775_v10  ;;  %10353 = vmatprep.mubr.f32.mxu1 %v13823_v49  ;;  %10385 = vmatprep.subr.mxu0 %v3767_v28  ;;  %v2881_v10 = vmul.f32 1.442695, %v2792_v20  ;;  %v17314_v20 = vld [vmem:[#allocation118_spill] sm:$0xff]  ;;  %v3782_v22 = vld [vmem:[%s12255_s29 + $0x1b8] sm:$0xff] }
 0x31d   : > { %v2393_v43 = vmul.f32 1.442695, %v17309_v11  ;;  %v2570_v4 = vpop.permute.xlu1 %2569  ;;  %10354 = vmatmul.mubr.f32.gmra.mxu1 %v13827_v27  ;;  %10386 = vmatpush3.msra.mxu0 %v3767_v28  ;;  %v3783_v11 = vld [vmem:[%s12255_s29 + $0x1c0] sm:$0xff]  ;;  %v2387_v48 = vmul.f32 1.442695, %v17312_v26 }
 0x31e   : > { %v13836_v55 = vpop.permute.xlu0 %3345  ;;  %11117 = vpow2.f32 %v2847_v12  ;;  %v2791_v6 = vsub.f32 %v17310_v14, %v2570_v4  ;;  %2649 = vperm.xlu1 %11013, %v13504_v21   ;;  %2744 = vperm.xlu0 %11014, %v13577_v45   ;;  %v13846_v12 = vpop.eup %11105  ;;  %v3763_v26 = vld [vmem:[%s12255_s29 + $0x120] sm:$0xff] }
 0x31f   : > { %11119 = vpow2.f32 %v2849_v25  ;;  %10387 = vmatprep.subr.mxu0 %v3766_v34  ;;  %10439 = vmatprep.subr.mxu1 %v3784_v13  ;;  %17313 = vst [vmem:[#allocation78_spill] sm:$0xff] %v13846_v12  ;;  %v3764_v25 = vld [vmem:[%s12255_s29 + $0x128] sm:$0xff] }
 0x320   : > { %11121 = vpow2.f32 %v2393_v43  ;;  %v2879_v28 = vmul.f32 1.442695, %v2791_v6  ;;  %10388 = vmatpush3.msra.mxu0 %v3766_v34  ;;  %10440 = vmatpush3.msra.mxu1 %v3784_v13 }
 0x321   : > { %v13848_v4 = vpop.permute.xlu1 %3350  ;;  %10389 = vmatprep.subr.mxu0 %v3765_v46  ;;  %10441 = vmatprep.subr.mxu1 %v3783_v11 }
 0x322   : > { %v13850_v14 = vpop.permute.xlu0 %3360  ;;  %11123 = vpow2.f32 %v2879_v28  ;;  %2729 = vperm.xlu1 %11013, %v17314_v20   ;;  %3520 = vperm.xlu0 %11014, %v13846_v12   ;;  %v17317_v12 = vld [vmem:[#allocation103_spill] sm:$0xff]  ;;  %v17323_v20 = vld [vmem:[#allocation113_spill] sm:$0xff] }
 0x323   : > { %v13856_v43 = vpop.eup %11107  ;;  %11125 = vpow2.f32 %v2881_v10  ;;  %10390 = vmatpush3.msra.mxu0 %v3765_v46  ;;  %10442 = vmatpush3.msra.mxu1 %v3783_v11  ;;  %v3781_v46 = vld [vmem:[%s12255_s29 + $0x1b0] sm:$0xff]  ;;  %v17316_v11 = vld [vmem:[#allocation29_spill] sm:$0xff]  ;;  %v17318_v16 = vsub.f32 %v17317_v12, %v13459_v40 }
 0x324   : > { %v13858_v34 = vpop.eup %11109  ;;  %11127 = vpow2.f32 %v2387_v48  ;;  %10300 = vmatprep.mubr.f32.mxu0 %v13856_v43  ;;  %10391 = vmatprep.subr.mxu0 %v3764_v25  ;;  %v2778_v10 = vsub.f32 %v17316_v11, %v13800_v59  ;;  %v3780_v40 = vld [vmem:[%s12255_s29 + $0x1a8] sm:$0xff] }
 0x325   : > { %v13861_v13 = vpop.eup %11111  ;;  %v13863_v6 = vpop.permute.xlu1 %3425  ;;  %10301 = vmatmul.mubr.f32.gmra.mxu0 %v13858_v34  ;;  %10443 = vmatprep.subr.mxu1 %v3782_v22  ;;  %v2397_v5 = vmul.f32 1.442695, %v17318_v16 }
 0x326   : > { %17315 = vst [vmem:[#allocation20_spill] sm:$0xff] %v13861_v13  ;;  %v13866_v29 = vpop.permute.xlu0 %3440  ;;  %3505 = vperm.xlu1 %11013, %v13861_v13   ;;  %2674 = vperm.xlu0 %11014, %v13595_v61   ;;  %v17319_v13 = vld [vmem:[#allocation98_spill] sm:$0xff]  ;;  %v2853_v12 = vmul.f32 1.442695, %v2778_v10 }
 0x327   : > { %v13872_v48 = vpop.eup %11113  ;;  %10392 = vmatpush3.msra.mxu0 %v3764_v25  ;;  %10444 = vmatpush3.msra.mxu1 %v3782_v22  ;;  %v17320_v58 = vsub.f32 %v17319_v13, %v13412_v62  ;;  %v3762_v25 = vld [vmem:[%s12255_s29 + $0x118] sm:$0xff]  ;;  %v17321_v22 = vld [vmem:[#allocation30_spill] sm:$0xff]  ;;  %11129 = vpow2.f32 %v2397_v5  ;;  %v17326_v5 = vld [vmem:[#allocation32_spill] sm:$0xff] }
 0x328   : > { %v13876_v28 = vpop.eup %11115  ;;  %10356 = vmatprep.mubr.f32.mxu1 %v13872_v48  ;;  %10393 = vmatprep.subr.mxu0 %v3763_v26  ;;  %v17322_v62 = vld [vmem:[#allocation31_spill] sm:$0xff] }
 0x329   : > { %v2391_v30 = vmul.f32 1.442695, %v17320_v58  ;;  %v2500_v2 = vpop.permute.xlu1 %2499  ;;  %10357 = vmatmul.mubr.f32.gmra.mxu1 %v13876_v28  ;;  %10445 = vmatprep.subr.mxu1 %v3781_v46  ;;  %v2794_v58 = vsub.f32 %v17322_v62, %v13817_v9 }
 0x32a   : > { %v13886_v59 = vpop.permute.xlu0 %2514  ;;  %v2777_v11 = vsub.f32 %v17321_v22, %v2500_v2  ;;  %2659 = vperm.xlu1 %11013, %v13557_v7   ;;  %2754 = vperm.xlu0 %11014, %v13611_v37   ;;  %v17324_v2 = vsub.f32 %v17323_v20, %v13501_v8  ;;  %v3779_v8 = vld [vmem:[%s12255_s29 + $0x1a0] sm:$0xff] }
 0x32b   : > { %v13893_v16 = vpop.eup %11117  ;;  %10394 = vmatpush3.msra.mxu0 %v3763_v26  ;;  %10446 = vmatpush3.msra.mxu1 %v3781_v46  ;;  %11131 = vpow2.f32 %v2391_v30  ;;  %v3761_v26 = vld [vmem:[%s12255_s29 + $0x110] sm:$0xff]  ;;  %v2885_v30 = vmul.f32 1.442695, %v2794_v58 }
 0x32c   : > { %v13897_v13 = vpop.eup %11119  ;;  %v2401_v22 = vmul.f32 1.442695, %v17324_v2  ;;  %v2851_v44 = vmul.f32 1.442695, %v2777_v11  ;;  %10303 = vmatprep.mubr.f32.mxu0 %v13893_v16  ;;  %10395 = vmatprep.subr.mxu0 %v3762_v25 }
 0x32d   : > { %v13903_v38 = vpop.eup %11121  ;;  %v2580_v10 = vpop.permute.xlu1 %2579  ;;  %10304 = vmatmul.mubr.f32.gmra.mxu0 %v13897_v13  ;;  %10447 = vmatprep.subr.mxu1 %v3780_v40 }
 0x32e   : > { %17325 = vst [vmem:[#allocation21_spill] sm:$0xff] %v13903_v38  ;;  %v13906_v9 = vpop.permute.xlu0 %2594  ;;  %11133 = vpow2.f32 %v2851_v44  ;;  %v2793_v46 = vsub.f32 %v17326_v5, %v2580_v10  ;;  %2739 = vperm.xlu1 %11013, %v13580_v23   ;;  %3530 = vperm.xlu0 %11014, %v13903_v38   ;;  %v3777_v5 = vld [vmem:[%s12255_s29 + $0x190] sm:$0xff]  ;;  %v3775_v23 = vld [vmem:[%s12255_s29 + $0x180] sm:$0xff] }
 0x32f   : > { %v13913_v20 = vpop.eup %11123  ;;  %11135 = vpow2.f32 %v2853_v12  ;;  %10396 = vmatpush3.msra.mxu0 %v3762_v25  ;;  %10448 = vmatpush3.msra.mxu1 %v3780_v40  ;;  %v3760_v25 = vld [vmem:[%s12255_s29 + $0x108] sm:$0xff]  ;;  %v3778_v40 = vld [vmem:[%s12255_s29 + $0x198] sm:$0xff]  ;;  %v17328_v12 = vld [vmem:[#allocation104_spill] sm:$0xff] }
 0x330   : > { %v13915_v11 = vpop.eup %11125  ;;  %11137 = vpow2.f32 %v2401_v22  ;;  %v2883_v62 = vmul.f32 1.442695, %v2793_v46  ;;  %10359 = vmatprep.mubr.f32.mxu1 %v13913_v20  ;;  %10397 = vmatprep.subr.mxu0 %v3761_v26  ;;  %v2293_v58 = vsub.f32 %v17328_v12, %v13462_v54  ;;  %v3759_v22 = vld [vmem:[%s12255_s29 + $0x100] sm:$0xff] }
 0x331   : > { %v13918_v44 = vpop.eup %11127  ;;  %v13920_v2 = vpop.permute.xlu1 %3355  ;;  %10360 = vmatmul.mubr.f32.gmra.mxu1 %v13915_v11  ;;  %10449 = vmatprep.subr.mxu1 %v3779_v8 }
 0x332   : > { %17327 = vst [vmem:[#allocation87_spill] sm:$0xff] %v13918_v44  ;;  %v13923_v10 = vpop.permute.xlu0 %3370  ;;  %11139 = vpow2.f32 %v2883_v62  ;;  %3515 = vperm.xlu1 %11013, %v13918_v44   ;;  %2684 = vperm.xlu0 %11014, %v13635_v0   ;;  %v2395_v54 = vmul.f32 1.442695, %v2293_v58  ;;  %v17330_v62 = vld [vmem:[#allocation114_spill] sm:$0xff] }
 0x333   : > { %11141 = vpow2.f32 %v2885_v30  ;;  %10398 = vmatpush3.msra.mxu0 %v3761_v26  ;;  %10450 = vmatpush3.msra.mxu1 %v3779_v8  ;;  %v3776_v26 = vld [vmem:[%s12255_s29 + $0x188] sm:$0xff]  ;;  %v2295_v12 = vsub.f32 %v17330_v62, %v13504_v21  ;;  %v17334_v21 = vld [vmem:[#allocation35_spill] sm:$0xff]  ;;  %v17335_v62 = vld [vmem:[#allocation120_spill] sm:$0xff] }
 0x334   : > { %10399 = vmatprep.subr.mxu0 %v3760_v25  ;;  %10451 = vmatprep.subr.mxu1 %v3778_v40  ;;  %v17329_v8 = vld [vmem:[#allocation33_spill] sm:$0xff]  ;;  %v13944_v44 = vpop.eup %11129  ;;  %11143 = vpow2.f32 %v2395_v54  ;;  %v2297_v19 = vsub.f32 %v17335_v62, %v13557_v7 }
 0x335   : > { %v13933_v46 = vpop.permute.xlu1 %3435  ;;  %10400 = vmatpush3.msra.mxu0 %v3760_v25  ;;  %10452 = vmatpush3.msra.mxu1 %v3778_v40  ;;  %v2780_v30 = vsub.f32 %v17329_v8, %v13886_v59  ;;  %17331 = vst [vmem:[#allocation22_spill] sm:$0xff] %v13944_v44  ;;  %v2399_v8 = vmul.f32 1.442695, %v2295_v12 }
 0x336   : > { %v13935_v38 = vpop.permute.xlu0 %3450  ;;  %2669 = vperm.xlu1 %11013, %v13598_v51   ;;  %2764 = vperm.xlu0 %11014, %v13661_v24   ;;  %v17333_v24 = vld [vmem:[#allocation34_spill] sm:$0xff]  ;;  %v2403_v12 = vmul.f32 1.442695, %v2297_v19  ;;  %v17339_v19 = vld [vmem:[#allocation37_spill] sm:$0xff]  ;;  %v17350_v51 = vld [vmem:[#allocation43_spill] sm:$0xff] }
 0x337   : > { %10401 = vmatprep.subr.mxu0 %v3759_v22  ;;  %10453 = vmatprep.subr.mxu1 %v3777_v5  ;;  %v2857_v58 = vmul.f32 1.442695, %v2780_v30 }
 0x338   : > { %10402 = vmatpush3.msra.mxu0 %v3759_v22  ;;  %10454 = vmatpush3.msra.mxu1 %v3777_v5  ;;  %v13947_v39 = vpop.eup %11131  ;;  %v2796_v22 = vsub.f32 %v17334_v21, %v13906_v9  ;;  %v17337_v9 = vld [vmem:[#allocation36_spill] sm:$0xff] }
 0x339   : > { %v2510_v25 = vpop.permute.xlu1 %2509  ;;  %10455 = vmatprep.subr.mxu1 %v3776_v26  ;;  %17332 = vst [vmem:[#allocation23_spill] sm:$0xff] %v13947_v39 }
 0x33a   : > { %v2525_v40 = vpop.permute.xlu0 %2524  ;;  %v2779_v37 = vsub.f32 %v17333_v24, %v2510_v25  ;;  %2749 = vperm.xlu1 %11013, %v13614_v33   ;;  %3540 = vperm.xlu0 %11014, %v13944_v44   ;;  %v2889_v7 = vmul.f32 1.442695, %v2796_v22 }
 0x33b   : > { %v13952_v59 = vpop.eup %11133  ;;  %10456 = vmatpush3.msra.mxu1 %v3776_v26  ;;  %v2782_v22 = vsub.f32 %v17339_v19, %v2525_v40 }
 0x33c   : > { %v13956_v5 = vpop.eup %11135  ;;  %v2855_v45 = vmul.f32 1.442695, %v2779_v37  ;;  %10306 = vmatprep.mubr.f32.mxu0 %v13952_v59  ;;  %10457 = vmatprep.subr.mxu1 %v3775_v23 }
 0x33d   : > { %v13961_v24 = vpop.eup %11137  ;;  %v2590_v25 = vpop.permute.xlu1 %2589  ;;  %10307 = vmatmul.mubr.f32.gmra.mxu0 %v13956_v5  ;;  %10458 = vmatpush3.msra.mxu1 %v3775_v23 }
 0x33e   : > { %17336 = vst [vmem:[#allocation82_spill] sm:$0xff] %v13961_v24  ;;  %v2605_v30 = vpop.permute.xlu0 %2604  ;;  %11145 = vpow2.f32 %v2855_v45  ;;  %v2795_v26 = vsub.f32 %v17337_v9, %v2590_v25  ;;  %3525 = vperm.xlu1 %11013, %v13947_v39   ;;  %3550 = vperm.xlu0 %11014, %v13961_v24  }
 0x33f   : > { %v13967_v54 = vpop.eup %11139  ;;  %11147 = vpow2.f32 %v2857_v58 }
 0x340   : > { %v13969_v37 = vpop.eup %11141  ;;  %11149 = vpow2.f32 %v2399_v8  ;;  %v2887_v21 = vmul.f32 1.442695, %v2795_v26  ;;  %10362 = vmatprep.mubr.f32.mxu1 %v13967_v54  ;;  %v17341_v26 = vld [vmem:[#allocation38_spill] sm:$0xff] }
 0x341   : > { %v13972_v62 = vpop.permute.xlu1 %3365  ;;  %10363 = vmatmul.mubr.f32.gmra.mxu1 %v13969_v37  ;;  %v13984_v8 = vpop.eup %11143 }
 0x342   : > { %v13975_v23 = vpop.permute.xlu0 %3380  ;;  %11151 = vpow2.f32 %v2887_v21  ;;  %2679 = vperm.xlu1 %11013, %v13638_v18   ;;  %17340 = vst [vmem:[#allocation25_spill] sm:$0xff] %v13984_v8 }
 0x343   : > { %11153 = vpow2.f32 %v2889_v7  ;;  %v2861_v7 = vmul.f32 1.442695, %v2782_v22 }
 0x344   : > { %11155 = vpow2.f32 %v2403_v12  ;;  %v17342_v12 = vld [vmem:[#allocation39_spill] sm:$0xff] }
 0x345   : > { %v13978_v45 = vpop.permute.xlu1 %3445  ;;  %v2798_v44 = vsub.f32 %v17342_v12, %v2605_v30 }
 0x346   : > { %v13980_v58 = vpop.permute.xlu0 %3460  ;;  %2759 = vperm.xlu1 %11013, %v13664_v47  }
 0x347   : > { %17338 = vst [vmem:[#allocation24_spill] sm:$0xff] %v13980_v58  ;;  %v2893_v30 = vmul.f32 1.442695, %v2798_v44 }
 0x349   : > { %v2520_v25 = vpop.permute.xlu1 %2519 }
 0x34a   : > { %v2615_v9 = vpop.permute.xlu0 %2614  ;;  %v2781_v24 = vsub.f32 %v17341_v26, %v2520_v25  ;;  %3535 = vperm.xlu1 %11013, %v13984_v8   ;;  %v17344_v25 = vld [vmem:[#allocation40_spill] sm:$0xff] }
 0x34b   : > { %v13988_v21 = vpop.eup %11145 }
 0x34c   : > { %v13991_v39 = vpop.eup %11147  ;;  %v2859_v33 = vmul.f32 1.442695, %v2781_v24  ;;  %10309 = vmatprep.mubr.f32.mxu0 %v13988_v21 }
 0x34d   : > { %v13994_v47 = vpop.eup %11149  ;;  %v2600_v40 = vpop.permute.xlu1 %2599  ;;  %10310 = vmatmul.mubr.f32.gmra.mxu0 %v13991_v39 }
 0x34e   : > { %17343 = vst [vmem:[#allocation26_spill] sm:$0xff] %v13994_v47  ;;  %v2695_v19 = vpop.permute.xlu0 %2694  ;;  %11157 = vpow2.f32 %v2859_v33  ;;  %v2797_v26 = vsub.f32 %v17344_v25, %v2600_v40  ;;  %3545 = vperm.xlu1 %11013, %v13994_v47  }
 0x34f   : > { %v13999_v8 = vpop.eup %11151  ;;  %11159 = vpow2.f32 %v2861_v7  ;;  %v17348_v7 = vld [vmem:[#allocation41_spill] sm:$0xff]  ;;  %v2816_v58 = vsub.f32 %v17350_v51, %v2695_v19 }
 0x350   : > { %v14001_v22 = vpop.eup %11153  ;;  %v2891_v24 = vmul.f32 1.442695, %v2797_v26  ;;  %10365 = vmatprep.mubr.f32.mxu1 %v13999_v8  ;;  %v2800_v25 = vsub.f32 %v17348_v7, %v2615_v9  ;;  %v17351_v7 = vld [vmem:[#allocation44_spill] sm:$0xff] }
 0x351   : > { %v14004_v12 = vpop.eup %11155  ;;  %v14006_v41 = vpop.permute.xlu1 %3375  ;;  %10366 = vmatmul.mubr.f32.gmra.mxu1 %v14001_v22 }
 0x352   : > { %17345 = vst [vmem:[#allocation27_spill] sm:$0xff] %v14004_v12  ;;  %v14009_v33 = vpop.permute.xlu0 %3390  ;;  %11161 = vpow2.f32 %v2891_v24  ;;  %3555 = vperm.xlu1 %11013, %v14004_v12   ;;  %v2897_v53 = vmul.f32 1.442695, %v2800_v25  ;;  %v2929_v25 = vmul.f32 1.442695, %v2816_v58  ;;  %v17355_v58 = vld [vmem:[#allocation45_spill] sm:$0xff] }
 0x353   : > { %17346 = vst [vmem:[#allocation97_spill] sm:$0xff] %v14009_v33  ;;  %11163 = vpow2.f32 %v2893_v30 }
 0x355   : > { %v14012_v40 = vpop.permute.xlu1 %3455 }
 0x356   : > { %v14014_v44 = vpop.permute.xlu0 %3470 }
 0x357   : > { %17347 = vst [vmem:[#allocation28_spill] sm:$0xff] %v14014_v44 }
 0x359   : > { %v2610_v26 = vpop.permute.xlu1 %2609 }
 0x35a   : > { %v2625_v47 = vpop.permute.xlu0 %2624  ;;  %v2799_v35 = vsub.f32 %v17349_v50, %v2610_v26 }
 0x35b   : > { %v14018_v18 = vpop.eup %11157 }
 0x35c   : > { %v14021_v33 = vpop.eup %11159  ;;  %v2895_v24 = vmul.f32 1.442695, %v2799_v35  ;;  %10312 = vmatprep.mubr.f32.mxu0 %v14018_v18 }
 0x35d   : > { %v2690_v30 = vpop.permute.xlu1 %2689  ;;  %3089 = vadd.xlane.f32.xlu0 %v13739_v52  ;;  %10313 = vmatmul.mubr.f32.gmra.mxu0 %v14021_v33 }
 0x35e   : > { %v2705_v9 = vpop.permute.xlu0 %2704  ;;  %11165 = vpow2.f32 %v2895_v24  ;;  %v2815_v12 = vsub.f32 %v17351_v7, %v2690_v30  ;;  %v17356_v7 = vld [vmem:[#allocation46_spill] sm:$0xff] }
 0x35f   : > { %v14027_v50 = vpop.eup %11161  ;;  %11167 = vpow2.f32 %v2897_v53 }
 0x360   : > { %v14029_v26 = vpop.eup %11163  ;;  %v2927_v51 = vmul.f32 1.442695, %v2815_v12  ;;  %10368 = vmatprep.mubr.f32.mxu1 %v14027_v50  ;;  %v2802_v12 = vsub.f32 %v17355_v58, %v2625_v47 }
 0x361   : > { %v14032_v35 = vpop.permute.xlu1 %3385  ;;  %3119 = vadd.xlane.f32.xlu0 %v13718_v15  ;;  %10369 = vmatmul.mubr.f32.gmra.mxu1 %v14029_v26 }
 0x362   : > { %17352 = vst [vmem:[#allocation88_spill] sm:$0xff] %v14032_v35  ;;  %v14036_v52 = vpop.permute.xlu0 %3400  ;;  %11169 = vpow2.f32 %v2927_v51  ;;  %v2901_v35 = vmul.f32 1.442695, %v2802_v12 }
 0x363   : > { %17353 = vst [vmem:[#allocation29_spill] sm:$0xff] %v14036_v52  ;;  %11171 = vpow2.f32 %v2929_v25  ;;  %v17357_v52 = vld [vmem:[#allocation47_spill] sm:$0xff] }
 0x364   : > { %v2818_v51 = vsub.f32 %v17357_v52, %v2705_v9 }
 0x365   : > { %v14038_v19 = vpop.permute.xlu1 %3465  ;;  %3091 = vadd.xlane.f32.xlu0 %v13761_v3 }
 0x366   : > { %17354 = vst [vmem:[#allocation103_spill] sm:$0xff] %v14038_v19  ;;  %v14041_v53 = vpop.permute.xlu0 %3480  ;;  %v2933_v12 = vmul.f32 1.442695, %v2818_v51 }
 0x369   : > { %v2620_v24 = vpop.permute.xlu1 %2619  ;;  %3123 = vadd.xlane.f32.xlu0 %v13772_v57  ;;  %v17358_v57 = vld [vmem:[#allocation48_spill] sm:$0xff] }
 0x36a   : > { %v2635_v30 = vpop.permute.xlu0 %2634  ;;  %v2801_v15 = vsub.f32 %v17356_v7, %v2620_v24 }
 0x36b   : > { %v14046_v44 = vpop.eup %11165 }
 0x36c   : > { %v14049_v25 = vpop.eup %11167  ;;  %v2899_v19 = vmul.f32 1.442695, %v2801_v15  ;;  %10403 = vmatprep.mubr.f32.mxu0 %v14046_v44  ;;  %v17362_v15 = vld [vmem:[#allocation49_spill] sm:$0xff] }
 0x36d   : > { %v2700_v3 = vpop.permute.xlu1 %2699  ;;  %3095 = vadd.xlane.f32.xlu0 %v13807_v32  ;;  %10404 = vmatmul.mubr.f32.vlgmr.msra.gmra.mxu0 %v14049_v25  ;;  %v2804_v51 = vsub.f32 %v17362_v15, %v2635_v30  ;;  %v17365_v30 = vld [vmem:[#allocation52_spill] sm:$0xff] }
 0x36e   : > { %v2715_v47 = vpop.permute.xlu0 %2714  ;;  %11173 = vpow2.f32 %v2899_v19  ;;  %v2817_v58 = vsub.f32 %v17358_v57, %v2700_v3  ;;  %v17363_v57 = vld [vmem:[#allocation50_spill] sm:$0xff] }
 0x36f   : > { %v14055_v24 = vpop.eup %11169  ;;  %11175 = vpow2.f32 %v2901_v35 }
 0x370   : > { %v14057_v7 = vpop.eup %11171  ;;  %v2931_v9 = vmul.f32 1.442695, %v2817_v58  ;;  %10459 = vmatprep.mubr.f32.mxu1 %v14055_v24 }
 0x371   : > { %v14060_v52 = vpop.permute.xlu1 %3395  ;;  %3127 = vadd.xlane.f32.xlu0 %v13823_v49  ;;  %10460 = vmatmul.mubr.f32.vlgmr.msra.gmra.mxu1 %v14057_v7 }
 0x372   : > { %v14064_v32 = vpop.permute.xlu0 %3410  ;;  %11177 = vpow2.f32 %v2931_v9 }
 0x373   : > { %17359 = vst [vmem:[#allocation98_spill] sm:$0xff] %v14064_v32  ;;  %11179 = vpow2.f32 %v2933_v12  ;;  %v2905_v12 = vmul.f32 1.442695, %v2804_v51  ;;  %v17364_v32 = vld [vmem:[#allocation51_spill] sm:$0xff] }
 0x375   : > { %v14066_v19 = vpop.permute.xlu1 %3475  ;;  %3099 = vadd.xlane.f32.xlu0 %v13856_v43 }
 0x376   : > { %17360 = vst [vmem:[#allocation30_spill] sm:$0xff] %v14066_v19  ;;  %v14069_v35 = vpop.permute.xlu0 %3490  ;;  %3121 = vadd.xlane.f32.xlu1 %v13724_v36  ;;  %v2820_v19 = vsub.f32 %v17364_v32, %v2715_v47 }
 0x377   : > { %17361 = vst [vmem:[#allocation31_spill] sm:$0xff] %v14069_v35 }
 0x378   : > { %v2937_v47 = vmul.f32 1.442695, %v2820_v19 }
 0x379   : > { %v2630_v3 = vpop.permute.xlu1 %2629  ;;  %3131 = vadd.xlane.f32.xlu0 %v13872_v48 }
 0x37a   : > { %v2645_v49 = vpop.permute.xlu0 %2644  ;;  %v2803_v58 = vsub.f32 %v17363_v57, %v2630_v3  ;;  %3087 = vadd.xlane.f32.xlu1 %v13730_v31 }
 0x37b   : > { %v14076_v9 = vpop.eup %11173 }
 0x37c   : > { %v14079_v43 = vpop.eup %11175  ;;  %v2903_v35 = vmul.f32 1.442695, %v2803_v58  ;;  %10406 = vmatprep.mubr.f32.mxu0 %v14076_v9 }
 0x37d   : > { %v2710_v36 = vpop.permute.xlu1 %2709  ;;  %3103 = vadd.xlane.f32.xlu0 %v13893_v16  ;;  %10407 = vmatmul.mubr.f32.gmra.mxu0 %v14079_v43 }
 0x37e   : > { %v2725_v48 = vpop.permute.xlu0 %2724  ;;  %11181 = vpow2.f32 %v2903_v35  ;;  %v2819_v15 = vsub.f32 %v17365_v30, %v2710_v36  ;;  %3093 = vadd.xlane.f32.xlu1 %v13763_v60  ;;  %v17366_v35 = vld [vmem:[#allocation53_spill] sm:$0xff] }
 0x37f   : > { %v14086_v31 = vpop.eup %11177  ;;  %11183 = vpow2.f32 %v2905_v12  ;;  %v2806_v57 = vsub.f32 %v17366_v35, %v2645_v49  ;;  %v17367_v12 = vld [vmem:[#allocation54_spill] sm:$0xff]  ;;  %v17369_v49 = vld [vmem:[#allocation56_spill] sm:$0xff] }
 0x380   : > { %v14088_v32 = vpop.eup %11179  ;;  %v2935_v51 = vmul.f32 1.442695, %v2819_v15  ;;  %10462 = vmatprep.mubr.f32.mxu1 %v14086_v31  ;;  %v17368_v15 = vld [vmem:[#allocation55_spill] sm:$0xff] }
 0x381   : > { %v14091_v3 = vpop.permute.xlu1 %3405  ;;  %3135 = vadd.xlane.f32.xlu0 %v13913_v20  ;;  %10463 = vmatmul.mubr.f32.gmra.mxu1 %v14088_v32  ;;  %v2909_v30 = vmul.f32 1.442695, %v2806_v57 }
 0x382   : > { %v14095_v16 = vpop.permute.xlu0 %3420  ;;  %11185 = vpow2.f32 %v2935_v51  ;;  %3125 = vadd.xlane.f32.xlu1 %v13775_v56 }
 0x383   : > { %11187 = vpow2.f32 %v2937_v47  ;;  %v2822_v47 = vsub.f32 %v17368_v15, %v2725_v48 }
 0x385   : > { %v14098_v60 = vpop.permute.xlu1 %3485  ;;  %3107 = vadd.xlane.f32.xlu0 %v13952_v59  ;;  %v2941_v48 = vmul.f32 1.442695, %v2822_v47 }
 0x386   : > { %v14101_v19 = vpop.permute.xlu0 %3500  ;;  %3097 = vadd.xlane.f32.xlu1 %v13811_v63 }
 0x389   : > { %v2640_v58 = vpop.permute.xlu1 %2639  ;;  %3139 = vadd.xlane.f32.xlu0 %v13967_v54 }
 0x38a   : > { %v2655_v20 = vpop.permute.xlu0 %2654  ;;  %v2805_v36 = vsub.f32 %v17367_v12, %v2640_v58  ;;  %3129 = vadd.xlane.f32.xlu1 %v13827_v27 }
 0x38b   : > { %v14108_v56 = vpop.eup %11181 }
 0x38c   : > { %v14111_v59 = vpop.eup %11183  ;;  %v2907_v51 = vmul.f32 1.442695, %v2805_v36  ;;  %10409 = vmatprep.mubr.f32.mxu0 %v14108_v56 }
 0x38d   : > { %v2720_v63 = vpop.permute.xlu1 %2719  ;;  %3111 = vadd.xlane.f32.xlu0 %v13988_v21  ;;  %10410 = vmatmul.mubr.f32.gmra.mxu0 %v14111_v59 }
 0x38e   : > { %v2735_v54 = vpop.permute.xlu0 %2734  ;;  %11189 = vpow2.f32 %v2907_v51  ;;  %v2821_v35 = vsub.f32 %v17369_v49, %v2720_v63  ;;  %3101 = vadd.xlane.f32.xlu1 %v13858_v34  ;;  %v17371_v51 = vld [vmem:[#allocation58_spill] sm:$0xff] }
 0x38f   : > { %v14118_v27 = vpop.eup %11185  ;;  %11191 = vpow2.f32 %v2909_v30  ;;  %v17370_v30 = vld [vmem:[#allocation57_spill] sm:$0xff] }
 0x390   : > { %v14120_v57 = vpop.eup %11187  ;;  %v2939_v58 = vmul.f32 1.442695, %v2821_v35  ;;  %10465 = vmatprep.mubr.f32.mxu1 %v14118_v27  ;;  %v2808_v15 = vsub.f32 %v17370_v30, %v2655_v20  ;;  %v17372_v35 = vld [vmem:[#allocation59_spill] sm:$0xff] }
 0x391   : > { %v14123_v12 = vpop.permute.xlu1 %3415  ;;  %3143 = vadd.xlane.f32.xlu0 %v13999_v8  ;;  %10466 = vmatmul.mubr.f32.gmra.mxu1 %v14120_v57 }
 0x392   : > { %v14127_v21 = vpop.permute.xlu0 %3510  ;;  %11193 = vpow2.f32 %v2939_v58  ;;  %3133 = vadd.xlane.f32.xlu1 %v13876_v28  ;;  %v2913_v28 = vmul.f32 1.442695, %v2808_v15 }
 0x393   : > { %11195 = vpow2.f32 %v2941_v48  ;;  %v2824_v48 = vsub.f32 %v17372_v35, %v2735_v54  ;;  %v17375_v35 = vld [vmem:[#allocation62_spill] sm:$0xff] }
 0x395   : > { %v14130_v34 = vpop.permute.xlu1 %3495  ;;  %3115 = vadd.xlane.f32.xlu0 %v14018_v18  ;;  %v2945_v54 = vmul.f32 1.442695, %v2824_v48 }
 0x396   : > { %v2665_v36 = vpop.permute.xlu0 %2664  ;;  %3105 = vadd.xlane.f32.xlu1 %v13897_v13 }
 0x399   : > { %v2650_v47 = vpop.permute.xlu1 %2649  ;;  %3147 = vadd.xlane.f32.xlu0 %v14027_v50  ;;  %v17373_v50 = vld [vmem:[#allocation60_spill] sm:$0xff] }
 0x39a   : > { %v2745_v8 = vpop.permute.xlu0 %2744  ;;  %v2807_v63 = vsub.f32 %v17371_v51, %v2650_v47  ;;  %3137 = vadd.xlane.f32.xlu1 %v13915_v11 }
 0x39b   : > { %v14138_v49 = vpop.eup %11189 }
 0x39c   : > { %v14141_v58 = vpop.eup %11191  ;;  %v2911_v18 = vmul.f32 1.442695, %v2807_v63  ;;  %10412 = vmatprep.mubr.f32.mxu0 %v14138_v49 }
 0x39d   : > { %v2730_v13 = vpop.permute.xlu1 %2729  ;;  %3151 = vadd.xlane.f32.xlu0 %v14046_v44  ;;  %10413 = vmatmul.mubr.f32.gmra.mxu0 %v14141_v58 }
 0x39e   : > { %11197 = vpow2.f32 %v2911_v18  ;;  %v2823_v20 = vsub.f32 %v17373_v50, %v2730_v13  ;;  %v14147_v30 = vpop.permute.xlu0 %3520  ;;  %3109 = vadd.xlane.f32.xlu1 %v13956_v5  ;;  %v17374_v5 = vld [vmem:[#allocation61_spill] sm:$0xff]  ;;  %v17376_v13 = vld [vmem:[#allocation63_spill] sm:$0xff] }
 0x39f   : > { %v14150_v11 = vpop.eup %11193  ;;  %11199 = vpow2.f32 %v2913_v28  ;;  %v2810_v44 = vsub.f32 %v17374_v5, %v2665_v36  ;;  %v2826_v50 = vsub.f32 %v17376_v13, %v2745_v8  ;;  %v17378_v8 = vld [vmem:[#allocation65_spill] sm:$0xff] }
 0x3a0   : > { %v14152_v15 = vpop.eup %11195  ;;  %v2943_v47 = vmul.f32 1.442695, %v2823_v20  ;;  %10468 = vmatprep.mubr.f32.mxu1 %v14150_v11 }
 0x3a1   : > { %v14155_v51 = vpop.permute.xlu1 %3505  ;;  %3183 = vadd.xlane.f32.xlu0 %v14055_v24  ;;  %10469 = vmatmul.mubr.f32.gmra.mxu1 %v14152_v15  ;;  %v2917_v18 = vmul.f32 1.442695, %v2810_v44 }
 0x3a2   : > { %11201 = vpow2.f32 %v2943_v47  ;;  %3141 = vadd.xlane.f32.xlu1 %v13969_v37  ;;  %v2675_v63 = vpop.permute.xlu0 %2674 }
 0x3a3   : > { %11203 = vpow2.f32 %v2945_v54  ;;  %v17377_v54 = vld [vmem:[#allocation64_spill] sm:$0xff] }
 0x3a5   : > { %v2660_v28 = vpop.permute.xlu1 %2659  ;;  %3155 = vadd.xlane.f32.xlu0 %v14076_v9  ;;  %v2949_v9 = vmul.f32 1.442695, %v2826_v50 }
 0x3a6   : > { %v2809_v48 = vsub.f32 %v17375_v35, %v2660_v28  ;;  %3113 = vadd.xlane.f32.xlu1 %v13991_v39  ;;  %v2755_v37 = vpop.permute.xlu0 %2754 }
 0x3a8   : > { %v2915_v24 = vmul.f32 1.442695, %v2809_v48 }
 0x3a9   : > { %v2740_v20 = vpop.permute.xlu1 %2739  ;;  %3187 = vadd.xlane.f32.xlu0 %v14086_v31 }
 0x3aa   : > { %11205 = vpow2.f32 %v2915_v24  ;;  %v2825_v47 = vsub.f32 %v17377_v54, %v2740_v20  ;;  %3145 = vadd.xlane.f32.xlu1 %v14001_v22  ;;  %v2812_v22 = vsub.f32 %v17378_v8, %v2675_v63  ;;  %v14178_v35 = vpop.permute.xlu0 %3530  ;;  %v17381_v54 = vld [vmem:[#allocation68_spill] sm:$0xff] }
 0x3ab   : > { %v11198_v36 = vpop.eup %11197  ;;  %11207 = vpow2.f32 %v2917_v18 }
 0x3ac   : > { %v14168_v5 = vpop.eup %11199  ;;  %v2947_v28 = vmul.f32 1.442695, %v2825_v47  ;;  %10415 = vmatprep.mubr.f32.mxu0 %v11198_v36  ;;  %v2921_v13 = vmul.f32 1.442695, %v2812_v22 }
 0x3ad   : > { %v14170_v39 = vpop.permute.xlu1 %3515  ;;  %3159 = vadd.xlane.f32.xlu0 %v14108_v56  ;;  %10416 = vmatmul.mubr.f32.gmra.mxu0 %v14168_v5  ;;  %v17379_v56 = vld [vmem:[#allocation66_spill] sm:$0xff] }
 0x3ae   : > { %11209 = vpow2.f32 %v2947_v28  ;;  %3117 = vadd.xlane.f32.xlu1 %v14021_v33  ;;  %v17380_v33 = vld [vmem:[#allocation67_spill] sm:$0xff]  ;;  %v2685_v63 = vpop.permute.xlu0 %2684 }
 0x3af   : > { %v11202_v31 = vpop.eup %11201  ;;  %11211 = vpow2.f32 %v2949_v9  ;;  %v2828_v50 = vsub.f32 %v17380_v33, %v2755_v37  ;;  %v17382_v37 = vld [vmem:[#allocation69_spill] sm:$0xff]  ;;  %v17384_v33 = vld [vmem:[#allocation71_spill] sm:$0xff] }
 0x3b0   : > { %v14176_v44 = vpop.eup %11203  ;;  %10471 = vmatprep.mubr.f32.mxu1 %v11202_v31 }
 0x3b1   : > { %v2670_v48 = vpop.permute.xlu1 %2669  ;;  %3191 = vadd.xlane.f32.xlu0 %v14118_v27  ;;  %10472 = vmatmul.mubr.f32.gmra.mxu1 %v14176_v44  ;;  %v2953_v9 = vmul.f32 1.442695, %v2828_v50 }
 0x3b2   : > { %v2811_v18 = vsub.f32 %v17379_v56, %v2670_v48  ;;  %3149 = vadd.xlane.f32.xlu1 %v14029_v26  ;;  %v2765_v48 = vpop.permute.xlu0 %2764 }
 0x3b3   : > { %v2830_v50 = vsub.f32 %v17384_v33, %v2765_v48 }
 0x3b4   : > { %v2919_v24 = vmul.f32 1.442695, %v2811_v18  ;;  %v17383_v18 = vld [vmem:[#allocation70_spill] sm:$0xff] }
 0x3b5   : > { %v2750_v20 = vpop.permute.xlu1 %2749  ;;  %3163 = vadd.xlane.f32.xlu0 %v14138_v49 }
 0x3b6   : > { %11213 = vpow2.f32 %v2919_v24  ;;  %v2827_v47 = vsub.f32 %v17381_v54, %v2750_v20  ;;  %3153 = vadd.xlane.f32.xlu1 %v14049_v25  ;;  %v2814_v25 = vsub.f32 %v17382_v37, %v2685_v63  ;;  %v3296_v24 = vld [vmem:[#allocation4 + $0x88] sm:$0xff]  ;;  %v17385_v63 = vld [vmem:[#allocation72_spill] sm:$0xff] }
 0x3b7   : > { %v11206_v27 = vpop.eup %11205  ;;  %11215 = vpow2.f32 %v2921_v13  ;;  %v3280_v37 = vld [vmem:[#allocation4 + $0x8] sm:$0xff] }
 0x3b8   : > { %v14188_v28 = vpop.eup %11207  ;;  %v2951_v8 = vmul.f32 1.442695, %v2827_v47  ;;  %10418 = vmatprep.mubr.f32.mxu0 %v11206_v27 }
 0x3b9   : > { %v14190_v26 = vpop.permute.xlu1 %3525  ;;  %3195 = vadd.xlane.f32.xlu0 %v14150_v11  ;;  %10419 = vmatmul.mubr.f32.gmra.mxu0 %v14188_v28  ;;  %v2925_v11 = vmul.f32 1.442695, %v2814_v25 }
 0x3ba   : > { %11217 = vpow2.f32 %v2951_v8  ;;  %3185 = vadd.xlane.f32.xlu1 %v14057_v7 }
 0x3bb   : > { %v11210_v49 = vpop.eup %11209  ;;  %11219 = vpow2.f32 %v2953_v9  ;;  %v2957_v9 = vmul.f32 1.442695, %v2830_v50 }
 0x3bc   : > { %v14196_v22 = vpop.eup %11211  ;;  %10474 = vmatprep.mubr.f32.mxu1 %v11210_v49 }
 0x3bd   : > { %v2680_v56 = vpop.permute.xlu1 %2679  ;;  %3167 = vadd.xlane.f32.xlu0 %v11198_v36  ;;  %10475 = vmatmul.mubr.f32.gmra.mxu1 %v14196_v22  ;;  %v3295_v36 = vld [vmem:[#allocation4 + $0x80] sm:$0xff] }
 0x3be   : > { %v2813_v13 = vsub.f32 %v17383_v18, %v2680_v56  ;;  %3157 = vadd.xlane.f32.xlu1 %v14079_v43  ;;  %v3680_v43 = vmul.f32 %v13784_v1, %v3296_v24  ;;  %v3679_v56 = vmul.f32 %v13863_v6, %v3295_v36 }
 0x3c0   : > { %v2923_v7 = vmul.f32 1.442695, %v2813_v13  ;;  %v3664_v13 = vmul.f32 %v13848_v4, %v3280_v37  ;;  %v3281_v4 = vld [vmem:[#allocation4 + $0x10] sm:$0xff] }
 0x3c1   : > { %v2760_v20 = vpop.permute.xlu1 %2759  ;;  %3199 = vadd.xlane.f32.xlu0 %v11202_v31  ;;  %v3279_v31 = vld [vmem:[#allocation4] sm:$0xff] }
 0x3c2   : > { %11221 = vpow2.f32 %v2923_v7  ;;  %v2829_v54 = vsub.f32 %v17385_v63, %v2760_v20  ;;  %3189 = vadd.xlane.f32.xlu1 %v14088_v32  ;;  %v3663_v50 = vmul.f32 %v13836_v55, %v3279_v31  ;;  %v3282_v7 = vld [vmem:[#allocation4 + $0x18] sm:$0xff] }
 0x3c3   : > { %v11214_v47 = vpop.eup %11213  ;;  %11223 = vpow2.f32 %v2925_v11  ;;  %v3666_v20 = vmul.f32 %v13850_v14, %v3282_v7  ;;  %v3298_v63 = vld [vmem:[#allocation4 + $0x98] sm:$0xff] }
 0x3c4   : > { %v14204_v8 = vpop.eup %11215  ;;  %v2955_v25 = vmul.f32 1.442695, %v2829_v54  ;;  %10421 = vmatprep.mubr.f32.mxu0 %v11214_v47  ;;  %v3682_v37 = vmul.f32 %v13866_v29, %v3298_v63 }
 0x3c5   : > { %v10349_v48 = vpop.f32.mrf.mxu1  ;;  %3171 = vadd.xlane.f32.xlu0 %v11206_v27  ;;  %10422 = vmatmul.mubr.f32.gmra.mxu0 %v14204_v8 }
 0x3c6   : > { %11225 = vpow2.f32 %v2955_v25  ;;  %v4388_v32 = vadd.f32 %v10349_v48, %v3680_v43  ;;  %3161 = vadd.xlane.f32.xlu1 %v14111_v59 }
 0x3c7   : > { %v11218_v18 = vpop.eup %11217  ;;  %11227 = vpow2.f32 %v2957_v9  ;;  %v4002_v11 = vpop.f32.mrf.mxu1  ;;  %v3297_v9 = vld [vmem:[#allocation4 + $0x90] sm:$0xff] }
 0x3c8   : > { %v14211_v1 = vpop.eup %11219  ;;  %4581 = vst.msk [vmem:[#allocation4 + $0x88] sm:$0xff] %vm1226_vm2, %v4388_v32  ;;  %v10293_v33 = vpop.f32.mrf.mxu0  ;;  %v4387_v27 = vadd.f32 %v4002_v11, %v3679_v56  ;;  %10477 = vmatprep.mubr.f32.mxu1 %v11218_v18  ;;  %v3284_v56 = vld [vmem:[#allocation4 + $0x28] sm:$0xff] }
 0x3c9   : > { %v4372_v6 = vadd.f32 %v10293_v33, %v3664_v13  ;;  %3203 = vadd.xlane.f32.xlu0 %v11210_v49  ;;  %10478 = vmatmul.mubr.f32.gmra.mxu1 %v14211_v1  ;;  %v3665_v49 = vmul.f32 %v13920_v2, %v3281_v4  ;;  %v3681_v2 = vmul.f32 %v13933_v46, %v3297_v9  ;;  %v3283_v46 = vld [vmem:[#allocation4 + $0x20] sm:$0xff]  ;;  %v3300_v13 = vld [vmem:[#allocation4 + $0xa8] sm:$0xff]  ;;  %v3302_v9 = vld [vmem:[#allocation4 + $0xb8] sm:$0xff] }
 0x3ca   : > { %4580 = vst.msk [vmem:[#allocation4 + $0x80] sm:$0xff] %vm1226_vm2, %v4387_v27  ;;  %v3857_v59 = vpop.f32.mrf.mxu0  ;;  %3193 = vadd.xlane.f32.xlu1 %v14120_v57  ;;  %v3668_v32 = vmul.f32 %v13923_v10, %v3284_v56  ;;  %v3667_v33 = vmul.f32 %v13972_v62, %v3283_v46  ;;  %v17390_v56 = vld [vmem:[#allocation83_spill] sm:$0xff]  ;;  %v17391_v46 = vld [vmem:[#allocation85_spill] sm:$0xff] }
 0x3cb   : > { %4565 = vst.msk [vmem:[#allocation4 + $0x8] sm:$0xff] %vm1226_vm2, %v4372_v6  ;;  %v4371_v24 = vadd.f32 %v3857_v59, %v3663_v50  ;;  %v3299_v50 = vld [vmem:[#allocation4 + $0xa0] sm:$0xff]  ;;  %v3684_v6 = vmul.f32 %v13935_v38, %v3300_v13  ;;  %v14243_v59 = vpop.permute.xlu0 %3540 }
 0x3cd   : > { %4564 = vst.msk [vmem:[#allocation4] sm:$0xff] %vm1226_vm2, %v4371_v24  ;;  %v10296_v55 = vpop.f32.mrf.mxu0  ;;  %3175 = vadd.xlane.f32.xlu0 %v11214_v47 }
 0x3ce   : > { %v4374_v54 = vadd.f32 %v10296_v55, %v3666_v20  ;;  %3165 = vadd.xlane.f32.xlu1 %v14141_v58  ;;  %v3683_v20 = vmul.f32 %v13978_v45, %v3299_v50  ;;  %v2302_v55 = vsub.f32 %v13616_v42, %v13635_v0  ;;  %v3285_v45 = vld [vmem:[#allocation4 + $0x30] sm:$0xff] }
 0x3cf   : > { %v11222_v36 = vpop.eup %11221  ;;  %v3867_v43 = vpop.f32.mrf.mxu0  ;;  %v2961_v50 = vld [vmem:[#allocation3 + $0x10] sm:$0xff] }
 0x3d0   : > { %v14223_v57 = vpop.eup %11223  ;;  %4567 = vst.msk [vmem:[#allocation4 + $0x18] sm:$0xff] %vm1226_vm2, %v4374_v54  ;;  %v4373_v14 = vadd.f32 %v3867_v43, %v3665_v49  ;;  %10424 = vmatprep.mubr.f32.mxu0 %v11222_v36  ;;  %v3286_v49 = vld [vmem:[#allocation4 + $0x38] sm:$0xff]  ;;  %v14254_v54 = vpop.permute.xlu0 %3550 }
 0x3d1   : > { %v10352_v25 = vpop.f32.mrf.mxu1  ;;  %3207 = vadd.xlane.f32.xlu0 %v11218_v18  ;;  %10425 = vmatmul.mubr.f32.gmra.mxu0 %v14223_v57 }
 0x3d2   : > { %4566 = vst.msk [vmem:[#allocation4 + $0x10] sm:$0xff] %vm1226_vm2, %v4373_v14  ;;  %v4390_v58 = vadd.f32 %v10352_v25, %v3682_v37  ;;  %3197 = vadd.xlane.f32.xlu1 %v14152_v15  ;;  %v17386_v15 = vld [vmem:[#allocation119_spill] sm:$0xff]  ;;  %v17388_v37 = vld [vmem:[#allocation76_spill] sm:$0xff]  ;;  %v3669_v25 = vmul.f32 %v14006_v41, %v3285_v45 }
 0x3d3   : > { %v11226_v47 = vpop.eup %11225  ;;  %v4012_v48 = vpop.f32.mrf.mxu1  ;;  %v2298_v18 = vsub.f32 %v17386_v15, %v13554_v17  ;;  %v17387_v17 = vld [vmem:[#allocation129_spill] sm:$0xff] }
 0x3d4   : > { %v14231_v31 = vpop.eup %11227  ;;  %4583 = vst.msk [vmem:[#allocation4 + $0x98] sm:$0xff] %vm1226_vm2, %v4390_v58  ;;  %v4389_v29 = vadd.f32 %v4012_v48, %v3681_v2  ;;  %10480 = vmatprep.mubr.f32.mxu1 %v11226_v47  ;;  %v2300_v4 = vsub.f32 %v17387_v17, %v13595_v61  ;;  %v2960_v61 = vld [vmem:[#allocation3 + $0x8] sm:$0xff]  ;;  %v2975_v2 = vld [vmem:[#allocation3 + $0x80] sm:$0xff]  ;;  %v3301_v58 = vld [vmem:[#allocation4 + $0xb0] sm:$0xff] }
 0x3d5   : > { %3179 = vadd.xlane.f32.xlu0 %v11222_v36  ;;  %10481 = vmatmul.mubr.f32.gmra.mxu1 %v14231_v31  ;;  %v2413_v36 = vmul.f32 1.442695, %v2302_v55  ;;  %v3024_v14 = vmul.f32 %v17388_v37, %v2960_v61  ;;  %v17389_v48 = vld [vmem:[#allocation24_spill] sm:$0xff]  ;;  %v3304_v55 = vld [vmem:[#allocation4 + $0xc8] sm:$0xff]  ;;  %v2977_v37 = vld [vmem:[#allocation3 + $0x90] sm:$0xff] }
 0x3d6   : > { %4582 = vst.msk [vmem:[#allocation4 + $0x90] sm:$0xff] %vm1226_vm2, %v4389_v29  ;;  %3169 = vadd.xlane.f32.xlu1 %v14168_v5  ;;  %v2405_v5 = vmul.f32 1.442695, %v2298_v18  ;;  %v2409_v63 = vmul.f32 1.442695, %v2300_v4  ;;  %v3686_v29 = vmul.f32 %v17389_v48, %v3302_v9  ;;  %v3288_v18 = vld [vmem:[#allocation4 + $0x48] sm:$0xff] }
 0x3d7   : > { %v17405_v48 = vld [vmem:[#allocation28_spill] sm:$0xff] }
 0x3d8   : > { %11229 = vpow2.f32 %v2405_v5  ;;  %v17394_v5 = vld [vmem:[#allocation97_spill] sm:$0xff] }
 0x3d9   : > { %v10299_v11 = vpop.f32.mrf.mxu0  ;;  %3211 = vadd.xlane.f32.xlu0 %v11226_v47  ;;  %11231 = vpow2.f32 %v2409_v63  ;;  %v3672_v17 = vmul.f32 %v17394_v5, %v3288_v18  ;;  %v17408_v18 = vld [vmem:[#allocation93_spill] sm:$0xff]  ;;  %v17411_v5 = vld [vmem:[#allocation110_spill] sm:$0xff] }
 0x3da   : > { %v4376_v27 = vadd.f32 %v10299_v11, %v3668_v32  ;;  %3201 = vadd.xlane.f32.xlu1 %v14176_v44  ;;  %v17392_v32 = vsub.f32 %v17390_v56, %v17391_v46  ;;  %11233 = vpow2.f32 %v2413_v36  ;;  %v3685_v11 = vmul.f32 %v14012_v40, %v3301_v58  ;;  %v17403_v58 = vld [vmem:[#allocation101_spill] sm:$0xff]  ;;  %v17406_v56 = vld [vmem:[#allocation138_spill] sm:$0xff]  ;;  %v17407_v46 = vld [vmem:[#allocation136_spill] sm:$0xff] }
 0x3db   : > { %v3877_v7 = vpop.f32.mrf.mxu0 }
 0x3dc   : > { %4569 = vst.msk [vmem:[#allocation4 + $0x28] sm:$0xff] %vm1226_vm2, %v4376_v27  ;;  %v4375_v10 = vadd.f32 %v3877_v7, %v3667_v33  ;;  %v2417_v15 = vmul.f32 1.442695, %v17392_v32  ;;  %v3287_v7 = vld [vmem:[#allocation4 + $0x40] sm:$0xff]  ;;  %v2301_v32 = vsub.f32 %v17407_v46, %v17406_v56 }
 0x3dd   : > { %v10355_v24 = vpop.f32.mrf.mxu1 }
 0x3de   : > { %4568 = vst.msk [vmem:[#allocation4 + $0x20] sm:$0xff] %vm1226_vm2, %v4375_v10  ;;  %v4392_v62 = vadd.f32 %v10355_v24, %v3684_v6  ;;  %3173 = vadd.xlane.f32.xlu1 %v14188_v28  ;;  %v3670_v28 = vmul.f32 %v13975_v23, %v3286_v49  ;;  %11235 = vpow2.f32 %v2417_v15  ;;  %v17395_v24 = vld [vmem:[#allocation91_spill] sm:$0xff]  ;;  %v17400_v49 = vld [vmem:[#allocation89_spill] sm:$0xff] }
 0x3df   : > { %v4022_v44 = vpop.f32.mrf.mxu1  ;;  %v3025_v61 = vmul.f32 %v17400_v49, %v2961_v50  ;;  %v2963_v50 = vld [vmem:[#allocation3 + $0x20] sm:$0xff]  ;;  %v17415_v49 = vld [vmem:[#allocation86_spill] sm:$0xff] }
 0x3e0   : > { %4585 = vst.msk [vmem:[#allocation4 + $0xa8] sm:$0xff] %vm1226_vm2, %v4392_v62  ;;  %v4391_v38 = vadd.f32 %v4022_v44, %v3683_v20  ;;  %v17396_v20 = vld [vmem:[#allocation94_spill] sm:$0xff]  ;;  %v17398_v44 = vld [vmem:[#allocation131_spill] sm:$0xff] }
 0x3e1   : > { %v17397_v62 = vsub.f32 %v17395_v24, %v17396_v20  ;;  %v2411_v20 = vmul.f32 1.442695, %v2301_v32  ;;  %v3289_v32 = vld [vmem:[#allocation4 + $0x50] sm:$0xff] }
 0x3e2   : > { %4584 = vst.msk [vmem:[#allocation4 + $0xa0] sm:$0xff] %vm1226_vm2, %v4391_v38  ;;  %3205 = vadd.xlane.f32.xlu1 %v14196_v22  ;;  %v17399_v38 = vld [vmem:[#allocation130_spill] sm:$0xff] }
 0x3e3   : > { %v2421_v40 = vmul.f32 1.442695, %v17397_v62  ;;  %v2299_v63 = vsub.f32 %v17399_v38, %v17398_v44 }
 0x3e5   : > { %v10302_v43 = vpop.f32.mrf.mxu0  ;;  %v14281_v45 = vpop.eup %11229  ;;  %11237 = vpow2.f32 %v2421_v40 }
 0x3e6   : > { %v4378_v0 = vadd.f32 %v10302_v43, %v3670_v28  ;;  %3177 = vadd.xlane.f32.xlu1 %v14204_v8  ;;  %v3090_v42 = vpop.xlane.xlu0 %3089  ;;  %v17393_v8 = vld [vmem:[#allocation79_spill] sm:$0xff]  ;;  %v17401_v28 = vld [vmem:[#allocation88_spill] sm:$0xff] }
 0x3e7   : > { %v3216_v47 = vadd.f32 %v3090_v42, %v3024_v14  ;;  %v3887_v22 = vpop.f32.mrf.mxu0  ;;  %v3039_v13 = vmul.f32 %v17393_v8, %v2975_v2  ;;  %v3671_v36 = vmul.f32 %v17401_v28, %v3287_v7  ;;  %v3303_v14 = vld [vmem:[#allocation4 + $0xc0] sm:$0xff]  ;;  %v17402_v2 = vld [vmem:[#allocation99_spill] sm:$0xff]  ;;  %v14298_v8 = vpop.eup %11231 }
 0x3e8   : > { %4571 = vst.msk [vmem:[#allocation4 + $0x38] sm:$0xff] %vm1226_vm2, %v4378_v0  ;;  %v4377_v23 = vadd.f32 %v3887_v22, %v3669_v25  ;;  %v14286_v25 = vpop.permute.xlu1 %3535  ;;  %v14312_v44 = vpop.eup %11233 }
 0x3e9   : > { %4501 = vst.msk [vmem:[#allocation3 + $0x8] sm:$0xff] %vm4435_vm3, %v3216_v47  ;;  %v10358_v41 = vpop.f32.mrf.mxu1  ;;  %v17404_v47 = vsub.f32 %v17402_v2, %v17403_v58  ;;  %v3290_v2 = vld [vmem:[#allocation4 + $0x58] sm:$0xff]  ;;  %v17422_v58 = vld [vmem:[#allocation109_spill] sm:$0xff] }
 0x3ea   : > { %4570 = vst.msk [vmem:[#allocation4 + $0x30] sm:$0xff] %vm1226_vm2, %v4377_v23  ;;  %v4394_v33 = vadd.f32 %v10358_v41, %v3686_v29  ;;  %3209 = vadd.xlane.f32.xlu1 %v14211_v1  ;;  %v3120_v27 = vpop.xlane.xlu0 %3119  ;;  %v3688_v29 = vmul.f32 %v17405_v48, %v3304_v55  ;;  %v3041_v41 = vmul.f32 %v17408_v18, %v2977_v37 }
 0x3eb   : > { %v3231_v6 = vadd.f32 %v3120_v27, %v3039_v13  ;;  %v4032_v10 = vpop.f32.mrf.mxu1  ;;  %v2425_v22 = vmul.f32 1.442695, %v17404_v47  ;;  %v17409_v13 = vld [vmem:[#allocation103_spill] sm:$0xff] }
 0x3ec   : > { %4587 = vst.msk [vmem:[#allocation4 + $0xb8] sm:$0xff] %vm1226_vm2, %v4394_v33  ;;  %v4393_v4 = vadd.f32 %v4032_v10, %v3685_v11  ;;  %v3687_v11 = vmul.f32 %v17409_v13, %v3303_v14  ;;  %v17410_v10 = vld [vmem:[#allocation107_spill] sm:$0xff]  ;;  %v14308_v62 = vpop.permute.xlu1 %3545  ;;  %v17420_v14 = vld [vmem:[#allocation126_spill] sm:$0xff]  ;;  %v17426_v13 = vld [vmem:[#allocation29_spill] sm:$0xff] }
 0x3ed   : > { %4516 = vst.msk [vmem:[#allocation3 + $0x80] sm:$0xff] %vm4435_vm3, %v3231_v6  ;;  %v10305_v1 = vpop.f32.mrf.mxu0  ;;  %11239 = vpow2.f32 %v2425_v22  ;;  %v14326_v22 = vpop.eup %11235 }
 0x3ee   : > { %4586 = vst.msk [vmem:[#allocation4 + $0xb0] sm:$0xff] %vm1226_vm2, %v4393_v4  ;;  %v4380_v9 = vadd.f32 %v10305_v1, %v3672_v17  ;;  %3181 = vadd.xlane.f32.xlu1 %v14223_v57  ;;  %v3092_v43 = vpop.xlane.xlu0 %3091  ;;  %v2407_v57 = vmul.f32 1.442695, %v2299_v63  ;;  %v17412_v17 = vsub.f32 %v17410_v10, %v17411_v5  ;;  %v2979_v63 = vld [vmem:[#allocation3 + $0xa0] sm:$0xff]  ;;  %v17429_v5 = vld [vmem:[#allocation121_spill] sm:$0xff] }
 0x3ef   : > { %v3217_v0 = vadd.f32 %v3092_v43, %v3025_v61  ;;  %v3897_v42 = vpop.f32.mrf.mxu0  ;;  %3560 = vperm.xlu0 %11014, %v14281_v45   ;;  %v17414_v1 = vld [vmem:[#allocation84_spill] sm:$0xff]  ;;  %v3043_v47 = vmul.f32 %v17422_v58, %v2979_v63  ;;  %v2981_v63 = vld [vmem:[#allocation3 + $0xb0] sm:$0xff] }
 0x3f0   : > { %4573 = vst.msk [vmem:[#allocation4 + $0x48] sm:$0xff] %vm1226_vm2, %v4380_v9  ;;  %v4379_v23 = vadd.f32 %v3897_v42, %v3671_v36  ;;  %v2429_v4 = vmul.f32 1.442695, %v17412_v17  ;;  %11241 = vpow2.f32 %v2407_v57  ;;  %v17416_v61 = vsub.f32 %v17414_v1, %v17415_v49  ;;  %v17417_v36 = vld [vmem:[#allocation115_spill] sm:$0xff]  ;;  %v17418_v9 = vld [vmem:[#allocation117_spill] sm:$0xff]  ;;  %v17432_v1 = vld [vmem:[#allocation102_spill] sm:$0xff] }
 0x3f1   : > { %4502 = vst.msk [vmem:[#allocation3 + $0x10] sm:$0xff] %vm4435_vm3, %v3217_v0  ;;  %v10361_v15 = vpop.f32.mrf.mxu1  ;;  %v17419_v43 = vsub.f32 %v17417_v36, %v17418_v9  ;;  %v17421_v0 = vld [vmem:[#allocation123_spill] sm:$0xff] }
 0x3f2   : > { %4572 = vst.msk [vmem:[#allocation4 + $0x40] sm:$0xff] %vm1226_vm2, %v4379_v23  ;;  %v4396_v33 = vadd.f32 %v10361_v15, %v3688_v29  ;;  %3213 = vadd.xlane.f32.xlu1 %v14231_v31  ;;  %v3124_v27 = vpop.xlane.xlu0 %3123  ;;  %v17413_v31 = vld [vmem:[#allocation105_spill] sm:$0xff]  ;;  %v2415_v28 = vmul.f32 1.442695, %v17416_v61  ;;  %11243 = vpow2.f32 %v2429_v4  ;;  %v2314_v42 = vsub.f32 %v17421_v0, %v17420_v14  ;;  %v2965_v29 = vld [vmem:[#allocation3 + $0x30] sm:$0xff]  ;;  %v17423_v23 = vld [vmem:[#allocation92_spill] sm:$0xff]  ;;  %v14331_v15 = vpop.permute.xlu1 %3555 }
 0x3f3   : > { %v3233_v7 = vadd.f32 %v3124_v27, %v3041_v41  ;;  %v4042_v6 = vpop.f32.mrf.mxu1  ;;  %3570 = vperm.xlu0 %11014, %v14298_v8   ;;  %v3027_v40 = vmul.f32 %v17413_v31, %v2963_v50  ;;  %v2433_v37 = vmul.f32 1.442695, %v17419_v43  ;;  %11245 = vpow2.f32 %v2411_v20  ;;  %v17424_v57 = vld [vmem:[#allocation95_spill] sm:$0xff]  ;;  %v2976_v41 = vld [vmem:[#allocation3 + $0x88] sm:$0xff]  ;;  %v17427_v27 = vld [vmem:[#allocation134_spill] sm:$0xff]  ;;  %v14339_v4 = vpop.eup %11237 }
 0x3f4   : > { %4589 = vst.msk [vmem:[#allocation4 + $0xc8] sm:$0xff] %vm1226_vm2, %v4396_v33  ;;  %v4395_v24 = vadd.f32 %v4042_v6, %v3687_v11  ;;  %v17425_v56 = vsub.f32 %v17423_v23, %v17424_v57  ;;  %11247 = vpow2.f32 %v2415_v28  ;;  %v3674_v11 = vmul.f32 %v17426_v13, %v3290_v2  ;;  %v17428_v50 = vld [vmem:[#allocation132_spill] sm:$0xff]  ;;  %v3306_v6 = vld [vmem:[#allocation4 + $0xd8] sm:$0xff]  ;;  %v3305_v28 = vld [vmem:[#allocation4 + $0xd0] sm:$0xff] }
 0x3f5   : > { %4518 = vst.msk [vmem:[#allocation3 + $0x90] sm:$0xff] %vm4435_vm3, %v3233_v7  ;;  %11249 = vpow2.f32 %v2433_v37  ;;  %v2437_v33 = vmul.f32 1.442695, %v2314_v42  ;;  %v2316_v7 = vsub.f32 %v17428_v50, %v17427_v27  ;;  %v3029_v17 = vmul.f32 %v17429_v5, %v2965_v29  ;;  %v2959_v37 = vld [vmem:[#allocation3] sm:$0xff]  ;;  %v17434_v14 = vld [vmem:[#allocation111_spill] sm:$0xff] }
 0x3f6   : > { %4588 = vst.msk [vmem:[#allocation4 + $0xc0] sm:$0xff] %vm1226_vm2, %v4395_v24  ;;  %v3096_v38 = vpop.xlane.xlu0 %3095  ;;  %v2419_v46 = vmul.f32 1.442695, %v17425_v56  ;;  %v3673_v24 = vmul.f32 %v14060_v52, %v3289_v32  ;;  %v17435_v0 = vld [vmem:[#allocation108_spill] sm:$0xff]  ;;  %v3690_v42 = vmul.f32 %v14041_v53, %v3306_v6  ;;  %v17436_v29 = vld [vmem:[#allocation143_spill] sm:$0xff] }
 0x3f7   : > { %v3219_v55 = vadd.f32 %v3096_v38, %v3027_v40  ;;  %3580 = vperm.xlu0 %11014, %v14312_v44   ;;  %v17430_v40 = vld [vmem:[#allocation73_spill] sm:$0xff]  ;;  %v2309_v52 = vsub.f32 %v17435_v0, %v17434_v14  ;;  %v17437_v23 = vld [vmem:[#allocation140_spill] sm:$0xff]  ;;  %v2962_v5 = vld [vmem:[#allocation3 + $0x18] sm:$0xff] }
 0x3f8   : > { %v3040_v38 = vmul.f32 %v17430_v40, %v2976_v41  ;;  %11251 = vpow2.f32 %v2419_v46  ;;  %v2318_v57 = vsub.f32 %v17437_v23, %v17436_v29  ;;  %v17438_v46 = vld [vmem:[#allocation125_spill] sm:$0xff]  ;;  %v17439_v41 = vld [vmem:[#allocation30_spill] sm:$0xff]  ;;  %v2967_v50 = vld [vmem:[#allocation3 + $0x40] sm:$0xff] }
 0x3f9   : > { %4504 = vst.msk [vmem:[#allocation3 + $0x20] sm:$0xff] %vm4435_vm3, %v3219_v55  ;;  %v17431_v55 = vld [vmem:[#allocation100_spill] sm:$0xff]  ;;  %11253 = vpow2.f32 %v2437_v33  ;;  %v3045_v32 = vmul.f32 %v17438_v46, %v2981_v63  ;;  %v3689_v53 = vmul.f32 %v17439_v41, %v3305_v28  ;;  %v17440_v33 = vld [vmem:[#allocation74_spill] sm:$0xff]  ;;  %v2978_v0 = vld [vmem:[#allocation3 + $0x98] sm:$0xff] }
 0x3fa   : > { %v3128_v48 = vpop.xlane.xlu0 %3127  ;;  %v17433_v49 = vsub.f32 %v17431_v55, %v17432_v1  ;;  %v3023_v27 = vmul.f32 %v17440_v33, %v2959_v37  ;;  %v17441_v40 = vld [vmem:[#allocation118_spill] sm:$0xff]  ;;  %v2445_v55 = vmul.f32 1.442695, %v2318_v57  ;;  %v17443_v1 = vld [vmem:[#allocation137_spill] sm:$0xff]  ;;  %v17448_v41 = vld [vmem:[#allocation80_spill] sm:$0xff] }
 0x3fb   : > { %v3235_v18 = vadd.f32 %v3128_v48, %v3043_v47  ;;  %3590 = vperm.xlu0 %11014, %v14326_v22   ;;  %v14351_v47 = vpop.eup %11239  ;;  %v2441_v48 = vmul.f32 1.442695, %v2316_v7  ;;  %v3292_v23 = vld [vmem:[#allocation4 + $0x68] sm:$0xff]  ;;  %v17447_v57 = vld [vmem:[#allocation142_spill] sm:$0xff] }
 0x3fc   : > { %v2423_v61 = vmul.f32 1.442695, %v17433_v49  ;;  %v3031_v49 = vmul.f32 %v17443_v1, %v2967_v50  ;;  %v2964_v50 = vld [vmem:[#allocation3 + $0x28] sm:$0xff] }
 0x3fd   : > { %4520 = vst.msk [vmem:[#allocation3 + $0xa0] sm:$0xff] %vm4435_vm3, %v3235_v18  ;;  %v10308_v10 = vpop.f32.mrf.mxu0  ;;  %v14357_v18 = vpop.eup %11241 }
 0x3fe   : > { %v4382_v20 = vadd.f32 %v10308_v10, %v3674_v11  ;;  %v3100_v31 = vpop.xlane.xlu0 %3099  ;;  %11255 = vpow2.f32 %v2423_v61 }
 0x3ff   : > { %v3221_v36 = vadd.f32 %v3100_v31, %v3029_v17  ;;  %v3122_v9 = vpop.xlane.xlu1 %3121  ;;  %v3907_v43 = vpop.f32.mrf.mxu0  ;;  %3600 = vperm.xlu0 %11014, %v14339_v4   ;;  %v2427_v17 = vmul.f32 1.442695, %v2309_v52  ;;  %11257 = vpow2.f32 %v2441_v48  ;;  %v17446_v48 = vld [vmem:[#allocation124_spill] sm:$0xff] }
 0x400   : > { %4575 = vst.msk [vmem:[#allocation4 + $0x58] sm:$0xff] %vm1226_vm2, %v4382_v20  ;;  %v3232_v2 = vadd.f32 %v3122_v9, %v3040_v38  ;;  %v4381_v58 = vadd.f32 %v3907_v43, %v3673_v24  ;;  %v14366_v31 = vpop.eup %11243  ;;  %v17442_v38 = vld [vmem:[#allocation116_spill] sm:$0xff] }
 0x401   : > { %4506 = vst.msk [vmem:[#allocation3 + $0x30] sm:$0xff] %vm4435_vm3, %v3221_v36  ;;  %v10364_v56 = vpop.f32.mrf.mxu1  ;;  %v2311_v63 = vsub.f32 %v17442_v38, %v17441_v40  ;;  %v14372_v28 = vpop.eup %11245  ;;  %v17444_v36 = vld [vmem:[#allocation77_spill] sm:$0xff]  ;;  %v2983_v43 = vld [vmem:[#allocation3 + $0xc0] sm:$0xff]  ;;  %11259 = vpow2.f32 %v2427_v17 }
 0x402   : > { %4517 = vst.msk [vmem:[#allocation3 + $0x88] sm:$0xff] %vm4435_vm3, %v3232_v2  ;;  %v4398_v13 = vadd.f32 %v10364_v56, %v3690_v42  ;;  %v3132_v11 = vpop.xlane.xlu0 %3131  ;;  %v3026_v9 = vmul.f32 %v17444_v36, %v2962_v5  ;;  %v14379_v42 = vpop.eup %11247  ;;  %11261 = vpow2.f32 %v2445_v55  ;;  %v3047_v56 = vmul.f32 %v17447_v57, %v2983_v43  ;;  %v3308_v38 = vld [vmem:[#allocation4 + $0xe8] sm:$0xff]  ;;  %v17452_v55 = vld [vmem:[#allocation146_spill] sm:$0xff] }
 0x403   : > { %4574 = vst.msk [vmem:[#allocation4 + $0x50] sm:$0xff] %vm1226_vm2, %v4381_v58  ;;  %v3237_v7 = vadd.f32 %v3132_v11, %v3045_v32  ;;  %v3088_v6 = vpop.xlane.xlu1 %3087  ;;  %v4052_v10 = vpop.f32.mrf.mxu1  ;;  %3610 = vperm.xlu0 %11014, %v14351_v47   ;;  %3565 = vperm.xlu1 %11013, %v14357_v18   ;;  %v2431_v2 = vmul.f32 1.442695, %v2311_v63  ;;  %v17445_v58 = vld [vmem:[#allocation127_spill] sm:$0xff]  ;;  %v3291_v11 = vld [vmem:[#allocation4 + $0x60] sm:$0xff]  ;;  %v17453_v43 = vld [vmem:[#allocation90_spill] sm:$0xff] }
 0x404   : > { %4591 = vst.msk [vmem:[#allocation4 + $0xd8] sm:$0xff] %vm1226_vm2, %v4398_v13  ;;  %v3215_v24 = vadd.f32 %v3088_v6, %v3023_v27  ;;  %v4397_v20 = vadd.f32 %v4052_v10, %v3689_v53  ;;  %v2313_v29 = vsub.f32 %v17446_v48, %v17445_v58  ;;  %v14385_v46 = vpop.eup %11249  ;;  %v3042_v53 = vmul.f32 %v17448_v41, %v2978_v0  ;;  %v2969_v13 = vld [vmem:[#allocation3 + $0x50] sm:$0xff]  ;;  %v3307_v0 = vld [vmem:[#allocation4 + $0xe0] sm:$0xff]  ;;  %v2980_v48 = vld [vmem:[#allocation3 + $0xa8] sm:$0xff] }
 0x405   : > { %4522 = vst.msk [vmem:[#allocation3 + $0xb0] sm:$0xff] %vm4435_vm3, %v3237_v7  ;;  %v14391_v7 = vpop.eup %11251  ;;  %v17449_v6 = vld [vmem:[#allocation98_spill] sm:$0xff]  ;;  %11263 = vpow2.f32 %v2431_v2  ;;  %v3033_v1 = vmul.f32 %v17452_v55, %v2969_v13  ;;  %v17455_v41 = vld [vmem:[#allocation144_spill] sm:$0xff]  ;;  %v2966_v55 = vld [vmem:[#allocation3 + $0x38] sm:$0xff] }
 0x406   : > { %4500 = vst.msk [vmem:[#allocation3] sm:$0xff] %vm4435_vm3, %v3215_v24  ;;  %v3104_v61 = vpop.xlane.xlu0 %3103  ;;  %v3676_v10 = vmul.f32 %v17449_v6, %v3292_v23  ;;  %v2435_v17 = vmul.f32 1.442695, %v2313_v29  ;;  %v17450_v24 = vld [vmem:[#allocation135_spill] sm:$0xff]  ;;  %v3691_v6 = vmul.f32 %v14098_v60, %v3307_v0  ;;  %v17460_v0 = vld [vmem:[#allocation106_spill] sm:$0xff] }
 0x407   : > { %4590 = vst.msk [vmem:[#allocation4 + $0xd0] sm:$0xff] %vm1226_vm2, %v4397_v20  ;;  %v3223_v37 = vadd.f32 %v3104_v61, %v3031_v49  ;;  %v3094_v14 = vpop.xlane.xlu1 %3093  ;;  %3620 = vperm.xlu0 %11014, %v14366_v31   ;;  %3575 = vperm.xlu1 %11013, %v14372_v28   ;;  %v17451_v20 = vld [vmem:[#allocation133_spill] sm:$0xff]  ;;  %v14398_v49 = vpop.eup %11253  ;;  %v3675_v61 = vmul.f32 %v14091_v3, %v3291_v11  ;;  %v17454_v29 = vld [vmem:[#allocation31_spill] sm:$0xff] }
 0x408   : > { %v3218_v52 = vadd.f32 %v3094_v14, %v3026_v9  ;;  %v2315_v40 = vsub.f32 %v17451_v20, %v17450_v24  ;;  %v2985_v14 = vld [vmem:[#allocation3 + $0xd0] sm:$0xff]  ;;  %v3692_v23 = vmul.f32 %v17454_v29, %v3308_v38  ;;  %11265 = vpow2.f32 %v2435_v17  ;;  %v17458_v17 = vld [vmem:[#allocation96_spill] sm:$0xff]  ;;  %v2982_v29 = vld [vmem:[#allocation3 + $0xb8] sm:$0xff] }
 0x409   : > { %4508 = vst.msk [vmem:[#allocation3 + $0x40] sm:$0xff] %vm4435_vm3, %v3223_v37  ;;  %v3028_v37 = vmul.f32 %v17453_v43, %v2964_v50  ;;  %v3044_v24 = vmul.f32 %v17458_v17, %v2980_v48  ;;  %v2971_v20 = vld [vmem:[#allocation3 + $0x60] sm:$0xff] }
 0x40a   : > { %4503 = vst.msk [vmem:[#allocation3 + $0x18] sm:$0xff] %vm4435_vm3, %v3218_v52  ;;  %v3136_v32 = vpop.xlane.xlu0 %3135 }
 0x40b   : > { %v3239_v33 = vadd.f32 %v3136_v32, %v3047_v56  ;;  %v3126_v27 = vpop.xlane.xlu1 %3125  ;;  %3630 = vperm.xlu0 %11014, %v14385_v46   ;;  %3585 = vperm.xlu1 %11013, %v14379_v42   ;;  %v14407_v56 = vpop.eup %11255  ;;  %v2439_v32 = vmul.f32 1.442695, %v2315_v40 }
 0x40c   : > { %v3234_v5 = vadd.f32 %v3126_v27, %v3042_v53  ;;  %v17456_v53 = vld [vmem:[#allocation141_spill] sm:$0xff]  ;;  %v14413_v50 = vpop.eup %11257 }
 0x40d   : > { %4524 = vst.msk [vmem:[#allocation3 + $0xc0] sm:$0xff] %vm4435_vm3, %v3239_v33  ;;  %v10311_v63 = vpop.f32.mrf.mxu0  ;;  %v2317_v13 = vsub.f32 %v17456_v53, %v17455_v41  ;;  %v17457_v33 = vld [vmem:[#allocation148_spill] sm:$0xff]  ;;  %11267 = vpow2.f32 %v2439_v32 }
 0x40e   : > { %4519 = vst.msk [vmem:[#allocation3 + $0x98] sm:$0xff] %vm4435_vm3, %v3234_v5  ;;  %v4384_v36 = vadd.f32 %v10311_v63, %v3676_v10  ;;  %v3108_v9 = vpop.xlane.xlu0 %3107  ;;  %v3049_v27 = vmul.f32 %v17457_v33, %v2985_v14  ;;  %v2973_v33 = vld [vmem:[#allocation3 + $0x70] sm:$0xff] }
 0x40f   : > { %v3225_v52 = vadd.f32 %v3108_v9, %v3033_v1  ;;  %v3098_v2 = vpop.xlane.xlu1 %3097  ;;  %v3917_v58 = vpop.f32.mrf.mxu0  ;;  %3640 = vperm.xlu0 %11014, %v14398_v49   ;;  %3595 = vperm.xlu1 %11013, %v14391_v7   ;;  %v17459_v9 = vld [vmem:[#allocation16_spill] sm:$0xff] }
 0x410   : > { %4577 = vst.msk [vmem:[#allocation4 + $0x68] sm:$0xff] %vm1226_vm2, %v4384_v36  ;;  %v3220_v3 = vadd.f32 %v3098_v2, %v3028_v37  ;;  %v4383_v57 = vadd.f32 %v3917_v58, %v3675_v61  ;;  %v14422_v61 = vpop.eup %11259  ;;  %v2443_v36 = vmul.f32 1.442695, %v2317_v13  ;;  %v3035_v43 = vmul.f32 %v17459_v9, %v2971_v20  ;;  %v2987_v2 = vld [vmem:[#allocation3 + $0xe0] sm:$0xff]  ;;  %v3310_v20 = vld [vmem:[#allocation4 + $0xf8] sm:$0xff]  ;;  %v17464_v9 = vld [vmem:[#allocation122_spill] sm:$0xff] }
 0x411   : > { %4510 = vst.msk [vmem:[#allocation3 + $0x50] sm:$0xff] %vm4435_vm3, %v3225_v52  ;;  %v10367_v11 = vpop.f32.mrf.mxu1  ;;  %v14426_v37 = vpop.eup %11261  ;;  %v3030_v52 = vmul.f32 %v17460_v0, %v2966_v55  ;;  %v17462_v13 = vld [vmem:[#allocation112_spill] sm:$0xff]  ;;  %v3309_v0 = vld [vmem:[#allocation4 + $0xf0] sm:$0xff] }
 0x412   : > { %4505 = vst.msk [vmem:[#allocation3 + $0x28] sm:$0xff] %vm4435_vm3, %v3220_v3  ;;  %v4400_v10 = vadd.f32 %v10367_v11, %v3692_v23  ;;  %v3140_v5 = vpop.xlane.xlu0 %3139  ;;  %11269 = vpow2.f32 %v2443_v36  ;;  %v3294_v3 = vld [vmem:[#allocation4 + $0x78] sm:$0xff]  ;;  %v14435_v41 = vpop.eup %11263  ;;  %v3046_v11 = vmul.f32 %v17462_v13, %v2982_v29 }
 0x413   : > { %4576 = vst.msk [vmem:[#allocation4 + $0x60] sm:$0xff] %vm1226_vm2, %v4383_v57  ;;  %v3241_v40 = vadd.f32 %v3140_v5, %v3049_v27  ;;  %v3130_v38 = vpop.xlane.xlu1 %3129  ;;  %v4062_v63 = vpop.f32.mrf.mxu1  ;;  %3650 = vperm.xlu0 %11014, %v14413_v50   ;;  %3605 = vperm.xlu1 %11013, %v14407_v56   ;;  %v17461_v57 = vld [vmem:[#allocation75_spill] sm:$0xff]  ;;  %v3293_v27 = vld [vmem:[#allocation4 + $0x70] sm:$0xff]  ;;  %v2968_v5 = vld [vmem:[#allocation3 + $0x48] sm:$0xff]  ;;  %v3678_v17 = vmul.f32 %v14095_v16, %v3294_v3 }
 0x414   : > { %4593 = vst.msk [vmem:[#allocation4 + $0xe8] sm:$0xff] %vm1226_vm2, %v4400_v10  ;;  %v3236_v60 = vadd.f32 %v3130_v38, %v3044_v24  ;;  %v4399_v1 = vadd.f32 %v4062_v63, %v3691_v6  ;;  %v3051_v32 = vmul.f32 %v17461_v57, %v2987_v2  ;;  %v17463_v38 = vld [vmem:[#allocation81_spill] sm:$0xff]  ;;  %v17465_v3 = vld [vmem:[#allocation19_spill] sm:$0xff] }
 0x415   : > { %4526 = vst.msk [vmem:[#allocation3 + $0xd0] sm:$0xff] %vm4435_vm3, %v3241_v40  ;;  %v3037_v63 = vmul.f32 %v17463_v38, %v2973_v33  ;;  %v14443_v55 = vpop.eup %11265 }
 0x416   : > { %4521 = vst.msk [vmem:[#allocation3 + $0xa8] sm:$0xff] %vm4435_vm3, %v3236_v60  ;;  %v3112_v14 = vpop.xlane.xlu0 %3111  ;;  %v3677_v60 = vmul.f32 %v14123_v12, %v3293_v27  ;;  %v2991_v27 = vld [vmem:[#allocation3 + $0x100] sm:$0xff] }
 0x417   : > { %4592 = vst.msk [vmem:[#allocation4 + $0xe0] sm:$0xff] %vm1226_vm2, %v4399_v1  ;;  %v3227_v58 = vadd.f32 %v3112_v14, %v3035_v43  ;;  %v3102_v48 = vpop.xlane.xlu1 %3101  ;;  %3660 = vperm.xlu0 %11014, %v14426_v37   ;;  %3615 = vperm.xlu1 %11013, %v14422_v61   ;;  %v3032_v43 = vmul.f32 %v17464_v9, %v2968_v5  ;;  %v2989_v14 = vld [vmem:[#allocation3 + $0xf0] sm:$0xff] }
 0x418   : > { %v3222_v23 = vadd.f32 %v3102_v48, %v3030_v52  ;;  %v3694_v48 = vmul.f32 %v14101_v19, %v3310_v20  ;;  %v3053_v57 = vmul.f32 %v17465_v3, %v2989_v14  ;;  %v17466_v19 = vld [vmem:[#allocation128_spill] sm:$0xff]  ;;  %v2986_v14 = vld [vmem:[#allocation3 + $0xd8] sm:$0xff] }
 0x419   : > { %4512 = vst.msk [vmem:[#allocation3 + $0x60] sm:$0xff] %vm4435_vm3, %v3227_v58  ;;  %v2984_v58 = vld [vmem:[#allocation3 + $0xc8] sm:$0xff] }
 0x41a   : > { %4507 = vst.msk [vmem:[#allocation3 + $0x38] sm:$0xff] %vm4435_vm3, %v3222_v23  ;;  %v3144_v53 = vpop.xlane.xlu0 %3143  ;;  %v3048_v33 = vmul.f32 %v17466_v19, %v2984_v58  ;;  %v17469_v58 = vld [vmem:[#allocation145_spill] sm:$0xff]  ;;  %v17470_v19 = vld [vmem:[#allocation87_spill] sm:$0xff] }
 0x41b   : > { %v3243_v6 = vadd.f32 %v3144_v53, %v3051_v32  ;;  %v3134_v10 = vpop.xlane.xlu1 %3133  ;;  %3625 = vperm.xlu1 %11013, %v14435_v41   ;;  %v14453_v32 = vpop.eup %11267  ;;  %v3693_v53 = vmul.f32 %v14130_v34, %v3309_v0  ;;  %v17467_v34 = vld [vmem:[#allocation20_spill] sm:$0xff] }
 0x41c   : > { %v3238_v24 = vadd.f32 %v3134_v10, %v3046_v11 }
 0x41d   : > { %4528 = vst.msk [vmem:[#allocation3 + $0xe0] sm:$0xff] %vm4435_vm3, %v3243_v6  ;;  %v10314_v40 = vpop.f32.mrf.mxu0 }
 0x41e   : > { %4523 = vst.msk [vmem:[#allocation3 + $0xb8] sm:$0xff] %vm4435_vm3, %v3238_v24  ;;  %v4386_v1 = vadd.f32 %v10314_v40, %v3678_v17  ;;  %v3116_v36 = vpop.xlane.xlu0 %3115  ;;  %v2970_v17 = vld [vmem:[#allocation3 + $0x58] sm:$0xff]  ;;  %v3055_v40 = vmul.f32 %v17467_v34, %v2991_v27 }
 0x41f   : > { %v3229_v16 = vadd.f32 %v3116_v36, %v3037_v63  ;;  %v3106_v52 = vpop.xlane.xlu1 %3105  ;;  %v3927_v2 = vpop.f32.mrf.mxu0  ;;  %3635 = vperm.xlu1 %11013, %v14443_v55   ;;  %v3007_v36 = vld [vmem:[#allocation3 + $0x180] sm:$0xff] }
 0x420   : > { %4579 = vst.msk [vmem:[#allocation4 + $0x78] sm:$0xff] %vm1226_vm2, %v4386_v1  ;;  %v3224_v29 = vadd.f32 %v3106_v52, %v3032_v43  ;;  %v4385_v12 = vadd.f32 %v3927_v2, %v3677_v60  ;;  %v14463_v38 = vpop.eup %11269  ;;  %v17468_v60 = vld [vmem:[#allocation139_spill] sm:$0xff]  ;;  %v3071_v52 = vmul.f32 %v14379_v42, %v3007_v36 }
 0x421   : > { %4514 = vst.msk [vmem:[#allocation3 + $0x70] sm:$0xff] %vm4435_vm3, %v3229_v16  ;;  %v10370_v23 = vpop.f32.mrf.mxu1  ;;  %v3034_v1 = vmul.f32 %v17468_v60, %v2970_v17  ;;  %v3312_v16 = vld [vmem:[#allocation4 + $0x108] sm:$0xff]  ;;  %v3009_v17 = vld [vmem:[#allocation3 + $0x190] sm:$0xff] }
 0x422   : > { %4509 = vst.msk [vmem:[#allocation3 + $0x48] sm:$0xff] %vm4435_vm3, %v3224_v29  ;;  %v4402_v13 = vadd.f32 %v10370_v23, %v3694_v48  ;;  %v3148_v11 = vpop.xlane.xlu0 %3147  ;;  %v3050_v48 = vmul.f32 %v17469_v58, %v2986_v14  ;;  %v2993_v29 = vld [vmem:[#allocation3 + $0x110] sm:$0xff]  ;;  %v3073_v60 = vmul.f32 %v14391_v7, %v3009_v17 }
 0x423   : > { %4578 = vst.msk [vmem:[#allocation4 + $0x70] sm:$0xff] %vm1226_vm2, %v4385_v12  ;;  %v3245_v6 = vadd.f32 %v3148_v11, %v3053_v57  ;;  %v3138_v10 = vpop.xlane.xlu1 %3137  ;;  %v4072_v5 = vpop.f32.mrf.mxu1  ;;  %3645 = vperm.xlu1 %11013, %v14453_v32   ;;  %v3311_v12 = vld [vmem:[#allocation4 + $0x100] sm:$0xff]  ;;  %v2972_v57 = vld [vmem:[#allocation3 + $0x68] sm:$0xff]  ;;  %v17474_v7 = vld [vmem:[#allocation150_spill] sm:$0xff] }
 0x424   : > { %4595 = vst.msk [vmem:[#allocation4 + $0xf8] sm:$0xff] %vm1226_vm2, %v4402_v13  ;;  %v3240_v24 = vadd.f32 %v3138_v10, %v3048_v33  ;;  %v4401_v20 = vadd.f32 %v4072_v5, %v3693_v53  ;;  %v3696_v53 = vmul.f32 %v14127_v21, %v3312_v16  ;;  %v3057_v33 = vmul.f32 %v17470_v19, %v2993_v29  ;;  %v17471_v10 = vld [vmem:[#allocation147_spill] sm:$0xff]  ;;  %v3011_v29 = vld [vmem:[#allocation3 + $0x1a0] sm:$0xff]  ;;  %v17475_v19 = vld [vmem:[#allocation17_spill] sm:$0xff] }
 0x425   : > { %4530 = vst.msk [vmem:[#allocation3 + $0xf0] sm:$0xff] %vm4435_vm3, %v3245_v6  ;;  %v3695_v42 = vmul.f32 %v14155_v51, %v3311_v12  ;;  %v3036_v5 = vmul.f32 %v17471_v10, %v2972_v57 }
 0x426   : > { %4525 = vst.msk [vmem:[#allocation3 + $0xc8] sm:$0xff] %vm4435_vm3, %v3240_v24  ;;  %v3152_v63 = vpop.xlane.xlu0 %3151 }
 0x427   : > { %4594 = vst.msk [vmem:[#allocation4 + $0xf0] sm:$0xff] %vm1226_vm2, %v4401_v20  ;;  %v3247_v9 = vadd.f32 %v3152_v63, %v3055_v40  ;;  %v3110_v43 = vpop.xlane.xlu1 %3109  ;;  %3655 = vperm.xlu1 %11013, %v14463_v38   ;;  %v2988_v40 = vld [vmem:[#allocation3 + $0xe8] sm:$0xff] }
 0x428   : > { %v3226_v0 = vadd.f32 %v3110_v43, %v3034_v1  ;;  %v17472_v1 = vld [vmem:[#allocation149_spill] sm:$0xff] }
 0x429   : > { %4532 = vst.msk [vmem:[#allocation3 + $0x100] sm:$0xff] %vm4435_vm3, %v3247_v9  ;;  %v3052_v36 = vmul.f32 %v17472_v1, %v2988_v40  ;;  %v2995_v9 = vld [vmem:[#allocation3 + $0x120] sm:$0xff]  ;;  %v3013_v1 = vld [vmem:[#allocation3 + $0x1b0] sm:$0xff] }
 0x42a   : > { %4511 = vst.msk [vmem:[#allocation3 + $0x58] sm:$0xff] %vm4435_vm3, %v3226_v0  ;;  %v3184_v2 = vpop.xlane.xlu0 %3183  ;;  %v2974_v0 = vld [vmem:[#allocation3 + $0x78] sm:$0xff] }
 0x42b   : > { %v3263_v23 = vadd.f32 %v3184_v2, %v3071_v52  ;;  %v3142_v3 = vpop.xlane.xlu1 %3141  ;;  %v17473_v52 = vld [vmem:[#allocation23_spill] sm:$0xff] }
 0x42c   : > { %v3242_v13 = vadd.f32 %v3142_v3, %v3050_v48  ;;  %v3059_v2 = vmul.f32 %v17473_v52, %v2995_v9  ;;  %v3038_v48 = vmul.f32 %v17474_v7, %v2974_v0  ;;  %v2990_v3 = vld [vmem:[#allocation3 + $0xf8] sm:$0xff] }
 0x42d   : > { %4548 = vst.msk [vmem:[#allocation3 + $0x180] sm:$0xff] %vm4435_vm3, %v3263_v23  ;;  %v10405_v11 = vpop.f32.mrf.mxu0 }
 0x42e   : > { %4527 = vst.msk [vmem:[#allocation3 + $0xd8] sm:$0xff] %vm4435_vm3, %v3242_v13  ;;  %v4404_v27 = vadd.f32 %v10405_v11, %v3696_v53  ;;  %v3156_v6 = vpop.xlane.xlu0 %3155  ;;  %v3314_v53 = vld [vmem:[#allocation4 + $0x118] sm:$0xff]  ;;  %v3075_v13 = vmul.f32 %v14407_v56, %v3011_v29 }
 0x42f   : > { %v3249_v24 = vadd.f32 %v3156_v6, %v3057_v33  ;;  %v3114_v20 = vpop.xlane.xlu1 %3113  ;;  %v4147_v34 = vpop.f32.mrf.mxu0  ;;  %v3054_v33 = vmul.f32 %v17475_v19, %v2990_v3  ;;  %v3698_v17 = vmul.f32 %v14147_v30, %v3314_v53  ;;  %v3015_v53 = vld [vmem:[#allocation3 + $0x1c0] sm:$0xff]  ;;  %v3010_v19 = vld [vmem:[#allocation3 + $0x198] sm:$0xff] }
 0x430   : > { %4597 = vst.msk [vmem:[#allocation4 + $0x108] sm:$0xff] %vm1226_vm2, %v4404_v27  ;;  %v3228_v21 = vadd.f32 %v3114_v20, %v3036_v5  ;;  %v4403_v63 = vadd.f32 %v4147_v34, %v3695_v42  ;;  %v2997_v42 = vld [vmem:[#allocation3 + $0x130] sm:$0xff]  ;;  %v2992_v5 = vld [vmem:[#allocation3 + $0x108] sm:$0xff] }
 0x431   : > { %4534 = vst.msk [vmem:[#allocation3 + $0x110] sm:$0xff] %vm4435_vm3, %v3249_v24  ;;  %v3313_v27 = vld [vmem:[#allocation4 + $0x110] sm:$0xff]  ;;  %v17476_v34 = vld [vmem:[#allocation25_spill] sm:$0xff] }
 0x432   : > { %4513 = vst.msk [vmem:[#allocation3 + $0x68] sm:$0xff] %vm4435_vm3, %v3228_v21  ;;  %v3188_v51 = vpop.xlane.xlu0 %3187  ;;  %v3061_v40 = vmul.f32 %v17476_v34, %v2997_v42  ;;  %v3697_v56 = vmul.f32 %v14170_v39, %v3313_v27  ;;  %v3079_v42 = vmul.f32 %v14435_v41, %v3015_v53  ;;  %v3014_v53 = vld [vmem:[#allocation3 + $0x1b8] sm:$0xff] }
 0x433   : > { %4596 = vst.msk [vmem:[#allocation4 + $0x100] sm:$0xff] %vm1226_vm2, %v4403_v63  ;;  %v3265_v43 = vadd.f32 %v3188_v51, %v3073_v60  ;;  %v3146_v14 = vpop.xlane.xlu1 %3145  ;;  %v17477_v60 = vld [vmem:[#allocation18_spill] sm:$0xff] }
 0x434   : > { %v3244_v16 = vadd.f32 %v3146_v14, %v3052_v36  ;;  %v3056_v51 = vmul.f32 %v17477_v60, %v2992_v5  ;;  %v3008_v14 = vld [vmem:[#allocation3 + $0x188] sm:$0xff]  ;;  %v3315_v5 = vld [vmem:[#allocation4 + $0x120] sm:$0xff] }
 0x435   : > { %4550 = vst.msk [vmem:[#allocation3 + $0x190] sm:$0xff] %vm4435_vm3, %v3265_v43  ;;  %v3072_v52 = vmul.f32 %v14326_v22, %v3008_v14  ;;  %v3316_v22 = vld [vmem:[#allocation4 + $0x128] sm:$0xff]  ;;  %v3699_v41 = vmul.f32 %v14190_v26, %v3315_v5 }
 0x436   : > { %4529 = vst.msk [vmem:[#allocation3 + $0xe8] sm:$0xff] %vm4435_vm3, %v3244_v16  ;;  %v3160_v58 = vpop.xlane.xlu0 %3159  ;;  %v3077_v16 = vmul.f32 %v14422_v61, %v3013_v1  ;;  %v17479_v61 = vld [vmem:[#allocation78_spill] sm:$0xff]  ;;  %v3700_v34 = vmul.f32 %v14178_v35, %v3316_v22 }
 0x437   : > { %v3251_v12 = vadd.f32 %v3160_v58, %v3059_v2  ;;  %v3118_v23 = vpop.xlane.xlu1 %3117  ;;  %v2999_v2 = vld [vmem:[#allocation3 + $0x140] sm:$0xff]  ;;  %v3317_v22 = vld [vmem:[#allocation4 + $0x130] sm:$0xff] }
 0x438   : > { %v3230_v57 = vadd.f32 %v3118_v23, %v3038_v48  ;;  %v2994_v48 = vld [vmem:[#allocation3 + $0x118] sm:$0xff] }
 0x439   : > { %4536 = vst.msk [vmem:[#allocation3 + $0x120] sm:$0xff] %vm4435_vm3, %v3251_v12  ;;  %v17478_v12 = vld [vmem:[#allocation26_spill] sm:$0xff] }
 0x43a   : > { %4515 = vst.msk [vmem:[#allocation3 + $0x78] sm:$0xff] %vm4435_vm3, %v3230_v57  ;;  %v3192_v11 = vpop.xlane.xlu0 %3191  ;;  %v3063_v23 = vmul.f32 %v17478_v12, %v2999_v2  ;;  %v3058_v57 = vmul.f32 %v17479_v61, %v2994_v48 }
 0x43b   : > { %v3267_v6 = vadd.f32 %v3192_v11, %v3075_v13  ;;  %v3150_v10 = vpop.xlane.xlu1 %3149 }
 0x43c   : > { %v3246_v24 = vadd.f32 %v3150_v10, %v3054_v33  ;;  %v3001_v10 = vld [vmem:[#allocation3 + $0x150] sm:$0xff] }
 0x43d   : > { %4552 = vst.msk [vmem:[#allocation3 + $0x1a0] sm:$0xff] %vm4435_vm3, %v3267_v6  ;;  %v10408_v20 = vpop.f32.mrf.mxu0  ;;  %v3074_v6 = vmul.f32 %v14339_v4, %v3010_v19  ;;  %v17481_v4 = vld [vmem:[#allocation21_spill] sm:$0xff] }
 0x43e   : > { %4531 = vst.msk [vmem:[#allocation3 + $0xf8] sm:$0xff] %vm4435_vm3, %v3246_v24  ;;  %v4406_v21 = vadd.f32 %v10408_v20, %v3698_v17  ;;  %v3164_v63 = vpop.xlane.xlu0 %3163  ;;  %v2996_v20 = vld [vmem:[#allocation3 + $0x128] sm:$0xff] }
 0x43f   : > { %v3253_v36 = vadd.f32 %v3164_v63, %v3061_v40  ;;  %v3154_v9 = vpop.xlane.xlu1 %3153  ;;  %v4157_v43 = vpop.f32.mrf.mxu0  ;;  %v3060_v1 = vmul.f32 %v17481_v4, %v2996_v20 }
 0x440   : > { %4599 = vst.msk [vmem:[#allocation4 + $0x118] sm:$0xff] %vm1226_vm2, %v4406_v21  ;;  %v3248_v30 = vadd.f32 %v3154_v9, %v3056_v51  ;;  %v4405_v0 = vadd.f32 %v4157_v43, %v3697_v56  ;;  %v17480_v21 = vld [vmem:[#allocation27_spill] sm:$0xff] }
 0x441   : > { %4538 = vst.msk [vmem:[#allocation3 + $0x130] sm:$0xff] %vm4435_vm3, %v3253_v36  ;;  %v3065_v63 = vmul.f32 %v17480_v21, %v3001_v10  ;;  %v3017_v36 = vld [vmem:[#allocation3 + $0x1d0] sm:$0xff] }
 0x442   : > { %4533 = vst.msk [vmem:[#allocation3 + $0x108] sm:$0xff] %vm4435_vm3, %v3248_v30  ;;  %v3196_v39 = vpop.xlane.xlu0 %3195  ;;  %v3012_v30 = vld [vmem:[#allocation3 + $0x1a8] sm:$0xff] }
 0x443   : > { %4598 = vst.msk [vmem:[#allocation4 + $0x110] sm:$0xff] %vm1226_vm2, %v4405_v0  ;;  %v3269_v58 = vadd.f32 %v3196_v39, %v3077_v16  ;;  %v3186_v7 = vpop.xlane.xlu1 %3185  ;;  %v3081_v16 = vmul.f32 %v14443_v55, %v3017_v36  ;;  %v3076_v39 = vmul.f32 %v14351_v47, %v3012_v30  ;;  %v17482_v55 = vld [vmem:[#allocation22_spill] sm:$0xff]  ;;  %v3318_v47 = vld [vmem:[#allocation4 + $0x138] sm:$0xff] }
 0x444   : > { %v3264_v29 = vadd.f32 %v3186_v7, %v3072_v52  ;;  %v3003_v52 = vld [vmem:[#allocation3 + $0x160] sm:$0xff]  ;;  %v2998_v7 = vld [vmem:[#allocation3 + $0x138] sm:$0xff]  ;;  %v3702_v10 = vmul.f32 %v14243_v59, %v3318_v47 }
 0x445   : > { %4554 = vst.msk [vmem:[#allocation3 + $0x1b0] sm:$0xff] %vm4435_vm3, %v3269_v58 }
 0x446   : > { %4549 = vst.msk [vmem:[#allocation3 + $0x188] sm:$0xff] %vm4435_vm3, %v3264_v29  ;;  %v3168_v3 = vpop.xlane.xlu0 %3167  ;;  %v3067_v29 = vmul.f32 %v14357_v18, %v3003_v52  ;;  %v3078_v18 = vmul.f32 %v14366_v31, %v3014_v53  ;;  %v17483_v31 = vld [vmem:[#allocation82_spill] sm:$0xff] }
 0x447   : > { %v3255_v13 = vadd.f32 %v3168_v3, %v3063_v23  ;;  %v3158_v11 = vpop.xlane.xlu1 %3157  ;;  %v3062_v23 = vmul.f32 %v17482_v55, %v2998_v7  ;;  %v3019_v3 = vld [vmem:[#allocation3 + $0x1e0] sm:$0xff] }
 0x448   : > { %v3250_v33 = vadd.f32 %v3158_v11, %v3058_v57  ;;  %v3083_v11 = vmul.f32 %v14453_v32, %v3019_v3  ;;  %v3701_v32 = vmul.f32 %v14286_v25, %v3317_v22 }
 0x449   : > { %4540 = vst.msk [vmem:[#allocation3 + $0x140] sm:$0xff] %vm4435_vm3, %v3255_v13 }
 0x44a   : > { %4535 = vst.msk [vmem:[#allocation3 + $0x118] sm:$0xff] %vm4435_vm3, %v3250_v33  ;;  %v3200_v27 = vpop.xlane.xlu0 %3199  ;;  %v3005_v33 = vld [vmem:[#allocation3 + $0x170] sm:$0xff] }
 0x44b   : > { %v3271_v17 = vadd.f32 %v3200_v27, %v3079_v42  ;;  %v3190_v24 = vpop.xlane.xlu1 %3189 }
 0x44c   : > { %v3266_v40 = vadd.f32 %v3190_v24, %v3074_v6  ;;  %v3000_v6 = vld [vmem:[#allocation3 + $0x148] sm:$0xff]  ;;  %v3069_v24 = vmul.f32 %v14372_v28, %v3005_v33  ;;  %v3322_v33 = vld [vmem:[#allocation4 + $0x158] sm:$0xff] }
 0x44d   : > { %4556 = vst.msk [vmem:[#allocation3 + $0x1c0] sm:$0xff] %vm4435_vm3, %v3271_v17  ;;  %v10411_v56 = vpop.f32.mrf.mxu0 }
 0x44e   : > { %4551 = vst.msk [vmem:[#allocation3 + $0x198] sm:$0xff] %vm4435_vm3, %v3266_v40  ;;  %v4408_v60 = vadd.f32 %v10411_v56, %v3700_v34  ;;  %v3172_v51 = vpop.xlane.xlu0 %3171  ;;  %v3064_v40 = vmul.f32 %v17483_v31, %v3000_v6  ;;  %v3021_v56 = vld [vmem:[#allocation3 + $0x1f0] sm:$0xff] }
 0x44f   : > { %v3257_v9 = vadd.f32 %v3172_v51, %v3065_v63  ;;  %v3162_v43 = vpop.xlane.xlu1 %3161  ;;  %v4167_v14 = vpop.f32.mrf.mxu0  ;;  %v3085_v28 = vmul.f32 %v14463_v38, %v3021_v56  ;;  %v3321_v6 = vld [vmem:[#allocation4 + $0x150] sm:$0xff] }
 0x450   : > { %4601 = vst.msk [vmem:[#allocation4 + $0x128] sm:$0xff] %vm1226_vm2, %v4408_v60  ;;  %v3252_v35 = vadd.f32 %v3162_v43, %v3060_v1  ;;  %v4407_v0 = vadd.f32 %v4167_v14, %v3699_v41  ;;  %v3016_v60 = vld [vmem:[#allocation3 + $0x1c8] sm:$0xff]  ;;  %v3705_v31 = vmul.f32 %v14331_v15, %v3321_v6  ;;  %v3331_v6 = vld [vmem:[#allocation4 + $0x1a0] sm:$0xff] }
 0x451   : > { %4542 = vst.msk [vmem:[#allocation3 + $0x150] sm:$0xff] %vm4435_vm3, %v3257_v9  ;;  %v3080_v4 = vmul.f32 %v14385_v46, %v3016_v60  ;;  %v3002_v9 = vld [vmem:[#allocation3 + $0x158] sm:$0xff] }
 0x452   : > { %4537 = vst.msk [vmem:[#allocation3 + $0x128] sm:$0xff] %vm4435_vm3, %v3252_v35  ;;  %v3204_v26 = vpop.xlane.xlu0 %3203  ;;  %v3066_v14 = vmul.f32 %v14281_v45, %v3002_v9  ;;  %v3018_v35 = vld [vmem:[#allocation3 + $0x1d8] sm:$0xff] }
 0x453   : > { %4600 = vst.msk [vmem:[#allocation4 + $0x120] sm:$0xff] %vm1226_vm2, %v4407_v0  ;;  %v3273_v2 = vadd.f32 %v3204_v26, %v3081_v16  ;;  %v3194_v58 = vpop.xlane.xlu1 %3193  ;;  %v3320_v0 = vld [vmem:[#allocation4 + $0x148] sm:$0xff]  ;;  %v10461_v16 = vpop.f32.mrf.mxu1  ;;  %v3082_v46 = vmul.f32 %v14398_v49, %v3018_v35  ;;  %v3334_v9 = vld [vmem:[#allocation4 + $0x1b8] sm:$0xff] }
 0x454   : > { %v3268_v48 = vadd.f32 %v3194_v58, %v3076_v39  ;;  %v3319_v39 = vld [vmem:[#allocation4 + $0x140] sm:$0xff]  ;;  %v3704_v58 = vmul.f32 %v14254_v54, %v3320_v0 }
 0x455   : > { %4558 = vst.msk [vmem:[#allocation3 + $0x1d0] sm:$0xff] %vm4435_vm3, %v3273_v2  ;;  %v3004_v2 = vld [vmem:[#allocation3 + $0x168] sm:$0xff]  ;;  %v14552_v45 = vpop.f32.mrf.mxu1 }
 0x456   : > { %4553 = vst.msk [vmem:[#allocation3 + $0x1a8] sm:$0xff] %vm4435_vm3, %v3268_v48  ;;  %v3176_v12 = vpop.xlane.xlu0 %3175 }
 0x457   : > { %v3259_v61 = vadd.f32 %v3176_v12, %v3067_v29  ;;  %v3166_v57 = vpop.xlane.xlu1 %3165  ;;  %v3703_v29 = vmul.f32 %v14308_v62, %v3319_v39 }
 0x458   : > { %v3254_v13 = vadd.f32 %v3166_v57, %v3062_v23  ;;  %v3068_v23 = vmul.f32 %v14298_v8, %v3004_v2  ;;  %v10464_v57 = vpop.f32.mrf.mxu1  ;;  %v3327_v2 = vld [vmem:[#allocation4 + $0x180] sm:$0xff] }
 0x459   : > { %4544 = vst.msk [vmem:[#allocation3 + $0x160] sm:$0xff] %vm4435_vm3, %v3259_v61  ;;  %v3020_v61 = vld [vmem:[#allocation3 + $0x1e8] sm:$0xff] }
 0x45a   : > { %4539 = vst.msk [vmem:[#allocation3 + $0x138] sm:$0xff] %vm4435_vm3, %v3254_v13  ;;  %v3208_v19 = vpop.xlane.xlu0 %3207  ;;  %v3084_v13 = vmul.f32 %v14413_v50, %v3020_v61  ;;  %v3330_v50 = vld [vmem:[#allocation4 + $0x198] sm:$0xff] }
 0x45b   : > { %v3275_v42 = vadd.f32 %v3208_v19, %v3083_v11  ;;  %v3198_v27 = vpop.xlane.xlu1 %3197  ;;  %v3006_v11 = vld [vmem:[#allocation3 + $0x178] sm:$0xff]  ;;  %v14564_v19 = vpop.f32.mrf.mxu1 }
 0x45c   : > { %v3270_v5 = vadd.f32 %v3198_v27, %v3078_v18  ;;  %v3328_v18 = vld [vmem:[#allocation4 + $0x188] sm:$0xff]  ;;  %v3070_v27 = vmul.f32 %v14312_v44, %v3006_v11 }
 0x45d   : > { %4560 = vst.msk [vmem:[#allocation3 + $0x1e0] sm:$0xff] %vm4435_vm3, %v3275_v42  ;;  %v10414_v17 = vpop.f32.mrf.mxu0  ;;  %v10467_v22 = vpop.f32.mrf.mxu1 }
 0x45e   : > { %4555 = vst.msk [vmem:[#allocation3 + $0x1b8] sm:$0xff] %vm4435_vm3, %v3270_v5  ;;  %v4410_v20 = vadd.f32 %v10414_v17, %v3702_v10  ;;  %v3180_v34 = vpop.xlane.xlu0 %3179  ;;  %v3022_v17 = vld [vmem:[#allocation3 + $0x1f8] sm:$0xff] }
 0x45f   : > { %v3261_v21 = vadd.f32 %v3180_v34, %v3069_v24  ;;  %v4177_v63 = vpop.f32.mrf.mxu0  ;;  %v3170_v41 = vpop.xlane.xlu1 %3169 }
 0x460   : > { %4603 = vst.msk [vmem:[#allocation4 + $0x138] sm:$0xff] %vm1226_vm2, %v4410_v20  ;;  %v4409_v59 = vadd.f32 %v4177_v63, %v3701_v32  ;;  %v3256_v51 = vadd.f32 %v3170_v41, %v3064_v40  ;;  %v14569_v40 = vpop.f32.mrf.mxu1  ;;  %v3086_v63 = vmul.f32 %v14426_v37, %v3022_v17 }
 0x461   : > { %4546 = vst.msk [vmem:[#allocation3 + $0x170] sm:$0xff] %vm4435_vm3, %v3261_v21 }
 0x462   : > { %4602 = vst.msk [vmem:[#allocation4 + $0x130] sm:$0xff] %vm1226_vm2, %v4409_v59  ;;  %v3212_v25 = vpop.xlane.xlu0 %3211  ;;  %v10470_v59 = vpop.f32.mrf.mxu1 }
 0x463   : > { %4541 = vst.msk [vmem:[#allocation3 + $0x148] sm:$0xff] %vm4435_vm3, %v3256_v51  ;;  %v3277_v1 = vadd.f32 %v3212_v25, %v3085_v28  ;;  %v3202_v36 = vpop.xlane.xlu1 %3201  ;;  %v3332_v25 = vld [vmem:[#allocation4 + $0x1a8] sm:$0xff] }
 0x464   : > { %v3272_v43 = vadd.f32 %v3202_v36, %v3080_v4  ;;  %v14578_v36 = vpop.f32.mrf.mxu1 }
 0x465   : > { %4562 = vst.msk [vmem:[#allocation3 + $0x1f0] sm:$0xff] %vm4435_vm3, %v3277_v1 }
 0x466   : > { %4557 = vst.msk [vmem:[#allocation3 + $0x1c8] sm:$0xff] %vm4435_vm3, %v3272_v43  ;;  %v3324_v43 = vld [vmem:[#allocation4 + $0x168] sm:$0xff] }
 0x467   : > { %v3174_v30 = vpop.xlane.xlu1 %3173 }
 0x468   : > { %v3258_v38 = vadd.f32 %v3174_v30, %v3066_v14 }
 0x46a   : > { %4543 = vst.msk [vmem:[#allocation3 + $0x158] sm:$0xff] %vm4435_vm3, %v3258_v38  ;;  %v3561_v26 = vpop.permute.xlu0 %3560  ;;  %v3323_v38 = vld [vmem:[#allocation4 + $0x160] sm:$0xff] }
 0x46b   : > { %v3206_v52 = vpop.xlane.xlu1 %3205  ;;  %v3706_v24 = vmul.f32 %v3561_v26, %v3322_v33 }
 0x46c   : > { %v3274_v7 = vadd.f32 %v3206_v52, %v3082_v46  ;;  %v3336_v46 = vld [vmem:[#allocation4 + $0x1c8] sm:$0xff] }
 0x46d   : > { %v10417_v48 = vpop.f32.mrf.mxu0 }
 0x46e   : > { %4559 = vst.msk [vmem:[#allocation3 + $0x1d8] sm:$0xff] %vm4435_vm3, %v3274_v7  ;;  %v4412_v12 = vadd.f32 %v10417_v48, %v3704_v58  ;;  %v14555_v55 = vpop.permute.xlu0 %3570 }
 0x46f   : > { %v4187_v3 = vpop.f32.mrf.mxu0  ;;  %v3178_v49 = vpop.xlane.xlu1 %3177  ;;  %v3708_v26 = vmul.f32 %v14555_v55, %v3324_v43  ;;  %v3338_v55 = vld [vmem:[#allocation4 + $0x1d8] sm:$0xff]  ;;  %v3337_v43 = vld [vmem:[#allocation4 + $0x1d0] sm:$0xff] }
 0x470   : > { %4605 = vst.msk [vmem:[#allocation4 + $0x148] sm:$0xff] %vm1226_vm2, %v4412_v12  ;;  %v4411_v54 = vadd.f32 %v4187_v3, %v3703_v29  ;;  %v3260_v53 = vadd.f32 %v3178_v49, %v3068_v23 }
 0x471   : > { %v10473_v30 = vpop.f32.mrf.mxu1 }
 0x472   : > { %4604 = vst.msk [vmem:[#allocation4 + $0x140] sm:$0xff] %vm1226_vm2, %v4411_v54  ;;  %v14561_v62 = vpop.permute.xlu0 %3580 }
 0x473   : > { %4545 = vst.msk [vmem:[#allocation3 + $0x168] sm:$0xff] %vm4435_vm3, %v3260_v53  ;;  %v3210_v47 = vpop.xlane.xlu1 %3209  ;;  %v14582_v58 = vpop.f32.mrf.mxu1  ;;  %v3329_v53 = vld [vmem:[#allocation4 + $0x190] sm:$0xff] }
 0x474   : > { %v3276_v8 = vadd.f32 %v3210_v47, %v3084_v13 }
 0x476   : > { %4561 = vst.msk [vmem:[#allocation3 + $0x1e8] sm:$0xff] %vm4435_vm3, %v3276_v8  ;;  %v3591_v42 = vpop.permute.xlu0 %3590 }
 0x477   : > { %v3712_v10 = vmul.f32 %v3591_v42, %v3328_v18  ;;  %v3182_v5 = vpop.xlane.xlu1 %3181  ;;  %v3326_v42 = vld [vmem:[#allocation4 + $0x178] sm:$0xff] }
 0x478   : > { %v3262_v32 = vadd.f32 %v3182_v5, %v3070_v27 }
 0x479   : > { %v4420_v20 = vadd.f32 %v10461_v16, %v3712_v10  ;;  %v10420_v34 = vpop.f32.mrf.mxu0 }
 0x47a   : > { %4547 = vst.msk [vmem:[#allocation3 + $0x178] sm:$0xff] %vm4435_vm3, %v3262_v32  ;;  %v4414_v56 = vadd.f32 %v10420_v34, %v3706_v24  ;;  %v3601_v21 = vpop.permute.xlu0 %3600  ;;  %v3325_v24 = vld [vmem:[#allocation4 + $0x170] sm:$0xff]  ;;  %v3342_v34 = vld [vmem:[#allocation4 + $0x1f8] sm:$0xff] }
 0x47b   : > { %4613 = vst.msk [vmem:[#allocation4 + $0x188] sm:$0xff] %vm1226_vm2, %v4420_v20  ;;  %v3714_v44 = vmul.f32 %v3601_v21, %v3330_v50  ;;  %v4197_v41 = vpop.f32.mrf.mxu0  ;;  %v3214_v60 = vpop.xlane.xlu1 %3213  ;;  %v3710_v50 = vmul.f32 %v14561_v62, %v3326_v42  ;;  %v3333_v21 = vld [vmem:[#allocation4 + $0x1b0] sm:$0xff] }
 0x47c   : > { %4607 = vst.msk [vmem:[#allocation4 + $0x158] sm:$0xff] %vm1226_vm2, %v4414_v56  ;;  %v4413_v51 = vadd.f32 %v4197_v41, %v3705_v31  ;;  %v3278_v28 = vadd.f32 %v3214_v60, %v3086_v63 }
 0x47d   : > { %v4422_v15 = vadd.f32 %v10464_v57, %v3714_v44  ;;  %v10476_v49 = vpop.f32.mrf.mxu1 }
 0x47e   : > { %4606 = vst.msk [vmem:[#allocation4 + $0x150] sm:$0xff] %vm1226_vm2, %v4413_v51  ;;  %v3611_v4 = vpop.permute.xlu0 %3610 }
 0x47f   : > { %4563 = vst.msk [vmem:[#allocation3 + $0x1f8] sm:$0xff] %vm4435_vm3, %v3278_v28  ;;  %v3716_v37 = vmul.f32 %v3611_v4, %v3332_v25  ;;  %v3566_v1 = vpop.permute.xlu1 %3565  ;;  %v4342_v18 = vpop.f32.mrf.mxu1  ;;  %v3335_v4 = vld [vmem:[#allocation4 + $0x1c0] sm:$0xff] }
 0x480   : > { %4615 = vst.msk [vmem:[#allocation4 + $0x198] sm:$0xff] %vm1226_vm2, %v4422_v15  ;;  %v3707_v7 = vmul.f32 %v3566_v1, %v3323_v38  ;;  %v3339_v38 = vld [vmem:[#allocation4 + $0x1e0] sm:$0xff] }
 0x481   : > { %v4424_v14 = vadd.f32 %v10467_v22, %v3716_v37  ;;  %v3340_v22 = vld [vmem:[#allocation4 + $0x1e8] sm:$0xff] }
 0x482   : > { %v3621_v35 = vpop.permute.xlu0 %3620 }
 0x483   : > { %4617 = vst.msk [vmem:[#allocation4 + $0x1a8] sm:$0xff] %vm1226_vm2, %v4424_v14  ;;  %v3718_v0 = vmul.f32 %v3621_v35, %v3334_v9  ;;  %v3576_v16 = vpop.permute.xlu1 %3575 }
 0x484   : > { %v3709_v63 = vmul.f32 %v3576_v16, %v3325_v24 }
 0x485   : > { %v4426_v39 = vadd.f32 %v10470_v59, %v3718_v0  ;;  %v10423_v52 = vpop.f32.mrf.mxu0 }
 0x486   : > { %v4416_v48 = vadd.f32 %v10423_v52, %v3708_v26  ;;  %v3631_v29 = vpop.permute.xlu0 %3630  ;;  %v3341_v26 = vld [vmem:[#allocation4 + $0x1f0] sm:$0xff] }
 0x487   : > { %4619 = vst.msk [vmem:[#allocation4 + $0x1b8] sm:$0xff] %vm1226_vm2, %v4426_v39  ;;  %v3720_v12 = vmul.f32 %v3631_v29, %v3336_v46  ;;  %v4207_v23 = vpop.f32.mrf.mxu0  ;;  %v3586_v3 = vpop.permute.xlu1 %3585 }
 0x488   : > { %4609 = vst.msk [vmem:[#allocation4 + $0x168] sm:$0xff] %vm1226_vm2, %v4416_v48  ;;  %v4415_v61 = vadd.f32 %v4207_v23, %v3707_v7  ;;  %v3711_v57 = vmul.f32 %v3586_v3, %v3327_v2 }
 0x489   : > { %v4428_v54 = vadd.f32 %v10473_v30, %v3720_v12  ;;  %v10479_v10 = vpop.f32.mrf.mxu1 }
 0x48a   : > { %4608 = vst.msk [vmem:[#allocation4 + $0x160] sm:$0xff] %vm1226_vm2, %v4415_v61  ;;  %v4419_v13 = vadd.f32 %v14552_v45, %v3711_v57  ;;  %v3641_v47 = vpop.permute.xlu0 %3640 }
 0x48b   : > { %4621 = vst.msk [vmem:[#allocation4 + $0x1c8] sm:$0xff] %vm1226_vm2, %v4428_v54  ;;  %v3722_v11 = vmul.f32 %v3641_v47, %v3338_v55  ;;  %v3596_v8 = vpop.permute.xlu1 %3595  ;;  %v4352_v44 = vpop.f32.mrf.mxu1 }
 0x48c   : > { %4612 = vst.msk [vmem:[#allocation4 + $0x180] sm:$0xff] %vm1226_vm2, %v4419_v13  ;;  %v3713_v33 = vmul.f32 %v3596_v8, %v3329_v53 }
 0x48d   : > { %v4430_v27 = vadd.f32 %v10476_v49, %v3722_v11 }
 0x48e   : > { %v4421_v5 = vadd.f32 %v14564_v19, %v3713_v33  ;;  %v3651_v17 = vpop.permute.xlu0 %3650 }
 0x48f   : > { %4623 = vst.msk [vmem:[#allocation4 + $0x1d8] sm:$0xff] %vm1226_vm2, %v4430_v27  ;;  %v3724_v45 = vmul.f32 %v3651_v17, %v3340_v22  ;;  %v3606_v32 = vpop.permute.xlu1 %3605 }
 0x490   : > { %4614 = vst.msk [vmem:[#allocation4 + $0x190] sm:$0xff] %vm1226_vm2, %v4421_v5  ;;  %v3715_v20 = vmul.f32 %v3606_v32, %v3331_v6 }
 0x491   : > { %v4432_v31 = vadd.f32 %v10479_v10, %v3724_v45  ;;  %v10426_v56 = vpop.f32.mrf.mxu0 }
 0x492   : > { %v4423_v41 = vadd.f32 %v14569_v40, %v3715_v20  ;;  %v4418_v19 = vadd.f32 %v10426_v56, %v3710_v50  ;;  %v3661_v60 = vpop.permute.xlu0 %3660 }
 0x493   : > { %4625 = vst.msk [vmem:[#allocation4 + $0x1e8] sm:$0xff] %vm1226_vm2, %v4432_v31  ;;  %v3726_v59 = vmul.f32 %v3661_v60, %v3342_v34  ;;  %v4217_v51 = vpop.f32.mrf.mxu0  ;;  %v3616_v28 = vpop.permute.xlu1 %3615 }
 0x494   : > { %4616 = vst.msk [vmem:[#allocation4 + $0x1a0] sm:$0xff] %vm1226_vm2, %v4423_v41  ;;  %4611 = vst.msk [vmem:[#allocation4 + $0x178] sm:$0xff] %vm1226_vm2, %v4418_v19  ;;  %v4417_v62 = vadd.f32 %v4217_v51, %v3709_v63  ;;  %v3717_v25 = vmul.f32 %v3616_v28, %v3333_v21 }
 0x495   : > { %v10482_v15 = vpop.f32.mrf.mxu1 }
 0x496   : > { %4610 = vst.msk [vmem:[#allocation4 + $0x170] sm:$0xff] %vm1226_vm2, %v4417_v62  ;;  %v4425_v37 = vadd.f32 %v14578_v36, %v3717_v25  ;;  %v4434_v40 = vadd.f32 %v10482_v15, %v3726_v59 }
 0x497   : > { %v3626_v1 = vpop.permute.xlu1 %3625  ;;  %v4362_v2 = vpop.f32.mrf.mxu1 }
 0x498   : > { %4618 = vst.msk [vmem:[#allocation4 + $0x1b0] sm:$0xff] %vm1226_vm2, %v4425_v37  ;;  %4627 = vst.msk [vmem:[#allocation4 + $0x1f8] sm:$0xff] %vm1226_vm2, %v4434_v40  ;;  %v3719_v9 = vmul.f32 %v3626_v1, %v3335_v4 }
 0x49a   : > { %v4427_v14 = vadd.f32 %v14582_v58, %v3719_v9 }
 0x49b   : > { %v3636_v30 = vpop.permute.xlu1 %3635 }
 0x49c   : > { %4620 = vst.msk [vmem:[#allocation4 + $0x1c0] sm:$0xff] %vm1226_vm2, %v4427_v14  ;;  %v3721_v35 = vmul.f32 %v3636_v30, %v3337_v43 }
 0x49e   : > { %v4429_v0 = vadd.f32 %v4342_v18, %v3721_v35 }
 0x49f   : > { %v3646_v16 = vpop.permute.xlu1 %3645 }
 0x4a0   : > { %4622 = vst.msk [vmem:[#allocation4 + $0x1d0] sm:$0xff] %vm1226_vm2, %v4429_v0  ;;  %v3723_v36 = vmul.f32 %v3646_v16, %v3339_v38 }
 0x4a2   : > { %v4431_v46 = vadd.f32 %v4352_v44, %v3723_v36 }
 0x4a3   : > { %v3656_v39 = vpop.permute.xlu1 %3655 }
 0x4a4   : > { %4624 = vst.msk [vmem:[#allocation4 + $0x1e0] sm:$0xff] %vm1226_vm2, %v4431_v46  ;;  %v3725_v52 = vmul.f32 %v3656_v39, %v3341_v26 }
 0x4a6   : > { %v4433_v7 = vadd.f32 %v4362_v2, %v3725_v52 }
 0x4a8   : > { %4626 = vst.msk [vmem:[#allocation4 + $0x1f0] sm:$0xff] %vm1226_vm2, %v4433_v7 }
 0x4a9 PF: > { %p9560_p2 = scmp.ne.s32.totalorder %s12244_s0, %s12240_s9 }
 0x4ab   : > { %4631 = sbr.rel (%p9560_p2) target bundleno = 2441 (0x989), region = 166 }
 0x4b0   : > { %v4696_v58 = vld [vmem:[%s12253_s15] sm:$0xff]  ;;  %v4697_v48 = vld [vmem:[%s12253_s15 + $0x8] sm:$0xff]  ;;  %vm17011_vm4 = vcmask 64512   ;;  %v4634_v49 = vld [vmem:[%s12251_s1 + $0x10] sm:$0xff]  ;;  %s17716_s26 = sld [smem:[#allocation255_spill]] }
 0x4b1   : > { %v4632_v29 = vld [vmem:[%s12251_s1] sm:$0xff]  ;;  %10483 = vmatprep.subr.mxu0 %v4696_v58  ;;  %10509 = vmatprep.subr.mxu1 %v4697_v48  ;;  %v4633_v23 = vld [vmem:[%s12251_s1 + $0x8] sm:$0xff]  ;;  %v4650_v61 = vld [vmem:[%s12251_s1 + $0x90] sm:$0xff]  ;;  %s17843_s6 = sld [smem:[#allocation256_spill]] }
 0x4b2   : > { %v4648_v12 = vld [vmem:[%s12251_s1 + $0x80] sm:$0xff]  ;;  %v4649_v3 = vld [vmem:[%s12251_s1 + $0x88] sm:$0xff]  ;;  %10484 = vmatpush3.msra.mxu0 %v4696_v58  ;;  %10485 = vmatprep.mubr.msk.f32.mxu0 %vm17011_vm4, %v4632_v29  ;;  %v4635_v57 = vld [vmem:[%s12251_s1 + $0x18] sm:$0xff] }
 0x4b3   : > { %10510 = vmatpush3.msra.mxu1 %v4697_v48  ;;  %10511 = vmatprep.mubr.msk.f32.mxu1 %vm17011_vm4, %v4648_v12  ;;  %v4651_v55 = vld [vmem:[%s12251_s1 + $0x98] sm:$0xff]  ;;  %v4636_v54 = vld [vmem:[%s12251_s1 + $0x20] sm:$0xff]  ;;  %v4698_v13 = vld [vmem:[%s12253_s15 + $0x10] sm:$0xff] }
 0x4b4   : > { %10486 = vmatmul.mubr.msk.f32.vlgmr.msra.gmra.mxu0 %vm17011_vm4, %v4633_v23  ;;  %10512 = vmatmul.mubr.msk.f32.vlgmr.msra.gmra.mxu1 %vm17011_vm4, %v4649_v3  ;;  %v4652_v53 = vld [vmem:[%s12251_s1 + $0xa0] sm:$0xff]  ;;  %v4699_v47 = vld [vmem:[%s12253_s15 + $0x18] sm:$0xff]  ;;  %v4637_v11 = vld [vmem:[%s12251_s1 + $0x28] sm:$0xff]  ;;  %v5473_v23 = vlaneseq }
 0x4b5   : > { %10488 = vmatprep.mubr.msk.f32.mxu0 %vm17011_vm4, %v4634_v49  ;;  %10514 = vmatprep.mubr.msk.f32.mxu1 %vm17011_vm4, %v4650_v61  ;;  %v4653_v8 = vld [vmem:[%s12251_s1 + $0xa8] sm:$0xff]  ;;  %v4638_v18 = vld [vmem:[%s12251_s1 + $0x30] sm:$0xff]  ;;  %v4639_v22 = vld [vmem:[%s12251_s1 + $0x38] sm:$0xff] }
 0x4b6   : > { %v4654_v33 = vld [vmem:[%s12251_s1 + $0xb0] sm:$0xff]  ;;  %10535 = vmatprep.subr.mxu0 %v4698_v13  ;;  %10561 = vmatprep.subr.mxu1 %v4699_v47  ;;  %v4655_v42 = vld [vmem:[%s12251_s1 + $0xb8] sm:$0xff]  ;;  %v4640_v27 = vld [vmem:[%s12251_s1 + $0x40] sm:$0xff]  ;;  %v14741_v3 = vshrl.u32 %v5473_v23, 7  ;;  %v14746_v61 = vand.u32 127, %v5473_v23 }
 0x4b7   : > { %10536 = vmatpush3.msra.mxu0 %v4698_v13  ;;  %10562 = vmatpush3.msra.mxu1 %v4699_v47  ;;  %v4656_v6 = vld [vmem:[%s12251_s1 + $0xc0] sm:$0xff]  ;;  %v4641_v10 = vld [vmem:[%s12251_s1 + $0x48] sm:$0xff]  ;;  %v4642_v17 = vld [vmem:[%s12251_s1 + $0x50] sm:$0xff] }
 0x4b8   : > { %10489 = vmatmul.mubr.msk.f32.gmra.mxu0 %vm17011_vm4, %v4635_v57  ;;  %10515 = vmatmul.mubr.msk.f32.gmra.mxu1 %vm17011_vm4, %v4651_v55  ;;  %v4657_v5 = vld [vmem:[%s12251_s1 + $0xc8] sm:$0xff]  ;;  %v4658_v24 = vld [vmem:[%s12251_s1 + $0xd0] sm:$0xff]  ;;  %v4643_v45 = vld [vmem:[%s12251_s1 + $0x58] sm:$0xff]  ;;  %v14744_v49 = vadd.s32 8, %v14741_v3  ;;  %v14751_v57 = vadd.s32 24, %v14741_v3  ;;  %vm5492_vm6 = vcmp.ge.s32.totalorder %v14741_v3, %v14746_v61 }
 0x4b9   : > { %10491 = vmatprep.mubr.msk.f32.mxu0 %vm17011_vm4, %v4636_v54  ;;  %10517 = vmatprep.mubr.msk.f32.mxu1 %vm17011_vm4, %v4652_v53  ;;  %v4659_v32 = vld [vmem:[%s12251_s1 + $0xd8] sm:$0xff]  ;;  %v4644_v50 = vld [vmem:[%s12251_s1 + $0x60] sm:$0xff]  ;;  %v4645_v34 = vld [vmem:[%s12251_s1 + $0x68] sm:$0xff] }
 0x4ba   : > { %v4660_v20 = vld [vmem:[%s12251_s1 + $0xe0] sm:$0xff]  ;;  %v4661_v31 = vld [vmem:[%s12251_s1 + $0xe8] sm:$0xff]  ;;  %v4646_v56 = vld [vmem:[%s12251_s1 + $0x70] sm:$0xff]  ;;  %vm5493_vm5 = vcmp.ge.s32.totalorder %v14744_v49, %v14746_v61  ;;  %vm5495_vm7 = vcmp.ge.s32.totalorder %v14751_v57, %v14746_v61 }
 0x4bb   : > { %v4662_v21 = vld [vmem:[%s12251_s1 + $0xf0] sm:$0xff]  ;;  %v4647_v63 = vld [vmem:[%s12251_s1 + $0x78] sm:$0xff]  ;;  %v4664_v41 = vld [vmem:[%s12251_s1 + $0x100] sm:$0xff] }
 0x4bc   : > { %10492 = vmatmul.mubr.msk.f32.gmra.mxu0 %vm17011_vm4, %v4637_v11  ;;  %10518 = vmatmul.mubr.msk.f32.gmra.mxu1 %vm17011_vm4, %v4653_v8  ;;  %v4663_v44 = vld [vmem:[%s12251_s1 + $0xf8] sm:$0xff]  ;;  %v4680_v19 = vld [vmem:[%s12251_s1 + $0x180] sm:$0xff]  ;;  %v4665_v60 = vld [vmem:[%s12251_s1 + $0x108] sm:$0xff] }
 0x4bd   : > { %10494 = vmatprep.mubr.msk.f32.mxu0 %vm17011_vm4, %v4638_v18  ;;  %10520 = vmatprep.mubr.msk.f32.mxu1 %vm17011_vm4, %v4654_v33  ;;  %v4681_v59 = vld [vmem:[%s12251_s1 + $0x188] sm:$0xff]  ;;  %v4666_v51 = vld [vmem:[%s12251_s1 + $0x110] sm:$0xff]  ;;  %v4667_v62 = vld [vmem:[%s12251_s1 + $0x118] sm:$0xff] }
 0x4be   : > { %v4682_v28 = vld [vmem:[%s12251_s1 + $0x190] sm:$0xff]  ;;  %v4683_v25 = vld [vmem:[%s12251_s1 + $0x198] sm:$0xff]  ;;  %v4668_v15 = vld [vmem:[%s12251_s1 + $0x120] sm:$0xff] }
 0x4bf   : > { %v4684_v4 = vld [vmem:[%s12251_s1 + $0x1a0] sm:$0xff]  ;;  %v4669_v37 = vld [vmem:[%s12251_s1 + $0x128] sm:$0xff]  ;;  %v4670_v1 = vld [vmem:[%s12251_s1 + $0x130] sm:$0xff] }
 0x4c0   : > { %10495 = vmatmul.mubr.msk.f32.gmra.mxu0 %vm17011_vm4, %v4639_v22  ;;  %10521 = vmatmul.mubr.msk.f32.gmra.mxu1 %vm17011_vm4, %v4655_v42  ;;  %v4685_v40 = vld [vmem:[%s12251_s1 + $0x1a8] sm:$0xff]  ;;  %v4686_v9 = vld [vmem:[%s12251_s1 + $0x1b0] sm:$0xff]  ;;  %v4671_v43 = vld [vmem:[%s12251_s1 + $0x138] sm:$0xff] }
 0x4c1   : > { %10497 = vmatprep.mubr.msk.f32.mxu0 %vm17011_vm4, %v4640_v27  ;;  %10523 = vmatprep.mubr.msk.f32.mxu1 %vm17011_vm4, %v4656_v6  ;;  %v4687_v14 = vld [vmem:[%s12251_s1 + $0x1b8] sm:$0xff]  ;;  %v4672_v30 = vld [vmem:[%s12251_s1 + $0x140] sm:$0xff]  ;;  %v4673_v38 = vld [vmem:[%s12251_s1 + $0x148] sm:$0xff]  ;;  %v14782_v27 = vadd.s32 16, %v14741_v3 }
 0x4c2   : > { %v4688_v35 = vld [vmem:[%s12251_s1 + $0x1c0] sm:$0xff]  ;;  %v4689_v0 = vld [vmem:[%s12251_s1 + $0x1c8] sm:$0xff]  ;;  %v4674_v16 = vld [vmem:[%s12251_s1 + $0x150] sm:$0xff] }
 0x4c3   : > { %v4690_v36 = vld [vmem:[%s12251_s1 + $0x1d0] sm:$0xff]  ;;  %v4675_v26 = vld [vmem:[%s12251_s1 + $0x158] sm:$0xff]  ;;  %v4676_v39 = vld [vmem:[%s12251_s1 + $0x160] sm:$0xff]  ;;  %vm5494_vm8 = vcmp.ge.s32.totalorder %v14782_v27, %v14746_v61 }
 0x4c4   : > { %10498 = vmatmul.mubr.msk.f32.gmra.mxu0 %vm17011_vm4, %v4641_v10  ;;  %10524 = vmatmul.mubr.msk.f32.gmra.mxu1 %vm17011_vm4, %v4657_v5  ;;  %v4691_v46 = vld [vmem:[%s12251_s1 + $0x1d8] sm:$0xff]  ;;  %v4692_v52 = vld [vmem:[%s12251_s1 + $0x1e0] sm:$0xff]  ;;  %v4677_v2 = vld [vmem:[%s12251_s1 + $0x168] sm:$0xff] }
 0x4c5   : > { %10500 = vmatprep.mubr.msk.f32.mxu0 %vm17011_vm4, %v4642_v17  ;;  %10526 = vmatprep.mubr.msk.f32.mxu1 %vm17011_vm4, %v4658_v24  ;;  %v4693_v7 = vld [vmem:[%s12251_s1 + $0x1e8] sm:$0xff]  ;;  %v4678_v58 = vld [vmem:[%s12251_s1 + $0x170] sm:$0xff]  ;;  %v4679_v29 = vld [vmem:[%s12251_s1 + $0x178] sm:$0xff]  ;;  %v14790_v17 = vadd.s32 40, %v14741_v3  ;;  %v14793_v24 = vadd.s32 32, %v14741_v3 }
 0x4c6   : > { %v4694_v48 = vld [vmem:[%s12251_s1 + $0x1f0] sm:$0xff]  ;;  %v4695_v12 = vld [vmem:[%s12251_s1 + $0x1f8] sm:$0xff] }
 0x4c7   : > { %vm5497_vm9 = vcmp.ge.s32.totalorder %v14790_v17, %v14746_v61  ;;  %vm5496_vm10 = vcmp.ge.s32.totalorder %v14793_v24, %v14746_v61 }
 0x4c8   : > { %10501 = vmatmul.mubr.msk.f32.gmra.mxu0 %vm17011_vm4, %v4643_v45  ;;  %10527 = vmatmul.mubr.msk.f32.gmra.mxu1 %vm17011_vm4, %v4659_v32 }
 0x4c9   : > { %10503 = vmatprep.mubr.msk.f32.mxu0 %vm17011_vm4, %v4644_v50  ;;  %10529 = vmatprep.mubr.msk.f32.mxu1 %vm17011_vm4, %v4660_v20 }
 0x4cc   : > { %10504 = vmatmul.mubr.msk.f32.gmra.mxu0 %vm17011_vm4, %v4645_v34  ;;  %10530 = vmatmul.mubr.msk.f32.gmra.mxu1 %vm17011_vm4, %v4661_v31 }
 0x4cd   : > { %10506 = vmatprep.mubr.msk.f32.mxu0 %vm17011_vm4, %v4646_v56  ;;  %10532 = vmatprep.mubr.msk.f32.mxu1 %vm17011_vm4, %v4662_v21  ;;  %v11789_v21 = vmov 0  }
 0x4ce   : > { %11271 = vset.pattern.permute.xlu1 %v11789_v21  ;;  %11272 = vset.pattern.permute.xlu0 %v11789_v21 }
 0x4d0   : > { %10507 = vmatmul.mubr.msk.f32.gmra.mxu0 %vm17011_vm4, %v4647_v63  ;;  %10533 = vmatmul.mubr.msk.f32.gmra.mxu1 %vm17011_vm4, %v4663_v44 }
 0x4d1   : > { %10537 = vmatprep.mubr.msk.f32.mxu0 %vm17011_vm4, %v4664_v41  ;;  %10563 = vmatprep.mubr.msk.f32.mxu1 %vm17011_vm4, %v4680_v19  ;;  %v14831_v41 = vadd.s32 56, %v14741_v3  ;;  %v14834_v19 = vadd.s32 48, %v14741_v3 }
 0x4d3   : > { %vm5499_vm11 = vcmp.ge.s32.totalorder %v14831_v41, %v14746_v61  ;;  %vm5498_vm12 = vcmp.ge.s32.totalorder %v14834_v19, %v14746_v61 }
 0x4d4   : > { %10538 = vmatmul.mubr.msk.f32.vlgmr.msra.gmra.mxu0 %vm17011_vm4, %v4665_v60  ;;  %10564 = vmatmul.mubr.msk.f32.vlgmr.msra.gmra.mxu1 %vm17011_vm4, %v4681_v59 }
 0x4d5   : > { %10540 = vmatprep.mubr.msk.f32.mxu0 %vm17011_vm4, %v4666_v51  ;;  %10566 = vmatprep.mubr.msk.f32.mxu1 %vm17011_vm4, %v4682_v28 }
 0x4d8   : > { %10541 = vmatmul.mubr.msk.f32.gmra.mxu0 %vm17011_vm4, %v4667_v62  ;;  %10567 = vmatmul.mubr.msk.f32.gmra.mxu1 %vm17011_vm4, %v4683_v25 }
 0x4d9   : > { %10543 = vmatprep.mubr.msk.f32.mxu0 %vm17011_vm4, %v4668_v15  ;;  %10569 = vmatprep.mubr.msk.f32.mxu1 %vm17011_vm4, %v4684_v4 }
 0x4dc   : > { %10544 = vmatmul.mubr.msk.f32.gmra.mxu0 %vm17011_vm4, %v4669_v37  ;;  %10570 = vmatmul.mubr.msk.f32.gmra.mxu1 %vm17011_vm4, %v4685_v40  ;;  %v14865_v37 = vadd.s32 72, %v14741_v3  ;;  %v14868_v40 = vadd.s32 64, %v14741_v3 }
 0x4dd   : > { %10546 = vmatprep.mubr.msk.f32.mxu0 %vm17011_vm4, %v4670_v1  ;;  %10572 = vmatprep.mubr.msk.f32.mxu1 %vm17011_vm4, %v4686_v9 }
 0x4de   : > { %vm5501_vm13 = vcmp.ge.s32.totalorder %v14865_v37, %v14746_v61  ;;  %vm5500_vm14 = vcmp.ge.s32.totalorder %v14868_v40, %v14746_v61 }
 0x4e0   : > { %10547 = vmatmul.mubr.msk.f32.gmra.mxu0 %vm17011_vm4, %v4671_v43  ;;  %10573 = vmatmul.mubr.msk.f32.gmra.mxu1 %vm17011_vm4, %v4687_v14 }
 0x4e1   : > { %10549 = vmatprep.mubr.msk.f32.mxu0 %vm17011_vm4, %v4672_v30  ;;  %10575 = vmatprep.mubr.msk.f32.mxu1 %vm17011_vm4, %v4688_v35 }
 0x4e4   : > { %10550 = vmatmul.mubr.msk.f32.gmra.mxu0 %vm17011_vm4, %v4673_v38  ;;  %10576 = vmatmul.mubr.msk.f32.gmra.mxu1 %vm17011_vm4, %v4689_v0 }
 0x4e5   : > { %10552 = vmatprep.mubr.msk.f32.mxu0 %vm17011_vm4, %v4674_v16  ;;  %10578 = vmatprep.mubr.msk.f32.mxu1 %vm17011_vm4, %v4690_v36  ;;  %v14899_v16 = vadd.s32 88, %v14741_v3  ;;  %v14902_v36 = vadd.s32 80, %v14741_v3 }
 0x4e7   : > { %vm5503_vm15 = vcmp.ge.s32.totalorder %v14899_v16, %v14746_v61  ;;  %vm5502_vm0 = vcmp.ge.s32.totalorder %v14902_v36, %v14746_v61 }
 0x4e8   : > { %10553 = vmatmul.mubr.msk.f32.gmra.mxu0 %vm17011_vm4, %v4675_v26  ;;  %10579 = vmatmul.mubr.msk.f32.gmra.mxu1 %vm17011_vm4, %v4691_v46 }
 0x4e9   : > { %10555 = vmatprep.mubr.msk.f32.mxu0 %vm17011_vm4, %v4676_v39  ;;  %10581 = vmatprep.mubr.msk.f32.mxu1 %vm17011_vm4, %v4692_v52 }
 0x4ec   : > { %10556 = vmatmul.mubr.msk.f32.gmra.mxu0 %vm17011_vm4, %v4677_v2  ;;  %10582 = vmatmul.mubr.msk.f32.gmra.mxu1 %vm17011_vm4, %v4693_v7 }
 0x4ed   : > { %10558 = vmatprep.mubr.msk.f32.mxu0 %vm17011_vm4, %v4678_v58  ;;  %10584 = vmatprep.mubr.msk.f32.mxu1 %vm17011_vm4, %v4694_v48 }
 0x4f0   : > { %10559 = vmatmul.mubr.msk.f32.gmra.mxu0 %vm17011_vm4, %v4679_v29  ;;  %10585 = vmatmul.mubr.msk.f32.gmra.mxu1 %vm17011_vm4, %v4695_v12  ;;  %v14933_v29 = vadd.s32 104, %v14741_v3  ;;  %v14936_v12 = vadd.s32 96, %v14741_v3 }
 0x4f2   : > { %vm5505_vm1 = vcmp.ge.s32.totalorder %v14933_v29, %v14746_v61  ;;  %vm5504_vm2 = vcmp.ge.s32.totalorder %v14936_v12, %v14746_v61 }
 0x574   : > { %v10487_v55 = vpop.f32.mrf.mxu0  ;;  %v10513_v54 = vpop.f32.mrf.mxu1 }
 0x575   : > { %v14756_v53 = vsel %vm5493_vm5, %v10513_v54, -1e+09  ;;  %v14761_v13 = vsel %vm5493_vm5, %v10487_v55, -1e+09 }
 0x576   : > { %5702 = vmax.xlane.f32.xlu1 %v14756_v53  ;;  %5670 = vmax.xlane.f32.xlu0 %v14761_v13  ;;  %v4815_v47 = vpop.f32.mrf.mxu0  ;;  %v5008_v11 = vpop.f32.mrf.mxu1 }
 0x577   : > { %v14772_v33 = vsel %vm5492_vm6, %v4815_v47, -1e+09  ;;  %v14798_v45 = vsel %vm5492_vm6, %v5008_v11, -1e+09 }
 0x578   : > { %v10490_v8 = vpop.f32.mrf.mxu0  ;;  %v10516_v18 = vpop.f32.mrf.mxu1 }
 0x579   : > { %v14777_v22 = vsel %vm5495_vm7, %v10490_v8, -1e+09  ;;  %v14787_v6 = vsel %vm5495_vm7, %v10516_v18, -1e+09 }
 0x57a   : > { %5668 = vmax.xlane.f32.xlu0 %v14772_v33  ;;  %5674 = vmax.xlane.f32.xlu1 %v14777_v22  ;;  %v4825_v42 = vpop.f32.mrf.mxu0  ;;  %v5018_v10 = vpop.f32.mrf.mxu1 }
 0x57b   : > { %v14807_v32 = vsel %vm5494_vm8, %v5018_v10, -1e+09  ;;  %v14816_v34 = vsel %vm5494_vm8, %v4825_v42, -1e+09  ;;  %v14967_v10 = vadd.s32 120, %v14741_v3 }
 0x57c   : > { %v10493_v5 = vpop.f32.mrf.mxu0  ;;  %v10519_v20 = vpop.f32.mrf.mxu1 }
 0x57d   : > { %v14823_v31 = vsel %vm5497_vm9, %v10493_v5, -1e+09  ;;  %v14841_v60 = vsel %vm5497_vm9, %v10519_v20, -1e+09  ;;  %v14970_v5 = vadd.s32 112, %v14741_v3  ;;  %vm5507_vm3 = vcmp.ge.s32.totalorder %v14967_v10, %v14746_v61  ;;  %v15209_v10 = vld [vmem:[#allocation2 + $0x8] sm:$0xff] }
 0x57e   : > { %5700 = vmax.xlane.f32.xlu0 %v14798_v45  ;;  %5706 = vmax.xlane.f32.xlu1 %v14787_v6  ;;  %v4835_v50 = vpop.f32.mrf.mxu0  ;;  %v5028_v63 = vpop.f32.mrf.mxu1  ;;  %17484 = vst [vmem:[#allocation151_spill] sm:$0xff] %v14841_v60 }
 0x57f   : > { %v14828_v56 = vsel %vm5496_vm10, %v4835_v50, -1e+09  ;;  %v14846_v59 = vsel %vm5496_vm10, %v5028_v63, -1e+09  ;;  %vm5506_vm4 = vcmp.ge.s32.totalorder %v14970_v5, %v14746_v61  ;;  %v7346_v61 = vld [vmem:[%s12255_s29 + $0x70] sm:$0xff]  ;;  %v7361_v5 = vld [vmem:[%s12255_s29 + $0xe8] sm:$0xff] }
 0x580   : > { %v10496_v44 = vpop.f32.mrf.mxu0  ;;  %17485 = vst [vmem:[#allocation152_spill] sm:$0xff] %v14846_v59  ;;  %v10522_v28 = vpop.f32.mrf.mxu1 }
 0x581   : > { %v14857_v62 = vsel %vm5499_vm11, %v10496_v44, -1e+09  ;;  %v14875_v1 = vsel %vm5499_vm11, %v10522_v28, -1e+09 }
 0x582   : > { %5704 = vmax.xlane.f32.xlu0 %v14807_v32  ;;  %5672 = vmax.xlane.f32.xlu1 %v14816_v34  ;;  %v4845_v51 = vpop.f32.mrf.mxu0  ;;  %17486 = vst [vmem:[#allocation153_spill] sm:$0xff] %v14857_v62  ;;  %v5038_v15 = vpop.f32.mrf.mxu1  ;;  %17488 = vst [vmem:[#allocation155_spill] sm:$0xff] %v14875_v1 }
 0x583   : > { %v14862_v25 = vsel %vm5498_vm12, %v4845_v51, -1e+09  ;;  %v14880_v9 = vsel %vm5498_vm12, %v5038_v15, -1e+09 }
 0x584   : > { %17487 = vst [vmem:[#allocation154_spill] sm:$0xff] %v14862_v25  ;;  %v10499_v4 = vpop.f32.mrf.mxu0  ;;  %17489 = vst [vmem:[#allocation156_spill] sm:$0xff] %v14880_v9  ;;  %v10525_v14 = vpop.f32.mrf.mxu1 }
 0x585   : > { %v14891_v30 = vsel %vm5501_vm13, %v10499_v4, -1e+09  ;;  %v14909_v26 = vsel %vm5501_vm13, %v10525_v14, -1e+09 }
 0x586   : > { %5678 = vmax.xlane.f32.xlu1 %v14823_v31  ;;  %5676 = vmax.xlane.f32.xlu0 %v14828_v56  ;;  %v4855_v43 = vpop.f32.mrf.mxu0  ;;  %17490 = vst [vmem:[#allocation157_spill] sm:$0xff] %v14891_v30  ;;  %v5048_v38 = vpop.f32.mrf.mxu1  ;;  %17492 = vst [vmem:[#allocation159_spill] sm:$0xff] %v14909_v26 }
 0x587   : > { %v14896_v35 = vsel %vm5500_vm14, %v4855_v43, -1e+09  ;;  %v14914_v46 = vsel %vm5500_vm14, %v5048_v38, -1e+09 }
 0x588   : > { %17491 = vst [vmem:[#allocation158_spill] sm:$0xff] %v14896_v35  ;;  %v10502_v0 = vpop.f32.mrf.mxu0  ;;  %17493 = vst [vmem:[#allocation160_spill] sm:$0xff] %v14914_v46  ;;  %v10528_v52 = vpop.f32.mrf.mxu1 }
 0x589   : > { %v14925_v2 = vsel %vm5503_vm15, %v10502_v0, -1e+09  ;;  %v14943_v23 = vsel %vm5503_vm15, %v10528_v52, -1e+09 }
 0x58a   : > { %5710 = vmax.xlane.f32.xlu1 %v14841_v60  ;;  %5708 = vmax.xlane.f32.xlu0 %v14846_v59  ;;  %v4865_v39 = vpop.f32.mrf.mxu0  ;;  %17494 = vst [vmem:[#allocation161_spill] sm:$0xff] %v14925_v2  ;;  %v5058_v58 = vpop.f32.mrf.mxu1  ;;  %17496 = vst [vmem:[#allocation163_spill] sm:$0xff] %v14943_v23  ;;  %v15495_v59 = vld [vmem:[#allocation2 + $0x60] sm:$0xff] }
 0x58b   : > { %v14930_v7 = vsel %vm5502_vm0, %v4865_v39, -1e+09  ;;  %v14948_v55 = vsel %vm5502_vm0, %v5058_v58, -1e+09 }
 0x58c   : > { %17495 = vst [vmem:[#allocation162_spill] sm:$0xff] %v14930_v7  ;;  %v10505_v48 = vpop.f32.mrf.mxu0  ;;  %17497 = vst [vmem:[#allocation164_spill] sm:$0xff] %v14948_v55  ;;  %v10531_v47 = vpop.f32.mrf.mxu1 }
 0x58d   : > { %v14959_v11 = vsel %vm5505_vm1, %v10505_v48, -1e+09  ;;  %v14977_v50 = vsel %vm5505_vm1, %v10531_v47, -1e+09 }
 0x58e   : > { %5682 = vmax.xlane.f32.xlu1 %v14857_v62  ;;  %5680 = vmax.xlane.f32.xlu0 %v14862_v25  ;;  %v4875_v54 = vpop.f32.mrf.mxu0  ;;  %17498 = vst [vmem:[#allocation165_spill] sm:$0xff] %v14959_v11  ;;  %v5068_v18 = vpop.f32.mrf.mxu1  ;;  %17500 = vst [vmem:[#allocation167_spill] sm:$0xff] %v14977_v50 }
 0x58f   : > { %v14964_v8 = vsel %vm5504_vm2, %v4875_v54, -1e+09  ;;  %v14982_v20 = vsel %vm5504_vm2, %v5068_v18, -1e+09 }
 0x590   : > { %17499 = vst [vmem:[#allocation166_spill] sm:$0xff] %v14964_v8  ;;  %v10508_v42 = vpop.f32.mrf.mxu0  ;;  %17501 = vst [vmem:[#allocation168_spill] sm:$0xff] %v14982_v20  ;;  %v10534_v63 = vpop.f32.mrf.mxu1 }
 0x591   : > { %v14993_v44 = vsel %vm5507_vm3, %v10508_v42, -1e+09  ;;  %v15005_v4 = vsel %vm5507_vm3, %v10534_v63, -1e+09 }
 0x592   : > { %5714 = vmax.xlane.f32.xlu1 %v14875_v1  ;;  %5712 = vmax.xlane.f32.xlu0 %v14880_v9  ;;  %v4885_v21 = vpop.f32.mrf.mxu0  ;;  %17502 = vst [vmem:[#allocation169_spill] sm:$0xff] %v14993_v44  ;;  %v5078_v28 = vpop.f32.mrf.mxu1  ;;  %17504 = vst [vmem:[#allocation171_spill] sm:$0xff] %v15005_v4  ;;  %v15479_v9 = vld [vmem:[#allocation2 + $0x198] sm:$0xff] }
 0x593   : > { %v14998_v51 = vsel %vm5506_vm4, %v4885_v21, -1e+09  ;;  %v15010_v43 = vsel %vm5506_vm4, %v5078_v28, -1e+09  ;;  %17548 = vst [vmem:[#allocation215_spill] sm:$0xff] %v15479_v9 }
 0x594   : > { %17503 = vst [vmem:[#allocation170_spill] sm:$0xff] %v14998_v51  ;;  %v10539_v15 = vpop.f32.mrf.mxu0  ;;  %17505 = vst [vmem:[#allocation172_spill] sm:$0xff] %v15010_v43  ;;  %v10565_v38 = vpop.f32.mrf.mxu1 }
 0x595   : > { %v15017_v0 = vsel %vm5493_vm5, %v10539_v15, -1e+09  ;;  %v15029_v48 = vsel %vm5493_vm5, %v10565_v38, -1e+09 }
 0x596   : > { %5686 = vmax.xlane.f32.xlu1 %v14891_v30  ;;  %5684 = vmax.xlane.f32.xlu0 %v14896_v35  ;;  %v5201_v14 = vpop.f32.mrf.mxu0  ;;  %17506 = vst [vmem:[#allocation173_spill] sm:$0xff] %v15017_v0  ;;  %v5394_v52 = vpop.f32.mrf.mxu1  ;;  %17508 = vst [vmem:[#allocation175_spill] sm:$0xff] %v15029_v48  ;;  %v15423_v35 = vld [vmem:[#allocation2 + $0x50] sm:$0xff] }
 0x597   : > { %v15022_v39 = vsel %vm5492_vm6, %v5201_v14, -1e+09  ;;  %v15034_v54 = vsel %vm5492_vm6, %v5394_v52, -1e+09 }
 0x598   : > { %17507 = vst [vmem:[#allocation174_spill] sm:$0xff] %v15022_v39  ;;  %v10542_v58 = vpop.f32.mrf.mxu0  ;;  %17509 = vst [vmem:[#allocation176_spill] sm:$0xff] %v15034_v54  ;;  %v10568_v18 = vpop.f32.mrf.mxu1 }
 0x599   : > { %v15041_v42 = vsel %vm5495_vm7, %v10542_v58, -1e+09  ;;  %v15053_v63 = vsel %vm5495_vm7, %v10568_v18, -1e+09 }
 0x59a   : > { %5718 = vmax.xlane.f32.xlu1 %v14909_v26  ;;  %5716 = vmax.xlane.f32.xlu0 %v14914_v46  ;;  %v5211_v47 = vpop.f32.mrf.mxu0  ;;  %17510 = vst [vmem:[#allocation177_spill] sm:$0xff] %v15041_v42  ;;  %v5404_v21 = vpop.f32.mrf.mxu1  ;;  %17512 = vst [vmem:[#allocation179_spill] sm:$0xff] %v15053_v63 }
 0x59b   : > { %v15046_v49 = vsel %vm5494_vm8, %v5211_v47, -1e+09  ;;  %v15058_v28 = vsel %vm5494_vm8, %v5404_v21, -1e+09 }
 0x59c   : > { %17511 = vst [vmem:[#allocation178_spill] sm:$0xff] %v15046_v49  ;;  %v10545_v3 = vpop.f32.mrf.mxu0  ;;  %17513 = vst [vmem:[#allocation180_spill] sm:$0xff] %v15058_v28  ;;  %v10571_v14 = vpop.f32.mrf.mxu1 }
 0x59d   : > { %v15065_v38 = vsel %vm5497_vm9, %v10545_v3, -1e+09  ;;  %v15077_v58 = vsel %vm5497_vm9, %v10571_v14, -1e+09 }
 0x59e   : > { %5690 = vmax.xlane.f32.xlu1 %v14925_v2  ;;  %5688 = vmax.xlane.f32.xlu0 %v14930_v7  ;;  %v5221_v15 = vpop.f32.mrf.mxu0  ;;  %17514 = vst [vmem:[#allocation181_spill] sm:$0xff] %v15065_v38  ;;  %v5414_v52 = vpop.f32.mrf.mxu1  ;;  %17516 = vst [vmem:[#allocation183_spill] sm:$0xff] %v15077_v58 }
 0x59f   : > { %v15070_v57 = vsel %vm5496_vm10, %v5221_v15, -1e+09  ;;  %v15082_v47 = vsel %vm5496_vm10, %v5414_v52, -1e+09 }
 0x5a0   : > { %17515 = vst [vmem:[#allocation182_spill] sm:$0xff] %v15070_v57  ;;  %v10548_v27 = vpop.f32.mrf.mxu0  ;;  %17517 = vst [vmem:[#allocation184_spill] sm:$0xff] %v15082_v47  ;;  %v10574_v21 = vpop.f32.mrf.mxu1 }
 0x5a1   : > { %v15089_v3 = vsel %vm5499_vm11, %v10548_v27, -1e+09  ;;  %v15101_v14 = vsel %vm5499_vm11, %v10574_v21, -1e+09 }
 0x5a2   : > { %5722 = vmax.xlane.f32.xlu1 %v14943_v23  ;;  %5720 = vmax.xlane.f32.xlu0 %v14948_v55  ;;  %v5231_v18 = vpop.f32.mrf.mxu0  ;;  %17518 = vst [vmem:[#allocation185_spill] sm:$0xff] %v15089_v3  ;;  %v5424_v15 = vpop.f32.mrf.mxu1  ;;  %17520 = vst [vmem:[#allocation187_spill] sm:$0xff] %v15101_v14  ;;  %v15372_v23 = vld [vmem:[#allocation2 + $0x40] sm:$0xff] }
 0x5a3   : > { %v15094_v17 = vsel %vm5498_vm12, %v5231_v18, -1e+09  ;;  %v15106_v52 = vsel %vm5498_vm12, %v5424_v15, -1e+09 }
 0x5a4   : > { %17519 = vst [vmem:[#allocation186_spill] sm:$0xff] %v15094_v17  ;;  %v10551_v24 = vpop.f32.mrf.mxu0  ;;  %17521 = vst [vmem:[#allocation188_spill] sm:$0xff] %v15106_v52 }
 0x5a5   : > { %v15113_v18 = vsel %vm5501_vm13, %v10551_v24, -1e+09 }
 0x5a6   : > { %5694 = vmax.xlane.f32.xlu1 %v14959_v11  ;;  %5692 = vmax.xlane.f32.xlu0 %v14964_v8  ;;  %v5241_v27 = vpop.f32.mrf.mxu0  ;;  %17522 = vst [vmem:[#allocation189_spill] sm:$0xff] %v15113_v18 }
 0x5a7   : > { %v15118_v41 = vsel %vm5500_vm14, %v5241_v27, -1e+09 }
 0x5a8   : > { %17523 = vst [vmem:[#allocation190_spill] sm:$0xff] %v15118_v41  ;;  %v10554_v19 = vpop.f32.mrf.mxu0 }
 0x5a9   : > { %v15137_v27 = vsel %vm5503_vm15, %v10554_v19, -1e+09 }
 0x5aa   : > { %5726 = vmax.xlane.f32.xlu1 %v14977_v50  ;;  %5724 = vmax.xlane.f32.xlu0 %v14982_v20  ;;  %17526 = vst [vmem:[#allocation193_spill] sm:$0xff] %v15137_v27  ;;  %v15313_v20 = vld [vmem:[#allocation2 + $0x48] sm:$0xff] }
 0x5ab   : > { %v15328_v50 = vld [vmem:[#allocation2 + $0xc8] sm:$0xff] }
 0x5ae   : > { %5698 = vmax.xlane.f32.xlu1 %v14993_v44  ;;  %5696 = vmax.xlane.f32.xlu0 %v14998_v51  ;;  %v15311_v44 = vld [vmem:[#allocation2 + $0xa0] sm:$0xff] }
 0x5b2   : > { %5730 = vmax.xlane.f32.xlu1 %v15005_v4  ;;  %5728 = vmax.xlane.f32.xlu0 %v15010_v43  ;;  %v7349_v43 = vld [vmem:[%s12255_s29 + $0x88] sm:$0xff] }
 0x5b3   : > { %v7333_v4 = vld [vmem:[%s12255_s29 + $0x8] sm:$0xff] }
 0x5b6   : > { %5734 = vmax.xlane.f32.xlu1 %v15017_v0  ;;  %5732 = vmax.xlane.f32.xlu0 %v15022_v39  ;;  %v15285_v39 = vld [vmem:[#allocation2 + $0x28] sm:$0xff]  ;;  %v15299_v0 = vld [vmem:[#allocation2 + $0xb8] sm:$0xff] }
 0x5ba   : > { %5766 = vmax.xlane.f32.xlu1 %v15029_v48  ;;  %5764 = vmax.xlane.f32.xlu0 %v15034_v54  ;;  %v7336_v54 = vld [vmem:[%s12255_s29 + $0x20] sm:$0xff]  ;;  %v7351_v48 = vld [vmem:[%s12255_s29 + $0x98] sm:$0xff] }
 0x5be   : > { %5738 = vmax.xlane.f32.xlu1 %v15041_v42  ;;  %5736 = vmax.xlane.f32.xlu0 %v15046_v49 }
 0x5c2   : > { %5770 = vmax.xlane.f32.xlu1 %v15053_v63  ;;  %5768 = vmax.xlane.f32.xlu0 %v15058_v28  ;;  %v15264_v28 = vld [vmem:[#allocation2 + $0x90] sm:$0xff] }
 0x5c6   : > { %5742 = vmax.xlane.f32.xlu1 %v15065_v38  ;;  %5740 = vmax.xlane.f32.xlu0 %v15070_v57  ;;  %v7353_v38 = vld [vmem:[%s12255_s29 + $0xa8] sm:$0xff] }
 0x5ca   : > { %5774 = vmax.xlane.f32.xlu1 %v15077_v58  ;;  %5772 = vmax.xlane.f32.xlu0 %v15082_v47  ;;  %v10577_v47 = vpop.f32.mrf.mxu1  ;;  %v15256_v58 = vld [vmem:[#allocation2 + $0x10] sm:$0xff] }
 0x5cb   : > { %v15125_v15 = vsel %vm5501_vm13, %v10577_v47, -1e+09 }
 0x5cc   : > { %v5434_v21 = vpop.f32.mrf.mxu1  ;;  %17524 = vst [vmem:[#allocation191_spill] sm:$0xff] %v15125_v15 }
 0x5cd   : > { %v15130_v24 = vsel %vm5500_vm14, %v5434_v21, -1e+09 }
 0x5ce   : > { %5746 = vmax.xlane.f32.xlu1 %v15089_v3  ;;  %5744 = vmax.xlane.f32.xlu0 %v15094_v17  ;;  %17525 = vst [vmem:[#allocation192_spill] sm:$0xff] %v15130_v24  ;;  %v15248_v17 = vld [vmem:[#allocation2 + $0x98] sm:$0xff] }
 0x5d2   : > { %5778 = vmax.xlane.f32.xlu1 %v15101_v14  ;;  %5776 = vmax.xlane.f32.xlu0 %v15106_v52  ;;  %v5251_v52 = vpop.f32.mrf.mxu0  ;;  %v10580_v14 = vpop.f32.mrf.mxu1 }
 0x5d3   : > { %v15142_v37 = vsel %vm5502_vm0, %v5251_v52, -1e+09  ;;  %v15149_v21 = vsel %vm5503_vm15, %v10580_v14, -1e+09 }
 0x5d4   : > { %17527 = vst [vmem:[#allocation194_spill] sm:$0xff] %v15142_v37  ;;  %v5444_v47 = vpop.f32.mrf.mxu1  ;;  %v10557_v40 = vpop.f32.mrf.mxu0  ;;  %17528 = vst [vmem:[#allocation195_spill] sm:$0xff] %v15149_v21 }
 0x5d5   : > { %v15154_v19 = vsel %vm5502_vm0, %v5444_v47, -1e+09  ;;  %v15161_v52 = vsel %vm5505_vm1, %v10557_v40, -1e+09 }
 0x5d6   : > { %5750 = vmax.xlane.f32.xlu1 %v15113_v18  ;;  %5748 = vmax.xlane.f32.xlu0 %v15118_v41  ;;  %17529 = vst [vmem:[#allocation196_spill] sm:$0xff] %v15154_v19  ;;  %17530 = vst [vmem:[#allocation197_spill] sm:$0xff] %v15161_v52  ;;  %v7355_v18 = vld [vmem:[%s12255_s29 + $0xb8] sm:$0xff] }
 0x5da   : > { %5782 = vmax.xlane.f32.xlu1 %v15125_v15  ;;  %5780 = vmax.xlane.f32.xlu0 %v15130_v24  ;;  %v5261_v24 = vpop.f32.mrf.mxu0  ;;  %v10583_v15 = vpop.f32.mrf.mxu1 }
 0x5db   : > { %v15166_v16 = vsel %vm5504_vm2, %v5261_v24, -1e+09  ;;  %v15173_v47 = vsel %vm5505_vm1, %v10583_v15, -1e+09 }
 0x5dc   : > { %17531 = vst [vmem:[#allocation198_spill] sm:$0xff] %v15166_v16  ;;  %v5454_v14 = vpop.f32.mrf.mxu1  ;;  %v10560_v36 = vpop.f32.mrf.mxu0  ;;  %17532 = vst [vmem:[#allocation199_spill] sm:$0xff] %v15173_v47 }
 0x5dd   : > { %v15178_v40 = vsel %vm5504_vm2, %v5454_v14, -1e+09  ;;  %v15185_v29 = vsel %vm5507_vm3, %v10560_v36, -1e+09 }
 0x5de   : > { %5754 = vmax.xlane.f32.xlu1 %v15137_v27  ;;  %5752 = vmax.xlane.f32.xlu0 %v15142_v37  ;;  %17533 = vst [vmem:[#allocation200_spill] sm:$0xff] %v15178_v40  ;;  %v10586_v24 = vpop.f32.mrf.mxu1  ;;  %17534 = vst [vmem:[#allocation201_spill] sm:$0xff] %v15185_v29 }
 0x5df   : > { %v15197_v14 = vsel %vm5507_vm3, %v10586_v24, -1e+09 }
 0x5e0   : > { %v5464_v12 = vpop.f32.mrf.mxu1  ;;  %17536 = vst [vmem:[#allocation203_spill] sm:$0xff] %v15197_v14 }
 0x5e1   : > { %v15202_v36 = vsel %vm5506_vm4, %v5464_v12, -1e+09 }
 0x5e2   : > { %5786 = vmax.xlane.f32.xlu1 %v15149_v21  ;;  %5784 = vmax.xlane.f32.xlu0 %v15154_v19  ;;  %v5271_v19 = vpop.f32.mrf.mxu0  ;;  %17537 = vst [vmem:[#allocation204_spill] sm:$0xff] %v15202_v36  ;;  %v15232_v21 = vld [vmem:[#allocation2] sm:$0xff] }
 0x5e3   : > { %v15190_v15 = vsel %vm5506_vm4, %v5271_v19, -1e+09  ;;  %v7363_v19 = vld [vmem:[%s12255_s29 + $0xf8] sm:$0xff]  ;;  %vm17755_vm4 = vcmask 64512  }
 0x5e4   : > { %17535 = vst [vmem:[#allocation202_spill] sm:$0xff] %v15190_v15  ;;  %10643 = vmatprep.subr.mxu1 %v7363_v19  ;;  %vm17756_vm5 = vmmov %vm17755_vm4 }
 0x5e5   : > { %10644 = vmatpush3.msra.mxu1 %v7363_v19  ;;  %vm17759_vm6 = vmmov %vm17755_vm4 }
 0x5e6   : > { %5758 = vmax.xlane.f32.xlu1 %v15161_v52  ;;  %5756 = vmax.xlane.f32.xlu0 %v15166_v16  ;;  %v7358_v16 = vld [vmem:[%s12255_s29 + $0xd0] sm:$0xff]  ;;  %vm17760_vm7 = vmmov %vm17755_vm4 }
 0x5e7   : > { %vm17763_vm8 = vmmov %vm17755_vm4 }
 0x5e8   : > { %vm17764_vm9 = vmmov %vm17755_vm4 }
 0x5e9   : > { %vm17767_vm10 = vmmov %vm17755_vm4 }
 0x5ea   : > { %5790 = vmax.xlane.f32.xlu1 %v15173_v47  ;;  %5788 = vmax.xlane.f32.xlu0 %v15178_v40  ;;  %v7359_v40 = vld [vmem:[%s12255_s29 + $0xd8] sm:$0xff]  ;;  %vm17768_vm11 = vmmov %vm17755_vm4 }
 0x5eb   : > { %vm17771_vm12 = vmmov %vm17755_vm4 }
 0x5ec   : > { %vm17772_vm13 = vmmov %vm17755_vm4 }
 0x5ed   : > { %vm17775_vm14 = vmmov %vm17755_vm4 }
 0x5ee   : > { %5762 = vmax.xlane.f32.xlu1 %v15185_v29  ;;  %5760 = vmax.xlane.f32.xlu0 %v15190_v15  ;;  %v7347_v29 = vld [vmem:[%s12255_s29 + $0x78] sm:$0xff]  ;;  %v7362_v15 = vld [vmem:[%s12255_s29 + $0xf0] sm:$0xff]  ;;  %vm17776_vm15 = vmmov %vm17755_vm4 }
 0x5ef   : > { %10587 = vmatprep.subr.mxu0 %v7347_v29  ;;  %10645 = vmatprep.subr.mxu1 %v7362_v15  ;;  %vm17779_vm0 = vmmov %vm17755_vm4 }
 0x5f0   : > { %10588 = vmatpush3.msra.mxu0 %v7347_v29  ;;  %10646 = vmatpush3.msra.mxu1 %v7362_v15  ;;  %v7344_v29 = vld [vmem:[%s12255_s29 + $0x60] sm:$0xff]  ;;  %v15220_v15 = vld [vmem:[#allocation2 + $0x88] sm:$0xff]  ;;  %vm17780_vm1 = vmmov %vm17779_vm0 }
 0x5f1   : > { %10589 = vmatprep.subr.mxu0 %v7346_v61  ;;  %10647 = vmatprep.subr.mxu1 %v7361_v5  ;;  %vm17783_vm2 = vmmov %vm17779_vm0 }
 0x5f2   : > { %5794 = vmax.xlane.f32.xlu1 %v15197_v14  ;;  %5792 = vmax.xlane.f32.xlu0 %v15202_v36  ;;  %v7345_v36 = vld [vmem:[%s12255_s29 + $0x68] sm:$0xff]  ;;  %v7360_v14 = vld [vmem:[%s12255_s29 + $0xe0] sm:$0xff]  ;;  %vm17784_vm3 = vmmov %vm17779_vm0 }
 0x5f3   : > { %10590 = vmatpush3.msra.mxu0 %v7346_v61  ;;  %10648 = vmatpush3.msra.mxu1 %v7361_v5  ;;  %v7342_v5 = vld [vmem:[%s12255_s29 + $0x50] sm:$0xff] }
 0x5f4   : > { %10591 = vmatprep.subr.mxu0 %v7345_v36  ;;  %10649 = vmatprep.subr.mxu1 %v7360_v14 }
 0x5f5   : > { %10592 = vmatpush3.msra.mxu0 %v7345_v36  ;;  %10650 = vmatpush3.msra.mxu1 %v7360_v14  ;;  %v15225_v36 = vld [vmem:[#allocation2 + $0x80] sm:$0xff]  ;;  %v7357_v14 = vld [vmem:[%s12255_s29 + $0xc8] sm:$0xff] }
 0x5f6   : > { %10593 = vmatprep.subr.mxu0 %v7344_v29  ;;  %10651 = vmatprep.subr.mxu1 %v7359_v40 }
 0x5f7   : > { %10594 = vmatpush3.msra.mxu0 %v7344_v29  ;;  %10652 = vmatpush3.msra.mxu1 %v7359_v40  ;;  %v7341_v40 = vld [vmem:[%s12255_s29 + $0x48] sm:$0xff]  ;;  %v7356_v29 = vld [vmem:[%s12255_s29 + $0xc0] sm:$0xff] }
 0x5f8   : > { %10653 = vmatprep.subr.mxu1 %v7358_v16 }
 0x5f9   : > { %10654 = vmatpush3.msra.mxu1 %v7358_v16  ;;  %v7340_v16 = vld [vmem:[%s12255_s29 + $0x40] sm:$0xff] }
 0x5fa   : > { %10655 = vmatprep.subr.mxu1 %v7357_v14 }
 0x5fb   : > { %10656 = vmatpush3.msra.mxu1 %v7357_v14  ;;  %v7354_v14 = vld [vmem:[%s12255_s29 + $0xb0] sm:$0xff] }
 0x5fc   : > { %10657 = vmatprep.subr.mxu1 %v7356_v29 }
 0x5fd   : > { %10658 = vmatpush3.msra.mxu1 %v7356_v29 }
 0x5fe   : > { %10659 = vmatprep.subr.mxu1 %v7355_v18 }
 0x5ff   : > { %v5703_v24 = vpop.xlane.xlu1 %5702  ;;  %v5671_v12 = vpop.xlane.xlu0 %5670  ;;  %10660 = vmatpush3.msra.mxu1 %v7355_v18  ;;  %v7337_v18 = vld [vmem:[%s12255_s29 + $0x28] sm:$0xff] }
 0x600   : > { %v15215_v19 = vmax.f32 %v15209_v10, %v5671_v12  ;;  %v7343_v12 = vld [vmem:[%s12255_s29 + $0x58] sm:$0xff]  ;;  %v15230_v52 = vmax.f32 %v15220_v15, %v5703_v24  ;;  %10661 = vmatprep.subr.mxu1 %v7354_v14 }
 0x601   : > { %10595 = vmatprep.subr.mxu0 %v7343_v12  ;;  %v15240_v24 = vld [vmem:[#allocation2 + $0x18] sm:$0xff]  ;;  %10662 = vmatpush3.msra.mxu1 %v7354_v14 }
 0x602   : > { %10596 = vmatpush3.msra.mxu0 %v7343_v12  ;;  %10663 = vmatprep.subr.mxu1 %v7353_v38 }
 0x603   : > { %v5669_v61 = vpop.xlane.xlu0 %5668  ;;  %v5675_v47 = vpop.xlane.xlu1 %5674  ;;  %6059 = vperm.xlu1 %11271, %v15215_v19   ;;  %10597 = vmatprep.subr.mxu0 %v7342_v5 }
 0x604   : > { %10598 = vmatpush3.msra.mxu0 %v7342_v5  ;;  %v15244_v12 = vmax.f32 %v15232_v21, %v5669_v61  ;;  %v15251_v5 = vmax.f32 %v15240_v24, %v5675_v47  ;;  %v7339_v61 = vld [vmem:[%s12255_s29 + $0x38] sm:$0xff]  ;;  %v7338_v47 = vld [vmem:[%s12255_s29 + $0x30] sm:$0xff]  ;;  %10664 = vmatpush3.msra.mxu1 %v7353_v38 }
 0x605   : > { %10599 = vmatprep.subr.mxu0 %v7341_v40  ;;  %v7335_v38 = vld [vmem:[%s12255_s29 + $0x18] sm:$0xff] }
 0x606   : > { %10600 = vmatpush3.msra.mxu0 %v7341_v40 }
 0x607   : > { %v5701_v37 = vpop.xlane.xlu0 %5700  ;;  %v5707_v27 = vpop.xlane.xlu1 %5706  ;;  %10601 = vmatprep.subr.mxu0 %v7340_v16 }
 0x608   : > { %v15237_v41 = vmax.f32 %v15225_v36, %v5701_v37  ;;  %6139 = vperm.xlu0 %11272, %v15230_v52   ;;  %10602 = vmatpush3.msra.mxu0 %v7340_v16  ;;  %v15259_v57 = vmax.f32 %v15248_v17, %v5707_v27  ;;  %v15270_v27 = vld [vmem:[#allocation2 + $0xa8] sm:$0xff]  ;;  %v7352_v16 = vld [vmem:[%s12255_s29 + $0xa0] sm:$0xff] }
 0x609   : > { %10603 = vmatprep.subr.mxu0 %v7339_v61  ;;  %10665 = vmatprep.subr.mxu1 %v7352_v16 }
 0x60a   : > { %6134 = vperm.xlu1 %11271, %v15237_v41   ;;  %10604 = vmatpush3.msra.mxu0 %v7339_v61 }
 0x60b   : > { %v5705_v37 = vpop.xlane.xlu0 %5704  ;;  %v5673_v3 = vpop.xlane.xlu1 %5672  ;;  %10605 = vmatprep.subr.mxu0 %v7338_v47  ;;  %10666 = vmatpush3.msra.mxu1 %v7352_v16  ;;  %v15297_v16 = vld [vmem:[#allocation2 + $0x20] sm:$0xff] }
 0x60c   : > { %6054 = vperm.xlu0 %11272, %v15244_v12   ;;  %v15267_v63 = vmax.f32 %v15256_v58, %v5673_v3  ;;  %10606 = vmatpush3.msra.mxu0 %v7338_v47  ;;  %v5877_v3 = vsub.f32 %v15220_v15, %v15230_v52  ;;  %v15278_v61 = vmax.f32 %v15264_v28, %v5705_v37  ;;  %v7350_v52 = vld [vmem:[%s12255_s29 + $0x90] sm:$0xff] }
 0x60d   : > { %10607 = vmatprep.subr.mxu0 %v7337_v18  ;;  %10667 = vmatprep.subr.mxu1 %v7351_v48 }
 0x60e   : > { %6069 = vperm.xlu1 %11271, %v15251_v5   ;;  %10608 = vmatpush3.msra.mxu0 %v7337_v18  ;;  %v5958_v37 = vmul.f32 1.442695, %v5877_v3  ;;  %v7334_v18 = vld [vmem:[%s12255_s29 + $0x10] sm:$0xff]  ;;  %v5878_v7 = vsub.f32 %v15264_v28, %v15278_v61 }
 0x60f   : > { %v5679_v40 = vpop.xlane.xlu1 %5678  ;;  %v5677_v29 = vpop.xlane.xlu0 %5676  ;;  %10609 = vmatprep.subr.mxu0 %v7336_v54  ;;  %10668 = vmatpush3.msra.mxu1 %v7351_v48 }
 0x610   : > { %6149 = vperm.xlu0 %11272, %v15259_v57   ;;  %v15294_v47 = vmax.f32 %v15285_v39, %v5679_v40  ;;  %10610 = vmatpush3.msra.mxu0 %v7336_v54  ;;  %11273 = vpow2.f32 %v5958_v37  ;;  %v15305_v48 = vmax.f32 %v15297_v16, %v5677_v29  ;;  %v7348_v40 = vld [vmem:[%s12255_s29 + $0x80] sm:$0xff]  ;;  %v5860_v37 = vsub.f32 %v15232_v21, %v15244_v12 }
 0x611   : > { %10611 = vmatprep.subr.mxu0 %v7335_v38  ;;  %10669 = vmatprep.subr.mxu1 %v7350_v52 }
 0x612   : > { %6064 = vperm.xlu1 %11271, %v15267_v63   ;;  %10612 = vmatpush3.msra.mxu0 %v7335_v38  ;;  %v7332_v38 = vld [vmem:[%s12255_s29] sm:$0xff]  ;;  %v5924_v12 = vmul.f32 1.442695, %v5860_v37 }
 0x613   : > { %v5711_v49 = vpop.xlane.xlu1 %5710  ;;  %v5709_v42 = vpop.xlane.xlu0 %5708  ;;  %10670 = vmatpush3.msra.mxu1 %v7350_v52  ;;  %10613 = vmatprep.subr.mxu0 %v7334_v18 }
 0x614   : > { %v15281_v14 = vmax.f32 %v15270_v27, %v5711_v49  ;;  %10671 = vmatprep.subr.mxu1 %v7349_v43  ;;  %10614 = vmatpush3.msra.mxu0 %v7334_v18  ;;  %v15321_v18 = vmax.f32 %v15311_v44, %v5709_v42  ;;  %11275 = vpow2.f32 %v5924_v12  ;;  %v15367_v12 = vld [vmem:[#allocation2 + $0xd8] sm:$0xff] }
 0x615   : > { %10672 = vmatpush3.msra.mxu1 %v7349_v43  ;;  %10615 = vmatprep.subr.mxu0 %v7333_v4  ;;  %v15326_v43 = vld [vmem:[#allocation2 + $0x38] sm:$0xff] }
 0x616   : > { %6144 = vperm.xlu1 %11271, %v15278_v61   ;;  %6159 = vperm.xlu0 %11272, %v15281_v14  }
 0x617   : > { %v5683_v15 = vpop.xlane.xlu1 %5682  ;;  %v15291_v49 = vpop.xlane.xlu0 %5680  ;;  %10673 = vmatprep.subr.mxu1 %v7348_v40  ;;  %10616 = vmatpush3.msra.mxu0 %v7333_v4  ;;  %v5861_v4 = vsub.f32 %v15209_v10, %v15215_v19  ;;  %v5876_v10 = vsub.f32 %v15225_v36, %v15237_v41  ;;  %v15348_v19 = vld [vmem:[#allocation2 + $0x58] sm:$0xff] }
 0x618   : > { %10674 = vmatpush3.msra.mxu1 %v7348_v40  ;;  %10617 = vmatprep.subr.mxu0 %v7332_v38  ;;  %v15337_v40 = vmax.f32 %v15326_v43, %v5683_v15  ;;  %v5879_v15 = vsub.f32 %v15248_v17, %v15259_v57 }
 0x619   : > { %10618 = vmatpush3.msra.mxu0 %v7332_v38  ;;  %v15342_v38 = vld [vmem:[#allocation2 + $0x30] sm:$0xff]  ;;  %v5926_v11 = vmul.f32 1.442695, %v5861_v4  ;;  %v5956_v36 = vmul.f32 1.442695, %v5876_v10 }
 0x61a   : > { %6079 = vperm.xlu1 %11271, %v15294_v47   ;;  %v15360_v4 = vld [vmem:[#allocation2 + $0xb0] sm:$0xff] }
 0x61b   : > { %v5715_v3 = vpop.xlane.xlu1 %5714  ;;  %v5713_v51 = vpop.xlane.xlu0 %5712  ;;  %11277 = vpow2.f32 %v5926_v11 }
 0x61c   : > { %v15308_v54 = vmax.f32 %v15299_v0, %v5715_v3 }
 0x61d   : > { %v15358_v55 = vpop.eup %11273 }
 0x61e   : > { %6074 = vperm.xlu1 %11271, %v15305_v48   ;;  %6169 = vperm.xlu0 %11272, %v15308_v54   ;;  %17538 = vst [vmem:[#allocation205_spill] sm:$0xff] %v15358_v55 }
 0x61f   : > { %v5687_v52 = vpop.xlane.xlu1 %5686  ;;  %v5685_v29 = vpop.xlane.xlu0 %5684 }
 0x620   : > { %v15324_v3 = vmax.f32 %v15313_v20, %v5687_v52  ;;  %v5863_v52 = vsub.f32 %v15240_v24, %v15251_v5 }
 0x622   : > { %6154 = vperm.xlu1 %11271, %v15321_v18   ;;  %6099 = vperm.xlu0 %11272, %v15324_v3   ;;  %v5930_v5 = vmul.f32 1.442695, %v5863_v52  ;;  %v15370_v52 = vmax.f32 %v15360_v4, %v5713_v51  ;;  %v5862_v51 = vsub.f32 %v15256_v58, %v15267_v63 }
 0x623   : > { %v5719_v21 = vpop.xlane.xlu1 %5718  ;;  %v5717_v42 = vpop.xlane.xlu0 %5716 }
 0x624   : > { %v15340_v8 = vmax.f32 %v15328_v50, %v5719_v21  ;;  %v15356_v21 = vmax.f32 %v15342_v38, %v15291_v49  ;;  %11279 = vpow2.f32 %v5930_v5  ;;  %v5962_v49 = vmul.f32 1.442695, %v5879_v15  ;;  %v15384_v15 = vld [vmem:[#allocation2 + $0xc0] sm:$0xff] }
 0x625   : > { %11281 = vpow2.f32 %v5956_v36  ;;  %v15382_v5 = vmax.f32 %v15372_v23, %v5685_v29  ;;  %v5865_v36 = vsub.f32 %v15285_v39, %v15294_v47  ;;  %v15397_v29 = vpop.eup %11275  ;;  %v5928_v2 = vmul.f32 1.442695, %v5862_v51 }
 0x626   : > { %6089 = vperm.xlu1 %11271, %v15337_v40   ;;  %6179 = vperm.xlu0 %11272, %v15340_v8   ;;  %11283 = vpow2.f32 %v5962_v49  ;;  %v15395_v49 = vmax.f32 %v15384_v15, %v5717_v42  ;;  %17539 = vst [vmem:[#allocation206_spill] sm:$0xff] %v15397_v29  ;;  %v5881_v47 = vsub.f32 %v15270_v27, %v15281_v14  ;;  %v15425_v27 = vld [vmem:[#allocation2 + $0x68] sm:$0xff] }
 0x627   : > { %v5691_v37 = vpop.xlane.xlu1 %5690  ;;  %v15350_v24 = vpop.xlane.xlu0 %5688  ;;  %v5934_v39 = vmul.f32 1.442695, %v5865_v36  ;;  %11285 = vpow2.f32 %v5928_v2 }
 0x628   : > { %v15363_v41 = vmax.f32 %v15348_v19, %v5691_v37  ;;  %v15407_v46 = vpop.eup %11277  ;;  %v5966_v26 = vmul.f32 1.442695, %v5881_v47  ;;  %v15435_v14 = vmax.f32 %v15423_v35, %v15350_v24  ;;  %v15440_v47 = vld [vmem:[#allocation2 + $0xd0] sm:$0xff]  ;;  %v5867_v24 = vsub.f32 %v15326_v43, %v15337_v40 }
 0x629   : > { %17540 = vst [vmem:[#allocation207_spill] sm:$0xff] %v15407_v46  ;;  %11287 = vpow2.f32 %v5934_v39 }
 0x62a   : > { %6084 = vperm.xlu1 %11271, %v15356_v21   ;;  %7035 = vperm.xlu0 %11272, %v15358_v55  }
 0x62b   : > { %v5723_v57 = vpop.xlane.xlu1 %5722  ;;  %v5721_v17 = vpop.xlane.xlu0 %5720 }
 0x62c   : > { %v15375_v37 = vmax.f32 %v15367_v12, %v5723_v57 }
 0x62e   : > { %6164 = vperm.xlu1 %11271, %v15370_v52   ;;  %6109 = vperm.xlu0 %11272, %v15363_v41  }
 0x62f   : > { %v5695_v11 = vpop.xlane.xlu1 %5694  ;;  %v15379_v10 = vpop.xlane.xlu0 %5692 }
 0x630   : > { %v15438_v39 = vmax.f32 %v15425_v27, %v5695_v11  ;;  %v15455_v11 = vmax.f32 %v15440_v47, %v5721_v17 }
 0x631   : > { %v15411_v42 = vpop.eup %11279 }
 0x632   : > { %6094 = vperm.xlu1 %11271, %v15382_v5   ;;  %6189 = vperm.xlu0 %11272, %v15375_v37   ;;  %17541 = vst [vmem:[#allocation208_spill] sm:$0xff] %v15411_v42  ;;  %v15419_v51 = vpop.eup %11281 }
 0x633   : > { %v5727_v57 = vpop.xlane.xlu1 %5726  ;;  %v15390_v55 = vpop.xlane.xlu0 %5724  ;;  %17542 = vst [vmem:[#allocation209_spill] sm:$0xff] %v15419_v51 }
 0x634   : > { %v15421_v36 = vpop.eup %11283 }
 0x635   : > { %17543 = vst [vmem:[#allocation210_spill] sm:$0xff] %v15421_v36  ;;  %v15473_v17 = vpop.eup %11285 }
 0x636   : > { %6174 = vperm.xlu1 %11271, %v15395_v49   ;;  %6950 = vperm.xlu0 %11272, %v15397_v29   ;;  %v5960_v29 = vmul.f32 1.442695, %v5878_v7  ;;  %17546 = vst [vmem:[#allocation213_spill] sm:$0xff] %v15473_v17  ;;  %v15477_v1 = vpop.eup %11287 }
 0x637   : > { %v15403_v63 = vpop.xlane.xlu1 %5698  ;;  %v15405_v58 = vpop.xlane.xlu0 %5696  ;;  %17547 = vst [vmem:[#allocation214_spill] sm:$0xff] %v15477_v1 }
 0x638   : > { %11289 = vpow2.f32 %v5960_v29 }
 0x639   : > { %11291 = vpow2.f32 %v5966_v26  ;;  %v5864_v26 = vsub.f32 %v15297_v16, %v15305_v48  ;;  %v5880_v48 = vsub.f32 %v15311_v44, %v15321_v18 }
 0x63a   : > { %6955 = vperm.xlu1 %11271, %v15407_v46   ;;  %6965 = vperm.xlu0 %11272, %v15411_v42   ;;  %v15442_v42 = vld [vmem:[#allocation2 + $0xe8] sm:$0xff] }
 0x63b   : > { %v15415_v28 = vpop.xlane.xlu1 %5730  ;;  %v15417_v61 = vpop.xlane.xlu0 %5728  ;;  %v15458_v46 = vmax.f32 %v15442_v42, %v5727_v57  ;;  %v5932_v16 = vmul.f32 1.442695, %v5864_v26  ;;  %v5938_v57 = vmul.f32 1.442695, %v5867_v24  ;;  %v5964_v44 = vmul.f32 1.442695, %v5880_v48 }
 0x63c   : > { %v15519_v48 = vld [vmem:[#allocation2 + $0xf8] sm:$0xff] }
 0x63d   : > { %11293 = vpow2.f32 %v5932_v16 }
 0x63e   : > { %7030 = vperm.xlu1 %11271, %v15419_v51   ;;  %7045 = vperm.xlu0 %11272, %v15421_v36   ;;  %v15444_v51 = vld [vmem:[#allocation2 + $0x188] sm:$0xff]  ;;  %11295 = vpow2.f32 %v5938_v57 }
 0x63f   : > { %v15429_v2 = vpop.xlane.xlu1 %5734  ;;  %v15431_v7 = vpop.xlane.xlu0 %5732  ;;  %17544 = vst [vmem:[#allocation211_spill] sm:$0xff] %v15444_v51  ;;  %11297 = vpow2.f32 %v5964_v44  ;;  %v15523_v44 = vld [vmem:[#allocation2 + $0x1a0] sm:$0xff] }
 0x640   : > { %17554 = vst [vmem:[#allocation221_spill] sm:$0xff] %v15523_v44 }
 0x642   : > { %6104 = vperm.xlu1 %11271, %v15435_v14   ;;  %6119 = vperm.xlu0 %11272, %v15438_v39  }
 0x643   : > { %v5767_v29 = vpop.xlane.xlu1 %5766  ;;  %v15450_v36 = vpop.xlane.xlu0 %5764 }
 0x644   : > { %v15461_v30 = vmax.f32 %v15444_v51, %v5767_v29  ;;  %v5883_v29 = vsub.f32 %v15299_v0, %v15308_v54  ;;  %v15481_v51 = vld [vmem:[#allocation2 + $0x190] sm:$0xff] }
 0x645   : > { %17549 = vst [vmem:[#allocation216_spill] sm:$0xff] %v15481_v51  ;;  %v15485_v25 = vpop.eup %11289 }
 0x646   : > { %17545 = vst [vmem:[#allocation212_spill] sm:$0xff] %v15461_v30  ;;  %6184 = vperm.xlu1 %11271, %v15455_v11   ;;  %6199 = vperm.xlu0 %11272, %v15458_v46   ;;  %17550 = vst [vmem:[#allocation217_spill] sm:$0xff] %v15485_v25  ;;  %v5970_v24 = vmul.f32 1.442695, %v5883_v29  ;;  %v15493_v62 = vpop.eup %11291 }
 0x647   : > { %v15469_v43 = vpop.xlane.xlu1 %5738  ;;  %v15471_v40 = vpop.xlane.xlu0 %5736  ;;  %17552 = vst [vmem:[#allocation219_spill] sm:$0xff] %v15493_v62 }
 0x648   : > { %11299 = vpow2.f32 %v5970_v24  ;;  %v5869_v24 = vsub.f32 %v15313_v20, %v15324_v3  ;;  %v5882_v3 = vsub.f32 %v15360_v4, %v15370_v52  ;;  %v15563_v20 = vld [vmem:[#allocation2 + $0x1b8] sm:$0xff] }
 0x649   : > { %17558 = vst [vmem:[#allocation225_spill] sm:$0xff] %v15563_v20 }
 0x64a   : > { %6960 = vperm.xlu1 %11271, %v15473_v17   ;;  %6975 = vperm.xlu0 %11272, %v15477_v1   ;;  %v15497_v17 = vld [vmem:[#allocation2 + $0x78] sm:$0xff]  ;;  %v5968_v4 = vmul.f32 1.442695, %v5882_v3 }
 0x64b   : > { %v5771_v18 = vpop.xlane.xlu1 %5770  ;;  %v5769_v26 = vpop.xlane.xlu0 %5768  ;;  %v15517_v16 = vmax.f32 %v15497_v17, %v15403_v63 }
 0x64c   : > { %v15488_v0 = vmax.f32 %v15479_v9, %v5771_v18  ;;  %v15491_v54 = vmax.f32 %v15481_v51, %v5769_v26  ;;  %v15511_v18 = vmax.f32 %v15495_v59, %v15379_v10  ;;  %v15513_v26 = vld [vmem:[#allocation2 + $0xe0] sm:$0xff]  ;;  %v5866_v10 = vsub.f32 %v15342_v38, %v15356_v21 }
 0x64d   : > { %v15533_v63 = vmax.f32 %v15513_v26, %v15390_v55  ;;  %v15537_v9 = vmax.f32 %v15519_v48, %v15415_v28  ;;  %v5942_v28 = vmul.f32 1.442695, %v5869_v24  ;;  %v5885_v38 = vsub.f32 %v15328_v50, %v15340_v8 }
 0x64e   : > { %17551 = vst [vmem:[#allocation218_spill] sm:$0xff] %v15488_v0  ;;  %7040 = vperm.xlu1 %11271, %v15485_v25   ;;  %7055 = vperm.xlu0 %11272, %v15493_v62   ;;  %v15521_v25 = vld [vmem:[#allocation2 + $0x1a8] sm:$0xff]  ;;  %v5936_v55 = vmul.f32 1.442695, %v5866_v10 }
 0x64f   : > { %v15505_v57 = vpop.xlane.xlu1 %5742  ;;  %v15507_v29 = vpop.xlane.xlu0 %5740  ;;  %17553 = vst [vmem:[#allocation220_spill] sm:$0xff] %v15521_v25  ;;  %v5974_v24 = vmul.f32 1.442695, %v5885_v38 }
 0x650   : > { %11301 = vpow2.f32 %v5936_v55  ;;  %v15596_v55 = vld [vmem:[#allocation2 + $0xf0] sm:$0xff] }
 0x651   : > { %11303 = vpow2.f32 %v5942_v28 }
 0x652   : > { %6114 = vperm.xlu1 %11271, %v15511_v18   ;;  %6129 = vperm.xlu0 %11272, %v15517_v16   ;;  %11305 = vpow2.f32 %v5968_v4  ;;  %v5868_v4 = vsub.f32 %v15372_v23, %v15382_v5  ;;  %v5887_v23 = vsub.f32 %v15367_v12, %v15375_v37  ;;  %v15651_v12 = vld [vmem:[#allocation2 + $0x118] sm:$0xff] }
 0x653   : > { %v5775_v1 = vpop.xlane.xlu1 %5774  ;;  %v5773_v62 = vpop.xlane.xlu0 %5772  ;;  %11307 = vpow2.f32 %v5974_v24 }
 0x654   : > { %v15540_v51 = vmax.f32 %v15521_v25, %v5775_v1  ;;  %v15543_v60 = vmax.f32 %v15523_v44, %v5773_v62  ;;  %v15557_v62 = vpop.eup %11293  ;;  %v5940_v5 = vmul.f32 1.442695, %v5868_v4 }
 0x655   : > { %17556 = vst [vmem:[#allocation223_spill] sm:$0xff] %v15557_v62  ;;  %v15561_v25 = vpop.eup %11295 }
 0x656   : > { %6194 = vperm.xlu1 %11271, %v15533_v63   ;;  %6209 = vperm.xlu0 %11272, %v15537_v9   ;;  %17557 = vst [vmem:[#allocation224_spill] sm:$0xff] %v15561_v25  ;;  %v15569_v44 = vpop.eup %11297  ;;  %11309 = vpow2.f32 %v5940_v5 }
 0x657   : > { %v15553_v21 = vpop.xlane.xlu1 %5746  ;;  %v15555_v1 = vpop.xlane.xlu0 %5744  ;;  %17559 = vst [vmem:[#allocation226_spill] sm:$0xff] %v15569_v44 }
 0x658   : > { %17555 = vst [vmem:[#allocation222_spill] sm:$0xff] %v15555_v1  ;;  %v15574_v50 = vpop.eup %11299  ;;  %v15576_v1 = vld [vmem:[#allocation2 + $0x70] sm:$0xff] }
 0x659   : > { %17560 = vst [vmem:[#allocation227_spill] sm:$0xff] %v15574_v50  ;;  %v15590_v28 = vmax.f32 %v15576_v1, %v15405_v58 }
 0x65a   : > { %6970 = vperm.xlu1 %11271, %v15557_v62   ;;  %6985 = vperm.xlu0 %11272, %v15561_v25   ;;  %v15578_v62 = vld [vmem:[#allocation2 + $0x108] sm:$0xff]  ;;  %v15601_v25 = vld [vmem:[%s12255_s29 + $0x178] sm:$0xff] }
 0x65b   : > { %v5779_v52 = vpop.xlane.xlu1 %5778  ;;  %v15567_v10 = vpop.xlane.xlu0 %5776  ;;  %10699 = vmatprep.subr.mxu0 %v15601_v25 }
 0x65c   : > { %v15572_v8 = vmax.f32 %v15563_v20, %v5779_v52  ;;  %v15594_v52 = vmax.f32 %v15578_v62, %v15429_v2  ;;  %v5871_v2 = vsub.f32 %v15348_v19, %v15363_v41  ;;  %v5884_v19 = vsub.f32 %v15384_v15, %v15395_v49 }
 0x65e   : > { %7050 = vperm.xlu1 %11271, %v15569_v44   ;;  %7065 = vperm.xlu0 %11272, %v15574_v50   ;;  %v15598_v44 = vld [vmem:[#allocation2 + $0x1c8] sm:$0xff]  ;;  %v15614_v50 = vmax.f32 %v15596_v55, %v15417_v61  ;;  %v5972_v15 = vmul.f32 1.442695, %v5884_v19  ;;  %v15667_v19 = vld [vmem:[#allocation2 + $0x180] sm:$0xff] }
 0x65f   : > { %v15584_v3 = vpop.xlane.xlu1 %5750  ;;  %v15586_v38 = vpop.xlane.xlu0 %5748  ;;  %17562 = vst [vmem:[#allocation229_spill] sm:$0xff] %v15598_v44 }
 0x660   : > { %17561 = vst [vmem:[#allocation228_spill] sm:$0xff] %v15586_v38  ;;  %v15620_v38 = vld [vmem:[%s12255_s29 + $0x1f8] sm:$0xff] }
 0x661   : > { %10755 = vmatprep.subr.mxu1 %v15620_v38 }
 0x662   : > { %6124 = vperm.xlu1 %11271, %v15590_v28   ;;  %6219 = vperm.xlu0 %11272, %v15594_v52  }
 0x663   : > { %v5783_v24 = vpop.xlane.xlu1 %5782  ;;  %v15607_v58 = vpop.xlane.xlu0 %5780 }
 0x664   : > { %17563 = vst [vmem:[#allocation230_spill] sm:$0xff] %v15607_v58  ;;  %v15617_v20 = vmax.f32 %v15598_v44, %v5783_v24  ;;  %v15633_v24 = vpop.eup %11301  ;;  %v5946_v58 = vmul.f32 1.442695, %v5871_v2 }
 0x665   : > { %17567 = vst [vmem:[#allocation234_spill] sm:$0xff] %v15633_v24  ;;  %v15637_v44 = vpop.eup %11303 }
 0x666   : > { %17564 = vst [vmem:[#allocation231_spill] sm:$0xff] %v15617_v20  ;;  %6204 = vperm.xlu1 %11271, %v15614_v50   ;;  %6299 = vperm.xlu0 %11272, %v15461_v30   ;;  %17568 = vst [vmem:[#allocation235_spill] sm:$0xff] %v15637_v44  ;;  %v15645_v30 = vpop.eup %11305  ;;  %11311 = vpow2.f32 %v5946_v58 }
 0x667   : > { %v15628_v41 = vpop.xlane.xlu1 %5754  ;;  %v15630_v61 = vpop.xlane.xlu0 %5752  ;;  %17569 = vst [vmem:[#allocation236_spill] sm:$0xff] %v15645_v30  ;;  %11313 = vpow2.f32 %v5972_v15  ;;  %v5870_v15 = vsub.f32 %v15423_v35, %v15435_v14 }
 0x668   : > { %17565 = vst [vmem:[#allocation232_spill] sm:$0xff] %v15628_v41  ;;  %17566 = vst [vmem:[#allocation233_spill] sm:$0xff] %v15630_v61  ;;  %v5978_v61 = vmul.f32 1.442695, %v5887_v23  ;;  %v15647_v2 = vpop.eup %11307  ;;  %v15649_v41 = vld [vmem:[#allocation2 + $0x100] sm:$0xff]  ;;  %v15665_v23 = vmax.f32 %v15651_v12, %v15469_v43  ;;  %v15681_v43 = vmax.f32 %v15667_v19, %v15450_v36 }
 0x669   : > { %17570 = vst [vmem:[#allocation237_spill] sm:$0xff] %v15647_v2  ;;  %v15661_v58 = vmax.f32 %v15649_v41, %v15431_v7  ;;  %v5873_v7 = vsub.f32 %v15425_v27, %v15438_v39  ;;  %v5889_v27 = vsub.f32 %v15442_v42, %v15458_v46 }
 0x66a   : > { %6980 = vperm.xlu1 %11271, %v15633_v24   ;;  %6995 = vperm.xlu0 %11272, %v15637_v44   ;;  %11315 = vpow2.f32 %v5978_v61  ;;  %v5886_v44 = vsub.f32 %v15440_v47, %v15455_v11 }
 0x66b   : > { %v15641_v49 = vpop.xlane.xlu1 %5786  ;;  %v15643_v4 = vpop.xlane.xlu0 %5784  ;;  %v5982_v11 = vmul.f32 1.442695, %v5889_v27 }
 0x66c   : > { %v5976_v39 = vmul.f32 1.442695, %v5886_v44 }
 0x66e   : > { %7060 = vperm.xlu1 %11271, %v15645_v30   ;;  %7075 = vperm.xlu0 %11272, %v15647_v2   ;;  %v5944_v30 = vmul.f32 1.442695, %v5870_v15  ;;  %v15691_v2 = vpop.eup %11309 }
 0x66f   : > { %v15655_v37 = vpop.xlane.xlu1 %5758  ;;  %v15657_v5 = vpop.xlane.xlu0 %5756  ;;  %17573 = vst [vmem:[#allocation240_spill] sm:$0xff] %v15691_v2 }
 0x670   : > { %11317 = vpow2.f32 %v5944_v30  ;;  %v5872_v30 = vsub.f32 %v15495_v59, %v15511_v18 }
 0x672   : > { %6214 = vperm.xlu1 %11271, %v15661_v58   ;;  %6229 = vperm.xlu0 %11272, %v15665_v23  }
 0x673   : > { %v15673_v24 = vpop.xlane.xlu1 %5790  ;;  %v15675_v61 = vpop.xlane.xlu0 %5788 }
 0x674   : > { %17571 = vst [vmem:[#allocation238_spill] sm:$0xff] %v15675_v61  ;;  %v5950_v61 = vmul.f32 1.442695, %v5873_v7  ;;  %v15695_v36 = vpop.eup %11311  ;;  %v15705_v7 = vld [vmem:[#allocation2 + $0x110] sm:$0xff] }
 0x675   : > { %17574 = vst [vmem:[#allocation241_spill] sm:$0xff] %v15695_v36  ;;  %v15701_v47 = vpop.eup %11313  ;;  %v15717_v42 = vmax.f32 %v15705_v7, %v15471_v40 }
 0x676   : > { %6294 = vperm.xlu1 %11271, %v15681_v43   ;;  %6309 = vperm.xlu0 %11272, %v15488_v0   ;;  %17575 = vst [vmem:[#allocation242_spill] sm:$0xff] %v15701_v47  ;;  %11319 = vpow2.f32 %v5950_v61  ;;  %v5875_v61 = vsub.f32 %v15497_v17, %v15517_v16  ;;  %v5888_v17 = vsub.f32 %v15513_v26, %v15533_v63 }
 0x677   : > { %v15687_v35 = vpop.xlane.xlu1 %5762  ;;  %v15689_v14 = vpop.xlane.xlu0 %5760  ;;  %11321 = vpow2.f32 %v5976_v39 }
 0x678   : > { %17572 = vst [vmem:[#allocation239_spill] sm:$0xff] %v15689_v14  ;;  %v15703_v0 = vpop.eup %11315  ;;  %v15707_v14 = vld [vmem:[#allocation2 + $0x128] sm:$0xff]  ;;  %11323 = vpow2.f32 %v5982_v11  ;;  %v5954_v18 = vmul.f32 1.442695, %v5875_v61  ;;  %v5980_v26 = vmul.f32 1.442695, %v5888_v17 }
 0x679   : > { %v15721_v44 = vmax.f32 %v15707_v14, %v15505_v57 }
 0x67a   : > { %6990 = vperm.xlu1 %11271, %v15691_v2   ;;  %7005 = vperm.xlu0 %11272, %v15695_v36   ;;  %v5948_v2 = vmul.f32 1.442695, %v5872_v30 }
 0x67b   : > { %v15699_v15 = vpop.xlane.xlu1 %5794  ;;  %v15709_v46 = vpop.xlane.xlu0 %5792 }
 0x67c   : > { %11325 = vpow2.f32 %v5948_v2 }
 0x67d   : > { %v15734_v36 = vpop.eup %11317  ;;  %11327 = vpow2.f32 %v5954_v18 }
 0x67e   : > { %7070 = vperm.xlu1 %11271, %v15701_v47   ;;  %7085 = vperm.xlu0 %11272, %v15703_v0  }
 0x67f   : > { %v6060_v27 = vpop.permute.xlu1 %6059 }
 0x680   : > { %v6373_v40 = vsub.f32 %v14761_v13, %v6060_v27 }
 0x682   : > { %6224 = vperm.xlu1 %11271, %v15717_v42   ;;  %6239 = vperm.xlu0 %11272, %v15721_v44   ;;  %v6438_v27 = vmul.f32 1.442695, %v6373_v40 }
 0x683   : > { %v6140_v39 = vpop.permute.xlu0 %6139  ;;  %v15739_v61 = vpop.eup %11319 }
 0x684   : > { %v6389_v59 = vsub.f32 %v14756_v53, %v6140_v39  ;;  %v5891_v53 = vsub.f32 %v15519_v48, %v15537_v9  ;;  %v15744_v2 = vpop.eup %11321 }
 0x685   : > { %v6135_v11 = vpop.permute.xlu1 %6134  ;;  %v15746_v48 = vpop.eup %11323 }
 0x686   : > { %v6388_v47 = vsub.f32 %v14798_v45, %v6135_v11  ;;  %6304 = vperm.xlu1 %11271, %v15491_v54   ;;  %6319 = vperm.xlu0 %11272, %v15540_v51   ;;  %v6470_v16 = vmul.f32 1.442695, %v6389_v59  ;;  %v5986_v9 = vmul.f32 1.442695, %v5891_v53  ;;  %v15750_v59 = vld [vmem:[#allocation2 + $0x138] sm:$0xff] }
 0x687   : > { %v6055_v57 = vpop.permute.xlu0 %6054 }
 0x688   : > { %v6468_v30 = vmul.f32 1.442695, %v6388_v47  ;;  %v6372_v13 = vsub.f32 %v14772_v33, %v6055_v57  ;;  %v15748_v47 = vld [vmem:[#allocation2 + $0x120] sm:$0xff] }
 0x689   : > { %v6070_v45 = vpop.permute.xlu1 %6069  ;;  %v15758_v17 = vmax.f32 %v15748_v47, %v15507_v29  ;;  %v5893_v29 = vsub.f32 %v15578_v62, %v15594_v52 }
 0x68a   : > { %11329 = vpow2.f32 %v6468_v30  ;;  %v6436_v39 = vmul.f32 1.442695, %v6372_v13  ;;  %7000 = vperm.xlu1 %11271, %v15734_v36   ;;  %7015 = vperm.xlu0 %11272, %v15739_v61   ;;  %v6375_v63 = vsub.f32 %v14777_v22, %v6070_v45  ;;  %v5890_v45 = vsub.f32 %v15596_v55, %v15614_v50 }
 0x68b   : > { %11331 = vpow2.f32 %v6470_v16  ;;  %v6150_v33 = vpop.permute.xlu0 %6149  ;;  %v15762_v16 = vmax.f32 %v15750_v59, %v15553_v21  ;;  %v15771_v21 = vpop.eup %11325 }
 0x68c   : > { %11333 = vpow2.f32 %v6436_v39  ;;  %v6442_v22 = vmul.f32 1.442695, %v6375_v63  ;;  %v6391_v40 = vsub.f32 %v14787_v6, %v6150_v33  ;;  %v5874_v6 = vsub.f32 %v15576_v1, %v15590_v28  ;;  %17576 = vst [vmem:[#allocation243_spill] sm:$0xff] %v15771_v21  ;;  %v15775_v39 = vpop.eup %11327  ;;  %v7394_v33 = vld [vmem:[%s12255_s29 + $0x1f0] sm:$0xff] }
 0x68d   : > { %v6065_v18 = vpop.permute.xlu1 %6064  ;;  %11335 = vpow2.f32 %v6438_v27  ;;  %v5984_v55 = vmul.f32 1.442695, %v5890_v45 }
 0x68e   : > { %v6374_v11 = vsub.f32 %v14816_v34, %v6065_v18  ;;  %7080 = vperm.xlu1 %11271, %v15744_v2   ;;  %7095 = vperm.xlu0 %11272, %v15746_v48   ;;  %11337 = vpow2.f32 %v5980_v26  ;;  %v6474_v30 = vmul.f32 1.442695, %v6391_v40  ;;  %v5952_v28 = vmul.f32 1.442695, %v5874_v6 }
 0x68f   : > { %11339 = vpow2.f32 %v5986_v9  ;;  %v5990_v26 = vmul.f32 1.442695, %v5893_v29  ;;  %v15808_v29 = vld [vmem:[#allocation2 + $0x148] sm:$0xff] }
 0x690   : > { %v6440_v57 = vmul.f32 1.442695, %v6374_v11  ;;  %v17577_v11 = vld [vmem:[#allocation151_spill] sm:$0xff] }
 0x691   : > { %v6145_v53 = vpop.permute.xlu1 %6144  ;;  %v6160_v27 = vpop.permute.xlu0 %6159 }
 0x692   : > { %11341 = vpow2.f32 %v6440_v57  ;;  %v6390_v34 = vsub.f32 %v14807_v32, %v6145_v53  ;;  %6234 = vperm.xlu1 %11271, %v15758_v17   ;;  %6249 = vperm.xlu0 %11272, %v15762_v16  }
 0x693   : > { %11343 = vpow2.f32 %v6442_v22  ;;  %v6393_v22 = vsub.f32 %v17577_v11, %v6160_v27  ;;  %v5892_v11 = vsub.f32 %v15649_v41, %v15661_v58 }
 0x694   : > { %v6472_v13 = vmul.f32 1.442695, %v6390_v34  ;;  %v7393_v34 = vld [vmem:[%s12255_s29 + $0x1e8] sm:$0xff] }
 0x695   : > { %v6080_v32 = vpop.permute.xlu1 %6079 }
 0x696   : > { %11345 = vpow2.f32 %v6472_v13  ;;  %6314 = vperm.xlu1 %11271, %v15543_v60   ;;  %6329 = vperm.xlu0 %11272, %v15572_v8   ;;  %v6377_v62 = vsub.f32 %v14823_v31, %v6080_v32  ;;  %v7377_v32 = vld [vmem:[%s12255_s29 + $0x168] sm:$0xff] }
 0x697   : > { %v15779_v1 = vpop.eup %11329  ;;  %11347 = vpow2.f32 %v6474_v30  ;;  %v15806_v30 = vld [vmem:[#allocation2 + $0x130] sm:$0xff] }
 0x698   : > { %v15782_v52 = vpop.eup %11331  ;;  %10675 = vmatprep.mubr.f32.mxu1 %v15779_v1  ;;  %11349 = vpow2.f32 %v5952_v28  ;;  %v6446_v40 = vmul.f32 1.442695, %v6377_v62  ;;  %v6478_v62 = vmul.f32 1.442695, %v6393_v22  ;;  %v5658_v22 = vld [vmem:[#allocation2 + $0x1b0] sm:$0xff] }
 0x699   : > { %v15785_v50 = vpop.eup %11333  ;;  %v6075_v63 = vpop.permute.xlu1 %6074  ;;  %10676 = vmatmul.mubr.f32.vlgmr.msra.gmra.mxu1 %v15782_v52  ;;  %11351 = vpow2.f32 %v5990_v26 }
 0x69a   : > { %v15788_v9 = vpop.permute.xlu0 %6169  ;;  %v6376_v18 = vsub.f32 %v14828_v56, %v6075_v63  ;;  %7010 = vperm.xlu1 %11271, %v15771_v21   ;;  %7025 = vperm.xlu0 %11272, %v15775_v39   ;;  %v15794_v31 = vpop.eup %11335  ;;  %v7378_v56 = vld [vmem:[%s12255_s29 + $0x170] sm:$0xff]  ;;  %11353 = vpow2.f32 %v5984_v55  ;;  %v17580_v55 = vld [vmem:[#allocation222_spill] sm:$0xff] }
 0x69b   : > { %10619 = vmatprep.mubr.f32.mxu0 %v15785_v50  ;;  %10756 = vmatpush3.msra.mxu1 %v15620_v38  ;;  %v15799_v57 = vpop.eup %11337  ;;  %v17579_v38 = vld [vmem:[#allocation152_spill] sm:$0xff]  ;;  %v15825_v63 = vmax.f32 %v15806_v30, %v17580_v55  ;;  %v5988_v55 = vmul.f32 1.442695, %v5892_v11 }
 0x69c   : > { %17578 = vst [vmem:[#allocation151_spill] sm:$0xff] %v15799_v57  ;;  %v6444_v53 = vmul.f32 1.442695, %v6376_v18  ;;  %10620 = vmatmul.mubr.f32.vlgmr.msra.gmra.mxu0 %v15794_v31  ;;  %10757 = vmatprep.subr.mxu1 %v7394_v33  ;;  %v15804_v6 = vpop.eup %11339 }
 0x69d   : > { %v6155_v13 = vpop.permute.xlu1 %6154  ;;  %10700 = vmatpush3.msra.mxu0 %v15601_v25  ;;  %10758 = vmatpush3.msra.mxu1 %v7394_v33  ;;  %v5908_v25 = vsub.f32 %v15667_v19, %v15681_v43  ;;  %v15829_v33 = vmax.f32 %v15808_v29, %v15584_v3  ;;  %v7376_v43 = vld [vmem:[%s12255_s29 + $0x160] sm:$0xff] }
 0x69e   : > { %v15810_v45 = vpop.permute.xlu0 %6099  ;;  %11355 = vpow2.f32 %v6444_v53  ;;  %v6392_v27 = vsub.f32 %v17579_v38, %v6155_v13  ;;  %7090 = vperm.xlu1 %11271, %v15799_v57   ;;  %7105 = vperm.xlu0 %11272, %v15804_v6   ;;  %v17581_v53 = vld [vmem:[#allocation153_spill] sm:$0xff]  ;;  %v5895_v13 = vsub.f32 %v15651_v12, %v15665_v23  ;;  %v15848_v38 = vmax.f32 %v5658_v22, %v15567_v10  ;;  %v7391_v12 = vld [vmem:[%s12255_s29 + $0x1d8] sm:$0xff]  ;;  %v17584_v23 = vld [vmem:[#allocation155_spill] sm:$0xff] }
 0x69f   : > { %v15817_v28 = vpop.eup %11341  ;;  %11357 = vpow2.f32 %v6446_v40  ;;  %10701 = vmatprep.subr.mxu0 %v7378_v56  ;;  %10759 = vmatprep.subr.mxu1 %v7393_v34  ;;  %v7374_v10 = vld [vmem:[%s12255_s29 + $0x150] sm:$0xff]  ;;  %v6395_v22 = vsub.f32 %v17584_v23, %v15788_v9  ;;  %v7373_v9 = vld [vmem:[%s12255_s29 + $0x148] sm:$0xff] }
 0x6a0   : > { %v15819_v26 = vpop.eup %11343  ;;  %v6476_v18 = vmul.f32 1.442695, %v6392_v27  ;;  %10622 = vmatprep.mubr.f32.mxu0 %v15817_v28  ;;  %10702 = vmatpush3.msra.mxu0 %v7378_v56  ;;  %v6020_v56 = vmul.f32 1.442695, %v5908_v25  ;;  %v7375_v27 = vld [vmem:[%s12255_s29 + $0x158] sm:$0xff]  ;;  %v17588_v23 = vld [vmem:[#allocation156_spill] sm:$0xff] }
 0x6a1   : > { %v6090_v40 = vpop.permute.xlu1 %6089  ;;  %10623 = vmatmul.mubr.f32.gmra.mxu0 %v15819_v26  ;;  %10703 = vmatprep.subr.mxu0 %v7377_v32 }
 0x6a2   : > { %v15835_v19 = vpop.permute.xlu0 %6179  ;;  %11359 = vpow2.f32 %v6476_v18  ;;  %6244 = vperm.xlu1 %11271, %v15825_v63   ;;  %6259 = vperm.xlu0 %11272, %v15829_v33   ;;  %v6379_v41 = vsub.f32 %v17581_v53, %v6090_v40  ;;  %v5994_v53 = vmul.f32 1.442695, %v5895_v13  ;;  %v7390_v13 = vld [vmem:[%s12255_s29 + $0x1d0] sm:$0xff] }
 0x6a3   : > { %v15840_v3 = vpop.eup %11345  ;;  %11361 = vpow2.f32 %v6478_v62  ;;  %10704 = vmatpush3.msra.mxu0 %v7377_v32  ;;  %10760 = vmatpush3.msra.mxu1 %v7393_v34  ;;  %v7392_v62 = vld [vmem:[%s12255_s29 + $0x1e0] sm:$0xff]  ;;  %v17583_v32 = vld [vmem:[#allocation154_spill] sm:$0xff] }
 0x6a4   : > { %v15843_v58 = vpop.eup %11347  ;;  %10678 = vmatprep.mubr.f32.mxu1 %v15840_v3  ;;  %10705 = vmatprep.subr.mxu0 %v7376_v43  ;;  %v6450_v40 = vmul.f32 1.442695, %v6379_v41  ;;  %11363 = vpow2.f32 %v6020_v56 }
 0x6a5   : > { %v6085_v18 = vpop.permute.xlu1 %6084  ;;  %10679 = vmatmul.mubr.f32.gmra.mxu1 %v15843_v58  ;;  %10706 = vmatpush3.msra.mxu0 %v7376_v43  ;;  %v15863_v11 = vpop.eup %11349  ;;  %11365 = vpow2.f32 %v5988_v55  ;;  %v17589_v55 = vld [vmem:[#allocation157_spill] sm:$0xff] }
 0x6a6   : > { %v15854_v34 = vpop.permute.xlu0 %7035  ;;  %v6378_v25 = vsub.f32 %v17583_v32, %v6085_v18  ;;  %6324 = vperm.xlu1 %11271, %v15848_v38   ;;  %6339 = vperm.xlu0 %11272, %v15617_v20   ;;  %17585 = vst [vmem:[#allocation222_spill] sm:$0xff] %v15863_v11  ;;  %v15865_v18 = vpop.eup %11351  ;;  %v5647_v32 = vld [vmem:[#allocation2 + $0x158] sm:$0xff] }
 0x6a7   : > { %17582 = vst [vmem:[#allocation152_spill] sm:$0xff] %v15854_v34  ;;  %10707 = vmatprep.subr.mxu0 %v7375_v27  ;;  %10761 = vmatprep.subr.mxu1 %v7392_v62  ;;  %17586 = vst [vmem:[#allocation153_spill] sm:$0xff] %v15865_v18  ;;  %v15870_v41 = vpop.eup %11353 }
 0x6a8   : > { %v6448_v43 = vmul.f32 1.442695, %v6378_v25  ;;  %10708 = vmatpush3.msra.mxu0 %v7375_v27  ;;  %10762 = vmatpush3.msra.mxu1 %v7392_v62  ;;  %17587 = vst [vmem:[#allocation154_spill] sm:$0xff] %v15870_v41  ;;  %v6482_v62 = vmul.f32 1.442695, %v6395_v22  ;;  %v6381_v25 = vsub.f32 %v17589_v55, %v15810_v45  ;;  %v5894_v22 = vsub.f32 %v15705_v7, %v15717_v42  ;;  %v5663_v45 = vld [vmem:[#allocation2 + $0x1d8] sm:$0xff] }
 0x6a9   : > { %v6165_v34 = vpop.permute.xlu1 %6164  ;;  %10709 = vmatprep.subr.mxu0 %v7374_v10  ;;  %10763 = vmatprep.subr.mxu1 %v7391_v12 }
 0x6aa   : > { %v15867_v20 = vpop.permute.xlu0 %6109  ;;  %11367 = vpow2.f32 %v6448_v43  ;;  %v6394_v56 = vsub.f32 %v17588_v23, %v6165_v34  ;;  %7020 = vperm.xlu1 %11271, %v15863_v11   ;;  %7115 = vperm.xlu0 %11272, %v15865_v18   ;;  %v17590_v43 = vld [vmem:[#allocation232_spill] sm:$0xff]  ;;  %v15888_v11 = vld [vmem:[#allocation2 + $0x140] sm:$0xff]  ;;  %v6454_v42 = vmul.f32 1.442695, %v6381_v25 }
 0x6ab   : > { %v15876_v27 = vpop.eup %11355  ;;  %11369 = vpow2.f32 %v6450_v40  ;;  %10710 = vmatpush3.msra.mxu0 %v7374_v10  ;;  %10764 = vmatpush3.msra.mxu1 %v7391_v12  ;;  %v15883_v34 = vmax.f32 %v5647_v32, %v17590_v43  ;;  %v7372_v12 = vld [vmem:[%s12255_s29 + $0x140] sm:$0xff]  ;;  %v17592_v40 = vld [vmem:[#allocation158_spill] sm:$0xff] }
 0x6ac   : > { %v15880_v21 = vpop.eup %11357  ;;  %11371 = vpow2.f32 %v5994_v53  ;;  %v6480_v23 = vmul.f32 1.442695, %v6394_v56  ;;  %10625 = vmatprep.mubr.f32.mxu0 %v15876_v27  ;;  %10711 = vmatprep.subr.mxu0 %v7373_v9  ;;  %v17593_v32 = vld [vmem:[#allocation159_spill] sm:$0xff] }
 0x6ad   : > { %17591 = vst [vmem:[#allocation155_spill] sm:$0xff] %v15883_v34  ;;  %v6095_v55 = vpop.permute.xlu1 %6094  ;;  %10626 = vmatmul.mubr.f32.gmra.mxu0 %v15880_v21  ;;  %10765 = vmatprep.subr.mxu1 %v7390_v13  ;;  %v6397_v56 = vsub.f32 %v17593_v32, %v15835_v19  ;;  %v7371_v19 = vld [vmem:[%s12255_s29 + $0x138] sm:$0xff]  ;;  %v5660_v25 = vld [vmem:[#allocation2 + $0x1c0] sm:$0xff] }
 0x6ae   : > { %v15891_v10 = vpop.permute.xlu0 %6189  ;;  %11373 = vpow2.f32 %v6480_v23  ;;  %v6380_v53 = vsub.f32 %v17592_v40, %v6095_v55  ;;  %7100 = vperm.xlu1 %11271, %v15870_v41   ;;  %6269 = vperm.xlu0 %11272, %v15883_v34   ;;  %v5897_v23 = vsub.f32 %v15707_v14, %v15721_v44  ;;  %v17594_v55 = vld [vmem:[#allocation228_spill] sm:$0xff]  ;;  %v15910_v34 = vmax.f32 %v5663_v45, %v15641_v49  ;;  %v7370_v45 = vld [vmem:[%s12255_s29 + $0x130] sm:$0xff]  ;;  %v17598_v41 = vld [vmem:[#allocation230_spill] sm:$0xff] }
 0x6af   : > { %v15897_v7 = vpop.eup %11359  ;;  %11375 = vpow2.f32 %v6482_v62  ;;  %10712 = vmatpush3.msra.mxu0 %v7373_v9  ;;  %10766 = vmatpush3.msra.mxu1 %v7390_v13  ;;  %v15907_v40 = vmax.f32 %v15888_v11, %v17594_v55  ;;  %v7389_v9 = vld [vmem:[%s12255_s29 + $0x1c8] sm:$0xff]  ;;  %v5992_v13 = vmul.f32 1.442695, %v5894_v22  ;;  %v6486_v55 = vmul.f32 1.442695, %v6397_v56 }
 0x6b0   : > { %v15901_v43 = vpop.eup %11361  ;;  %17595 = vst [vmem:[#allocation156_spill] sm:$0xff] %v15910_v34  ;;  %v6452_v62 = vmul.f32 1.442695, %v6380_v53  ;;  %10681 = vmatprep.mubr.f32.mxu1 %v15897_v7  ;;  %10713 = vmatprep.subr.mxu0 %v7372_v12  ;;  %v17597_v44 = vld [vmem:[#allocation160_spill] sm:$0xff]  ;;  %v7388_v53 = vld [vmem:[%s12255_s29 + $0x1c0] sm:$0xff]  ;;  %v15924_v18 = vmax.f32 %v5660_v25, %v17598_v41  ;;  %v7387_v41 = vld [vmem:[%s12255_s29 + $0x1b8] sm:$0xff] }
 0x6b1   : > { %v6175_v32 = vpop.permute.xlu1 %6174  ;;  %10682 = vmatmul.mubr.f32.gmra.mxu1 %v15901_v43  ;;  %10714 = vmatpush3.msra.mxu0 %v7372_v12  ;;  %v5998_v22 = vmul.f32 1.442695, %v5897_v23  ;;  %v15947_v25 = vld [vmem:[#allocation2 + $0x150] sm:$0xff] }
 0x6b2   : > { %v15916_v14 = vpop.permute.xlu0 %6950  ;;  %11377 = vpow2.f32 %v6452_v62  ;;  %v6396_v49 = vsub.f32 %v17597_v44, %v6175_v32  ;;  %6254 = vperm.xlu1 %11271, %v15907_v40   ;;  %6349 = vperm.xlu0 %11272, %v15910_v34   ;;  %v15926_v62 = vpop.eup %11363  ;;  %v5665_v34 = vld [vmem:[#allocation2 + $0x1e8] sm:$0xff] }
 0x6b3   : > { %17596 = vst [vmem:[#allocation157_spill] sm:$0xff] %v15916_v14  ;;  %11379 = vpow2.f32 %v6454_v42  ;;  %10715 = vmatprep.subr.mxu0 %v7371_v19  ;;  %10767 = vmatprep.subr.mxu1 %v7389_v9  ;;  %17599 = vst [vmem:[#allocation232_spill] sm:$0xff] %v15926_v62  ;;  %v7369_v42 = vld [vmem:[%s12255_s29 + $0x128] sm:$0xff]  ;;  %v15933_v56 = vpop.eup %11365 }
 0x6b4   : > { %v6484_v12 = vmul.f32 1.442695, %v6396_v49  ;;  %10716 = vmatpush3.msra.mxu0 %v7371_v19  ;;  %10768 = vmatpush3.msra.mxu1 %v7389_v9  ;;  %11381 = vpow2.f32 %v5992_v13  ;;  %17602 = vst [vmem:[#allocation228_spill] sm:$0xff] %v15933_v56  ;;  %v5896_v13 = vsub.f32 %v15748_v47, %v15758_v17  ;;  %v5649_v49 = vld [vmem:[#allocation2 + $0x168] sm:$0xff]  ;;  %v5899_v47 = vsub.f32 %v15750_v59, %v15762_v16  ;;  %v17606_v17 = vld [vmem:[#allocation161_spill] sm:$0xff] }
 0x6b5   : > { %v15928_v32 = vpop.permute.xlu1 %6955  ;;  %10717 = vmatprep.subr.mxu0 %v7370_v45  ;;  %10769 = vmatprep.subr.mxu1 %v7388_v53  ;;  %v5662_v16 = vld [vmem:[#allocation2 + $0x1d0] sm:$0xff] }
 0x6b6   : > { %17600 = vst [vmem:[#allocation158_spill] sm:$0xff] %v15928_v32  ;;  %v15930_v44 = vpop.permute.xlu0 %6965  ;;  %11383 = vpow2.f32 %v6484_v12  ;;  %6334 = vperm.xlu1 %11271, %v15924_v18   ;;  %7190 = vperm.xlu0 %11272, %v15926_v62   ;;  %v5996_v59 = vmul.f32 1.442695, %v5896_v13 }
 0x6b7   : > { %17601 = vst [vmem:[#allocation159_spill] sm:$0xff] %v15930_v44  ;;  %v15938_v23 = vpop.eup %11367  ;;  %11385 = vpow2.f32 %v6486_v55  ;;  %10718 = vmatpush3.msra.mxu0 %v7370_v45  ;;  %10770 = vmatpush3.msra.mxu1 %v7388_v53  ;;  %v7368_v53 = vld [vmem:[%s12255_s29 + $0x120] sm:$0xff]  ;;  %v7386_v55 = vld [vmem:[%s12255_s29 + $0x1b0] sm:$0xff]  ;;  %v6383_v44 = vsub.f32 %v17606_v17, %v15867_v20 }
 0x6b8   : > { %v15940_v19 = vpop.eup %11369  ;;  %11387 = vpow2.f32 %v5998_v22  ;;  %10628 = vmatprep.mubr.f32.mxu0 %v15938_v23  ;;  %10719 = vmatprep.subr.mxu0 %v7369_v42 }
 0x6b9   : > { %v15943_v9 = vpop.eup %11371  ;;  %v15949_v12 = vpop.permute.xlu1 %7030  ;;  %10629 = vmatmul.mubr.f32.gmra.mxu0 %v15940_v19  ;;  %10771 = vmatprep.subr.mxu1 %v7387_v41  ;;  %v6458_v13 = vmul.f32 1.442695, %v6383_v44  ;;  %11389 = vpow2.f32 %v5996_v59 }
 0x6ba   : > { %17603 = vst [vmem:[#allocation160_spill] sm:$0xff] %v15943_v9  ;;  %17604 = vst [vmem:[#allocation230_spill] sm:$0xff] %v15949_v12  ;;  %v15952_v45 = vpop.permute.xlu0 %7045  ;;  %7110 = vperm.xlu1 %11271, %v15933_v56   ;;  %7125 = vperm.xlu0 %11272, %v15943_v9   ;;  %v15971_v12 = vmax.f32 %v5649_v49, %v15655_v37  ;;  %v7385_v37 = vld [vmem:[%s12255_s29 + $0x1a8] sm:$0xff]  ;;  %v17610_v56 = vld [vmem:[#allocation163_spill] sm:$0xff] }
 0x6bb   : > { %17605 = vst [vmem:[#allocation244_spill] sm:$0xff] %v15952_v45  ;;  %v15958_v22 = vpop.eup %11373  ;;  %10720 = vmatpush3.msra.mxu0 %v7369_v42  ;;  %10772 = vmatpush3.msra.mxu1 %v7387_v41  ;;  %v17607_v45 = vld [vmem:[#allocation233_spill] sm:$0xff]  ;;  %v7367_v42 = vld [vmem:[%s12255_s29 + $0x118] sm:$0xff]  ;;  %v6399_v9 = vsub.f32 %v17610_v56, %v15891_v10 }
 0x6bc   : > { %v15964_v32 = vpop.eup %11375  ;;  %v15968_v14 = vmax.f32 %v15947_v25, %v17607_v45  ;;  %17608 = vst [vmem:[#allocation161_spill] sm:$0xff] %v15971_v12  ;;  %10684 = vmatprep.mubr.f32.mxu1 %v15958_v22  ;;  %10721 = vmatprep.subr.mxu0 %v7368_v53  ;;  %v17609_v41 = vld [vmem:[#allocation162_spill] sm:$0xff]  ;;  %v6002_v45 = vmul.f32 1.442695, %v5899_v47  ;;  %v7366_v56 = vld [vmem:[%s12255_s29 + $0x110] sm:$0xff] }
 0x6bd   : > { %v6105_v62 = vpop.permute.xlu1 %6104  ;;  %10685 = vmatmul.mubr.f32.gmra.mxu1 %v15964_v32  ;;  %10773 = vmatprep.subr.mxu1 %v7386_v55 }
 0x6be   : > { %v15975_v20 = vpop.permute.xlu0 %6119  ;;  %v6382_v17 = vsub.f32 %v17609_v41, %v6105_v62  ;;  %6264 = vperm.xlu1 %11271, %v15968_v14   ;;  %6279 = vperm.xlu0 %11272, %v15971_v12   ;;  %v5901_v62 = vsub.f32 %v15808_v29, %v15829_v33  ;;  %v15991_v41 = vmax.f32 %v5662_v16, %v15643_v4  ;;  %v17612_v4 = vld [vmem:[#allocation164_spill] sm:$0xff]  ;;  %v5648_v16 = vld [vmem:[#allocation2 + $0x160] sm:$0xff] }
 0x6bf   : > { %v15982_v49 = vpop.eup %11377  ;;  %10722 = vmatpush3.msra.mxu0 %v7368_v53  ;;  %10774 = vmatpush3.msra.mxu1 %v7386_v55  ;;  %v15994_v12 = vmax.f32 %v5665_v34, %v15673_v24  ;;  %v7384_v24 = vld [vmem:[%s12255_s29 + $0x1a0] sm:$0xff]  ;;  %v6490_v53 = vmul.f32 1.442695, %v6399_v9 }
 0x6c0   : > { %v15986_v57 = vpop.eup %11379  ;;  %v6456_v47 = vmul.f32 1.442695, %v6382_v17  ;;  %10631 = vmatprep.mubr.f32.mxu0 %v15982_v49  ;;  %10723 = vmatprep.subr.mxu0 %v7367_v42  ;;  %v6006_v59 = vmul.f32 1.442695, %v5901_v62 }
 0x6c1   : > { %17611 = vst [vmem:[#allocation233_spill] sm:$0xff] %v15994_v12  ;;  %v6185_v10 = vpop.permute.xlu1 %6184  ;;  %10632 = vmatmul.mubr.f32.gmra.mxu0 %v15986_v57  ;;  %10775 = vmatprep.subr.mxu1 %v7385_v37  ;;  %v16001_v29 = vpop.eup %11381 }
 0x6c2   : > { %v15998_v44 = vpop.permute.xlu0 %6199  ;;  %11391 = vpow2.f32 %v6456_v47  ;;  %v6398_v33 = vsub.f32 %v17612_v4, %v6185_v10  ;;  %6344 = vperm.xlu1 %11271, %v15991_v41   ;;  %6359 = vperm.xlu0 %11272, %v15994_v12   ;;  %v5651_v10 = vld [vmem:[#allocation2 + $0x178] sm:$0xff] }
 0x6c3   : > { %v16007_v34 = vpop.eup %11383  ;;  %11393 = vpow2.f32 %v6458_v13  ;;  %10724 = vmatpush3.msra.mxu0 %v7367_v42  ;;  %10776 = vmatpush3.msra.mxu1 %v7385_v37  ;;  %v7365_v42 = vld [vmem:[%s12255_s29 + $0x108] sm:$0xff]  ;;  %v7383_v37 = vld [vmem:[%s12255_s29 + $0x198] sm:$0xff]  ;;  %v16026_v13 = vmax.f32 %v5648_v16, %v15657_v5  ;;  %v16029_v62 = vmax.f32 %v5651_v10, %v15687_v35  ;;  %v17619_v35 = vld [vmem:[#allocation165_spill] sm:$0xff] }
 0x6c4   : > { %v16009_v55 = vpop.eup %11385  ;;  %11395 = vpow2.f32 %v6002_v45  ;;  %v6488_v17 = vmul.f32 1.442695, %v6398_v33  ;;  %10687 = vmatprep.mubr.f32.mxu1 %v16007_v34  ;;  %10725 = vmatprep.subr.mxu0 %v7366_v56  ;;  %v5898_v45 = vsub.f32 %v15806_v30, %v15825_v63  ;;  %v7364_v33 = vld [vmem:[%s12255_s29 + $0x100] sm:$0xff]  ;;  %v7381_v5 = vld [vmem:[%s12255_s29 + $0x188] sm:$0xff]  ;;  %v6385_v30 = vsub.f32 %v17619_v35, %v15975_v20  ;;  %v17623_v20 = vld [vmem:[#allocation166_spill] sm:$0xff] }
 0x6c5   : > { %v16012_v47 = vpop.eup %11387  ;;  %v16014_v4 = vpop.permute.xlu1 %6960  ;;  %10688 = vmatmul.mubr.f32.gmra.mxu1 %v16009_v55  ;;  %10777 = vmatprep.subr.mxu1 %v7384_v24  ;;  %17615 = vst [vmem:[#allocation164_spill] sm:$0xff] %v16026_v13  ;;  %17616 = vst [vmem:[#allocation245_spill] sm:$0xff] %v16029_v62 }
 0x6c6   : > { %17613 = vst [vmem:[#allocation162_spill] sm:$0xff] %v16014_v4  ;;  %v16017_v9 = vpop.permute.xlu0 %6975  ;;  %11397 = vpow2.f32 %v6488_v17  ;;  %7120 = vperm.xlu1 %11271, %v16001_v29   ;;  %7135 = vperm.xlu0 %11272, %v16012_v47   ;;  %v7382_v17 = vld [vmem:[%s12255_s29 + $0x190] sm:$0xff]  ;;  %v5667_v4 = vld [vmem:[#allocation2 + $0x1f8] sm:$0xff]  ;;  %v6000_v63 = vmul.f32 1.442695, %v5898_v45 }
 0x6c7   : > { %17614 = vst [vmem:[#allocation163_spill] sm:$0xff] %v16017_v9  ;;  %11399 = vpow2.f32 %v6490_v53  ;;  %10726 = vmatpush3.msra.mxu0 %v7366_v56  ;;  %10778 = vmatpush3.msra.mxu1 %v7384_v24  ;;  %v5664_v9 = vld [vmem:[#allocation2 + $0x1e0] sm:$0xff]  ;;  %v5900_v24 = vsub.f32 %v15888_v11, %v15907_v40  ;;  %v16048_v10 = vmax.f32 %v5667_v4, %v15699_v15  ;;  %v6462_v40 = vmul.f32 1.442695, %v6385_v30 }
 0x6c8   : > { %11401 = vpow2.f32 %v6006_v59  ;;  %10727 = vmatprep.subr.mxu0 %v7365_v42  ;;  %10779 = vmatprep.subr.mxu1 %v7383_v37  ;;  %v17620_v59 = vld [vmem:[#allocation238_spill] sm:$0xff]  ;;  %v17624_v15 = vld [vmem:[#allocation167_spill] sm:$0xff] }
 0x6c9   : > { %v16033_v53 = vpop.permute.xlu1 %7040  ;;  %10728 = vmatpush3.msra.mxu0 %v7365_v42  ;;  %10780 = vmatpush3.msra.mxu1 %v7383_v37  ;;  %v16045_v16 = vmax.f32 %v5664_v9, %v17620_v59  ;;  %17621 = vst [vmem:[#allocation165_spill] sm:$0xff] %v16048_v10  ;;  %v6401_v4 = vsub.f32 %v17624_v15, %v15998_v44  ;;  %11403 = vpow2.f32 %v6000_v63  ;;  %v6004_v45 = vmul.f32 1.442695, %v5900_v24  ;;  %v17625_v44 = vld [vmem:[#allocation168_spill] sm:$0xff] }
 0x6ca   : > { %17617 = vst [vmem:[#allocation246_spill] sm:$0xff] %v16033_v53  ;;  %v16035_v56 = vpop.permute.xlu0 %7055  ;;  %6274 = vperm.xlu1 %11271, %v16026_v13   ;;  %6289 = vperm.xlu0 %11272, %v16029_v62   ;;  %v16051_v53 = vpop.eup %11389 }
 0x6cb   : > { %17618 = vst [vmem:[#allocation247_spill] sm:$0xff] %v16035_v56  ;;  %10729 = vmatprep.subr.mxu0 %v7364_v33  ;;  %10781 = vmatprep.subr.mxu1 %v7382_v17  ;;  %v7380_v56 = vld [vmem:[%s12255_s29 + $0x180] sm:$0xff]  ;;  %17622 = vst [vmem:[#allocation238_spill] sm:$0xff] %v16051_v53 }
 0x6cc   : > { %10730 = vmatpush3.msra.mxu0 %v7364_v33  ;;  %10782 = vmatpush3.msra.mxu1 %v7382_v17  ;;  %v5902_v33 = vsub.f32 %v15947_v25, %v15968_v14  ;;  %v6494_v25 = vmul.f32 1.442695, %v6401_v4 }
 0x6cd   : > { %v6115_v42 = vpop.permute.xlu1 %6114  ;;  %10783 = vmatprep.subr.mxu1 %v7381_v5 }
 0x6ce   : > { %v6130_v37 = vpop.permute.xlu0 %6129  ;;  %v6384_v35 = vsub.f32 %v17623_v20, %v6115_v42  ;;  %6354 = vperm.xlu1 %11271, %v16045_v16   ;;  %6369 = vperm.xlu0 %11272, %v16048_v10   ;;  %v5650_v42 = vld [vmem:[#allocation2 + $0x170] sm:$0xff]  ;;  %v6008_v24 = vmul.f32 1.442695, %v5902_v33  ;;  %v17646_v10 = vld [vmem:[#allocation174_spill] sm:$0xff] }
 0x6cf   : > { %v16056_v11 = vpop.eup %11391  ;;  %10784 = vmatpush3.msra.mxu1 %v7381_v5  ;;  %v17634_v33 = vld [vmem:[#allocation169_spill] sm:$0xff] }
 0x6d0   : > { %v16060_v9 = vpop.eup %11393  ;;  %v6460_v17 = vmul.f32 1.442695, %v6384_v35  ;;  %10634 = vmatprep.mubr.f32.mxu0 %v16056_v11  ;;  %10785 = vmatprep.subr.mxu1 %v7380_v56  ;;  %v17626_v35 = vld [vmem:[#allocation239_spill] sm:$0xff] }
 0x6d1   : > { %v16065_v59 = vpop.eup %11395  ;;  %v6195_v20 = vpop.permute.xlu1 %6194  ;;  %10635 = vmatmul.mubr.f32.gmra.mxu0 %v16060_v9  ;;  %10786 = vmatpush3.msra.mxu1 %v7380_v56  ;;  %v16076_v15 = vmax.f32 %v5650_v42, %v17626_v35  ;;  %v6387_v42 = vsub.f32 %v17634_v33, %v6130_v37 }
 0x6d2   : > { %v6210_v30 = vpop.permute.xlu0 %6209  ;;  %11405 = vpow2.f32 %v6460_v17  ;;  %v6400_v5 = vsub.f32 %v17625_v44, %v6195_v20  ;;  %7130 = vperm.xlu1 %11271, %v16051_v53   ;;  %7145 = vperm.xlu0 %11272, %v16065_v59   ;;  %v5666_v17 = vld [vmem:[#allocation2 + $0x1f0] sm:$0xff] }
 0x6d3   : > { %v16071_v14 = vpop.eup %11397  ;;  %11407 = vpow2.f32 %v6462_v40  ;;  %17627 = vst [vmem:[#allocation166_spill] sm:$0xff] %v16076_v15  ;;  %v16089_v40 = vmax.f32 %v5666_v17, %v15709_v46  ;;  %v6466_v46 = vmul.f32 1.442695, %v6387_v42 }
 0x6d4   : > { %v16073_v63 = vpop.eup %11399  ;;  %11409 = vpow2.f32 %v6004_v45  ;;  %v6492_v62 = vmul.f32 1.442695, %v6400_v5  ;;  %10690 = vmatprep.mubr.f32.mxu1 %v16071_v14 }
 0x6d5   : > { %v16079_v56 = vpop.eup %11401  ;;  %v16081_v20 = vpop.permute.xlu1 %6970  ;;  %10691 = vmatmul.mubr.f32.gmra.mxu1 %v16073_v63  ;;  %17631 = vst [vmem:[#allocation248_spill] sm:$0xff] %v16089_v40 }
 0x6d6   : > { %17628 = vst [vmem:[#allocation167_spill] sm:$0xff] %v16079_v56  ;;  %17629 = vst [vmem:[#allocation168_spill] sm:$0xff] %v16081_v20  ;;  %v16084_v44 = vpop.permute.xlu0 %6985  ;;  %11411 = vpow2.f32 %v6492_v62  ;;  %6284 = vperm.xlu1 %11271, %v16076_v15   ;;  %7155 = vperm.xlu0 %11272, %v16079_v56   ;;  %v16097_v5 = vpop.eup %11403 }
 0x6d7   : > { %17630 = vst [vmem:[#allocation239_spill] sm:$0xff] %v16084_v44  ;;  %11413 = vpow2.f32 %v6494_v25  ;;  %17635 = vst [vmem:[#allocation169_spill] sm:$0xff] %v16097_v5  ;;  %v17636_v44 = vld [vmem:[#allocation170_spill] sm:$0xff] }
 0x6d8   : > { %11415 = vpow2.f32 %v6008_v24  ;;  %v17637_v24 = vld [vmem:[#allocation171_spill] sm:$0xff] }
 0x6d9   : > { %v16091_v4 = vpop.permute.xlu1 %7050  ;;  %v6403_v17 = vsub.f32 %v17637_v24, %v6210_v30 }
 0x6da   : > { %17632 = vst [vmem:[#allocation249_spill] sm:$0xff] %v16091_v4  ;;  %v16093_v45 = vpop.permute.xlu0 %7065  ;;  %6364 = vperm.xlu1 %11271, %v16089_v40  }
 0x6db   : > { %17633 = vst [vmem:[#allocation250_spill] sm:$0xff] %v16093_v45  ;;  %v6498_v30 = vmul.f32 1.442695, %v6403_v17  ;;  %v17645_v17 = vld [vmem:[#allocation173_spill] sm:$0xff] }
 0x6dd   : > { %v6125_v62 = vpop.permute.xlu1 %6124 }
 0x6de   : > { %v6220_v35 = vpop.permute.xlu0 %6219  ;;  %v6386_v20 = vsub.f32 %v17636_v44, %v6125_v62  ;;  %7140 = vperm.xlu1 %11271, %v16097_v5   ;;  %v17639_v44 = vld [vmem:[#allocation172_spill] sm:$0xff]  ;;  %v17647_v5 = vld [vmem:[#allocation175_spill] sm:$0xff] }
 0x6df   : > { %v16101_v25 = vpop.eup %11405 }
 0x6e0   : > { %v16104_v4 = vpop.eup %11407  ;;  %v6464_v45 = vmul.f32 1.442695, %v6386_v20  ;;  %10637 = vmatprep.mubr.f32.mxu0 %v16101_v25 }
 0x6e1   : > { %v16107_v15 = vpop.eup %11409  ;;  %v6205_v37 = vpop.permute.xlu1 %6204  ;;  %10638 = vmatmul.mubr.f32.gmra.mxu0 %v16104_v4 }
 0x6e2   : > { %17638 = vst [vmem:[#allocation170_spill] sm:$0xff] %v16107_v15  ;;  %v6300_v33 = vpop.permute.xlu0 %6299  ;;  %11417 = vpow2.f32 %v6464_v45  ;;  %v6402_v62 = vsub.f32 %v17639_v44, %v6205_v37  ;;  %7150 = vperm.xlu1 %11271, %v16107_v15   ;;  %v6405_v44 = vsub.f32 %v17645_v17, %v6220_v35  ;;  %v17648_v35 = vld [vmem:[#allocation176_spill] sm:$0xff] }
 0x6e3   : > { %v16112_v13 = vpop.eup %11411  ;;  %11419 = vpow2.f32 %v6466_v46  ;;  %v6421_v53 = vsub.f32 %v17647_v5, %v6300_v33 }
 0x6e4   : > { %v16114_v42 = vpop.eup %11413  ;;  %v6496_v20 = vmul.f32 1.442695, %v6402_v62  ;;  %10693 = vmatprep.mubr.f32.mxu1 %v16112_v13 }
 0x6e5   : > { %v16117_v24 = vpop.eup %11415  ;;  %v16119_v12 = vpop.permute.xlu1 %6980  ;;  %10694 = vmatmul.mubr.f32.gmra.mxu1 %v16114_v42 }
 0x6e6   : > { %17640 = vst [vmem:[#allocation171_spill] sm:$0xff] %v16117_v24  ;;  %17641 = vst [vmem:[#allocation172_spill] sm:$0xff] %v16119_v12  ;;  %v16122_v45 = vpop.permute.xlu0 %6995  ;;  %11421 = vpow2.f32 %v6496_v20  ;;  %7160 = vperm.xlu1 %11271, %v16117_v24   ;;  %v6502_v12 = vmul.f32 1.442695, %v6405_v44 }
 0x6e7   : > { %17642 = vst [vmem:[#allocation251_spill] sm:$0xff] %v16122_v45  ;;  %11423 = vpow2.f32 %v6498_v30 }
 0x6e9   : > { %v16125_v37 = vpop.permute.xlu1 %7060 }
 0x6ea   : > { %17643 = vst [vmem:[#allocation252_spill] sm:$0xff] %v16125_v37  ;;  %v16127_v46 = vpop.permute.xlu0 %7075 }
 0x6eb   : > { %17644 = vst [vmem:[#allocation253_spill] sm:$0xff] %v16127_v46 }
 0x6ed   : > { %v6215_v62 = vpop.permute.xlu1 %6214 }
 0x6ee   : > { %v6230_v15 = vpop.permute.xlu0 %6229  ;;  %v6404_v56 = vsub.f32 %v17646_v10, %v6215_v62  ;;  %v6534_v10 = vmul.f32 1.442695, %v6421_v53  ;;  %v17652_v53 = vld [vmem:[#allocation177_spill] sm:$0xff] }
 0x6ef   : > { %v16131_v40 = vpop.eup %11417 }
 0x6f0   : > { %v16134_v45 = vpop.eup %11419  ;;  %v6500_v20 = vmul.f32 1.442695, %v6404_v56  ;;  %10640 = vmatprep.mubr.f32.mxu0 %v16131_v40 }
 0x6f1   : > { %v6295_v30 = vpop.permute.xlu1 %6294  ;;  %10641 = vmatmul.mubr.f32.gmra.mxu0 %v16134_v45 }
 0x6f2   : > { %v6310_v46 = vpop.permute.xlu0 %6309  ;;  %11425 = vpow2.f32 %v6500_v20  ;;  %v6420_v17 = vsub.f32 %v17648_v35, %v6295_v30  ;;  %v6407_v20 = vsub.f32 %v17652_v53, %v6230_v15 }
 0x6f3   : > { %v16139_v37 = vpop.eup %11421  ;;  %11427 = vpow2.f32 %v6502_v12 }
 0x6f4   : > { %v16141_v62 = vpop.eup %11423  ;;  %v6532_v44 = vmul.f32 1.442695, %v6420_v17  ;;  %10696 = vmatprep.mubr.f32.mxu1 %v16139_v37  ;;  %v17653_v17 = vld [vmem:[#allocation178_spill] sm:$0xff]  ;;  %v6506_v24 = vmul.f32 1.442695, %v6407_v20 }
 0x6f5   : > { %v16144_v5 = vpop.permute.xlu1 %6990  ;;  %6694 = vadd.xlane.f32.xlu0 %v15794_v31  ;;  %10697 = vmatmul.mubr.f32.gmra.mxu1 %v16141_v62 }
 0x6f6   : > { %17649 = vst [vmem:[#allocation173_spill] sm:$0xff] %v16144_v5  ;;  %v16148_v56 = vpop.permute.xlu0 %7005  ;;  %11429 = vpow2.f32 %v6532_v44 }
 0x6f7   : > { %17650 = vst [vmem:[#allocation174_spill] sm:$0xff] %v16148_v56  ;;  %11431 = vpow2.f32 %v6534_v10  ;;  %v17654_v56 = vld [vmem:[#allocation179_spill] sm:$0xff] }
 0x6f8   : > { %v6423_v44 = vsub.f32 %v17654_v56, %v6310_v46 }
 0x6f9   : > { %v16150_v33 = vpop.permute.xlu1 %7070  ;;  %6724 = vadd.xlane.f32.xlu0 %v15779_v1 }
 0x6fa   : > { %17651 = vst [vmem:[#allocation175_spill] sm:$0xff] %v16150_v33  ;;  %v16153_v12 = vpop.permute.xlu0 %7085  ;;  %v6538_v20 = vmul.f32 1.442695, %v6423_v44 }
 0x6fd   : > { %v6225_v30 = vpop.permute.xlu1 %6224  ;;  %6696 = vadd.xlane.f32.xlu0 %v15817_v28  ;;  %v17655_v28 = vld [vmem:[#allocation180_spill] sm:$0xff] }
 0x6fe   : > { %v6240_v35 = vpop.permute.xlu0 %6239  ;;  %v6406_v31 = vsub.f32 %v17653_v17, %v6225_v30 }
 0x6ff   : > { %v16158_v5 = vpop.eup %11425 }
 0x700   : > { %v16161_v10 = vpop.eup %11427  ;;  %v6504_v33 = vmul.f32 1.442695, %v6406_v31  ;;  %10731 = vmatprep.mubr.f32.mxu0 %v16158_v5  ;;  %v17659_v31 = vld [vmem:[#allocation181_spill] sm:$0xff] }
 0x701   : > { %v6305_v1 = vpop.permute.xlu1 %6304  ;;  %6728 = vadd.xlane.f32.xlu0 %v15840_v3  ;;  %10732 = vmatmul.mubr.f32.vlgmr.msra.gmra.mxu0 %v16161_v10  ;;  %v6409_v44 = vsub.f32 %v17659_v31, %v6240_v35  ;;  %v17662_v35 = vld [vmem:[#allocation184_spill] sm:$0xff] }
 0x702   : > { %v6320_v15 = vpop.permute.xlu0 %6319  ;;  %11433 = vpow2.f32 %v6504_v33  ;;  %v6422_v53 = vsub.f32 %v17655_v28, %v6305_v1  ;;  %v17660_v28 = vld [vmem:[#allocation182_spill] sm:$0xff] }
 0x703   : > { %v16167_v30 = vpop.eup %11429  ;;  %11435 = vpow2.f32 %v6506_v24 }
 0x704   : > { %v16169_v17 = vpop.eup %11431  ;;  %v6536_v46 = vmul.f32 1.442695, %v6422_v53  ;;  %10787 = vmatprep.mubr.f32.mxu1 %v16167_v30 }
 0x705   : > { %v16172_v56 = vpop.permute.xlu1 %7000  ;;  %6700 = vadd.xlane.f32.xlu0 %v15876_v27  ;;  %10788 = vmatmul.mubr.f32.vlgmr.msra.gmra.mxu1 %v16169_v17 }
 0x706   : > { %17656 = vst [vmem:[#allocation176_spill] sm:$0xff] %v16172_v56  ;;  %v16176_v3 = vpop.permute.xlu0 %7015  ;;  %11437 = vpow2.f32 %v6536_v46 }
 0x707   : > { %17657 = vst [vmem:[#allocation177_spill] sm:$0xff] %v16176_v3  ;;  %11439 = vpow2.f32 %v6538_v20  ;;  %v6510_v20 = vmul.f32 1.442695, %v6409_v44  ;;  %v17661_v3 = vld [vmem:[#allocation183_spill] sm:$0xff] }
 0x708   : > { %v6425_v56 = vsub.f32 %v17661_v3, %v6320_v15 }
 0x709   : > { %v16178_v33 = vpop.permute.xlu1 %7080  ;;  %6732 = vadd.xlane.f32.xlu0 %v15897_v7 }
 0x70a   : > { %v16181_v24 = vpop.permute.xlu0 %7095  ;;  %6726 = vadd.xlane.f32.xlu1 %v15782_v52  ;;  %v6542_v15 = vmul.f32 1.442695, %v6425_v56 }
 0x70b   : > { %17658 = vst [vmem:[#allocation178_spill] sm:$0xff] %v16181_v24 }
 0x70d   : > { %v6235_v1 = vpop.permute.xlu1 %6234  ;;  %6704 = vadd.xlane.f32.xlu0 %v15938_v23 }
 0x70e   : > { %v6250_v27 = vpop.permute.xlu0 %6249  ;;  %v6408_v53 = vsub.f32 %v17660_v28, %v6235_v1  ;;  %6692 = vadd.xlane.f32.xlu1 %v15785_v50 }
 0x70f   : > { %v16188_v46 = vpop.eup %11433 }
 0x710   : > { %v16191_v7 = vpop.eup %11435  ;;  %v6508_v24 = vmul.f32 1.442695, %v6408_v53  ;;  %10734 = vmatprep.mubr.f32.mxu0 %v16188_v46 }
 0x711   : > { %v6315_v52 = vpop.permute.xlu1 %6314  ;;  %6736 = vadd.xlane.f32.xlu0 %v15958_v22  ;;  %10735 = vmatmul.mubr.f32.gmra.mxu0 %v16191_v7 }
 0x712   : > { %v6330_v23 = vpop.permute.xlu0 %6329  ;;  %11441 = vpow2.f32 %v6508_v24  ;;  %v6424_v31 = vsub.f32 %v17662_v35, %v6315_v52  ;;  %6698 = vadd.xlane.f32.xlu1 %v15819_v26  ;;  %v17663_v24 = vld [vmem:[#allocation185_spill] sm:$0xff] }
 0x713   : > { %v16198_v50 = vpop.eup %11437  ;;  %11443 = vpow2.f32 %v6510_v20  ;;  %v6411_v28 = vsub.f32 %v17663_v24, %v6250_v27  ;;  %v17664_v20 = vld [vmem:[#allocation186_spill] sm:$0xff]  ;;  %v17666_v27 = vld [vmem:[#allocation188_spill] sm:$0xff] }
 0x714   : > { %v16200_v3 = vpop.eup %11439  ;;  %v6540_v44 = vmul.f32 1.442695, %v6424_v31  ;;  %10790 = vmatprep.mubr.f32.mxu1 %v16198_v50  ;;  %v17665_v31 = vld [vmem:[#allocation187_spill] sm:$0xff] }
 0x715   : > { %v16203_v1 = vpop.permute.xlu1 %7010  ;;  %6708 = vadd.xlane.f32.xlu0 %v15982_v49  ;;  %10791 = vmatmul.mubr.f32.gmra.mxu1 %v16200_v3  ;;  %v6514_v35 = vmul.f32 1.442695, %v6411_v28 }
 0x716   : > { %v16207_v22 = vpop.permute.xlu0 %7025  ;;  %11445 = vpow2.f32 %v6540_v44  ;;  %6730 = vadd.xlane.f32.xlu1 %v15843_v58 }
 0x717   : > { %11447 = vpow2.f32 %v6542_v15  ;;  %v6427_v15 = vsub.f32 %v17665_v31, %v6330_v23 }
 0x719   : > { %v16210_v26 = vpop.permute.xlu1 %7090  ;;  %6740 = vadd.xlane.f32.xlu0 %v16007_v34  ;;  %v6546_v23 = vmul.f32 1.442695, %v6427_v15 }
 0x71a   : > { %v16213_v56 = vpop.permute.xlu0 %7105  ;;  %6702 = vadd.xlane.f32.xlu1 %v15880_v21 }
 0x71d   : > { %v6245_v53 = vpop.permute.xlu1 %6244  ;;  %6712 = vadd.xlane.f32.xlu0 %v16056_v11 }
 0x71e   : > { %v6260_v49 = vpop.permute.xlu0 %6259  ;;  %v6410_v52 = vsub.f32 %v17664_v20, %v6245_v53  ;;  %6734 = vadd.xlane.f32.xlu1 %v15901_v43 }
 0x71f   : > { %v16220_v58 = vpop.eup %11441 }
 0x720   : > { %v16223_v34 = vpop.eup %11443  ;;  %v6512_v44 = vmul.f32 1.442695, %v6410_v52  ;;  %10737 = vmatprep.mubr.f32.mxu0 %v16220_v58 }
 0x721   : > { %v6325_v21 = vpop.permute.xlu1 %6324  ;;  %6744 = vadd.xlane.f32.xlu0 %v16071_v14  ;;  %10738 = vmatmul.mubr.f32.gmra.mxu0 %v16223_v34 }
 0x722   : > { %v6340_v11 = vpop.permute.xlu0 %6339  ;;  %11449 = vpow2.f32 %v6512_v44  ;;  %v6426_v24 = vsub.f32 %v17666_v27, %v6325_v21  ;;  %6706 = vadd.xlane.f32.xlu1 %v15940_v19  ;;  %v17668_v44 = vld [vmem:[#allocation190_spill] sm:$0xff] }
 0x723   : > { %v16230_v43 = vpop.eup %11445  ;;  %11451 = vpow2.f32 %v6514_v35  ;;  %v17667_v35 = vld [vmem:[#allocation189_spill] sm:$0xff] }
 0x724   : > { %v16232_v28 = vpop.eup %11447  ;;  %v6544_v53 = vmul.f32 1.442695, %v6426_v24  ;;  %10793 = vmatprep.mubr.f32.mxu1 %v16230_v43  ;;  %v6413_v31 = vsub.f32 %v17667_v35, %v6260_v49  ;;  %v17669_v24 = vld [vmem:[#allocation191_spill] sm:$0xff]  ;;  %v17671_v49 = vld [vmem:[#allocation192_spill] sm:$0xff] }
 0x725   : > { %v16235_v20 = vpop.permute.xlu1 %7020  ;;  %6716 = vadd.xlane.f32.xlu0 %v16101_v25  ;;  %10794 = vmatmul.mubr.f32.gmra.mxu1 %v16232_v28 }
 0x726   : > { %v16239_v14 = vpop.permute.xlu0 %7115  ;;  %11453 = vpow2.f32 %v6544_v53  ;;  %6738 = vadd.xlane.f32.xlu1 %v15964_v32  ;;  %v6518_v32 = vmul.f32 1.442695, %v6413_v31 }
 0x727   : > { %11455 = vpow2.f32 %v6546_v23  ;;  %v6429_v23 = vsub.f32 %v17669_v24, %v6340_v11 }
 0x729   : > { %v16242_v19 = vpop.permute.xlu1 %7100  ;;  %6748 = vadd.xlane.f32.xlu0 %v16112_v13  ;;  %v6550_v11 = vmul.f32 1.442695, %v6429_v23  ;;  %v17673_v23 = vld [vmem:[#allocation194_spill] sm:$0xff] }
 0x72a   : > { %v6270_v52 = vpop.permute.xlu0 %6269  ;;  %6710 = vadd.xlane.f32.xlu1 %v15986_v57 }
 0x72d   : > { %v6255_v15 = vpop.permute.xlu1 %6254  ;;  %6720 = vadd.xlane.f32.xlu0 %v16131_v40 }
 0x72e   : > { %v6350_v25 = vpop.permute.xlu0 %6349  ;;  %v6412_v21 = vsub.f32 %v17668_v44, %v6255_v15  ;;  %6742 = vadd.xlane.f32.xlu1 %v16009_v55 }
 0x72f   : > { %v16250_v27 = vpop.eup %11449 }
 0x730   : > { %v16253_v53 = vpop.eup %11451  ;;  %v6516_v13 = vmul.f32 1.442695, %v6412_v21  ;;  %10740 = vmatprep.mubr.f32.mxu0 %v16250_v27 }
 0x731   : > { %v6335_v57 = vpop.permute.xlu1 %6334  ;;  %6752 = vadd.xlane.f32.xlu0 %v16139_v37  ;;  %10741 = vmatmul.mubr.f32.gmra.mxu0 %v16253_v53 }
 0x732   : > { %v16258_v40 = vpop.permute.xlu0 %7190  ;;  %11457 = vpow2.f32 %v6516_v13  ;;  %v6428_v55 = vsub.f32 %v17671_v49, %v6335_v57  ;;  %6714 = vadd.xlane.f32.xlu1 %v16060_v9  ;;  %v17672_v9 = vld [vmem:[#allocation193_spill] sm:$0xff] }
 0x733   : > { %17670 = vst [vmem:[#allocation179_spill] sm:$0xff] %v16258_v40  ;;  %v16262_v35 = vpop.eup %11453  ;;  %11459 = vpow2.f32 %v6518_v32  ;;  %v6415_v21 = vsub.f32 %v17672_v9, %v6270_v52 }
 0x734   : > { %v16264_v31 = vpop.eup %11455  ;;  %v6548_v15 = vmul.f32 1.442695, %v6428_v55  ;;  %10796 = vmatprep.mubr.f32.mxu1 %v16262_v35 }
 0x735   : > { %v16267_v44 = vpop.permute.xlu1 %7110  ;;  %6756 = vadd.xlane.f32.xlu0 %v16158_v5  ;;  %10797 = vmatmul.mubr.f32.gmra.mxu1 %v16264_v31  ;;  %v6522_v57 = vmul.f32 1.442695, %v6415_v21  ;;  %v17674_v5 = vld [vmem:[#allocation195_spill] sm:$0xff] }
 0x736   : > { %v16271_v37 = vpop.permute.xlu0 %7125  ;;  %11461 = vpow2.f32 %v6548_v15  ;;  %6746 = vadd.xlane.f32.xlu1 %v16073_v63  ;;  %v6431_v49 = vsub.f32 %v17674_v5, %v6350_v25  ;;  %v17675_v63 = vld [vmem:[#allocation196_spill] sm:$0xff]  ;;  %v17676_v25 = vld [vmem:[#allocation197_spill] sm:$0xff] }
 0x737   : > { %11463 = vpow2.f32 %v6550_v11 }
 0x739   : > { %v6265_v32 = vpop.permute.xlu1 %6264  ;;  %6788 = vadd.xlane.f32.xlu0 %v16167_v30  ;;  %v6554_v30 = vmul.f32 1.442695, %v6431_v49 }
 0x73a   : > { %v6280_v24 = vpop.permute.xlu0 %6279  ;;  %v6414_v13 = vsub.f32 %v17673_v23, %v6265_v32  ;;  %6718 = vadd.xlane.f32.xlu1 %v16104_v4 }
 0x73c   : > { %v6520_v55 = vmul.f32 1.442695, %v6414_v13 }
 0x73d   : > { %v6345_v40 = vpop.permute.xlu1 %6344  ;;  %6760 = vadd.xlane.f32.xlu0 %v16188_v46 }
 0x73e   : > { %11465 = vpow2.f32 %v6520_v55  ;;  %v6430_v11 = vsub.f32 %v17675_v63, %v6345_v40  ;;  %v6360_v15 = vpop.permute.xlu0 %6359  ;;  %6750 = vadd.xlane.f32.xlu1 %v16114_v42  ;;  %v6417_v42 = vsub.f32 %v17676_v25, %v6280_v24  ;;  %v17680_v63 = vld [vmem:[#allocation200_spill] sm:$0xff] }
 0x73f   : > { %v11458_v52 = vpop.eup %11457  ;;  %11467 = vpow2.f32 %v6522_v57 }
 0x740   : > { %v16282_v9 = vpop.eup %11459  ;;  %v6552_v32 = vmul.f32 1.442695, %v6430_v11  ;;  %10743 = vmatprep.mubr.f32.mxu0 %v11458_v52  ;;  %v6526_v57 = vmul.f32 1.442695, %v6417_v42 }
 0x741   : > { %v16284_v4 = vpop.permute.xlu1 %7120  ;;  %6792 = vadd.xlane.f32.xlu0 %v16198_v50  ;;  %10744 = vmatmul.mubr.f32.gmra.mxu0 %v16282_v9  ;;  %v17678_v50 = vld [vmem:[#allocation198_spill] sm:$0xff] }
 0x742   : > { %11469 = vpow2.f32 %v6552_v32  ;;  %6722 = vadd.xlane.f32.xlu1 %v16134_v45  ;;  %v16292_v21 = vpop.permute.xlu0 %7135  ;;  %v17679_v45 = vld [vmem:[#allocation199_spill] sm:$0xff] }
 0x743   : > { %v11462_v46 = vpop.eup %11461  ;;  %11471 = vpow2.f32 %v6554_v30  ;;  %17677 = vst [vmem:[#allocation180_spill] sm:$0xff] %v16292_v21  ;;  %v6433_v5 = vsub.f32 %v17679_v45, %v6360_v15  ;;  %v17681_v15 = vld [vmem:[#allocation201_spill] sm:$0xff]  ;;  %v17683_v45 = vld [vmem:[#allocation203_spill] sm:$0xff] }
 0x744   : > { %v16290_v40 = vpop.eup %11463  ;;  %10799 = vmatprep.mubr.f32.mxu1 %v11462_v46 }
 0x745   : > { %v6275_v23 = vpop.permute.xlu1 %6274  ;;  %6764 = vadd.xlane.f32.xlu0 %v16220_v58  ;;  %10800 = vmatmul.mubr.f32.gmra.mxu1 %v16290_v40  ;;  %v6558_v30 = vmul.f32 1.442695, %v6433_v5 }
 0x746   : > { %v6416_v13 = vsub.f32 %v17678_v50, %v6275_v23  ;;  %6754 = vadd.xlane.f32.xlu1 %v16141_v62  ;;  %v6290_v24 = vpop.permute.xlu0 %6289 }
 0x747   : > { %v6419_v42 = vsub.f32 %v17681_v15, %v6290_v24 }
 0x748   : > { %v6524_v49 = vmul.f32 1.442695, %v6416_v13  ;;  %v17682_v13 = vld [vmem:[#allocation202_spill] sm:$0xff] }
 0x749   : > { %v6355_v55 = vpop.permute.xlu1 %6354  ;;  %6796 = vadd.xlane.f32.xlu0 %v16230_v43 }
 0x74a   : > { %11473 = vpow2.f32 %v6524_v49  ;;  %v6432_v11 = vsub.f32 %v17680_v63, %v6355_v55  ;;  %6758 = vadd.xlane.f32.xlu1 %v16161_v10  ;;  %v6370_v10 = vpop.permute.xlu0 %6369  ;;  %v17684_v55 = vld [vmem:[#allocation204_spill] sm:$0xff] }
 0x74b   : > { %v11466_v58 = vpop.eup %11465  ;;  %11475 = vpow2.f32 %v6526_v57  ;;  %v6435_v5 = vsub.f32 %v17683_v45, %v6370_v10 }
 0x74c   : > { %v11468_v32 = vpop.eup %11467  ;;  %v6556_v25 = vmul.f32 1.442695, %v6432_v11  ;;  %10746 = vmatprep.mubr.f32.mxu0 %v11466_v58 }
 0x74d   : > { %v16302_v62 = vpop.permute.xlu1 %7130  ;;  %6768 = vadd.xlane.f32.xlu0 %v16250_v27  ;;  %10747 = vmatmul.mubr.f32.gmra.mxu0 %v11468_v32  ;;  %v6530_v27 = vmul.f32 1.442695, %v6419_v42  ;;  %v6562_v11 = vmul.f32 1.442695, %v6435_v5 }
 0x74e   : > { %11477 = vpow2.f32 %v6556_v25  ;;  %6790 = vadd.xlane.f32.xlu1 %v16169_v17 }
 0x74f   : > { %v11470_v43 = vpop.eup %11469  ;;  %11479 = vpow2.f32 %v6558_v30 }
 0x750   : > { %v11472_v23 = vpop.eup %11471  ;;  %10802 = vmatprep.mubr.f32.mxu1 %v11470_v43 }
 0x751   : > { %v6285_v50 = vpop.permute.xlu1 %6284  ;;  %6800 = vadd.xlane.f32.xlu0 %v16262_v35  ;;  %10803 = vmatmul.mubr.f32.gmra.mxu1 %v11472_v23 }
 0x752   : > { %v6418_v57 = vsub.f32 %v17682_v13, %v6285_v50  ;;  %6762 = vadd.xlane.f32.xlu1 %v16191_v7  ;;  %v17693_v13 = vld [vmem:[#allocation218_spill] sm:$0xff] }
 0x754   : > { %v6528_v49 = vmul.f32 1.442695, %v6418_v57 }
 0x755   : > { %v6365_v17 = vpop.permute.xlu1 %6364  ;;  %6772 = vadd.xlane.f32.xlu0 %v11458_v52 }
 0x756   : > { %11481 = vpow2.f32 %v6528_v49  ;;  %v6434_v24 = vsub.f32 %v17684_v55, %v6365_v17  ;;  %6794 = vadd.xlane.f32.xlu1 %v16200_v3  ;;  %v17698_v49 = vld [vmem:[#allocation220_spill] sm:$0xff] }
 0x757   : > { %v11474_v63 = vpop.eup %11473  ;;  %11483 = vpow2.f32 %v6530_v27  ;;  %v17695_v27 = vld [vmem:[#allocation221_spill] sm:$0xff]  ;;  %v17699_v17 = vsub.f32 %v17698_v49, %v15540_v51 }
 0x758   : > { %v11476_v35 = vpop.eup %11475  ;;  %v6560_v30 = vmul.f32 1.442695, %v6434_v24  ;;  %10749 = vmatprep.mubr.f32.mxu0 %v11474_v63  ;;  %v17696_v45 = vsub.f32 %v17695_v27, %v15543_v60  ;;  %v11657_v24 = vld [vmem:[#allocation2 + $0x1b0] sm:$0xff]  ;;  %v17705_v27 = vld [vmem:[#allocation207_spill] sm:$0xff] }
 0x759   : > { %6804 = vadd.xlane.f32.xlu0 %v11462_v46  ;;  %10750 = vmatmul.mubr.f32.gmra.mxu0 %v11476_v35  ;;  %v6030_v55 = vmul.f32 1.442695, %v17699_v17  ;;  %v17701_v51 = vld [vmem:[#allocation225_spill] sm:$0xff] }
 0x75a   : > { %11485 = vpow2.f32 %v6560_v30  ;;  %6766 = vadd.xlane.f32.xlu1 %v16223_v34 }
 0x75b   : > { %v11478_v7 = vpop.eup %11477  ;;  %11487 = vpow2.f32 %v6562_v11 }
 0x75c   : > { %v11480_v25 = vpop.eup %11479  ;;  %10805 = vmatprep.mubr.f32.mxu1 %v11478_v7 }
 0x75d   : > { %6776 = vadd.xlane.f32.xlu0 %v11466_v58  ;;  %10806 = vmatmul.mubr.f32.gmra.mxu1 %v11480_v25  ;;  %v17687_v58 = vld [vmem:[#allocation212_spill] sm:$0xff] }
 0x75e   : > { %6798 = vadd.xlane.f32.xlu1 %v16232_v28  ;;  %v16319_v28 = vpop.permute.xlu0 %7145 }
 0x75f   : > { %17685 = vst [vmem:[#allocation181_spill] sm:$0xff] %v16319_v28  ;;  %v17711_v28 = vld [vmem:[#allocation214_spill] sm:$0xff] }
 0x761   : > { %6808 = vadd.xlane.f32.xlu0 %v11470_v43 }
 0x762   : > { %6770 = vadd.xlane.f32.xlu1 %v16253_v53  ;;  %v17686_v53 = vld [vmem:[#allocation211_spill] sm:$0xff]  ;;  %v16327_v50 = vpop.permute.xlu0 %7155 }
 0x763   : > { %v11482_v3 = vpop.eup %11481  ;;  %v17688_v43 = vsub.f32 %v17686_v53, %v17687_v58  ;;  %17691 = vst [vmem:[#allocation182_spill] sm:$0xff] %v16327_v50  ;;  %v17710_v50 = vld [vmem:[#allocation206_spill] sm:$0xff] }
 0x764   : > { %v11484_v52 = vpop.eup %11483  ;;  %10752 = vmatprep.mubr.f32.mxu0 %v11482_v3 }
 0x765   : > { %6780 = vadd.xlane.f32.xlu0 %v11474_v63  ;;  %10753 = vmatmul.mubr.f32.gmra.mxu0 %v11484_v52  ;;  %v6022_v15 = vmul.f32 1.442695, %v17688_v43  ;;  %v5914_v63 = vsub.f32 %v11657_v24, %v15848_v38  ;;  %v17702_v38 = vsub.f32 %v17701_v51, %v15572_v8  ;;  %v6581_v43 = vld [vmem:[#allocation3 + $0x88] sm:$0xff]  ;;  %v17704_v8 = vld [vmem:[#allocation205_spill] sm:$0xff] }
 0x766   : > { %6802 = vadd.xlane.f32.xlu1 %v16264_v31  ;;  %v17689_v31 = vld [vmem:[#allocation216_spill] sm:$0xff] }
 0x767   : > { %v11486_v46 = vpop.eup %11485  ;;  %11489 = vpow2.f32 %v6022_v15  ;;  %v17690_v42 = vsub.f32 %v17689_v31, %v15491_v54  ;;  %v16337_v54 = vpop.permute.xlu1 %7140  ;;  %v6032_v60 = vmul.f32 1.442695, %v5914_v63  ;;  %v6583_v63 = vld [vmem:[#allocation3 + $0x98] sm:$0xff] }
 0x768   : > { %v11488_v34 = vpop.eup %11487  ;;  %10808 = vmatprep.mubr.f32.mxu1 %v11486_v46  ;;  %17697 = vst [vmem:[#allocation183_spill] sm:$0xff] %v16337_v54 }
 0x769   : > { %6812 = vadd.xlane.f32.xlu0 %v11478_v7  ;;  %10809 = vmatmul.mubr.f32.gmra.mxu1 %v11488_v34  ;;  %v6024_v10 = vmul.f32 1.442695, %v17690_v42 }
 0x76a   : > { %6774 = vadd.xlane.f32.xlu1 %v16282_v9  ;;  %v17692_v9 = vld [vmem:[#allocation215_spill] sm:$0xff] }
 0x76b   : > { %11491 = vpow2.f32 %v6024_v10  ;;  %v16348_v30 = vpop.permute.xlu1 %7150  ;;  %v6645_v10 = vmul.f32 %v17704_v8, %v6581_v43  ;;  %v17707_v8 = vld [vmem:[#allocation208_spill] sm:$0xff] }
 0x76c   : > { %17700 = vst [vmem:[#allocation184_spill] sm:$0xff] %v16348_v30  ;;  %v6582_v30 = vld [vmem:[#allocation3 + $0x90] sm:$0xff] }
 0x76d   : > { %6784 = vadd.xlane.f32.xlu0 %v11482_v3  ;;  %v6034_v3 = vmul.f32 1.442695, %v17702_v38  ;;  %v17706_v38 = vld [vmem:[#allocation210_spill] sm:$0xff] }
 0x76e   : > { %6806 = vadd.xlane.f32.xlu1 %v16290_v40  ;;  %v17694_v40 = vsub.f32 %v17692_v9, %v17693_v13 }
 0x76f   : > { %v16363_v58 = vpop.permute.xlu1 %7160 }
 0x770   : > { %v6026_v57 = vmul.f32 1.442695, %v17694_v40  ;;  %17703 = vst [vmem:[#allocation185_spill] sm:$0xff] %v16363_v58 }
 0x771   : > { %6816 = vadd.xlane.f32.xlu0 %v11486_v46 }
 0x772   : > { %6778 = vadd.xlane.f32.xlu1 %v11468_v32  ;;  %11493 = vpow2.f32 %v6026_v57 }
 0x774   : > { %v16343_v11 = vpop.eup %11489 }
 0x776   : > { %6810 = vadd.xlane.f32.xlu1 %v11472_v23  ;;  %v6028_v23 = vmul.f32 1.442695, %v17696_v45 }
 0x778   : > { %11495 = vpow2.f32 %v6028_v23  ;;  %v16350_v7 = vpop.eup %11491 }
 0x779   : > { %11497 = vpow2.f32 %v6030_v55 }
 0x77a   : > { %6782 = vadd.xlane.f32.xlu1 %v11476_v35  ;;  %11499 = vpow2.f32 %v6032_v60 }
 0x77b   : > { %11501 = vpow2.f32 %v6034_v3  ;;  %v6647_v3 = vmul.f32 %v17706_v38, %v6583_v63 }
 0x77e   : > { %6814 = vadd.xlane.f32.xlu1 %v11480_v25  ;;  %v6695_v32 = vpop.xlane.xlu0 %6694 }
 0x782   : > { %6786 = vadd.xlane.f32.xlu1 %v11484_v52  ;;  %v16335_v5 = vpop.xlane.xlu0 %6724  ;;  %v11658_v52 = vld [vmem:[#allocation2 + $0x1c0] sm:$0xff] }
 0x783   : > { %v5916_v46 = vsub.f32 %v11658_v52, %v15924_v18  ;;  %v6565_v18 = vld [vmem:[#allocation3 + $0x8] sm:$0xff]  ;;  %v6567_v52 = vld [vmem:[#allocation3 + $0x18] sm:$0xff] }
 0x784   : > { %v6629_v45 = vmul.f32 %v17705_v27, %v6565_v18  ;;  %v17708_v18 = vld [vmem:[#allocation209_spill] sm:$0xff] }
 0x785   : > { %v6036_v15 = vmul.f32 1.442695, %v5916_v46 }
 0x786   : > { %6818 = vadd.xlane.f32.xlu1 %v11488_v34  ;;  %v16345_v35 = vpop.xlane.xlu0 %6696  ;;  %v16359_v34 = vpop.eup %11493  ;;  %v6821_v49 = vadd.f32 %v6695_v32, %v6629_v45  ;;  %v6580_v32 = vld [vmem:[#allocation3 + $0x80] sm:$0xff]  ;;  %v6585_v45 = vld [vmem:[#allocation3 + $0xa8] sm:$0xff] }
 0x787   : > { %7195 = vperm.xlu0 %11272, %v16343_v11   ;;  %v16366_v31 = vpop.eup %11495  ;;  %11503 = vpow2.f32 %v6036_v15 }
 0x788   : > { %v16372_v40 = vpop.eup %11497 }
 0x789   : > { %v16378_v17 = vpop.eup %11499 }
 0x78a   : > { %v16352_v25 = vpop.xlane.xlu0 %6728  ;;  %v16383_v60 = vpop.eup %11501 }
 0x78b   : > { %7200 = vperm.xlu0 %11272, %v16350_v7  }
 0x78e   : > { %v16361_v53 = vpop.xlane.xlu0 %6700 }
 0x78f   : > { %7205 = vperm.xlu0 %11272, %v16359_v34  }
 0x792   : > { %v16368_v42 = vpop.xlane.xlu0 %6732 }
 0x793   : > { %v6727_v9 = vpop.xlane.xlu1 %6726  ;;  %7210 = vperm.xlu0 %11272, %v16366_v31  }
 0x794   : > { %v6837_v13 = vadd.f32 %v6727_v9, %v6645_v10  ;;  %v16389_v15 = vpop.eup %11503  ;;  %v6631_v10 = vmul.f32 %v17707_v8, %v6567_v52 }
 0x796   : > { %v16374_v57 = vpop.xlane.xlu0 %6704 }
 0x797   : > { %v6693_v23 = vpop.xlane.xlu1 %6692  ;;  %7215 = vperm.xlu0 %11272, %v16372_v40   ;;  %8127 = vperm.xlu1 %11271, %v6837_v13   ;;  %v6644_v13 = vmul.f32 %v17708_v18, %v6580_v32 }
 0x799   : > { %v6836_v38 = vadd.f32 %v16335_v5, %v6644_v13  ;;  %v6587_v13 = vld [vmem:[#allocation3 + $0xb8] sm:$0xff] }
 0x79a   : > { %v16380_v55 = vpop.xlane.xlu0 %6736 }
 0x79b   : > { %v6699_v24 = vpop.xlane.xlu1 %6698  ;;  %7220 = vperm.xlu0 %11272, %v16378_v17   ;;  %8047 = vperm.xlu1 %11271, %v6821_v49   ;;  %v6564_v49 = vld [vmem:[#allocation3] sm:$0xff] }
 0x79c   : > { %v6823_v63 = vadd.f32 %v6699_v24, %v6631_v10  ;;  %v6628_v52 = vmul.f32 %v17710_v50, %v6564_v49  ;;  %v17712_v24 = vld [vmem:[#allocation217_spill] sm:$0xff] }
 0x79d   : > { %v6646_v5 = vmul.f32 %v17712_v24, %v6582_v30 }
 0x79e   : > { %v16385_v51 = vpop.xlane.xlu0 %6708  ;;  %v6820_v18 = vadd.f32 %v6693_v23, %v6628_v52  ;;  %v17714_v23 = vld [vmem:[#allocation213_spill] sm:$0xff] }
 0x79f   : > { %v6731_v46 = vpop.xlane.xlu1 %6730  ;;  %7225 = vperm.xlu0 %11272, %v16383_v60   ;;  %v6838_v50 = vadd.f32 %v16352_v25, %v6646_v5  ;;  %v9625_v25 = vld [vmem:[%s17716_s26 + $0x8] sm:$0xff] }
 0x7a0   : > { %v6839_v43 = vadd.f32 %v6731_v46, %v6647_v3  ;;  %v17709_v3 = vld [vmem:[#allocation219_spill] sm:$0xff]  ;;  %10811 = vmatprep.subr.mxu0 %v9625_v25 }
 0x7a1   : > { %v6649_v46 = vmul.f32 %v17709_v3, %v6585_v45  ;;  %10812 = vmatpush3.msra.mxu0 %v9625_v25  ;;  %v17721_v25 = vld [vmem:[#allocation236_spill] sm:$0xff] }
 0x7a2   : > { %8137 = vperm.xlu1 %11271, %v6839_v43   ;;  %v16392_v9 = vpop.xlane.xlu0 %6740  ;;  %v6569_v43 = vld [vmem:[#allocation3 + $0x28] sm:$0xff] }
 0x7a3   : > { %v6703_v27 = vpop.xlane.xlu1 %6702  ;;  %7230 = vperm.xlu0 %11272, %v16389_v15   ;;  %v6633_v54 = vmul.f32 %v17711_v28, %v6569_v43  ;;  %v6571_v28 = vld [vmem:[#allocation3 + $0x38] sm:$0xff]  ;;  %v6584_v43 = vld [vmem:[#allocation3 + $0xa0] sm:$0xff] }
 0x7a5   : > { %v6825_v45 = vadd.f32 %v6703_v27, %v6633_v54  ;;  %v17717_v27 = vld [vmem:[#allocation226_spill] sm:$0xff] }
 0x7a6   : > { %8057 = vperm.xlu1 %11271, %v6823_v63   ;;  %v16397_v58 = vpop.xlane.xlu0 %6712  ;;  %v6566_v63 = vld [vmem:[#allocation3 + $0x10] sm:$0xff]  ;;  %v6648_v24 = vmul.f32 %v17717_v27, %v6584_v43 }
 0x7a7   : > { %v6735_v8 = vpop.xlane.xlu1 %6734  ;;  %8122 = vperm.xlu0 %11272, %v6836_v38   ;;  %v17713_v38 = vld [vmem:[#allocation227_spill] sm:$0xff] }
 0x7a8   : > { %v6841_v32 = vadd.f32 %v6735_v8, %v6649_v46  ;;  %v6651_v3 = vmul.f32 %v17713_v38, %v6587_v13  ;;  %v6630_v46 = vmul.f32 %v17714_v23, %v6566_v63  ;;  %v6589_v13 = vld [vmem:[#allocation3 + $0xc8] sm:$0xff]  ;;  %v6568_v63 = vld [vmem:[#allocation3 + $0x20] sm:$0xff]  ;;  %v17718_v38 = vld [vmem:[#allocation237_spill] sm:$0xff] }
 0x7a9   : > { %v8488_v23 = vld [vmem:[%s17716_s26] sm:$0xff] }
 0x7aa   : > { %8147 = vperm.xlu1 %11271, %v6841_v32   ;;  %v16402_v21 = vpop.xlane.xlu0 %6744  ;;  %v6822_v30 = vadd.f32 %v16345_v35, %v6630_v46  ;;  %v17715_v32 = vld [vmem:[#allocation224_spill] sm:$0xff]  ;;  %v6840_v35 = vadd.f32 %v16368_v42, %v6648_v24  ;;  %v17719_v46 = vld [vmem:[#allocation223_spill] sm:$0xff]  ;;  %10837 = vmatprep.subr.mxu1 %v8488_v23 }
 0x7ab   : > { %v6707_v10 = vpop.xlane.xlu1 %6706  ;;  %8042 = vperm.xlu0 %11272, %v6820_v18   ;;  %v6635_v18 = vmul.f32 %v17715_v32, %v6571_v28  ;;  %v6632_v28 = vmul.f32 %v17719_v46, %v6568_v63  ;;  %10838 = vmatpush3.msra.mxu1 %v8488_v23  ;;  %v6570_v63 = vld [vmem:[#allocation3 + $0x30] sm:$0xff]  ;;  %v6575_v46 = vld [vmem:[#allocation3 + $0x58] sm:$0xff] }
 0x7ad   : > { %v6824_v42 = vadd.f32 %v16361_v53, %v6632_v28  ;;  %v17722_v53 = vld [vmem:[#allocation234_spill] sm:$0xff] }
 0x7ae   : > { %8067 = vperm.xlu1 %11271, %v6825_v45   ;;  %v16406_v49 = vpop.xlane.xlu0 %6716  ;;  %v6827_v45 = vadd.f32 %v6707_v10, %v6635_v18  ;;  %v6634_v23 = vmul.f32 %v17722_v53, %v6570_v63 }
 0x7af   : > { %v6739_v52 = vpop.xlane.xlu1 %6738  ;;  %8132 = vperm.xlu0 %11272, %v6838_v50  }
 0x7b0   : > { %v6843_v8 = vadd.f32 %v6739_v52, %v6651_v3  ;;  %v6653_v3 = vmul.f32 %v17718_v38, %v6589_v13  ;;  %v6573_v52 = vld [vmem:[#allocation3 + $0x48] sm:$0xff]  ;;  %v6591_v13 = vld [vmem:[#allocation3 + $0xd8] sm:$0xff] }
 0x7b2   : > { %8157 = vperm.xlu1 %11271, %v6843_v8   ;;  %v16412_v54 = vpop.xlane.xlu0 %6748  ;;  %v6586_v8 = vld [vmem:[#allocation3 + $0xb0] sm:$0xff] }
 0x7b3   : > { %v6711_v5 = vpop.xlane.xlu1 %6710  ;;  %8052 = vperm.xlu0 %11272, %v6822_v30   ;;  %v17720_v30 = vld [vmem:[#allocation235_spill] sm:$0xff]  ;;  %v6650_v27 = vmul.f32 %v17721_v25, %v6586_v8  ;;  %v6826_v8 = vadd.f32 %v16374_v57, %v6634_v23  ;;  %v6593_v25 = vld [vmem:[#allocation3 + $0xe8] sm:$0xff]  ;;  %v6590_v23 = vld [vmem:[#allocation3 + $0xd0] sm:$0xff] }
 0x7b4   : > { %v6637_v32 = vmul.f32 %v17720_v30, %v6573_v52  ;;  %v6588_v52 = vld [vmem:[#allocation3 + $0xc0] sm:$0xff]  ;;  %v17725_v57 = vld [vmem:[#allocation240_spill] sm:$0xff] }
 0x7b6   : > { %8077 = vperm.xlu1 %11271, %v6827_v45   ;;  %v16419_v50 = vpop.xlane.xlu0 %6720  ;;  %v6829_v45 = vadd.f32 %v6711_v5, %v6637_v32 }
 0x7b7   : > { %v6743_v43 = vpop.xlane.xlu1 %6742  ;;  %8142 = vperm.xlu0 %11272, %v6840_v35   ;;  %v6842_v35 = vadd.f32 %v16380_v55, %v6650_v27  ;;  %v17724_v55 = vld [vmem:[#allocation242_spill] sm:$0xff] }
 0x7b8   : > { %v6845_v10 = vadd.f32 %v6743_v43, %v6653_v3  ;;  %v6655_v3 = vmul.f32 %v15703_v0, %v6591_v13  ;;  %v6652_v30 = vmul.f32 %v17724_v55, %v6588_v52  ;;  %v6572_v0 = vld [vmem:[#allocation3 + $0x40] sm:$0xff] }
 0x7ba   : > { %8167 = vperm.xlu1 %11271, %v6845_v10   ;;  %v16428_v18 = vpop.xlane.xlu0 %6752  ;;  %v17723_v10 = vld [vmem:[#allocation241_spill] sm:$0xff]  ;;  %v6844_v13 = vadd.f32 %v16392_v9, %v6652_v30  ;;  %v6654_v9 = vmul.f32 %v15744_v2, %v6590_v23 }
 0x7bb   : > { %v6715_v24 = vpop.xlane.xlu1 %6714  ;;  %8062 = vperm.xlu0 %11272, %v6824_v42   ;;  %v6639_v42 = vmul.f32 %v17723_v10, %v6575_v46 }
 0x7bd   : > { %v6831_v27 = vadd.f32 %v6715_v24, %v6639_v42  ;;  %v6846_v42 = vadd.f32 %v16402_v21, %v6654_v9  ;;  %v17726_v21 = vld [vmem:[#allocation151_spill] sm:$0xff]  ;;  %v6594_v9 = vld [vmem:[#allocation3 + $0xf0] sm:$0xff] }
 0x7be   : > { %8087 = vperm.xlu1 %11271, %v6829_v45   ;;  %v16432_v38 = vpop.xlane.xlu0 %6756  ;;  %v6657_v45 = vmul.f32 %v15746_v48, %v6593_v25  ;;  %v6574_v48 = vld [vmem:[#allocation3 + $0x50] sm:$0xff] }
 0x7bf   : > { %v6747_v28 = vpop.xlane.xlu1 %6746  ;;  %8152 = vperm.xlu0 %11272, %v6842_v35   ;;  %v6636_v35 = vmul.f32 %v17725_v57, %v6572_v0  ;;  %v6592_v0 = vld [vmem:[#allocation3 + $0xe0] sm:$0xff]  ;;  %v6597_v57 = vld [vmem:[#allocation3 + $0x108] sm:$0xff] }
 0x7c0   : > { %v6847_v43 = vadd.f32 %v6747_v28, %v6655_v3  ;;  %v6577_v3 = vld [vmem:[#allocation3 + $0x68] sm:$0xff] }
 0x7c1   : > { %v6828_v28 = vadd.f32 %v16385_v51, %v6636_v35  ;;  %v6641_v52 = vmul.f32 %v15739_v61, %v6577_v3  ;;  %v6638_v51 = vmul.f32 %v15734_v36, %v6574_v48  ;;  %v6579_v61 = vld [vmem:[#allocation3 + $0x78] sm:$0xff] }
 0x7c2   : > { %8177 = vperm.xlu1 %11271, %v6847_v43   ;;  %v16438_v5 = vpop.xlane.xlu0 %6788 }
 0x7c3   : > { %v6719_v32 = vpop.xlane.xlu1 %6718  ;;  %8072 = vperm.xlu0 %11272, %v6826_v8   ;;  %v6595_v8 = vld [vmem:[#allocation3 + $0xf8] sm:$0xff]  ;;  %v6830_v2 = vadd.f32 %v16397_v58, %v6638_v51  ;;  %v17728_v58 = vld [vmem:[#allocation243_spill] sm:$0xff] }
 0x7c4   : > { %v6833_v10 = vadd.f32 %v6719_v32, %v6641_v52  ;;  %v6659_v30 = vmul.f32 %v15804_v6, %v6595_v8  ;;  %v6576_v6 = vld [vmem:[#allocation3 + $0x60] sm:$0xff] }
 0x7c6   : > { %8097 = vperm.xlu1 %11271, %v6831_v27   ;;  %v16442_v63 = vpop.xlane.xlu0 %6760 }
 0x7c7   : > { %v6751_v53 = vpop.xlane.xlu1 %6750  ;;  %8162 = vperm.xlu0 %11272, %v6844_v13   ;;  %v6643_v13 = vmul.f32 %v15775_v39, %v6579_v61  ;;  %v6613_v39 = vld [vmem:[#allocation3 + $0x188] sm:$0xff]  ;;  %v6578_v61 = vld [vmem:[#allocation3 + $0x70] sm:$0xff] }
 0x7c8   : > { %v6849_v46 = vadd.f32 %v6751_v53, %v6657_v45  ;;  %v6656_v45 = vmul.f32 %v17726_v21, %v6592_v0  ;;  %v17727_v53 = vld [vmem:[#allocation153_spill] sm:$0xff] }
 0x7c9   : > { %v6661_v23 = vmul.f32 %v17727_v53, %v6597_v57  ;;  %v6596_v57 = vld [vmem:[#allocation3 + $0x100] sm:$0xff] }
 0x7ca   : > { %8187 = vperm.xlu1 %11271, %v6849_v46   ;;  %v16448_v24 = vpop.xlane.xlu0 %6792  ;;  %v6848_v36 = vadd.f32 %v16412_v54, %v6656_v45  ;;  %v17729_v54 = vld [vmem:[#allocation154_spill] sm:$0xff] }
 0x7cb   : > { %v6723_v43 = vpop.xlane.xlu1 %6722  ;;  %8082 = vperm.xlu0 %11272, %v6828_v28   ;;  %v6640_v28 = vmul.f32 %v17728_v58, %v6576_v6 }
 0x7cc   : > { %v6835_v3 = vadd.f32 %v6723_v43, %v6643_v13 }
 0x7cd   : > { %v6832_v48 = vadd.f32 %v16406_v49, %v6640_v28  ;;  %v17731_v49 = vld [vmem:[#allocation222_spill] sm:$0xff]  ;;  %v6612_v28 = vld [vmem:[#allocation3 + $0x180] sm:$0xff] }
 0x7ce   : > { %8107 = vperm.xlu1 %11271, %v6833_v10   ;;  %v16452_v55 = vpop.xlane.xlu0 %6764  ;;  %v6677_v10 = vmul.f32 %v16343_v11, %v6613_v39  ;;  %v6642_v21 = vmul.f32 %v17731_v49, %v6578_v61  ;;  %v6615_v11 = vld [vmem:[#allocation3 + $0x198] sm:$0xff]  ;;  %v17735_v61 = vld [vmem:[#allocation231_spill] sm:$0xff] }
 0x7cf   : > { %v6755_v25 = vpop.xlane.xlu1 %6754  ;;  %8172 = vperm.xlu0 %11272, %v6846_v42   ;;  %v6658_v42 = vmul.f32 %v17729_v54, %v6594_v9  ;;  %v6598_v54 = vld [vmem:[#allocation3 + $0x110] sm:$0xff] }
 0x7d0   : > { %v6851_v27 = vadd.f32 %v6755_v25, %v6659_v30  ;;  %v6599_v30 = vld [vmem:[#allocation3 + $0x118] sm:$0xff]  ;;  %v6834_v6 = vadd.f32 %v16419_v50, %v6642_v21  ;;  %v17733_v50 = vld [vmem:[#allocation232_spill] sm:$0xff]  ;;  %v6662_v49 = vmul.f32 %v16001_v29, %v6598_v54 }
 0x7d1   : > { %v6850_v0 = vadd.f32 %v16428_v18, %v6658_v42  ;;  %v17732_v18 = vld [vmem:[#allocation228_spill] sm:$0xff]  ;;  %v6603_v21 = vld [vmem:[#allocation3 + $0x138] sm:$0xff] }
 0x7d2   : > { %8197 = vperm.xlu1 %11271, %v6851_v27   ;;  %v16458_v32 = vpop.xlane.xlu0 %6796  ;;  %v17730_v27 = vld [vmem:[#allocation160_spill] sm:$0xff]  ;;  %v6660_v53 = vmul.f32 %v17732_v18, %v6596_v57  ;;  %v17739_v54 = vld [vmem:[#allocation238_spill] sm:$0xff] }
 0x7d3   : > { %v6759_v35 = vpop.xlane.xlu1 %6758  ;;  %8092 = vperm.xlu0 %11272, %v6830_v2   ;;  %v6663_v2 = vmul.f32 %v17730_v27, %v6599_v30  ;;  %v11659_v27 = vld [vmem:[#allocation2 + $0x1d0] sm:$0xff] }
 0x7d4   : > { %v6853_v8 = vadd.f32 %v6759_v35, %v6661_v23  ;;  %v6601_v23 = vld [vmem:[#allocation3 + $0x128] sm:$0xff] }
 0x7d5   : > { %v6665_v9 = vmul.f32 %v16012_v47, %v6601_v23 }
 0x7d6   : > { %8117 = vperm.xlu1 %11271, %v6835_v3   ;;  %v16463_v46 = vpop.xlane.xlu0 %6768  ;;  %v6679_v3 = vmul.f32 %v16359_v34, %v6615_v11  ;;  %v6617_v34 = vld [vmem:[#allocation3 + $0x1a8] sm:$0xff] }
 0x7d7   : > { %v6791_v52 = vpop.xlane.xlu1 %6790  ;;  %8182 = vperm.xlu0 %11272, %v6848_v36  }
 0x7d8   : > { %v6869_v25 = vadd.f32 %v6791_v52, %v6677_v10  ;;  %v6852_v52 = vadd.f32 %v16432_v38, %v6660_v53  ;;  %v6681_v38 = vmul.f32 %v16372_v40, %v6617_v34  ;;  %v6667_v40 = vmul.f32 %v16065_v59, %v6603_v21 }
 0x7da   : > { %8207 = vperm.xlu1 %11271, %v6853_v8   ;;  %v16468_v43 = vpop.xlane.xlu0 %6800 }
 0x7db   : > { %v6763_v51 = vpop.xlane.xlu1 %6762  ;;  %8102 = vperm.xlu0 %11272, %v6832_v48   ;;  %v6676_v48 = vmul.f32 %v17733_v50, %v6612_v28  ;;  %v11662_v50 = vld [vmem:[#allocation2 + $0x1d8] sm:$0xff] }
 0x7dc   : > { %v6855_v35 = vadd.f32 %v6763_v51, %v6663_v2  ;;  %v17734_v51 = vld [vmem:[#allocation229_spill] sm:$0xff]  ;;  %v5918_v2 = vsub.f32 %v11659_v27, %v15991_v41  ;;  %v11661_v41 = vld [vmem:[#allocation2 + $0x1e0] sm:$0xff]  ;;  %v16519_v27 = vld [vmem:[%s17716_s26 + $0x18] sm:$0xff] }
 0x7dd   : > { %v6868_v30 = vadd.f32 %v16438_v5, %v6676_v48  ;;  %v6854_v5 = vadd.f32 %v16442_v63, %v6662_v49  ;;  %v5920_v29 = vsub.f32 %v11661_v41, %v16045_v16  ;;  %v17738_v48 = vld [vmem:[#allocation156_spill] sm:$0xff]  ;;  %v16510_v16 = vld [vmem:[%s17716_s26 + $0x10] sm:$0xff]  ;;  %10889 = vmatprep.subr.mxu1 %v16519_v27  ;;  %v17743_v41 = vld [vmem:[#allocation167_spill] sm:$0xff] }
 0x7de   : > { %8287 = vperm.xlu1 %11271, %v6869_v25   ;;  %v16473_v13 = vpop.xlane.xlu0 %6772  ;;  %v17736_v25 = vsub.f32 %v17734_v51, %v17735_v61  ;;  %v6040_v53 = vmul.f32 1.442695, %v5918_v2  ;;  %v5919_v59 = vsub.f32 %v11662_v50, %v17738_v48  ;;  %10863 = vmatprep.subr.mxu0 %v16510_v16  ;;  %v6616_v51 = vld [vmem:[#allocation3 + $0x1a0] sm:$0xff]  ;;  %v11663_v2 = vld [vmem:[#allocation2 + $0x1f0] sm:$0xff]  ;;  %v17741_v49 = vld [vmem:[#allocation248_spill] sm:$0xff] }
 0x7df   : > { %v6795_v45 = vpop.xlane.xlu1 %6794  ;;  %8192 = vperm.xlu0 %11272, %v6850_v0   ;;  %v5922_v21 = vsub.f32 %v11663_v2, %v17741_v49 }
 0x7e0   : > { %v6871_v39 = vadd.f32 %v6795_v45, %v6679_v3  ;;  %v6038_v0 = vmul.f32 1.442695, %v17736_v25  ;;  %v6614_v45 = vld [vmem:[#allocation3 + $0x190] sm:$0xff]  ;;  %v6042_v25 = vmul.f32 1.442695, %v5919_v59  ;;  %v11666_v59 = vld [vmem:[#allocation2 + $0x1e8] sm:$0xff] }
 0x7e1   : > { %v6678_v23 = vmul.f32 %v16350_v7, %v6614_v45  ;;  %v6044_v7 = vmul.f32 1.442695, %v5920_v29  ;;  %v6605_v45 = vld [vmem:[#allocation3 + $0x148] sm:$0xff] }
 0x7e2   : > { %8217 = vperm.xlu1 %11271, %v6855_v35   ;;  %v16478_v36 = vpop.xlane.xlu0 %6804  ;;  %11505 = vpow2.f32 %v6038_v0  ;;  %v11660_v35 = vld [vmem:[#allocation2 + $0x158] sm:$0xff]  ;;  %v17740_v0 = vld [vmem:[#allocation169_spill] sm:$0xff]  ;;  %v6669_v29 = vmul.f32 %v17743_v41, %v6605_v45 }
 0x7e3   : > { %v6767_v58 = vpop.xlane.xlu1 %6766  ;;  %8112 = vperm.xlu0 %11272, %v6834_v6   ;;  %v17737_v6 = vld [vmem:[#allocation155_spill] sm:$0xff]  ;;  %11507 = vpow2.f32 %v6040_v53  ;;  %v11668_v41 = vld [vmem:[#allocation2 + $0x170] sm:$0xff] }
 0x7e4   : > { %v6857_v42 = vadd.f32 %v6767_v58, %v6665_v9  ;;  %v5903_v3 = vsub.f32 %v11660_v35, %v17737_v6  ;;  %v6619_v58 = vld [vmem:[#allocation3 + $0x1b8] sm:$0xff] }
 0x7e5   : > { %v6683_v34 = vmul.f32 %v16383_v60, %v6619_v58  ;;  %v17744_v58 = vld [vmem:[#allocation165_spill] sm:$0xff] }
 0x7e6   : > { %8297 = vperm.xlu1 %11271, %v6871_v39   ;;  %v16483_v8 = vpop.xlane.xlu0 %6776  ;;  %v6600_v39 = vld [vmem:[#allocation3 + $0x120] sm:$0xff]  ;;  %v6010_v9 = vmul.f32 1.442695, %v5903_v3  ;;  %v11664_v3 = vld [vmem:[#allocation2 + $0x168] sm:$0xff] }
 0x7e7   : > { %v6799_v10 = vpop.xlane.xlu1 %6798  ;;  %8202 = vperm.xlu0 %11272, %v6852_v52   ;;  %v6870_v52 = vadd.f32 %v16448_v24, %v6678_v23  ;;  %v11665_v23 = vld [vmem:[#allocation2 + $0x1f8] sm:$0xff] }
 0x7e8   : > { %v6873_v57 = vadd.f32 %v6799_v10, %v6681_v38  ;;  %11509 = vpow2.f32 %v6010_v9  ;;  %v6620_v9 = vld [vmem:[#allocation3 + $0x1c0] sm:$0xff] }
 0x7e9   : > { %11511 = vpow2.f32 %v6044_v7 }
 0x7ea   : > { %8227 = vperm.xlu1 %11271, %v6857_v42   ;;  %v16491_v47 = vpop.xlane.xlu0 %6808  ;;  %v6664_v42 = vmul.f32 %v17739_v54, %v6600_v39  ;;  %11513 = vpow2.f32 %v6042_v25  ;;  %v6048_v39 = vmul.f32 1.442695, %v5922_v21  ;;  %v17747_v21 = vld [vmem:[#allocation170_spill] sm:$0xff] }
 0x7eb   : > { %v6771_v11 = vpop.xlane.xlu1 %6770  ;;  %8282 = vperm.xlu0 %11272, %v6868_v30   ;;  %v6602_v30 = vld [vmem:[#allocation3 + $0x130] sm:$0xff] }
 0x7ec   : > { %v6859_v63 = vadd.f32 %v6771_v11, %v6667_v40  ;;  %v6856_v60 = vadd.f32 %v16452_v55, %v6664_v42  ;;  %v6666_v38 = vmul.f32 %v17740_v0, %v6602_v30  ;;  %v6680_v11 = vmul.f32 %v16366_v31, %v6616_v51  ;;  %v17742_v40 = vld [vmem:[#allocation161_spill] sm:$0xff]  ;;  %v6604_v51 = vld [vmem:[#allocation3 + $0x140] sm:$0xff] }
 0x7ed   : > { %v5905_v53 = vsub.f32 %v11664_v3, %v17742_v40  ;;  %11515 = vpow2.f32 %v6048_v39  ;;  %v11667_v0 = vld [vmem:[#allocation2 + $0x160] sm:$0xff] }
 0x7ee   : > { %8307 = vperm.xlu1 %11271, %v6873_v57   ;;  %v16498_v18 = vpop.xlane.xlu0 %6780  ;;  %v6858_v55 = vadd.f32 %v16463_v46, %v6666_v38  ;;  %v6872_v6 = vadd.f32 %v16458_v32, %v6680_v11  ;;  %v17746_v38 = vld [vmem:[#allocation164_spill] sm:$0xff]  ;;  %v6668_v11 = vmul.f32 %v17747_v21, %v6604_v51  ;;  %v6624_v3 = vld [vmem:[#allocation3 + $0x1e0] sm:$0xff] }
 0x7ef   : > { %v6803_v28 = vpop.xlane.xlu1 %6802  ;;  %8212 = vperm.xlu0 %11272, %v6854_v5   ;;  %v6618_v5 = vld [vmem:[#allocation3 + $0x1b0] sm:$0xff]  ;;  %v16530_v31 = vpop.eup %11505  ;;  %v6014_v48 = vmul.f32 1.442695, %v5905_v53  ;;  %v5904_v2 = vsub.f32 %v11667_v0, %v17746_v38 }
 0x7f0   : > { %v6875_v61 = vadd.f32 %v6803_v28, %v6683_v34  ;;  %v5923_v28 = vsub.f32 %v11665_v23, %v17744_v58  ;;  %v6682_v46 = vmul.f32 %v16378_v17, %v6618_v5  ;;  %v17745_v34 = vld [vmem:[#allocation233_spill] sm:$0xff]  ;;  %v6684_v17 = vmul.f32 %v16389_v15, %v6620_v9  ;;  %v6607_v5 = vld [vmem:[#allocation3 + $0x158] sm:$0xff] }
 0x7f1   : > { %v5921_v7 = vsub.f32 %v11666_v59, %v17745_v34  ;;  %11517 = vpow2.f32 %v6014_v48  ;;  %v6012_v53 = vmul.f32 1.442695, %v5904_v2  ;;  %v6609_v2 = vld [vmem:[#allocation3 + $0x168] sm:$0xff] }
 0x7f2   : > { %8237 = vperm.xlu1 %11271, %v6859_v63   ;;  %v16505_v10 = vpop.xlane.xlu0 %6812  ;;  %v6621_v63 = vld [vmem:[#allocation3 + $0x1c8] sm:$0xff]  ;;  %v6874_v50 = vadd.f32 %v16468_v43, %v6682_v46  ;;  %v6050_v30 = vmul.f32 1.442695, %v5923_v28  ;;  %v6876_v25 = vadd.f32 %v16478_v36, %v6684_v17  ;;  %v6860_v36 = vadd.f32 %v16473_v13, %v6668_v11  ;;  %v6626_v17 = vld [vmem:[#allocation3 + $0x1f0] sm:$0xff] }
 0x7f3   : > { %v6775_v24 = vpop.xlane.xlu1 %6774  ;;  %8292 = vperm.xlu0 %11272, %v6870_v52   ;;  %v6685_v54 = vmul.f32 %v16530_v31, %v6621_v63  ;;  %v6046_v49 = vmul.f32 1.442695, %v5921_v7  ;;  %v6623_v63 = vld [vmem:[#allocation3 + $0x1d8] sm:$0xff] }
 0x7f4   : > { %v6861_v32 = vadd.f32 %v6775_v24, %v6669_v29  ;;  %v6622_v24 = vld [vmem:[#allocation3 + $0x1d0] sm:$0xff]  ;;  %11519 = vpow2.f32 %v6050_v30  ;;  %v17748_v29 = vld [vmem:[#allocation166_spill] sm:$0xff] }
 0x7f5   : > { %11521 = vpow2.f32 %v6046_v49  ;;  %v5906_v23 = vsub.f32 %v11668_v41, %v17748_v29 }
 0x7f6   : > { %8317 = vperm.xlu1 %11271, %v6875_v61   ;;  %v16525_v35 = vpop.xlane.xlu0 %6784  ;;  %11523 = vpow2.f32 %v6012_v53 }
 0x7f7   : > { %v6807_v57 = vpop.xlane.xlu1 %6806  ;;  %8222 = vperm.xlu0 %11272, %v6856_v60   ;;  %v16540_v60 = vpop.eup %11507  ;;  %v6016_v59 = vmul.f32 1.442695, %v5906_v23 }
 0x7f8   : > { %v6877_v43 = vadd.f32 %v6807_v57, %v6685_v54  ;;  %v6686_v15 = vmul.f32 %v16540_v60, %v6622_v24  ;;  %v6606_v54 = vld [vmem:[#allocation3 + $0x150] sm:$0xff] }
 0x7f9   : > { %11525 = vpow2.f32 %v6016_v59 }
 0x7fa   : > { %8232 = vperm.xlu1 %11271, %v6858_v55   ;;  %v16537_v42 = vpop.xlane.xlu0 %6816  ;;  %v16547_v55 = vpop.eup %11509  ;;  %v6878_v40 = vadd.f32 %v16491_v47, %v6686_v15  ;;  %v11669_v47 = vld [vmem:[#allocation2 + $0x178] sm:$0xff] }
 0x7fb   : > { %v6779_v52 = vpop.xlane.xlu1 %6778  ;;  %8302 = vperm.xlu0 %11272, %v6872_v6   ;;  %v16550_v57 = vpop.eup %11511  ;;  %v6671_v58 = vmul.f32 %v16547_v55, %v6607_v5  ;;  %v6627_v15 = vld [vmem:[#allocation3 + $0x1f8] sm:$0xff] }
 0x7fc   : > { %v11514_v39 = vpop.eup %11513  ;;  %v6688_v46 = vmul.f32 %v16550_v57, %v6624_v3 }
 0x7fd   : > { %v6863_v13 = vadd.f32 %v6779_v52, %v6671_v58  ;;  %v6687_v34 = vmul.f32 %v11514_v39, %v6623_v63  ;;  %v16563_v51 = vpop.eup %11515  ;;  %v17750_v52 = vld [vmem:[#allocation171_spill] sm:$0xff] }
 0x7fe   : > { %8247 = vperm.xlu1 %11271, %v6861_v32   ;;  %v6880_v32 = vadd.f32 %v16505_v10, %v6688_v46  ;;  %v6670_v10 = vmul.f32 %v17750_v52, %v6606_v54  ;;  %v11518_v0 = vpop.eup %11517  ;;  %v6690_v38 = vmul.f32 %v16563_v51, %v6626_v17  ;;  %v6608_v46 = vld [vmem:[#allocation3 + $0x160] sm:$0xff] }
 0x7ff   : > { %v6811_v61 = vpop.xlane.xlu1 %6810  ;;  %8312 = vperm.xlu0 %11272, %v6874_v50   ;;  %v17749_v50 = vld [vmem:[#allocation245_spill] sm:$0xff]  ;;  %v6673_v5 = vmul.f32 %v11518_v0, %v6609_v2 }
 0x800   : > { %v5907_v48 = vsub.f32 %v11669_v47, %v17749_v50  ;;  %v6879_v24 = vadd.f32 %v6811_v61, %v6687_v34  ;;  %v6862_v11 = vadd.f32 %v16483_v8, %v6670_v10  ;;  %v6882_v61 = vadd.f32 %v16537_v42, %v6690_v38  ;;  %v6610_v50 = vld [vmem:[#allocation3 + $0x170] sm:$0xff]  ;;  %v10677_v38 = vpop.f32.mrf.mxu1 }
 0x801   : > { %v11520_v21 = vpop.eup %11519 }
 0x802   : > { %8327 = vperm.xlu1 %11271, %v6877_v43   ;;  %v16545_v45 = vpop.permute.xlu0 %7195  ;;  %v6018_v43 = vmul.f32 1.442695, %v5907_v48  ;;  %v11522_v3 = vpop.eup %11521  ;;  %v6691_v53 = vmul.f32 %v11520_v21, %v6627_v15 }
 0x803   : > { %v6783_v6 = vpop.xlane.xlu1 %6782  ;;  %8322 = vperm.xlu0 %11272, %v6876_v25   ;;  %v16576_v8 = vpop.eup %11523 }
 0x804   : > { %11527 = vpow2.f32 %v6018_v43  ;;  %v6865_v29 = vadd.f32 %v6783_v6, %v6673_v5  ;;  %v7607_v15 = vpop.f32.mrf.mxu1 }
 0x806   : > { %8242 = vperm.xlu1 %11271, %v6860_v36   ;;  %v16556_v28 = vpop.permute.xlu0 %7200  ;;  %v16581_v47 = vpop.eup %11525 }
 0x807   : > { %v6815_v9 = vpop.xlane.xlu1 %6814  ;;  %8332 = vperm.xlu0 %11272, %v6878_v40   ;;  %v6625_v40 = vld [vmem:[#allocation3 + $0x1e8] sm:$0xff]  ;;  %v6674_v59 = vmul.f32 %v16581_v47, %v6610_v50 }
 0x808   : > { %v6689_v58 = vmul.f32 %v11522_v3, %v6625_v40 }
 0x809   : > { %v6866_v17 = vadd.f32 %v16525_v35, %v6674_v59 }
 0x80a   : > { %8257 = vperm.xlu1 %11271, %v6863_v13   ;;  %v16561_v7 = vpop.permute.xlu0 %7205  ;;  %v6881_v42 = vadd.f32 %v6815_v9, %v6689_v58  ;;  %v6672_v13 = vmul.f32 %v16576_v8, %v6608_v46  ;;  %v6611_v9 = vld [vmem:[#allocation3 + $0x178] sm:$0xff] }
 0x80b   : > { %v6787_v30 = vpop.xlane.xlu1 %6786  ;;  %8342 = vperm.xlu0 %11272, %v6880_v32  }
 0x80c   : > { %v6864_v6 = vadd.f32 %v16498_v18, %v6672_v13 }
 0x80e   : > { %8337 = vperm.xlu1 %11271, %v6879_v24   ;;  %v16566_v25 = vpop.permute.xlu0 %7210 }
 0x80f   : > { %v6819_v49 = vpop.xlane.xlu1 %6818  ;;  %7235 = vperm.xlu0 %11272, %v16530_v31  }
 0x810   : > { %v6883_v23 = vadd.f32 %v6819_v49, %v6691_v53  ;;  %v6900_v49 = vld [vmem:[#allocation4 + $0x80] sm:$0xff] }
 0x811   : > { %v11528_v54 = vpop.eup %11527  ;;  %v6884_v53 = vld [vmem:[#allocation4] sm:$0xff] }
 0x812   : > { %8252 = vperm.xlu1 %11271, %v6862_v11   ;;  %v16572_v36 = vpop.permute.xlu0 %7215  ;;  %v6675_v43 = vmul.f32 %v11528_v54, %v6611_v9  ;;  %v10621_v11 = vpop.f32.mrf.mxu0 }
 0x813   : > { %v8128_v41 = vpop.permute.xlu1 %8127  ;;  %8352 = vperm.xlu0 %11272, %v6882_v61   ;;  %v17751_v61 = vld [vmem:[#allocation230_spill] sm:$0xff] }
 0x814   : > { %11529 = vrcp.f32 %v8128_v41 }
 0x816   : > { %8267 = vperm.xlu1 %11271, %v6865_v29   ;;  %v16574_v31 = vpop.permute.xlu0 %7220 }
 0x817   : > { %8357 = vperm.xlu0 %11272, %v6883_v23   ;;  %v8048_v63 = vpop.permute.xlu1 %8047  ;;  %v6885_v23 = vld [vmem:[#allocation4 + $0x8] sm:$0xff] }
 0x81a   : > { %8347 = vperm.xlu1 %11271, %v6881_v42   ;;  %v16579_v32 = vpop.permute.xlu0 %7225  ;;  %v7462_v42 = vpop.f32.mrf.mxu0 }
 0x81b   : > { %7245 = vperm.xlu0 %11272, %v11514_v39   ;;  %v6867_v39 = vadd.f32 %v6787_v30, %v6675_v43  ;;  %v7284_v30 = vmul.f32 %v17751_v61, %v6900_v49  ;;  %v17757_v49 = vld [vmem:[#allocation246_spill] sm:$0xff]  ;;  %v6886_v61 = vld [vmem:[#allocation4 + $0x10] sm:$0xff] }
 0x81d   : > { %v8138_v48 = vpop.permute.xlu1 %8137  ;;  %v7992_v58 = vadd.f32 %v7607_v15, %v7284_v30 }
 0x81e   : > { %8262 = vperm.xlu1 %11271, %v6864_v6   ;;  %v16585_v34 = vpop.permute.xlu0 %7230 }
 0x81f   : > { %7175 = vperm.xlu0 %11272, %v11518_v0   ;;  %v6901_v0 = vld [vmem:[#allocation4 + $0x88] sm:$0xff] }
 0x821   : > { %v8058_v24 = vpop.permute.xlu1 %8057  ;;  %v11530_v29 = vpop.eup %11529 }
 0x822   : > { %8272 = vperm.xlu1 %11271, %v6866_v17   ;;  %v8123_v52 = vpop.permute.xlu0 %8122 }
 0x823   : > { %11531 = vrcp.f32 %v8123_v52  ;;  %7255 = vperm.xlu0 %11272, %v11522_v3   ;;  %v17752_v3 = vld [vmem:[#allocation152_spill] sm:$0xff] }
 0x824   : > { %11533 = vrcp.f32 %v8048_v63  ;;  %v7285_v40 = vmul.f32 %v17752_v3, %v6901_v0  ;;  %v17753_v63 = vld [vmem:[#allocation157_spill] sm:$0xff] }
 0x825   : > { %v8148_v18 = vpop.permute.xlu1 %8147  ;;  %v7268_v13 = vmul.f32 %v17753_v63, %v6884_v53  ;;  %v6904_v63 = vld [vmem:[#allocation4 + $0xa0] sm:$0xff] }
 0x826   : > { %8277 = vperm.xlu1 %11271, %v6867_v39   ;;  %v8043_v10 = vpop.permute.xlu0 %8042  ;;  %v7993_v46 = vadd.f32 %v10677_v38, %v7285_v40 }
 0x827   : > { %11535 = vrcp.f32 %v8043_v10  ;;  %7185 = vperm.xlu0 %11272, %v11528_v54   ;;  %v6902_v54 = vld [vmem:[#allocation4 + $0x90] sm:$0xff]  ;;  %v7976_v43 = vadd.f32 %v7462_v42, %v7268_v13  ;;  %v10624_v10 = vpop.f32.mrf.mxu0 }
 0x828   : > { %11537 = vrcp.f32 %v8138_v48  ;;  %v17754_v48 = vld [vmem:[#allocation158_spill] sm:$0xff]  ;;  %v8395_v9 = vmul.f32 %v11530_v29, %v7993_v46 }
 0x829   : > { %v8068_v2 = vpop.permute.xlu1 %8067  ;;  %v7269_v59 = vmul.f32 %v17754_v48, %v6885_v23  ;;  %v7472_v29 = vpop.f32.mrf.mxu0 }
 0x82a   : > { %7165 = vperm.xlu1 %11271, %v16547_v55   ;;  %v8133_v35 = vpop.permute.xlu0 %8132 }
 0x82b   : > { %11539 = vrcp.f32 %v8133_v35  ;;  %7265 = vperm.xlu0 %11272, %v11520_v21   ;;  %v10680_v21 = vpop.f32.mrf.mxu1  ;;  %v7977_v39 = vadd.f32 %v10621_v11, %v7269_v59  ;;  %v7286_v35 = vmul.f32 %v17757_v49, %v6902_v54  ;;  %v6887_v11 = vld [vmem:[#allocation4 + $0x18] sm:$0xff]  ;;  %v6905_v59 = vld [vmem:[#allocation4 + $0xa8] sm:$0xff] }
 0x82c   : > { %11541 = vrcp.f32 %v8058_v24  ;;  %v6903_v24 = vld [vmem:[#allocation4 + $0x98] sm:$0xff] }
 0x82d   : > { %v8158_v5 = vpop.permute.xlu1 %8157  ;;  %v7617_v38 = vpop.f32.mrf.mxu1 }
 0x82e   : > { %7240 = vperm.xlu1 %11271, %v16540_v60   ;;  %v8053_v41 = vpop.permute.xlu0 %8052  ;;  %v7994_v53 = vadd.f32 %v7617_v38, %v7286_v35 }
 0x82f   : > { %11543 = vrcp.f32 %v8053_v41 }
 0x830   : > { %v11532_v55 = vpop.eup %11531  ;;  %11545 = vrcp.f32 %v8148_v18 }
 0x831   : > { %v8078_v50 = vpop.permute.xlu1 %8077  ;;  %v8393_v6 = vmul.f32 %v11532_v55, %v7992_v58  ;;  %v11534_v17 = vpop.eup %11533 }
 0x832   : > { %7170 = vperm.xlu1 %11271, %v16576_v8   ;;  %v8143_v60 = vpop.permute.xlu0 %8142  ;;  %v17758_v8 = vld [vmem:[#allocation244_spill] sm:$0xff]  ;;  %v8363_v30 = vmul.f32 %v11534_v17, %v7977_v39  ;;  %v10683_v58 = vpop.f32.mrf.mxu1  ;;  %v6888_v39 = vld [vmem:[#allocation4 + $0x20] sm:$0xff] }
 0x833   : > { %11547 = vrcp.f32 %v8143_v60  ;;  %10813 = vmatprep.mubr.msk.f32.mxu0 %vm17755_vm4, %v8393_v6  ;;  %v7287_v18 = vmul.f32 %v17758_v8, %v6903_v24  ;;  %v10627_v60 = vpop.f32.mrf.mxu0  ;;  %vm17787_vm4 = vmmov %vm17779_vm0 }
 0x834   : > { %v11536_v52 = vpop.eup %11535  ;;  %10814 = vmatmul.mubr.msk.f32.vlgmr.msra.gmra.mxu0 %vm17756_vm5, %v8395_v9  ;;  %11549 = vrcp.f32 %v8068_v2  ;;  %v7627_v17 = vpop.f32.mrf.mxu1  ;;  %vm17788_vm5 = vmmov %vm17779_vm0 }
 0x835   : > { %v8168_v0 = vpop.permute.xlu1 %8167  ;;  %v8361_v15 = vmul.f32 %v11536_v52, %v7976_v43  ;;  %10864 = vmatpush3.msra.mxu0 %v16510_v16  ;;  %v11538_v40 = vpop.eup %11537  ;;  %v7995_v23 = vadd.f32 %v10680_v21, %v7287_v18  ;;  %v17761_v16 = vld [vmem:[#allocation162_spill] sm:$0xff]  ;;  %v17766_v52 = vld [vmem:[#allocation247_spill] sm:$0xff] }
 0x836   : > { %7250 = vperm.xlu1 %11271, %v16550_v57   ;;  %v8063_v3 = vpop.permute.xlu0 %8062  ;;  %v7270_v55 = vmul.f32 %v17761_v16, %v6886_v61  ;;  %v17762_v57 = vld [vmem:[#allocation159_spill] sm:$0xff]  ;;  %v7482_v18 = vpop.f32.mrf.mxu0 }
 0x837   : > { %11551 = vrcp.f32 %v8063_v3  ;;  %10839 = vmatprep.mubr.msk.f32.mxu1 %vm17759_vm6, %v8361_v15  ;;  %v7271_v2 = vmul.f32 %v17762_v57, %v6887_v11  ;;  %v8399_v6 = vmul.f32 %v11538_v40, %v7995_v23  ;;  %v6889_v15 = vld [vmem:[#allocation4 + $0x28] sm:$0xff]  ;;  %vm17789_vm6 = vmmov %vm17779_vm0 }
 0x838   : > { %v11540_v41 = vpop.eup %11539  ;;  %10840 = vmatmul.mubr.msk.f32.vlgmr.msra.gmra.mxu1 %vm17760_vm7, %v8363_v30  ;;  %11553 = vrcp.f32 %v8158_v5  ;;  %v7978_v21 = vadd.f32 %v7472_v29, %v7270_v55  ;;  %v10686_v30 = vpop.f32.mrf.mxu1  ;;  %v17769_v3 = vld [vmem:[#allocation168_spill] sm:$0xff]  ;;  %v6907_v55 = vld [vmem:[#allocation4 + $0xb8] sm:$0xff]  ;;  %vm17790_vm7 = vmmov %vm17779_vm0 }
 0x839   : > { %v8088_v46 = vpop.permute.xlu1 %8087  ;;  %v8397_v42 = vmul.f32 %v11540_v41, %v7994_v53  ;;  %10890 = vmatpush3.msra.mxu1 %v16519_v27  ;;  %v11542_v48 = vpop.eup %11541  ;;  %v7979_v9 = vadd.f32 %v10624_v10, %v7271_v2  ;;  %v17765_v27 = vld [vmem:[#allocation249_spill] sm:$0xff]  ;;  %v7272_v40 = vmul.f32 %v17769_v3, %v6888_v39  ;;  %v17770_v53 = vld [vmem:[#allocation163_spill] sm:$0xff] }
 0x83a   : > { %7180 = vperm.xlu1 %11271, %v16581_v47   ;;  %v8153_v13 = vpop.permute.xlu0 %8152  ;;  %v7288_v24 = vmul.f32 %v17765_v27, %v6904_v63  ;;  %v7289_v47 = vmul.f32 %v17766_v52, %v6905_v59  ;;  %v6906_v41 = vld [vmem:[#allocation4 + $0xb0] sm:$0xff]  ;;  %v10630_v2 = vpop.f32.mrf.mxu0 }
 0x83b   : > { %11555 = vrcp.f32 %v8153_v13  ;;  %10816 = vmatprep.mubr.msk.f32.mxu0 %vm17763_vm8, %v8397_v42  ;;  %v8367_v49 = vmul.f32 %v11542_v48, %v7979_v9  ;;  %v7980_v42 = vadd.f32 %v7482_v18, %v7272_v40  ;;  %v7637_v63 = vpop.f32.mrf.mxu1  ;;  %v17773_v13 = vld [vmem:[#allocation252_spill] sm:$0xff]  ;;  %vm17793_vm8 = vmmov %vm17779_vm0 }
 0x83c   : > { %v11544_v54 = vpop.eup %11543  ;;  %10817 = vmatmul.mubr.msk.f32.gmra.mxu0 %vm17764_vm9, %v8399_v6  ;;  %11557 = vrcp.f32 %v8078_v50  ;;  %v7996_v8 = vadd.f32 %v7627_v17, %v7288_v24  ;;  %v7997_v61 = vadd.f32 %v10683_v58, %v7289_v47  ;;  %v7290_v6 = vmul.f32 %v17773_v13, %v6906_v41  ;;  %v6891_v24 = vld [vmem:[#allocation4 + $0x38] sm:$0xff]  ;;  %v7492_v52 = vpop.f32.mrf.mxu0  ;;  %v6909_v40 = vld [vmem:[#allocation4 + $0xc8] sm:$0xff]  ;;  %vm17794_vm9 = vmmov %vm17779_vm0 }
 0x83d   : > { %v8178_v43 = vpop.permute.xlu1 %8177  ;;  %v8365_v5 = vmul.f32 %v11544_v54, %v7978_v21  ;;  %v11546_v35 = vpop.eup %11545  ;;  %v17774_v21 = vld [vmem:[#allocation250_spill] sm:$0xff]  ;;  %v6890_v54 = vld [vmem:[#allocation4 + $0x30] sm:$0xff] }
 0x83e   : > { %7260 = vperm.xlu1 %11271, %v16563_v51   ;;  %v8073_v38 = vpop.permute.xlu0 %8072  ;;  %v7273_v51 = vmul.f32 %v17770_v53, %v6889_v15  ;;  %v8403_v23 = vmul.f32 %v11546_v35, %v7997_v61  ;;  %v10689_v39 = vpop.f32.mrf.mxu1 }
 0x83f   : > { %11559 = vrcp.f32 %v8073_v38  ;;  %10842 = vmatprep.mubr.msk.f32.mxu1 %vm17767_vm10, %v8365_v5  ;;  %v7998_v5 = vadd.f32 %v7637_v63, %v7290_v6  ;;  %v17777_v38 = vld [vmem:[#allocation172_spill] sm:$0xff]  ;;  %vm17796_vm10 = vmmov %vm17779_vm0 }
 0x840   : > { %v11548_v10 = vpop.eup %11547  ;;  %10843 = vmatmul.mubr.msk.f32.gmra.mxu1 %vm17768_vm11, %v8367_v49  ;;  %11561 = vrcp.f32 %v8168_v0  ;;  %v7981_v57 = vadd.f32 %v10627_v60, %v7273_v51  ;;  %v7291_v0 = vmul.f32 %v17774_v21, %v6907_v55  ;;  %v7274_v49 = vmul.f32 %v17777_v38, %v6890_v54  ;;  %v10633_v51 = vpop.f32.mrf.mxu0  ;;  %v6893_v6 = vld [vmem:[#allocation4 + $0x48] sm:$0xff]  ;;  %vm17797_vm11 = vmmov %vm17779_vm0 }
 0x841   : > { %v8098_v11 = vpop.permute.xlu1 %8097  ;;  %v8401_v50 = vmul.f32 %v11548_v10, %v7996_v8  ;;  %v11550_v16 = vpop.eup %11549  ;;  %v17778_v8 = vld [vmem:[#allocation239_spill] sm:$0xff] }
 0x842   : > { %v8163_v29 = vpop.permute.xlu0 %8162  ;;  %v8371_v17 = vmul.f32 %v11550_v16, %v7981_v57  ;;  %v7999_v47 = vadd.f32 %v10686_v30, %v7291_v0  ;;  %v6908_v10 = vld [vmem:[#allocation4 + $0xc0] sm:$0xff]  ;;  %v7647_v41 = vpop.f32.mrf.mxu1 }
 0x843   : > { %11563 = vrcp.f32 %v8163_v29  ;;  %10819 = vmatprep.mubr.msk.f32.mxu0 %vm17771_vm12, %v8401_v50  ;;  %v7982_v50 = vadd.f32 %v7492_v52, %v7274_v49  ;;  %v17781_v29 = vld [vmem:[#allocation175_spill] sm:$0xff]  ;;  %v7502_v21 = vpop.f32.mrf.mxu0  ;;  %v6911_v49 = vld [vmem:[#allocation4 + $0xd8] sm:$0xff]  ;;  %vm17799_vm12 = vmmov %vm17779_vm0 }
 0x844   : > { %v11552_v58 = vpop.eup %11551  ;;  %10820 = vmatmul.mubr.msk.f32.gmra.mxu0 %vm17772_vm13, %v8403_v23  ;;  %11565 = vrcp.f32 %v8088_v46  ;;  %v7275_v46 = vmul.f32 %v17778_v8, %v6891_v24  ;;  %v7292_v23 = vmul.f32 %v17781_v29, %v6908_v10  ;;  %v10692_v54 = vpop.f32.mrf.mxu1  ;;  %vm17800_vm13 = vmmov %vm17779_vm0 }
 0x845   : > { %v8188_v48 = vpop.permute.xlu1 %8187  ;;  %v8369_v59 = vmul.f32 %v11552_v58, %v7980_v42  ;;  %v11554_v27 = vpop.eup %11553  ;;  %v17782_v42 = vld [vmem:[#allocation253_spill] sm:$0xff]  ;;  %v6892_v58 = vld [vmem:[#allocation4 + $0x40] sm:$0xff] }
 0x846   : > { %v8083_v9 = vpop.permute.xlu0 %8082  ;;  %v8407_v61 = vmul.f32 %v11554_v27, %v7999_v47  ;;  %v7983_v53 = vadd.f32 %v10630_v2, %v7275_v46  ;;  %v10636_v46 = vpop.f32.mrf.mxu0 }
 0x847   : > { %11567 = vrcp.f32 %v8083_v9  ;;  %10845 = vmatprep.mubr.msk.f32.mxu1 %vm17775_vm14, %v8369_v59  ;;  %v8000_v59 = vadd.f32 %v7647_v41, %v7292_v23  ;;  %v17785_v9 = vld [vmem:[#allocation173_spill] sm:$0xff]  ;;  %v7657_v10 = vpop.f32.mrf.mxu1  ;;  %v6895_v41 = vld [vmem:[#allocation4 + $0x58] sm:$0xff]  ;;  %vm17801_vm14 = vmmov %vm17779_vm0 }
 0x848   : > { %v11556_v60 = vpop.eup %11555  ;;  %10846 = vmatmul.mubr.msk.f32.gmra.mxu1 %vm17776_vm15, %v8371_v17  ;;  %11569 = vrcp.f32 %v8178_v43  ;;  %v7293_v43 = vmul.f32 %v17782_v42, %v6909_v40  ;;  %v7276_v17 = vmul.f32 %v17785_v9, %v6892_v58  ;;  %v6894_v40 = vld [vmem:[#allocation4 + $0x50] sm:$0xff]  ;;  %v7512_v23 = vpop.f32.mrf.mxu0  ;;  %vm17802_vm15 = vmmov %vm17779_vm0 }
 0x849   : > { %v8108_v35 = vpop.permute.xlu1 %8107  ;;  %v8405_v15 = vmul.f32 %v11556_v60, %v7998_v5  ;;  %v11558_v3 = vpop.eup %11557  ;;  %v17786_v5 = vld [vmem:[#allocation251_spill] sm:$0xff]  ;;  %v6910_v60 = vld [vmem:[#allocation4 + $0xd0] sm:$0xff] }
 0x84a   : > { %v8173_v18 = vpop.permute.xlu0 %8172  ;;  %v8375_v63 = vmul.f32 %v11558_v3, %v7983_v53  ;;  %v8001_v0 = vadd.f32 %v10689_v39, %v7293_v43  ;;  %v10695_v42 = vpop.f32.mrf.mxu1 }
 0x84b   : > { %11571 = vrcp.f32 %v8173_v18  ;;  %10822 = vmatprep.mubr.msk.f32.mxu0 %vm17779_vm0, %v8405_v15  ;;  %v7984_v15 = vadd.f32 %v7502_v21, %v7276_v17  ;;  %v7294_v18 = vmul.f32 %v16178_v33, %v6910_v60  ;;  %v17791_v33 = vld [vmem:[#allocation176_spill] sm:$0xff]  ;;  %v10639_v9 = vpop.f32.mrf.mxu0  ;;  %v17795_v60 = vld [vmem:[#allocation178_spill] sm:$0xff] }
 0x84c   : > { %v11560_v30 = vpop.eup %11559  ;;  %10823 = vmatmul.mubr.msk.f32.gmra.mxu0 %vm17780_vm1, %v8407_v61  ;;  %11573 = vrcp.f32 %v8098_v11  ;;  %v7277_v11 = vmul.f32 %v17786_v5, %v6893_v6  ;;  %v7278_v43 = vmul.f32 %v17791_v33, %v6894_v40  ;;  %v7667_v17 = vpop.f32.mrf.mxu1  ;;  %v17798_v40 = vld [vmem:[#allocation177_spill] sm:$0xff]  ;;  %vm17803_vm1 = vmmov %vm17779_vm0 }
 0x84d   : > { %v8198_v16 = vpop.permute.xlu1 %8197  ;;  %v8373_v55 = vmul.f32 %v11560_v30, %v7982_v50  ;;  %v11562_v13 = vpop.eup %11561  ;;  %v8002_v29 = vadd.f32 %v7657_v10, %v7294_v18 }
 0x84e   : > { %v8093_v57 = vpop.permute.xlu0 %8092  ;;  %v8411_v47 = vmul.f32 %v11562_v13, %v8001_v0  ;;  %v7985_v8 = vadd.f32 %v10633_v51, %v7277_v11  ;;  %v7986_v21 = vadd.f32 %v7512_v23, %v7278_v43  ;;  %v10698_v18 = vpop.f32.mrf.mxu1 }
 0x84f   : > { %11575 = vrcp.f32 %v8093_v57  ;;  %10848 = vmatprep.mubr.msk.f32.mxu1 %vm17783_vm2, %v8373_v55  ;;  %v17792_v57 = vld [vmem:[#allocation174_spill] sm:$0xff]  ;;  %vm17804_vm2 = vmmov %vm17779_vm0 }
 0x850   : > { %v11564_v2 = vpop.eup %11563  ;;  %10849 = vmatmul.mubr.msk.f32.gmra.mxu1 %vm17784_vm3, %v8375_v63  ;;  %11577 = vrcp.f32 %v8188_v48  ;;  %v7295_v48 = vmul.f32 %v16153_v12, %v6911_v49  ;;  %v6912_v63 = vld [vmem:[#allocation4 + $0xe0] sm:$0xff]  ;;  %v7677_v33 = vpop.f32.mrf.mxu1  ;;  %vm17805_vm3 = vmmov %vm17779_vm0 }
 0x851   : > { %v8118_v27 = vpop.permute.xlu1 %8117  ;;  %v8409_v24 = vmul.f32 %v11564_v2, %v8000_v59  ;;  %v11566_v38 = vpop.eup %11565  ;;  %v6913_v2 = vld [vmem:[#allocation4 + $0xe8] sm:$0xff] }
 0x852   : > { %v8183_v52 = vpop.permute.xlu0 %8182  ;;  %v8379_v30 = vmul.f32 %v11566_v38, %v7985_v8  ;;  %v8003_v55 = vadd.f32 %v10692_v54, %v7295_v48 }
 0x853   : > { %11579 = vrcp.f32 %v8183_v52  ;;  %10825 = vmatprep.mubr.msk.f32.mxu0 %vm17787_vm4, %v8409_v24  ;;  %v7296_v24 = vmul.f32 %v16210_v26, %v6912_v63  ;;  %v6896_v52 = vld [vmem:[#allocation4 + $0x60] sm:$0xff]  ;;  %vm17807_vm4 = vmmov %vm17779_vm0 }
 0x854   : > { %v11568_v39 = vpop.eup %11567  ;;  %10826 = vmatmul.mubr.msk.f32.gmra.mxu0 %vm17788_vm5, %v8411_v47  ;;  %11581 = vrcp.f32 %v8108_v35  ;;  %v7279_v35 = vmul.f32 %v17792_v57, %v6895_v41  ;;  %v7280_v26 = vmul.f32 %v16203_v1, %v6896_v52  ;;  %vm17808_vm5 = vmmov %vm17779_vm0 }
 0x855   : > { %v8208_v61 = vpop.permute.xlu1 %8207  ;;  %v8377_v3 = vmul.f32 %v11568_v39, %v7984_v15  ;;  %v11570_v53 = vpop.eup %11569  ;;  %v6897_v15 = vld [vmem:[#allocation4 + $0x68] sm:$0xff]  ;;  %v8004_v39 = vadd.f32 %v7667_v17, %v7296_v24 }
 0x856   : > { %v8103_v50 = vpop.permute.xlu0 %8102  ;;  %v8415_v6 = vmul.f32 %v11570_v53, %v8003_v55  ;;  %v7987_v54 = vadd.f32 %v10636_v46, %v7279_v35  ;;  %v7522_v46 = vpop.f32.mrf.mxu0 }
 0x857   : > { %11583 = vrcp.f32 %v8103_v50  ;;  %10851 = vmatprep.mubr.msk.f32.mxu1 %vm17789_vm6, %v8377_v3  ;;  %v6914_v50 = vld [vmem:[#allocation4 + $0xf0] sm:$0xff]  ;;  %v7988_v23 = vadd.f32 %v7522_v46, %v7280_v26  ;;  %v6932_v46 = vld [vmem:[#allocation4 + $0x180] sm:$0xff]  ;;  %vm17809_vm6 = vmmov %vm17779_vm0 }
 0x858   : > { %v11572_v51 = vpop.eup %11571  ;;  %10852 = vmatmul.mubr.msk.f32.gmra.mxu1 %vm17790_vm7, %v8379_v30  ;;  %11585 = vrcp.f32 %v8198_v16  ;;  %v7297_v16 = vmul.f32 %v17795_v60, %v6913_v2  ;;  %v10642_v30 = vpop.f32.mrf.mxu0  ;;  %v7298_v1 = vmul.f32 %v16242_v19, %v6914_v50  ;;  %vm17810_vm7 = vmmov %vm17779_vm0 }
 0x859   : > { %v8288_v58 = vpop.permute.xlu1 %8287  ;;  %v8413_v12 = vmul.f32 %v11572_v51, %v8002_v29  ;;  %v11574_v59 = vpop.eup %11573  ;;  %v6915_v51 = vld [vmem:[#allocation4 + $0xf8] sm:$0xff] }
 0x85a   : > { %v8193_v13 = vpop.permute.xlu0 %8192  ;;  %v8383_v38 = vmul.f32 %v11574_v59, %v7987_v54  ;;  %v8005_v10 = vadd.f32 %v10695_v42, %v7297_v16  ;;  %v7299_v57 = vmul.f32 %v16213_v56, %v6915_v51  ;;  %v7532_v35 = vpop.f32.mrf.mxu0  ;;  %v6899_v59 = vld [vmem:[#allocation4 + $0x78] sm:$0xff]  ;;  %v8006_v2 = vadd.f32 %v7677_v33, %v7298_v1  ;;  %v6917_v16 = vld [vmem:[#allocation4 + $0x108] sm:$0xff] }
 0x85b   : > { %11587 = vrcp.f32 %v8193_v13  ;;  %10828 = vmatprep.mubr.msk.f32.mxu0 %vm17793_vm8, %v8413_v12  ;;  %v7283_v17 = vmul.f32 %v16207_v22, %v6899_v59  ;;  %vm17811_vm8 = vmmov %vm17779_vm0 }
 0x85c   : > { %v11576_v0 = vpop.eup %11575  ;;  %10829 = vmatmul.mubr.msk.f32.gmra.mxu0 %vm17794_vm9, %v8415_v6  ;;  %11589 = vrcp.f32 %v8118_v27  ;;  %v7281_v27 = vmul.f32 %v17798_v40, %v6897_v15  ;;  %v10733_v54 = vpop.f32.mrf.mxu0  ;;  %vm17812_vm9 = vmmov %vm17779_vm0 }
 0x85d   : > { %v8218_v5 = vpop.permute.xlu1 %8217  ;;  %v8381_v11 = vmul.f32 %v11576_v0, %v7986_v21  ;;  %v11578_v49 = vpop.eup %11577  ;;  %v8007_v0 = vadd.f32 %v10698_v18, %v7299_v57 }
 0x85e   : > { %v8113_v47 = vpop.permute.xlu0 %8112  ;;  %v8419_v41 = vmul.f32 %v11578_v49, %v8005_v10  ;;  %v7989_v42 = vadd.f32 %v10639_v9, %v7281_v27  ;;  %v7752_v49 = vpop.f32.mrf.mxu0 }
 0x85f   : > { %11591 = vrcp.f32 %v8113_v47  ;;  %10854 = vmatprep.mubr.msk.f32.mxu1 %vm17796_vm10, %v8381_v11  ;;  %v10789_v15 = vpop.f32.mrf.mxu1  ;;  %vm17814_vm10 = vmmov %vm17779_vm0 }
 0x860   : > { %v11580_v8 = vpop.eup %11579  ;;  %10855 = vmatmul.mubr.msk.f32.gmra.mxu1 %vm17797_vm11, %v8383_v38  ;;  %11593 = vrcp.f32 %v8208_v61  ;;  %v6898_v61 = vld [vmem:[#allocation4 + $0x70] sm:$0xff]  ;;  %v7991_v38 = vadd.f32 %v10642_v30, %v7283_v17  ;;  %v10736_v40 = vpop.f32.mrf.mxu0  ;;  %vm17816_vm11 = vmmov %vm17779_vm0 }
 0x861   : > { %v8298_v3 = vpop.permute.xlu1 %8297  ;;  %v8417_v48 = vmul.f32 %v11580_v8, %v8004_v39  ;;  %v11582_v29 = vpop.eup %11581  ;;  %v7282_v19 = vmul.f32 %v16235_v20, %v6898_v61  ;;  %v6933_v39 = vld [vmem:[#allocation4 + $0x188] sm:$0xff]  ;;  %v6934_v61 = vld [vmem:[#allocation4 + $0x190] sm:$0xff] }
 0x862   : > { %v8203_v53 = vpop.permute.xlu0 %8202  ;;  %v8387_v13 = vmul.f32 %v11582_v29, %v7989_v42  ;;  %v7897_v30 = vpop.f32.mrf.mxu1  ;;  %v6919_v42 = vld [vmem:[#allocation4 + $0x118] sm:$0xff] }
 0x863   : > { %11595 = vrcp.f32 %v8203_v53  ;;  %10831 = vmatprep.mubr.msk.f32.mxu0 %vm17799_vm12, %v8417_v48  ;;  %v7990_v52 = vadd.f32 %v7532_v35, %v7282_v19  ;;  %v17806_v53 = vld [vmem:[#allocation179_spill] sm:$0xff]  ;;  %v7762_v1 = vpop.f32.mrf.mxu0  ;;  %v7303_v59 = vmul.f32 %v16271_v37, %v6919_v42  ;;  %v7318_v19 = vmul.f32 %v16556_v28, %v6934_v61  ;;  %v6921_v28 = vld [vmem:[#allocation4 + $0x128] sm:$0xff]  ;;  %v6939_v42 = vld [vmem:[#allocation4 + $0x1b8] sm:$0xff] }
 0x864   : > { %v11584_v55 = vpop.eup %11583  ;;  %10832 = vmatmul.mubr.msk.f32.gmra.mxu0 %vm17800_vm13, %v8419_v41  ;;  %11597 = vrcp.f32 %v8288_v58  ;;  %v6916_v58 = vld [vmem:[#allocation4 + $0x100] sm:$0xff]  ;;  %v7316_v41 = vmul.f32 %v17806_v53, %v6932_v46  ;;  %v10792_v57 = vpop.f32.mrf.mxu1  ;;  %vm17818_vm12 = vmmov %vm17779_vm0 }
 0x865   : > { %v8228_v43 = vpop.permute.xlu1 %8227  ;;  %v8385_v12 = vmul.f32 %v11584_v55, %v7988_v23  ;;  %v11586_v6 = vpop.eup %11585  ;;  %v7300_v20 = vmul.f32 %v16267_v44, %v6916_v58  ;;  %v7317_v44 = vmul.f32 %v16545_v45, %v6933_v39  ;;  %vm17819_vm13 = vmmov %vm17779_vm0 }
 0x866   : > { %v8283_v63 = vpop.permute.xlu0 %8282  ;;  %v8423_v11 = vmul.f32 %v11586_v6, %v8007_v0  ;;  %v8024_v33 = vadd.f32 %v7897_v30, %v7316_v41 }
 0x867   : > { %11599 = vrcp.f32 %v8283_v63  ;;  %10857 = vmatprep.mubr.msk.f32.mxu1 %vm17801_vm14, %v8385_v12  ;;  %v8008_v48 = vadd.f32 %v7752_v49, %v7300_v20  ;;  %v8025_v45 = vadd.f32 %v10789_v15, %v7317_v44  ;;  %v10739_v63 = vpop.f32.mrf.mxu0  ;;  %vm17820_vm14 = vmmov %vm17779_vm0 }
 0x868   : > { %v11588_v21 = vpop.eup %11587  ;;  %10858 = vmatmul.mubr.msk.f32.gmra.mxu1 %vm17802_vm15, %v8387_v13  ;;  %11601 = vrcp.f32 %v8218_v5  ;;  %v7301_v5 = vmul.f32 %v16239_v14, %v6917_v16  ;;  %v6935_v13 = vld [vmem:[#allocation4 + $0x198] sm:$0xff]  ;;  %vm17821_vm15 = vmmov %vm17779_vm0 }
 0x869   : > { %v8308_v9 = vpop.permute.xlu1 %8307  ;;  %v8421_v56 = vmul.f32 %v11588_v21, %v8006_v2  ;;  %v11590_v60 = vpop.eup %11589  ;;  %v7319_v17 = vmul.f32 %v16561_v7, %v6935_v13  ;;  %v6936_v7 = vld [vmem:[#allocation4 + $0x1a0] sm:$0xff] }
 0x86a   : > { %v8213_v24 = vpop.permute.xlu0 %8212  ;;  %v8391_v18 = vmul.f32 %v11590_v60, %v7991_v38  ;;  %v8009_v50 = vadd.f32 %v10733_v54, %v7301_v5  ;;  %v7772_v58 = vpop.f32.mrf.mxu0  ;;  %v7320_v53 = vmul.f32 %v16566_v25, %v6936_v7 }
 0x86b   : > { %11603 = vrcp.f32 %v8213_v24  ;;  %10834 = vmatprep.mubr.msk.f32.mxu0 %vm17779_vm0, %v8421_v56  ;;  %v8011_v56 = vadd.f32 %v10736_v40, %v7303_v59  ;;  %v8027_v20 = vadd.f32 %v10792_v57, %v7319_v17 }
 0x86c   : > { %v11592_v47 = vpop.eup %11591  ;;  %10835 = vmatmul.mubr.msk.f32.gmra.mxu0 %vm17803_vm1, %v8423_v11  ;;  %11605 = vrcp.f32 %v8298_v3  ;;  %v6918_v3 = vld [vmem:[#allocation4 + $0x110] sm:$0xff]  ;;  %v6920_v11 = vld [vmem:[#allocation4 + $0x120] sm:$0xff]  ;;  %v10742_v38 = vpop.f32.mrf.mxu0  ;;  %vm17822_vm1 = vmmov %vm17779_vm0 }
 0x86d   : > { %v8238_v22 = vpop.permute.xlu1 %8237  ;;  %v8389_v8 = vmul.f32 %v11592_v47, %v7990_v52  ;;  %v11594_v26 = vpop.eup %11593  ;;  %v7302_v35 = vmul.f32 %v16284_v4, %v6918_v3  ;;  %v7304_v39 = vmul.f32 %v16302_v62, %v6920_v11  ;;  %v17815_v62 = vld [vmem:[#allocation183_spill] sm:$0xff] }
 0x86e   : > { %v8293_v10 = vpop.permute.xlu0 %8292  ;;  %v8427_v51 = vmul.f32 %v11594_v26, %v8009_v50  ;;  %v7907_v4 = vpop.f32.mrf.mxu1  ;;  %v6923_v50 = vld [vmem:[#allocation4 + $0x138] sm:$0xff] }
 0x86f   : > { %11607 = vrcp.f32 %v8293_v10  ;;  %10860 = vmatprep.mubr.msk.f32.mxu1 %vm17804_vm2, %v8389_v8  ;;  %v8010_v54 = vadd.f32 %v7762_v1, %v7302_v35  ;;  %v8026_v49 = vadd.f32 %v7907_v4, %v7318_v19  ;;  %v6937_v8 = vld [vmem:[#allocation4 + $0x1a8] sm:$0xff]  ;;  %v8012_v30 = vadd.f32 %v7772_v58, %v7304_v39  ;;  %v7782_v44 = vpop.f32.mrf.mxu0  ;;  %vm17823_vm2 = vmmov %vm17779_vm0 }
 0x870   : > { %v11596_v27 = vpop.eup %11595  ;;  %10861 = vmatmul.mubr.msk.f32.gmra.mxu1 %vm17805_vm3, %v8391_v18  ;;  %11609 = vrcp.f32 %v8228_v43  ;;  %v10795_v60 = vpop.f32.mrf.mxu1  ;;  %v17813_v10 = vld [vmem:[#allocation180_spill] sm:$0xff]  ;;  %vm17825_vm3 = vmmov %vm17779_vm0 }
 0x871   : > { %v8318_v14 = vpop.permute.xlu1 %8317  ;;  %v8425_v29 = vmul.f32 %v11596_v27, %v8008_v48  ;;  %v11598_v55 = vpop.eup %11597  ;;  %v7305_v18 = vmul.f32 %v17813_v10, %v6921_v28  ;;  %v17826_v10 = vld [vmem:[#allocation182_spill] sm:$0xff] }
 0x872   : > { %v8223_v23 = vpop.permute.xlu0 %8222  ;;  %v8459_v2 = vmul.f32 %v11598_v55, %v8025_v45  ;;  %v7917_v26 = vpop.f32.mrf.mxu1 }
 0x873   : > { %11611 = vrcp.f32 %v8223_v23  ;;  %10865 = vmatprep.mubr.msk.f32.mxu0 %vm17807_vm4, %v8425_v29  ;;  %v8013_v29 = vadd.f32 %v10739_v63, %v7305_v18  ;;  %v6938_v23 = vld [vmem:[#allocation4 + $0x1b0] sm:$0xff]  ;;  %v8028_v13 = vadd.f32 %v7917_v26, %v7320_v53  ;;  %vm17827_vm4 = vmmov %vm17779_vm0 }
 0x874   : > { %v11600_v12 = vpop.eup %11599  ;;  %11613 = vrcp.f32 %v8308_v9  ;;  %10866 = vmatmul.mubr.msk.f32.vlgmr.msra.gmra.mxu0 %vm17808_vm5, %v8427_v51  ;;  %v10798_v3 = vpop.f32.mrf.mxu1  ;;  %v7321_v51 = vmul.f32 %v16572_v36, %v6937_v8  ;;  %v7322_v36 = vmul.f32 %v16574_v31, %v6938_v23  ;;  %v17824_v8 = vld [vmem:[#allocation184_spill] sm:$0xff]  ;;  %vm17828_vm5 = vmmov %vm17779_vm0 }
 0x875   : > { %11615 = vrcp.f32 %v8238_v22  ;;  %v8233_v43 = vpop.permute.xlu1 %8232  ;;  %v8457_v6 = vmul.f32 %v11600_v12, %v8024_v33  ;;  %v11602_v0 = vpop.eup %11601  ;;  %v6922_v22 = vld [vmem:[#allocation4 + $0x130] sm:$0xff] }
 0x876   : > { %11617 = vrcp.f32 %v8233_v43  ;;  %v8303_v21 = vpop.permute.xlu0 %8302  ;;  %v8431_v52 = vmul.f32 %v11602_v0, %v8011_v56  ;;  %v17817_v12 = vld [vmem:[#allocation181_spill] sm:$0xff]  ;;  %v7927_v59 = vpop.f32.mrf.mxu1  ;;  %v6940_v0 = vld [vmem:[#allocation4 + $0x1c0] sm:$0xff] }
 0x877   : > { %11619 = vrcp.f32 %v8303_v21  ;;  %10891 = vmatprep.mubr.msk.f32.mxu1 %vm17809_vm6, %v8457_v6  ;;  %v7307_v57 = vmul.f32 %v17817_v12, %v6923_v50  ;;  %v7323_v21 = vmul.f32 %v16579_v32, %v6939_v42  ;;  %v7324_v11 = vmul.f32 %v16585_v34, %v6940_v0  ;;  %vm17829_vm6 = vmmov %vm17779_vm0 }
 0x878   : > { %v11604_v9 = vpop.eup %11603  ;;  %10892 = vmatmul.mubr.msk.f32.vlgmr.msra.gmra.mxu1 %vm17810_vm7, %v8459_v2  ;;  %11621 = vrcp.f32 %v8318_v14  ;;  %v7306_v14 = vmul.f32 %v17815_v62, %v6922_v22  ;;  %v8029_v2 = vadd.f32 %v10795_v60, %v7321_v51  ;;  %v10801_v56 = vpop.f32.mrf.mxu1  ;;  %vm17830_vm7 = vmmov %vm17779_vm0  ;;  %v6926_v51 = vld [vmem:[#allocation4 + $0x150] sm:$0xff] }
 0x879   : > { %v8248_v24 = vpop.permute.xlu1 %8247  ;;  %v8429_v37 = vmul.f32 %v11604_v9, %v8010_v54  ;;  %v11606_v47 = vpop.eup %11605  ;;  %v8015_v6 = vadd.f32 %v10742_v38, %v7307_v57  ;;  %v8031_v60 = vadd.f32 %v10798_v3, %v7323_v21  ;;  %v6925_v38 = vld [vmem:[#allocation4 + $0x148] sm:$0xff] }
 0x87a   : > { %v8313_v16 = vpop.permute.xlu0 %8312  ;;  %v8463_v40 = vmul.f32 %v11606_v47, %v8027_v20  ;;  %v8014_v45 = vadd.f32 %v7782_v44, %v7306_v14  ;;  %v7309_v18 = vmul.f32 %v17826_v10, %v6925_v38 }
 0x87b   : > { %11623 = vrcp.f32 %v8313_v16  ;;  %10868 = vmatprep.mubr.msk.f32.mxu0 %vm17811_vm8, %v8429_v37  ;;  %v8030_v37 = vadd.f32 %v7927_v59, %v7322_v36  ;;  %v6941_v16 = vld [vmem:[#allocation4 + $0x1c8] sm:$0xff]  ;;  %vm17832_vm8 = vmmov %vm17779_vm0 }
 0x87c   : > { %v11608_v15 = vpop.eup %11607  ;;  %10869 = vmatmul.mubr.msk.f32.gmra.mxu0 %vm17812_vm9, %v8431_v52  ;;  %v6924_v52 = vld [vmem:[#allocation4 + $0x140] sm:$0xff]  ;;  %vm17833_vm9 = vmmov %vm17779_vm0 }
 0x87d   : > { %v8328_v5 = vpop.permute.xlu1 %8327  ;;  %v8461_v46 = vmul.f32 %v11608_v15, %v8026_v49  ;;  %v11610_v27 = vpop.eup %11609 }
 0x87e   : > { %v8323_v48 = vpop.permute.xlu0 %8322  ;;  %v8435_v35 = vmul.f32 %v11610_v27, %v8013_v29  ;;  %v7937_v49 = vpop.f32.mrf.mxu1 }
 0x87f   : > { %11625 = vrcp.f32 %v8323_v48  ;;  %10894 = vmatprep.mubr.msk.f32.mxu1 %vm17814_vm10, %v8461_v46  ;;  %v8032_v39 = vadd.f32 %v7937_v49, %v7324_v11  ;;  %vm17834_vm10 = vmmov %vm17779_vm0 }
 0x880   : > { %v11612_v41 = vpop.eup %11611  ;;  %11627 = vrcp.f32 %v8248_v24  ;;  %10895 = vmatmul.mubr.msk.f32.gmra.mxu1 %vm17816_vm11, %v8463_v40  ;;  %v10745_v24 = vpop.f32.mrf.mxu0  ;;  %vm17835_vm11 = vmmov %vm17779_vm0 }
 0x881   : > { %v11614_v55 = vpop.eup %11613  ;;  %11629 = vrcp.f32 %v8328_v5  ;;  %v8243_v33 = vpop.permute.xlu1 %8242  ;;  %v8433_v1 = vmul.f32 %v11612_v41, %v8012_v30  ;;  %v7308_v5 = vmul.f32 %v17824_v8, %v6924_v52  ;;  %v8017_v44 = vadd.f32 %v10745_v24, %v7309_v18  ;;  %v6944_v8 = vld [vmem:[#allocation4 + $0x1e0] sm:$0xff] }
 0x882   : > { %v11616_v25 = vpop.eup %11615  ;;  %11631 = vrcp.f32 %v8243_v33  ;;  %v16682_v61 = vpop.permute.xlu0 %8332  ;;  %v8467_v17 = vmul.f32 %v11614_v55, %v8029_v2  ;;  %v17831_v33 = vld [vmem:[#allocation185_spill] sm:$0xff] }
 0x883   : > { %v11618_v63 = vpop.eup %11617  ;;  %10871 = vmatprep.mubr.msk.f32.mxu0 %vm17818_vm12, %v8433_v1  ;;  %v8439_v31 = vmul.f32 %v11616_v25, %v8015_v6  ;;  %v7792_v7 = vpop.f32.mrf.mxu0  ;;  %v7310_v1 = vmul.f32 %v17831_v33, %v6926_v51  ;;  %v6943_v6 = vld [vmem:[#allocation4 + $0x1d8] sm:$0xff]  ;;  %vm17836_vm12 = vmmov %vm17779_vm0 }
 0x884   : > { %v11620_v43 = vpop.eup %11619  ;;  %10872 = vmatmul.mubr.msk.f32.gmra.mxu0 %vm17819_vm13, %v8435_v35  ;;  %v8437_v54 = vmul.f32 %v11618_v63, %v8014_v45  ;;  %v8016_v50 = vadd.f32 %v7792_v7, %v7308_v5  ;;  %v10804_v21 = vpop.f32.mrf.mxu1  ;;  %vm17837_vm13 = vmmov %vm17779_vm0 }
 0x885   : > { %v8258_v19 = vpop.permute.xlu1 %8257  ;;  %v8465_v9 = vmul.f32 %v11620_v43, %v8028_v13  ;;  %v11622_v58 = vpop.eup %11621  ;;  %v6927_v43 = vld [vmem:[#allocation4 + $0x158] sm:$0xff] }
 0x886   : > { %10874 = vmatprep.mubr.msk.f32.mxu0 %vm17820_vm14, %v8437_v54  ;;  %v16689_v4 = vpop.permute.xlu0 %8342  ;;  %v8471_v20 = vmul.f32 %v11622_v58, %v8031_v60  ;;  %v10748_v3 = vpop.f32.mrf.mxu0  ;;  %v6942_v54 = vld [vmem:[#allocation4 + $0x1d0] sm:$0xff]  ;;  %v6928_v60 = vld [vmem:[#allocation4 + $0x160] sm:$0xff]  ;;  %vm17838_vm14 = vmmov %vm17779_vm0 }
 0x887   : > { %10897 = vmatprep.mubr.msk.f32.mxu1 %vm17821_vm15, %v8465_v9  ;;  %v7947_v24 = vpop.f32.mrf.mxu1  ;;  %vm17839_vm15 = vmmov %vm17779_vm0 }
 0x888   : > { %v11624_v32 = vpop.eup %11623  ;;  %10875 = vmatmul.mubr.msk.f32.gmra.mxu0 %vm17779_vm0, %v8439_v31  ;;  %10898 = vmatmul.mubr.msk.f32.gmra.mxu1 %vm17822_vm1, %v8467_v17  ;;  %v7802_v42 = vpop.f32.mrf.mxu0  ;;  %vm17840_vm1 = vmmov %vm17779_vm0 }
 0x889   : > { %v8338_v47 = vpop.permute.xlu1 %8337  ;;  %v8469_v28 = vmul.f32 %v11624_v32, %v8030_v37  ;;  %v8018_v12 = vadd.f32 %v7802_v42, %v7310_v1  ;;  %v10807_v7 = vpop.f32.mrf.mxu1 }
 0x88a   : > { %v7236_v15 = vpop.permute.xlu0 %7235  ;;  %v10751_v37 = vpop.f32.mrf.mxu0 }
 0x88b   : > { %v7325_v22 = vmul.f32 %v7236_v15, %v6941_v16  ;;  %10900 = vmatprep.mubr.msk.f32.mxu1 %vm17823_vm2, %v8469_v28  ;;  %v6945_v16 = vld [vmem:[#allocation4 + $0x1e8] sm:$0xff]  ;;  %vm17841_vm2 = vmmov %vm17779_vm0 }
 0x88c   : > { %v11626_v34 = vpop.eup %11625  ;;  %10901 = vmatmul.mubr.msk.f32.gmra.mxu1 %vm17825_vm3, %v8471_v20  ;;  %v7812_v20 = vpop.f32.mrf.mxu0  ;;  %vm17842_vm3 = vmmov %vm17779_vm0 }
 0x88d   : > { %v11628_v46 = vpop.eup %11627  ;;  %v8033_v26 = vadd.f32 %v10801_v56, %v7325_v22  ;;  %v8253_v48 = vpop.permute.xlu1 %8252  ;;  %v8473_v40 = vmul.f32 %v11626_v34, %v8032_v39 }
 0x88e   : > { %v11630_v27 = vpop.eup %11629  ;;  %11633 = vrcp.f32 %v8253_v48  ;;  %v16700_v41 = vpop.permute.xlu0 %8352  ;;  %v8443_v29 = vmul.f32 %v11628_v46, %v8017_v44 }
 0x88f   : > { %v11632_v30 = vpop.eup %11631  ;;  %v8475_v53 = vmul.f32 %v11630_v27, %v8033_v26  ;;  %10903 = vmatprep.mubr.msk.f32.mxu1 %vm17827_vm4, %v8473_v40  ;;  %11635 = vrcp.f32 %v8258_v19  ;;  %v6929_v19 = vld [vmem:[#allocation4 + $0x168] sm:$0xff]  ;;  %v6931_v26 = vld [vmem:[#allocation4 + $0x178] sm:$0xff]  ;;  %v7957_v27 = vpop.f32.mrf.mxu1  ;;  %vm9322_vm4 = vcmask 261120  }
 0x890   : > { %v8441_v62 = vmul.f32 %v11632_v30, %v8016_v50  ;;  %11637 = vrcp.f32 %v16682_v61  ;;  %v10754_v50 = vpop.f32.mrf.mxu0 }
 0x891   : > { %v8268_v14 = vpop.permute.xlu1 %8267  ;;  %10904 = vmatmul.mubr.msk.f32.gmra.mxu1 %vm17828_vm5, %v8475_v53  ;;  %11639 = vrcp.f32 %v8338_v47  ;;  %v6930_v53 = vld [vmem:[#allocation4 + $0x170] sm:$0xff]  ;;  %v10810_v1 = vpop.f32.mrf.mxu1 }
 0x892   : > { %10877 = vmatprep.mubr.msk.f32.mxu0 %vm17829_vm6, %v8441_v62  ;;  %v8358_v55 = vpop.permute.xlu0 %8357  ;;  %11641 = vrcp.f32 %v8268_v14  ;;  %v6947_v14 = vld [vmem:[#allocation4 + $0x1f8] sm:$0xff]  ;;  %v7822_v33 = vpop.f32.mrf.mxu0 }
 0x893   : > { %10878 = vmatmul.mubr.msk.f32.gmra.mxu0 %vm17830_vm7, %v8443_v29 }
 0x895   : > { %v8348_v23 = vpop.permute.xlu1 %8347 }
 0x896   : > { %v7246_v45 = vpop.permute.xlu0 %7245 }
 0x897   : > { %v7327_v0 = vmul.f32 %v7246_v45, %v6943_v6 }
 0x899   : > { %v8263_v25 = vpop.permute.xlu1 %8262  ;;  %v8035_v11 = vadd.f32 %v10804_v21, %v7327_v0 }
 0x89a   : > { %v7176_v36 = vpop.permute.xlu0 %7175  ;;  %11643 = vrcp.f32 %v8263_v25 }
 0x89b   : > { %v11634_v57 = vpop.eup %11633  ;;  %11645 = vrcp.f32 %v8348_v23  ;;  %v7313_v32 = vmul.f32 %v7176_v36, %v6929_v19 }
 0x89c   : > { %v8445_v35 = vmul.f32 %v11634_v57, %v8018_v12  ;;  %11647 = vrcp.f32 %v16689_v4  ;;  %v11636_v31 = vpop.eup %11635  ;;  %v6946_v57 = vld [vmem:[#allocation4 + $0x1f0] sm:$0xff] }
 0x89d   : > { %v8273_v63 = vpop.permute.xlu1 %8272  ;;  %v11638_v47 = vpop.eup %11637  ;;  %v8021_v22 = vadd.f32 %v10751_v37, %v7313_v32 }
 0x89e   : > { %10880 = vmatprep.mubr.msk.f32.mxu0 %vm17832_vm8, %v8445_v35  ;;  %v7256_v9 = vpop.permute.xlu0 %7255  ;;  %v11640_v28 = vpop.eup %11639 }
 0x89f   : > { %v8479_v39 = vmul.f32 %v11640_v28, %v8035_v11  ;;  %v7329_v34 = vmul.f32 %v7256_v9, %v6945_v16  ;;  %v11642_v5 = vpop.eup %11641 }
 0x8a0   : > { %v8451_v30 = vmul.f32 %v11642_v5, %v8021_v22 }
 0x8a1   : > { %v8278_v13 = vpop.permute.xlu1 %8277  ;;  %v8037_v44 = vadd.f32 %v10807_v7, %v7329_v34 }
 0x8a2   : > { %11649 = vrcp.f32 %v8278_v13  ;;  %v7186_v38 = vpop.permute.xlu0 %7185 }
 0x8a3   : > { %11651 = vrcp.f32 %v8273_v63  ;;  %v7315_v51 = vmul.f32 %v7186_v38, %v6931_v26 }
 0x8a4   : > { %11653 = vrcp.f32 %v16700_v41 }
 0x8a5   : > { %v7166_v59 = vpop.permute.xlu1 %7165  ;;  %11655 = vrcp.f32 %v8358_v55  ;;  %v8023_v13 = vadd.f32 %v10754_v50, %v7315_v51 }
 0x8a6   : > { %v7311_v2 = vmul.f32 %v7166_v59, %v6927_v43  ;;  %v7266_v29 = vpop.permute.xlu0 %7265  ;;  %v7967_v59 = vpop.f32.mrf.mxu1 }
 0x8a7   : > { %v11644_v10 = vpop.eup %11643  ;;  %v7331_v12 = vmul.f32 %v7266_v29, %v6947_v14 }
 0x8a8   : > { %v8019_v56 = vadd.f32 %v10748_v3, %v7311_v2  ;;  %v11646_v62 = vpop.eup %11645 }
 0x8a9   : > { %v7241_v61 = vpop.permute.xlu1 %7240  ;;  %v11648_v3 = vpop.eup %11647  ;;  %v8483_v25 = vmul.f32 %v11646_v62, %v8037_v44  ;;  %v8039_v21 = vadd.f32 %v10810_v1, %v7331_v12 }
 0x8aa   : > { %v8447_v17 = vmul.f32 %v11636_v31, %v8019_v56  ;;  %v7326_v58 = vmul.f32 %v7241_v61, %v6942_v54 }
 0x8ac   : > { %v8034_v52 = vadd.f32 %v7947_v24, %v7326_v58  ;;  %10881 = vmatmul.mubr.msk.f32.gmra.mxu0 %vm17833_vm9, %v8447_v17 }
 0x8ad   : > { %v7171_v4 = vpop.permute.xlu1 %7170 }
 0x8ae   : > { %v8477_v49 = vmul.f32 %v11638_v47, %v8034_v52  ;;  %v7312_v15 = vmul.f32 %v7171_v4, %v6928_v60 }
 0x8af   : > { %v11650_v45 = vpop.eup %11649 }
 0x8b0   : > { %v8020_v46 = vadd.f32 %v7812_v20, %v7312_v15  ;;  %10906 = vmatprep.mubr.msk.f32.mxu1 %vm17834_vm10, %v8477_v49  ;;  %v11652_v63 = vpop.eup %11651  ;;  %v8455_v2 = vmul.f32 %v11650_v45, %v8023_v13 }
 0x8b1   : > { %v7251_v18 = vpop.permute.xlu1 %7250  ;;  %10907 = vmatmul.mubr.msk.f32.gmra.mxu1 %vm17835_vm11, %v8479_v39  ;;  %v11654_v54 = vpop.eup %11653 }
 0x8b2   : > { %v8449_v48 = vmul.f32 %v11644_v10, %v8020_v46  ;;  %v7328_v40 = vmul.f32 %v7251_v18, %v6944_v8  ;;  %v11656_v19 = vpop.eup %11655 }
 0x8b3   : > { %v8487_v56 = vmul.f32 %v11656_v19, %v8039_v21 }
 0x8b4   : > { %v8036_v41 = vadd.f32 %v7957_v27, %v7328_v40  ;;  %10883 = vmatprep.mubr.msk.f32.mxu0 %vm17836_vm12, %v8449_v48 }
 0x8b5   : > { %v7181_v23 = vpop.permute.xlu1 %7180  ;;  %10884 = vmatmul.mubr.msk.f32.gmra.mxu0 %vm17837_vm13, %v8451_v30 }
 0x8b6   : > { %v8481_v55 = vmul.f32 %v11648_v3, %v8036_v41  ;;  %v7314_v42 = vmul.f32 %v7181_v23, %v6930_v53 }
 0x8b8   : > { %v8022_v35 = vadd.f32 %v7822_v33, %v7314_v42  ;;  %10909 = vmatprep.mubr.msk.f32.mxu1 %vm17838_vm14, %v8481_v55  ;;  %v16750_v33 = vld [vmem:[%s17843_s6] ss:$0 sm:$0xff] }
 0x8b9   : > { %v7261_v36 = vpop.permute.xlu1 %7260  ;;  %10910 = vmatmul.mubr.msk.f32.gmra.mxu1 %vm17839_vm15, %v8483_v25 }
 0x8ba   : > { %v8453_v43 = vmul.f32 %v11652_v63, %v8022_v35  ;;  %v7330_v6 = vmul.f32 %v7261_v36, %v6946_v57 }
 0x8bc   : > { %v8038_v0 = vadd.f32 %v7967_v59, %v7330_v6  ;;  %10886 = vmatprep.mubr.msk.f32.mxu0 %vm17779_vm0, %v8453_v43 }
 0x8bd   : > { %10887 = vmatmul.mubr.msk.f32.gmra.mxu0 %vm17840_vm1, %v8455_v2 }
 0x8be   : > { %v8485_v9 = vmul.f32 %v11654_v54, %v8038_v0 }
 0x8c0   : > { %10912 = vmatprep.mubr.msk.f32.mxu1 %vm17841_vm2, %v8485_v9 }
 0x8c1   : > { %10913 = vmatmul.mubr.msk.f32.gmra.mxu1 %vm17842_vm3, %v8487_v56 }
 0x8f4   : > { %v10815_v31 = vpop.f32.mrf.mxu0 }
 0x8f6   : > { %v8605_v17 = vpop.f32.mrf.mxu0 }
 0x8f8   : > { %v10841_v61 = vpop.f32.mrf.mxu1 }
 0x8f9   : > { %v8804_v3 = vadd.f32 %v10841_v61, %v10815_v31 }
 0x8fa   : > { %v8798_v58 = vpop.f32.mrf.mxu1 }
 0x8fb   : > { %v8799_v23 = vadd.f32 %v8798_v58, %v8605_v17 }
 0x8fc   : > { %v10818_v24 = vpop.f32.mrf.mxu0 }
 0x8fe   : > { %v8615_v11 = vpop.f32.mrf.mxu0 }
 0x900   : > { %v10844_v37 = vpop.f32.mrf.mxu1 }
 0x901   : > { %v8814_v63 = vadd.f32 %v10844_v37, %v10818_v24 }
 0x902   : > { %v8808_v32 = vpop.f32.mrf.mxu1 }
 0x903   : > { %v8809_v43 = vadd.f32 %v8808_v32, %v8615_v11 }
 0x904   : > { %v10821_v60 = vpop.f32.mrf.mxu0 }
 0x906   : > { %v8625_v52 = vpop.f32.mrf.mxu0 }
 0x908   : > { %v10847_v16 = vpop.f32.mrf.mxu1 }
 0x909   : > { %v8824_v56 = vadd.f32 %v10847_v16, %v10821_v60 }
 0x90a   : > { %v8818_v47 = vpop.f32.mrf.mxu1 }
 0x90b   : > { %v8819_v17 = vadd.f32 %v8818_v47, %v8625_v52 }
 0x90c   : > { %v16721_v4 = vpop.f32.mrf.mxu0 }
 0x90e   : > { %v16723_v38 = vpop.f32.mrf.mxu0 }
 0x910   : > { %v10850_v28 = vpop.f32.mrf.mxu1 }
 0x911   : > { %v8834_v11 = vadd.f32 %v10850_v28, %v16721_v4 }
 0x912   : > { %v16725_v49 = vpop.f32.mrf.mxu1 }
 0x913   : > { %v8829_v16 = vadd.f32 %v16725_v49, %v16723_v38 }
 0x914   : > { %v16727_v15 = vpop.f32.mrf.mxu0 }
 0x916   : > { %v16731_v7 = vpop.f32.mrf.mxu0 }
 0x918   : > { %v16729_v20 = vpop.f32.mrf.mxu1 }
 0x919   : > { %v8844_v49 = vadd.f32 %v16729_v20, %v16727_v15 }
 0x91a   : > { %v16733_v39 = vpop.f32.mrf.mxu1 }
 0x91c   : > { %v10830_v22 = vpop.f32.mrf.mxu0 }
 0x91e   : > { %v8655_v5 = vpop.f32.mrf.mxu0 }
 0x920   : > { %v10856_v34 = vpop.f32.mrf.mxu1 }
 0x921   : > { %v16735_v8 = vadd.f32 %v10856_v34, %v10830_v22 }
 0x922   : > { %v8848_v46 = vpop.f32.mrf.mxu1 }
 0x923   : > { %v16737_v10 = vadd.f32 %v8848_v46, %v8655_v5 }
 0x924   : > { %v10833_v18 = vpop.f32.mrf.mxu0 }
 0x926   : > { %v8665_v40 = vpop.f32.mrf.mxu0 }
 0x928   : > { %v10859_v26 = vpop.f32.mrf.mxu1 }
 0x929   : > { %v16739_v48 = vadd.f32 %v10859_v26, %v10833_v18 }
 0x92a   : > { %v8858_v27 = vpop.f32.mrf.mxu1 }
 0x92b   : > { %v16741_v50 = vadd.f32 %v8858_v27, %v8665_v40 }
 0x92c   : > { %v10836_v30 = vpop.f32.mrf.mxu0 }
 0x92e   : > { %v8675_v62 = vpop.f32.mrf.mxu0 }
 0x930   : > { %v10862_v44 = vpop.f32.mrf.mxu1 }
 0x931   : > { %v16743_v53 = vadd.f32 %v10862_v44, %v10836_v30 }
 0x932   : > { %v8868_v14 = vpop.f32.mrf.mxu1 }
 0x933   : > { %v16745_v29 = vadd.f32 %v8868_v14, %v8675_v62  ;;  %v8839_v62 = vadd.f32 %v16733_v39, %v16731_v7 }
 0x934   : > { %v10867_v41 = vpop.f32.mrf.mxu0 }
 0x935   : > { %v9073_v55 = vadd.f32 %v10867_v41, %v8804_v3 }
 0x936   : > { %v8993_v51 = vpop.f32.mrf.mxu0 }
 0x937   : > { %v9072_v1 = vadd.f32 %v8993_v51, %v8799_v23 }
 0x938   : > { %v10893_v42 = vpop.f32.mrf.mxu1 }
 0x939   : > { %v9284_v25 = vadd.f32 %v10893_v42, %v9073_v55 }
 0x93a   : > { %v9204_v12 = vpop.f32.mrf.mxu1 }
 0x93b   : > { %v9307_v57 = vadd.f32 %v16750_v33, %v9284_v25  ;;  %v9283_v45 = vadd.f32 %v9204_v12, %v9072_v1 }
 0x93c   : > { %v10870_v35 = vpop.f32.mrf.mxu0 }
 0x93d   : > { %9324 = vst.msk [vmem:[%s12249_s27 + $0x8] sm:$0xff] %vm9322_vm4, %v9307_v57  ;;  %v9306_v13 = vadd.f32 %v16750_v33, %v9283_v45  ;;  %v9075_v6 = vadd.f32 %v10870_v35, %v8814_v63 }
 0x93e   : > { %v9003_v36 = vpop.f32.mrf.mxu0 }
 0x93f   : > { %9323 = vst.msk [vmem:[%s12249_s27] sm:$0xff] %vm9322_vm4, %v9306_v13  ;;  %v9074_v2 = vadd.f32 %v9003_v36, %v8809_v43 }
 0x940   : > { %v10896_v59 = vpop.f32.mrf.mxu1 }
 0x941   : > { %v9286_v21 = vadd.f32 %v10896_v59, %v9075_v6 }
 0x942   : > { %v9214_v0 = vpop.f32.mrf.mxu1 }
 0x943   : > { %v9309_v54 = vadd.f32 %v16750_v33, %v9286_v21  ;;  %v9285_v19 = vadd.f32 %v9214_v0, %v9074_v2 }
 0x944   : > { %v10873_v9 = vpop.f32.mrf.mxu0 }
 0x945   : > { %9326 = vst.msk [vmem:[%s12249_s27 + $0x18] sm:$0xff] %vm9322_vm4, %v9309_v54  ;;  %v9308_v31 = vadd.f32 %v16750_v33, %v9285_v19  ;;  %v9077_v58 = vadd.f32 %v10873_v9, %v8824_v56 }
 0x946   : > { %v9013_v61 = vpop.f32.mrf.mxu0 }
 0x947   : > { %9325 = vst.msk [vmem:[%s12249_s27 + $0x10] sm:$0xff] %vm9322_vm4, %v9308_v31  ;;  %v9076_v32 = vadd.f32 %v9013_v61, %v8819_v17 }
 0x948   : > { %v10876_v24 = vpop.f32.mrf.mxu0  ;;  %v10899_v37 = vpop.f32.mrf.mxu1 }
 0x949   : > { %v9288_v22 = vadd.f32 %v10899_v37, %v9077_v58  ;;  %v9079_v5 = vadd.f32 %v10876_v24, %v8834_v11 }
 0x94a   : > { %v9023_v34 = vpop.f32.mrf.mxu0  ;;  %v9224_v60 = vpop.f32.mrf.mxu1 }
 0x94b   : > { %v9311_v52 = vadd.f32 %v16750_v33, %v9288_v22  ;;  %v9287_v47 = vadd.f32 %v9224_v60, %v9076_v32  ;;  %v9078_v18 = vadd.f32 %v9023_v34, %v8829_v16 }
 0x94c   : > { %v10902_v46 = vpop.f32.mrf.mxu1 }
 0x94d   : > { %9328 = vst.msk [vmem:[%s12249_s27 + $0x28] sm:$0xff] %vm9322_vm4, %v9311_v52  ;;  %v9310_v26 = vadd.f32 %v16750_v33, %v9287_v47  ;;  %v9290_v4 = vadd.f32 %v10902_v46, %v9079_v5 }
 0x94e   : > { %v9234_v28 = vpop.f32.mrf.mxu1 }
 0x94f   : > { %9327 = vst.msk [vmem:[%s12249_s27 + $0x20] sm:$0xff] %vm9322_vm4, %v9310_v26  ;;  %v9313_v40 = vadd.f32 %v16750_v33, %v9290_v4  ;;  %v9289_v27 = vadd.f32 %v9234_v28, %v9078_v18 }
 0x951   : > { %9330 = vst.msk [vmem:[%s12249_s27 + $0x38] sm:$0xff] %vm9322_vm4, %v9313_v40  ;;  %v9312_v38 = vadd.f32 %v16750_v33, %v9289_v27  ;;  %v10905_v30 = vpop.f32.mrf.mxu1 }
 0x953   : > { %9329 = vst.msk [vmem:[%s12249_s27 + $0x30] sm:$0xff] %vm9322_vm4, %v9312_v38  ;;  %v10879_v44 = vpop.f32.mrf.mxu0  ;;  %v9244_v23 = vpop.f32.mrf.mxu1 }
 0x954   : > { %v9081_v14 = vadd.f32 %v10879_v44, %v8844_v49 }
 0x955   : > { %v9033_v41 = vpop.f32.mrf.mxu0 }
 0x956   : > { %v9292_v3 = vadd.f32 %v10905_v30, %v9081_v14  ;;  %v9080_v51 = vadd.f32 %v9033_v41, %v8839_v62 }
 0x958   : > { %v9315_v55 = vadd.f32 %v16750_v33, %v9292_v3  ;;  %v9291_v42 = vadd.f32 %v9244_v23, %v9080_v51 }
 0x95a   : > { %9332 = vst.msk [vmem:[%s12249_s27 + $0x48] sm:$0xff] %vm9322_vm4, %v9315_v55  ;;  %v9314_v15 = vadd.f32 %v16750_v33, %v9291_v42 }
 0x95c   : > { %9331 = vst.msk [vmem:[%s12249_s27 + $0x40] sm:$0xff] %vm9322_vm4, %v9314_v15 }
 0x96c   : > { %v10882_v20 = vpop.f32.mrf.mxu0 }
 0x96d   : > { %v9083_v7 = vadd.f32 %v10882_v20, %v16735_v8 }
 0x96e   : > { %v9043_v1 = vpop.f32.mrf.mxu0 }
 0x96f   : > { %v9082_v25 = vadd.f32 %v9043_v1, %v16737_v10 }
 0x971   : > { %v10908_v39 = vpop.f32.mrf.mxu1 }
 0x972   : > { %v9294_v12 = vadd.f32 %v10908_v39, %v9083_v7 }
 0x973   : > { %v9254_v57 = vpop.f32.mrf.mxu1 }
 0x974   : > { %v9317_v45 = vadd.f32 %v16750_v33, %v9294_v12  ;;  %v9293_v35 = vadd.f32 %v9254_v57, %v9082_v25 }
 0x975   : > { %v10885_v63 = vpop.f32.mrf.mxu0 }
 0x976   : > { %9334 = vst.msk [vmem:[%s12249_s27 + $0x58] sm:$0xff] %vm9322_vm4, %v9317_v45  ;;  %v9316_v13 = vadd.f32 %v16750_v33, %v9293_v35  ;;  %v9085_v8 = vadd.f32 %v10885_v63, %v16739_v48 }
 0x977   : > { %v9053_v36 = vpop.f32.mrf.mxu0 }
 0x978   : > { %9333 = vst.msk [vmem:[%s12249_s27 + $0x50] sm:$0xff] %vm9322_vm4, %v9316_v13  ;;  %v9084_v10 = vadd.f32 %v9053_v36, %v16741_v50 }
 0x979   : > { %v10911_v43 = vpop.f32.mrf.mxu1 }
 0x97a   : > { %v9296_v6 = vadd.f32 %v10911_v43, %v9085_v8 }
 0x97b   : > { %v9264_v59 = vpop.f32.mrf.mxu1 }
 0x97c   : > { %v9319_v2 = vadd.f32 %v16750_v33, %v9296_v6  ;;  %v9295_v21 = vadd.f32 %v9264_v59, %v9084_v10 }
 0x97d   : > { %v10888_v0 = vpop.f32.mrf.mxu0 }
 0x97e   : > { %9336 = vst.msk [vmem:[%s12249_s27 + $0x68] sm:$0xff] %vm9322_vm4, %v9319_v2  ;;  %v9318_v54 = vadd.f32 %v16750_v33, %v9295_v21  ;;  %v9087_v48 = vadd.f32 %v10888_v0, %v16743_v53 }
 0x97f   : > { %v9063_v19 = vpop.f32.mrf.mxu0 }
 0x980   : > { %9335 = vst.msk [vmem:[%s12249_s27 + $0x60] sm:$0xff] %vm9322_vm4, %v9318_v54  ;;  %v9086_v50 = vadd.f32 %v9063_v19, %v16745_v29 }
 0x981   : > { %v10914_v9 = vpop.f32.mrf.mxu1 }
 0x982   : > { %v9298_v56 = vadd.f32 %v10914_v9, %v9087_v48 }
 0x983   : > { %v9274_v31 = vpop.f32.mrf.mxu1 }
 0x984   : > { %v9321_v61 = vadd.f32 %v16750_v33, %v9298_v56  ;;  %v9297_v17 = vadd.f32 %v9274_v31, %v9086_v50 }
 0x986   : > { %9338 = vst.msk [vmem:[%s12249_s27 + $0x78] sm:$0xff] %vm9322_vm4, %v9321_v61  ;;  %v9320_v58 = vadd.f32 %v16750_v33, %v9297_v17 }
 0x988   : > { %9337 = vst.msk [vmem:[%s12249_s27 + $0x70] sm:$0xff] %vm9322_vm4, %v9320_v58 }
 0x989 PF: > { %s27_s19 = sadd.s32 1, %s11782_s19   ;;  %s17844_s22 = sld [smem:[#allocation15_spill]] }
 0x98a   : > { %p24_p3 = scmp.ge.s32.totalorder %s27_s19, 14   ;;  %s17845_s1 = smov %s11746_s10 }
 0x98b   : > { %s17846_s10 = smov %s11941_s30  ;;  %s17847_s11 = smov %s11754_s12 }
 0x98c   : > { %s17848_s12 = smov %s11931_s21  ;;  %s17849_s13 = smov %s11762_s14 }
 0x98d   : > { %s17850_s14 = smov %s11926_s16  ;;  %s17851_s15 = smov %s11774_s17 }
 0x98e   : > { %s17852_s16 = smov %s11778_s18  ;;  %s17853_s17 = smov %s17856_s20 }
 0x98f   : > { %s17854_s18 = smov %s17844_s22  ;;  %26 = sbr.rel (!%p24_p3) target bundleno = 33 (0x21), region = 220 }

</bundles_post_ra>
